<compile_context>
chip_gen: v6e
topology: v6e:2x2x1
jax: 0.10.0
libtpu: 0.0.40
codegen_flags: <defaults>
</compile_context>

<pallas_src>
import jax
import jax.numpy as jnp
from jax.experimental import pallas as pl
from jax.experimental.pallas import tpu as pltpu

EPS = 1e-5


def relu_conv1x1_bn_kernel(x_ref, w_ref, gamma_ref, beta_ref, o_ref):
    # x_ref:     (Cin, M)  f32  -- whole input, resident across the Cout grid
    # w_ref:     (TN, Cin) bf16 -- one Cout tile of the 1x1-conv weight
    # gamma_ref: (TN, 1)   f32
    # beta_ref:  (TN, 1)   f32
    # o_ref:     (TN, M)   f32 (or bf16 if requested)
    x = jnp.maximum(x_ref[...], 0.0).astype(jnp.bfloat16)        # ReLU (VPU) + bf16 for MXU
    y = jnp.dot(w_ref[...], x,
                preferred_element_type=jnp.float32)              # (TN, M) f32 accumulate

    m = y.shape[1]                                               # 196 (unpadded, see header)
    inv_m = 1.0 / m
    # Single pass over y: sum and sum-of-squares -> batch mean / biased variance.
    s1 = jnp.sum(y, axis=1, keepdims=True)
    s2 = jnp.sum(y * y, axis=1, keepdims=True)
    mean = s1 * inv_m
    var = jnp.maximum(s2 * inv_m - mean * mean, 0.0)
    inv_std = jax.lax.rsqrt(var + EPS)

    # Fused BN epilogue: one FMA per element.
    a = gamma_ref[...] * inv_std
    b = beta_ref[...] - mean * a
    o_ref[...] = (y * a + b).astype(o_ref.dtype)


def relu_conv1x1_bn(x_nchw, w_oi, gamma, beta, *, tn=672, out_dtype=jnp.float32):
    """x_nchw: (N, Cin, H, W) f32; w_oi: (Cout, Cin); gamma/beta: (Cout,)"""
    n, cin, h, w = x_nchw.shape
    cout = w_oi.shape[0]
    m = n * h * w

    # Free (contiguous) reshape for N == 1; transpose fallback otherwise.
    if n == 1:
        x2d = x_nchw.reshape(cin, m)
    else:
        x2d = jnp.transpose(x_nchw, (1, 0, 2, 3)).reshape(cin, m)

    w_bf16 = w_oi.astype(jnp.bfloat16)        # (Cout, Cin) -- halves the weight DMA
    gamma2d = gamma.reshape(cout, 1).astype(jnp.float32)
    beta2d = beta.reshape(cout, 1).astype(jnp.float32)

    assert cout % tn == 0, "tile size must divide Cout"
    grid = (cout // tn,)

    out_bytes = cout * m * jnp.dtype(out_dtype).itemsize
    cost = pl.CostEstimate(
        flops=2 * cout * cin * m,                                  # ~0.71 GFLOP
        transcendentals=cout,                                      # rsqrt per channel
        bytes_accessed=(cout * cin * 2                             # bf16 weight
                        + cin * m * 4                              # f32 input
                        + out_bytes                                # output
                        + 2 * cout * 4),                           # gamma/beta
    )

    out2d = pl.pallas_call(
        relu_conv1x1_bn_kernel,
        out_shape=jax.ShapeDtypeStruct((cout, m), out_dtype),
        grid_spec=pltpu.PrefetchScalarGridSpec(
            num_scalar_prefetch=0,
            grid=grid,
            in_specs=[
                pl.BlockSpec((cin, m), lambda j: (0, 0)),    # x  : resident, no re-DMA
                pl.BlockSpec((tn, cin), lambda j: (j, 0)),   # w  : Cout-tiled, double-buffered
                pl.BlockSpec((tn, 1), lambda j: (j, 0)),     # gamma
                pl.BlockSpec((tn, 1), lambda j: (j, 0)),     # beta
            ],
            out_specs=pl.BlockSpec((tn, m), lambda j: (j, 0)),
        ),
        compiler_params=pltpu.CompilerParams(
            dimension_semantics=("parallel",),               # megacore split on v7x (grid=2)
        ),
        cost_estimate=cost,
    )(x2d, w_bf16, gamma2d, beta2d)

    # Free reshape back to NCHW for N == 1.
    if n == 1:
        return out2d.reshape(1, cout, h, w)
    return jnp.transpose(out2d.reshape(cout, n, h, w), (1, 0, 2, 3))


def _reference(x_nchw, w_oi, gamma, beta):
    # Pure-JAX f32 reference (training-mode BatchNorm forward, batch statistics).
    n, cin, h, w = x_nchw.shape
    cout = w_oi.shape[0]
    x = jnp.maximum(x_nchw, 0.0)
    xm = jnp.transpose(x, (0, 2, 3, 1)).reshape(-1, cin)                # (M, Cin)
    y = xm @ w_oi.T                                                     # (M, Cout)
    mean = jnp.mean(y, axis=0)
    var = jnp.mean((y - mean) ** 2, axis=0)                             # biased var
    o = (y - mean) * jax.lax.rsqrt(var + EPS) * gamma + beta
    return jnp.transpose(o.reshape(n, h, w, cout), (0, 3, 1, 2))


if __name__ == "__main__":
    # Shapes implied by the module: N=1, C=1344, H=W=14 (already small).
    N, C, H, W = 1, 1344, 14, 14

    key = jax.random.PRNGKey(0)
    kx, kw, kg, kb = jax.random.split(key, 4)

    x = jax.random.normal(kx, (N, C, H, W), dtype=jnp.float32)
    # Conv2d weight (Cout, Cin, 1, 1) squeezed to (Cout, Cin).
    conv_w = jax.random.normal(kw, (C, C), dtype=jnp.float32) * 0.02
    bn_gamma = 1.0 + 0.1 * jax.random.normal(kg, (C,), dtype=jnp.float32)
    bn_beta = 0.1 * jax.random.normal(kb, (C,), dtype=jnp.float32)

    # TODO(synk): running_mean/running_var buffer updates (momentum=0.1) are a training
    # side-effect on module buffers and are not part of the returned tensor; not emitted.
    out = relu_conv1x1_bn(x, conv_w, bn_gamma, bn_beta)   # tn=672 -> grid=2
    out = jax.block_until_ready(out)

    assert out.shape == (N, C, H, W)
    assert bool(jnp.all(jnp.isfinite(out)))

    ref = _reference(x, conv_w, bn_gamma, bn_beta)
    max_err = float(jnp.max(jnp.abs(out - ref)))
    # bf16 MXU operands -> loose tolerance vs the f32 reference.
    assert max_err < 0.1, f"max abs error vs reference too large: {max_err}"

    print("KERNEL_OK")
</pallas_src>

<mosaic_0001>
module attributes {stable_mosaic.version = 11 : i64} {
  func.func @relu_conv1x1_bn_kernel(%arg0: i32, %arg1: memref<1344x196xf32, #tpu.memory_space<vmem>>, %arg2: memref<672x1344xbf16, #tpu.memory_space<vmem>>, %arg3: memref<672x1xf32, #tpu.memory_space<vmem>>, %arg4: memref<672x1xf32, #tpu.memory_space<vmem>>, %arg5: memref<672x196xf32, #tpu.memory_space<vmem>>) attributes {dimension_semantics = [#tpu.dimension_semantics<parallel>], iteration_bounds = array<i64: 2>, scalar_prefetch = 0 : i64, scratch_operands = 0 : i64, tpu.core_type = #tpu.core_type<tc>, window_params = [{pipeline_mode = #tpu.pipeline_mode<synchronous>, transform_indices = @transform_0, window_bounds = array<i64: 1344, 196>}, {transform_indices = @transform_1, window_bounds = array<i64: 672, 1344>}, {transform_indices = @transform_2, window_bounds = array<i64: 672, 1>}, {transform_indices = @transform_3, window_bounds = array<i64: 672, 1>}, {transform_indices = @transform_4, window_bounds = array<i64: 672, 196>}]} {
    %c0 = arith.constant 0 : index
    %c0_0 = arith.constant 0 : index
    %0 = vector.load %arg1[%c0, %c0_0] : memref<1344x196xf32, #tpu.memory_space<vmem>>, vector<1344x196xf32>
    %cst = arith.constant 0.000000e+00 : f32
    %1 = vector.broadcast %cst : f32 to vector<1344x196xf32>
    %2 = arith.maximumf %0, %1 : vector<1344x196xf32>
    %3 = arith.truncf %2 : vector<1344x196xf32> to vector<1344x196xbf16>
    %c0_1 = arith.constant 0 : index
    %c0_2 = arith.constant 0 : index
    %4 = vector.load %arg2[%c0_1, %c0_2] : memref<672x1344xbf16, #tpu.memory_space<vmem>>, vector<672x1344xbf16>
    %cst_3 = arith.constant dense<0.000000e+00> : vector<672x196xf32>
    %5 = tpu.matmul %4, %3, %cst_3 {dimension_numbers = #tpu.dot_dimension_numbers<[1], [0], [0], [1], [0, 0, 1, 1], [], []>} : vector<672x1344xbf16>, vector<1344x196xbf16>, vector<672x196xf32> -> vector<672x196xf32>
    %cst_4 = arith.constant dense<0.000000e+00> : vector<672xf32>
    %6 = vector.multi_reduction <add>, %5, %cst_4 [1] : vector<672x196xf32> to vector<672xf32>
    %7 = vector.shape_cast %6 : vector<672xf32> to vector<672x1xf32>
    %8 = arith.mulf %5, %5 : vector<672x196xf32>
    %cst_5 = arith.constant dense<0.000000e+00> : vector<672xf32>
    %9 = vector.multi_reduction <add>, %8, %cst_5 [1] : vector<672x196xf32> to vector<672xf32>
    %10 = vector.shape_cast %9 : vector<672xf32> to vector<672x1xf32>
    %cst_6 = arith.constant 0.00510204071 : f32
    %11 = vector.broadcast %cst_6 : f32 to vector<672x1xf32>
    %12 = arith.mulf %7, %11 : vector<672x1xf32>
    %cst_7 = arith.constant 0.00510204071 : f32
    %13 = vector.broadcast %cst_7 : f32 to vector<672x1xf32>
    %14 = arith.mulf %10, %13 : vector<672x1xf32>
    %15 = arith.mulf %12, %12 : vector<672x1xf32>
    %16 = arith.subf %14, %15 : vector<672x1xf32>
    %cst_8 = arith.constant 0.000000e+00 : f32
    %17 = vector.broadcast %cst_8 : f32 to vector<672x1xf32>
    %18 = arith.maximumf %16, %17 : vector<672x1xf32>
    %cst_9 = arith.constant 9.99999974E-6 : f32
    %19 = vector.broadcast %cst_9 : f32 to vector<672x1xf32>
    %20 = arith.addf %18, %19 : vector<672x1xf32>
    %21 = math.rsqrt %20 : vector<672x1xf32>
    %c0_10 = arith.constant 0 : index
    %c0_11 = arith.constant 0 : index
    %22 = vector.load %arg3[%c0_10, %c0_11] : memref<672x1xf32, #tpu.memory_space<vmem>>, vector<672x1xf32>
    %23 = arith.mulf %22, %21 : vector<672x1xf32>
    %c0_12 = arith.constant 0 : index
    %c0_13 = arith.constant 0 : index
    %24 = vector.load %arg4[%c0_12, %c0_13] : memref<672x1xf32, #tpu.memory_space<vmem>>, vector<672x1xf32>
    %25 = arith.mulf %12, %23 : vector<672x1xf32>
    %26 = arith.subf %24, %25 : vector<672x1xf32>
    %27 = vector.broadcast %23 : vector<672x1xf32> to vector<672x196xf32>
    %28 = arith.mulf %5, %27 : vector<672x196xf32>
    %29 = vector.broadcast %26 : vector<672x1xf32> to vector<672x196xf32>
    %30 = arith.addf %28, %29 : vector<672x196xf32>
    %c0_14 = arith.constant 0 : index
    %c0_15 = arith.constant 0 : index
    %31 = vector.load %arg5[%c0_14, %c0_15] : memref<672x196xf32, #tpu.memory_space<vmem>>, vector<672x196xf32>
    tpu.vector_store %arg5[%c0_14, %c0_15], %30 {strides = array<i32>} : memref<672x196xf32, #tpu.memory_space<vmem>>, vector<672x196xf32>,
    return
  }
  func.func @transform_0(%arg0: i32) -> (i32, i32) {
    %c0_i32 = arith.constant 0 : i32
    %c0_i32_0 = arith.constant 0 : i32
    %c0_i32_1 = arith.constant 0 : i32
    return %c0_i32, %c0_i32_0 : i32, i32
  }
  func.func @transform_1(%arg0: i32) -> (i32, i32) {
    %c0_i32 = arith.constant 0 : i32
    %c0_i32_0 = arith.constant 0 : i32
    return %arg0, %c0_i32 : i32, i32
  }
  func.func @transform_2(%arg0: i32) -> (i32, i32) {
    %c0_i32 = arith.constant 0 : i32
    %c0_i32_0 = arith.constant 0 : i32
    return %arg0, %c0_i32 : i32, i32
  }
  func.func @transform_3(%arg0: i32) -> (i32, i32) {
    %c0_i32 = arith.constant 0 : i32
    %c0_i32_0 = arith.constant 0 : i32
    return %arg0, %c0_i32 : i32, i32
  }
  func.func @transform_4(%arg0: i32) -> (i32, i32) {
    %c0_i32 = arith.constant 0 : i32
    %c0_i32_0 = arith.constant 0 : i32
    return %arg0, %c0_i32 : i32, i32
  }
}

</mosaic_0001>

<bundles_post_ra>
// kernel: tpu_custom_call.1
= control target key start
LH: loop header
LB: loop body
LE: loop exit
PB: predicated region body
PF: predicated region fallthrough
CT: control target
= control target key end

     0   :  { %s11428_s15 = smov 0   ;;  %s16652_s0 = inlined_call_operand.vmem [shape: f32[1344,196], index: 0, kind: input, shape index: {}]   ;;  %s16653_s1 = inlined_call_operand.vmem [shape: bf16[1344,1344], index: 1, kind: input, shape index: {}]   ;;  %s16654_s2 = inlined_call_operand.vmem [shape: f32[1344,1], index: 2, kind: input, shape index: {}]   ;;  %s16655_s3 = inlined_call_operand.vmem [shape: f32[1344,1], index: 3, kind: input, shape index: {}]   ;;  %s16656_s4 = inlined_call_operand.vmem [shape: f32[1344,196], index: 4, kind: output, shape index: {}]  }
   0x1 LB: > { %s10025_s16 = sadd.s32 4294967295, %s11400_s15   ;;  %p10029_p0 = scmp.ge.s32.totalorder %s11400_s15, 1  ;;  %s11400_s15 = sphi %s11428_s15, %s14_s15  }
   0x2   : > { %p186_p1 = scmp.lt.s32.totalorder %s11400_s15, 3 }
   0x4   : > { %p187_p2 = pnand %p10029_p0, %p186_p1 }
   0x6   : > { %190 = sbr.rel (%p187_p2) target bundleno = 3671 (0xe57), region = 36 }
   0xb   : > { %v280_v0 = vld [vmem:[%s16652_s0 + $0xe8] sm:$0xff]  ;;  %v282_v1 = vld [vmem:[%s16652_s0 + $0xf8] sm:$0xff]  ;;  %v279_v7 = vld [vmem:[%s16652_s0 + $0xe0] sm:$0xff]  ;;  %s11645_s9 = smul.u32 84, %s10025_s16  ;;  %vm3905_vm0 = vcmask 523264   ;;  %vm6750_vm1 = vcmask 556032  }
   0xc   : > { %v344_v2 = vld [vmem:[%s16652_s0 + $0x2e8] sm:$0xff]  ;;  %v616_v3 = vmax.f32 %v280_v0, 0.0  ;;  %v618_v4 = vmax.f32 %v282_v1, 0.0  ;;  %v346_v5 = vld [vmem:[%s16652_s0 + $0x2f8] sm:$0xff]  ;;  %v281_v8 = vld [vmem:[%s16652_s0 + $0xf0] sm:$0xff]  ;;  %v615_v10 = vmax.f32 %v279_v7, 0.0 }
   0xd   : > { %v680_v6 = vmax.f32 %v344_v2, 0.0  ;;  %v682_v9 = vmax.f32 %v346_v5, 0.0  ;;  %v617_v11 = vmax.f32 %v281_v8, 0.0  ;;  %v343_v12 = vld [vmem:[%s16652_s0 + $0x2e0] sm:$0xff]  ;;  %v345_v13 = vld [vmem:[%s16652_s0 + $0x2f0] sm:$0xff]  ;;  %v276_v14 = vld [vmem:[%s16652_s0 + $0xc8] sm:$0xff] }
   0xe   : > { %v938_v15 = vpack.c.bf16 %v618_v4, %v616_v3  ;;  %v679_v16 = vmax.f32 %v343_v12, 0.0  ;;  %v681_v17 = vmax.f32 %v345_v13, 0.0  ;;  %v278_v18 = vld [vmem:[%s16652_s0 + $0xd8] sm:$0xff]  ;;  %v612_v19 = vmax.f32 %v276_v14, 0.0  ;;  %v340_v20 = vld [vmem:[%s16652_s0 + $0x2c8] sm:$0xff]  ;;  %v275_v26 = vld [vmem:[%s16652_s0 + $0xc0] sm:$0xff] }
   0xf   : > { %v342_v21 = vld [vmem:[%s16652_s0 + $0x2d8] sm:$0xff]  ;;  %v970_v22 = vpack.c.bf16 %v682_v9, %v680_v6  ;;  %v937_v23 = vpack.c.bf16 %v617_v11, %v615_v10  ;;  %v614_v24 = vmax.f32 %v278_v18, 0.0  ;;  %v676_v25 = vmax.f32 %v340_v20, 0.0  ;;  %v277_v27 = vld [vmem:[%s16652_s0 + $0xd0] sm:$0xff]  ;;  %v339_v28 = vld [vmem:[%s16652_s0 + $0x2c0] sm:$0xff]  ;;  %p225_p3 = scmp.lt.s32.totalorder %s11645_s9, 167 }
  0x10   : > { %4032 = vmatprep.subr.bf16.mxu0 %v938_v15  ;;  %v969_v29 = vpack.c.bf16 %v681_v17, %v679_v16  ;;  %v678_v30 = vmax.f32 %v342_v21, 0.0  ;;  %v611_v31 = vmax.f32 %v275_v26, 0.0  ;;  %v613_v32 = vmax.f32 %v277_v27, 0.0  ;;  %v341_v33 = vld [vmem:[%s16652_s0 + $0x2d0] sm:$0xff]  ;;  %v272_v34 = vld [vmem:[%s16652_s0 + $0xa8] sm:$0xff]  ;;  %v274_v35 = vld [vmem:[%s16652_s0 + $0xb8] sm:$0xff] }
  0x11   : > { %4485 = vmatprep.subr.bf16.mxu1 %v970_v22  ;;  %4033 = vmatpush1.bf16.msra.mxu0 %v937_v23  ;;  %v936_v36 = vpack.c.bf16 %v614_v24, %v612_v19  ;;  %v675_v37 = vmax.f32 %v339_v28, 0.0  ;;  %v677_v38 = vmax.f32 %v341_v33, 0.0  ;;  %v608_v39 = vmax.f32 %v272_v34, 0.0  ;;  %v336_v40 = vld [vmem:[%s16652_s0 + $0x2a8] sm:$0xff]  ;;  %v338_v41 = vld [vmem:[%s16652_s0 + $0x2b8] sm:$0xff]  ;;  %v271_v42 = vld [vmem:[%s16652_s0 + $0xa0] sm:$0xff] }
  0x12   : > { %4486 = vmatpush1.bf16.msra.mxu1 %v969_v29  ;;  %v968_v43 = vpack.c.bf16 %v678_v30, %v676_v25  ;;  %v935_v44 = vpack.c.bf16 %v613_v32, %v611_v31  ;;  %v610_v45 = vmax.f32 %v274_v35, 0.0  ;;  %v672_v46 = vmax.f32 %v336_v40, 0.0  ;;  %v273_v47 = vld [vmem:[%s16652_s0 + $0xb0] sm:$0xff]  ;;  %v335_v48 = vld [vmem:[%s16652_s0 + $0x2a0] sm:$0xff]  ;;  %v268_v54 = vld [vmem:[%s16652_s0 + $0x88] sm:$0xff]  ;;  %s17980_s9 = smov (!%p225_p3, %s11645_s9), 167 }
  0x13   : > { %v337_v49 = vld [vmem:[%s16652_s0 + $0x2b0] sm:$0xff]  ;;  %4034 = vmatprep.subr.bf16.mxu0 %v936_v36  ;;  %v967_v50 = vpack.c.bf16 %v677_v38, %v675_v37  ;;  %v674_v51 = vmax.f32 %v338_v41, 0.0  ;;  %v607_v52 = vmax.f32 %v271_v42, 0.0  ;;  %v609_v53 = vmax.f32 %v273_v47, 0.0  ;;  %v270_v55 = vld [vmem:[%s16652_s0 + $0x98] sm:$0xff]  ;;  %v332_v56 = vld [vmem:[%s16652_s0 + $0x288] sm:$0xff] }
  0x14   : > { %4487 = vmatprep.subr.bf16.mxu1 %v968_v43  ;;  %v934_v57 = vpack.c.bf16 %v610_v45, %v608_v39  ;;  %v671_v58 = vmax.f32 %v335_v48, 0.0  ;;  %v673_v59 = vmax.f32 %v337_v49, 0.0  ;;  %v604_v60 = vmax.f32 %v268_v54, 0.0  ;;  %v334_v61 = vld [vmem:[%s16652_s0 + $0x298] sm:$0xff]  ;;  %v267_v62 = vld [vmem:[%s16652_s0 + $0x80] sm:$0xff]  ;;  %v269_v63 = vld [vmem:[%s16652_s0 + $0x90] sm:$0xff] }
  0x15   : > { %4035 = vmatpush1.bf16.msra.mxu0 %v935_v44  ;;  %v966_v0 = vpack.c.bf16 %v674_v51, %v672_v46  ;;  %v933_v1 = vpack.c.bf16 %v609_v53, %v607_v52  ;;  %v606_v2 = vmax.f32 %v270_v55, 0.0  ;;  %v668_v3 = vmax.f32 %v332_v56, 0.0  ;;  %v331_v4 = vld [vmem:[%s16652_s0 + $0x280] sm:$0xff]  ;;  %v333_v5 = vld [vmem:[%s16652_s0 + $0x290] sm:$0xff]  ;;  %v264_v6 = vld [vmem:[%s16652_s0 + $0x68] sm:$0xff]  ;;  %s10542_s10 = smul.u32 44, %s17980_s9 }
  0x16   : > { %4488 = vmatpush1.bf16.msra.mxu1 %v967_v50  ;;  %4036 = vmatprep.subr.bf16.mxu0 %v934_v57  ;;  %v965_v7 = vpack.c.bf16 %v673_v59, %v671_v58  ;;  %v670_v8 = vmax.f32 %v334_v61, 0.0  ;;  %v603_v9 = vmax.f32 %v267_v62, 0.0  ;;  %v605_v10 = vmax.f32 %v269_v63, 0.0  ;;  %v266_v11 = vld [vmem:[%s16652_s0 + $0x78] sm:$0xff]  ;;  %v328_v12 = vld [vmem:[%s16652_s0 + $0x268] sm:$0xff]  ;;  %v263_v18 = vld [vmem:[%s16652_s0 + $0x60] sm:$0xff] }
  0x17   : > { %v330_v13 = vld [vmem:[%s16652_s0 + $0x278] sm:$0xff]  ;;  %4489 = vmatprep.subr.bf16.mxu1 %v966_v0  ;;  %v932_v14 = vpack.c.bf16 %v606_v2, %v604_v60  ;;  %v667_v15 = vmax.f32 %v331_v4, 0.0  ;;  %v669_v16 = vmax.f32 %v333_v5, 0.0  ;;  %v600_v17 = vmax.f32 %v264_v6, 0.0  ;;  %v265_v19 = vld [vmem:[%s16652_s0 + $0x70] sm:$0xff]  ;;  %v327_v20 = vld [vmem:[%s16652_s0 + $0x260] sm:$0xff]  ;;  %s11762_s12 = scalar_lea.vmem %s16653_s1, %s10542_s10 }
  0x18   : > { %v964_v21 = vpack.c.bf16 %v670_v8, %v668_v3  ;;  %v931_v22 = vpack.c.bf16 %v605_v10, %v603_v9  ;;  %v602_v23 = vmax.f32 %v266_v11, 0.0  ;;  %v664_v24 = vmax.f32 %v328_v12, 0.0  ;;  %v329_v25 = vld [vmem:[%s16652_s0 + $0x270] sm:$0xff]  ;;  %v260_v26 = vld [vmem:[%s16652_s0 + $0x48] sm:$0xff]  ;;  %v262_v27 = vld [vmem:[%s16652_s0 + $0x58] sm:$0xff]  ;;  %s10541_s23 = sshll.u32 %s17980_s9, 4 }
  0x19   : > { %4037 = vmatpush1.bf16.msra.mxu0 %v933_v1  ;;  %v963_v28 = vpack.c.bf16 %v669_v16, %v667_v15  ;;  %v666_v29 = vmax.f32 %v330_v13, 0.0  ;;  %v599_v30 = vmax.f32 %v263_v18, 0.0  ;;  %v601_v31 = vmax.f32 %v265_v19, 0.0  ;;  %v324_v32 = vld [vmem:[%s16652_s0 + $0x248] sm:$0xff]  ;;  %v326_v33 = vld [vmem:[%s16652_s0 + $0x258] sm:$0xff]  ;;  %v259_v34 = vld [vmem:[%s16652_s0 + $0x40] sm:$0xff]  ;;  %s14990_s26 = scalar_lea.vmem %s16656_s4, %s10541_s23 }
  0x1a   : > { %4490 = vmatpush1.bf16.msra.mxu1 %v965_v7  ;;  %4038 = vmatprep.subr.bf16.mxu0 %v932_v14  ;;  %v930_v35 = vpack.c.bf16 %v602_v23, %v600_v17  ;;  %v663_v36 = vmax.f32 %v327_v20, 0.0  ;;  %v665_v37 = vmax.f32 %v329_v25, 0.0  ;;  %v596_v38 = vmax.f32 %v260_v26, 0.0  ;;  %v261_v39 = vld [vmem:[%s16652_s0 + $0x50] sm:$0xff]  ;;  %v323_v40 = vld [vmem:[%s16652_s0 + $0x240] sm:$0xff]  ;;  %v256_v45 = vld [vmem:[%s16652_s0 + $0x28] sm:$0xff] }
  0x1b   : > { %4491 = vmatprep.subr.bf16.mxu1 %v964_v21  ;;  %v962_v41 = vpack.c.bf16 %v666_v29, %v664_v24  ;;  %v598_v42 = vmax.f32 %v262_v27, 0.0  ;;  %v660_v43 = vmax.f32 %v324_v32, 0.0  ;;  %v325_v44 = vld [vmem:[%s16652_s0 + $0x250] sm:$0xff]  ;;  %v258_v46 = vld [vmem:[%s16652_s0 + $0x38] sm:$0xff]  ;;  %v662_v47 = vmax.f32 %v326_v33, 0.0  ;;  %v320_v50 = vld [vmem:[%s16652_s0 + $0x228] sm:$0xff] }
  0x1c   : > { %v595_v48 = vmax.f32 %v259_v34, 0.0  ;;  %v597_v49 = vmax.f32 %v261_v39, 0.0  ;;  %v322_v51 = vld [vmem:[%s16652_s0 + $0x238] sm:$0xff]  ;;  %v929_v52 = vpack.c.bf16 %v601_v31, %v599_v30  ;;  %v961_v53 = vpack.c.bf16 %v665_v37, %v663_v36  ;;  %v255_v55 = vld [vmem:[%s16652_s0 + $0x20] sm:$0xff]  ;;  %v257_v56 = vld [vmem:[%s16652_s0 + $0x30] sm:$0xff] }
  0x1d   : > { %4039 = vmatpush1.bf16.msra.mxu0 %v931_v22  ;;  %v659_v54 = vmax.f32 %v323_v40, 0.0  ;;  %v319_v57 = vld [vmem:[%s16652_s0 + $0x220] sm:$0xff]  ;;  %v928_v58 = vpack.c.bf16 %v598_v42, %v596_v38  ;;  %v661_v59 = vmax.f32 %v325_v44, 0.0  ;;  %v592_v60 = vmax.f32 %v256_v45, 0.0  ;;  %v321_v62 = vld [vmem:[%s16652_s0 + $0x230] sm:$0xff]  ;;  %v252_v63 = vld [vmem:[%s16652_s0 + $0x8] sm:$0xff] }
  0x1e   : > { %4492 = vmatpush1.bf16.msra.mxu1 %v963_v28  ;;  %4040 = vmatprep.subr.bf16.mxu0 %v930_v35  ;;  %v594_v61 = vmax.f32 %v258_v46, 0.0  ;;  %v254_v0 = vld [vmem:[%s16652_s0 + $0x18] sm:$0xff]  ;;  %v960_v1 = vpack.c.bf16 %v662_v47, %v660_v43  ;;  %v656_v2 = vmax.f32 %v320_v50, 0.0  ;;  %v658_v3 = vmax.f32 %v322_v51, 0.0  ;;  %v316_v7 = vld [vmem:[%s16652_s0 + $0x208] sm:$0xff]  ;;  %v251_v13 = vld [vmem:[%s16652_s0] sm:$0xff] }
  0x1f   : > { %4493 = vmatprep.subr.bf16.mxu1 %v962_v41  ;;  %v927_v4 = vpack.c.bf16 %v597_v49, %v595_v48  ;;  %v591_v5 = vmax.f32 %v255_v55, 0.0  ;;  %v593_v6 = vmax.f32 %v257_v56, 0.0  ;;  %v318_v8 = vld [vmem:[%s16652_s0 + $0x218] sm:$0xff]  ;;  %v655_v9 = vmax.f32 %v319_v57, 0.0  ;;  %v253_v14 = vld [vmem:[%s16652_s0 + $0x10] sm:$0xff]  ;;  %v315_v17 = vld [vmem:[%s16652_s0 + $0x200] sm:$0xff] }
  0x20   : > { %v657_v10 = vmax.f32 %v321_v62, 0.0  ;;  %v588_v11 = vmax.f32 %v252_v63, 0.0  ;;  %v590_v12 = vmax.f32 %v254_v0, 0.0  ;;  %v959_v15 = vpack.c.bf16 %v661_v59, %v659_v54  ;;  %v317_v21 = vld [vmem:[%s16652_s0 + $0x210] sm:$0xff]  ;;  %v312_v22 = vld [vmem:[%s16652_s0 + $0x1e8] sm:$0xff]  ;;  %v314_v23 = vld [vmem:[%s16652_s0 + $0x1f8] sm:$0xff] }
  0x21   : > { %4041 = vmatpush1.bf16.msra.mxu0 %v929_v52  ;;  %v926_v16 = vpack.c.bf16 %v594_v61, %v592_v60  ;;  %v958_v18 = vpack.c.bf16 %v658_v3, %v656_v2  ;;  %v652_v19 = vmax.f32 %v316_v7, 0.0  ;;  %v654_v20 = vmax.f32 %v318_v8, 0.0  ;;  %v376_v26 = vld [vmem:[%s16652_s0 + $0x3e8] sm:$0xff]  ;;  %v378_v27 = vld [vmem:[%s16652_s0 + $0x3f8] sm:$0xff]  ;;  %v311_v28 = vld [vmem:[%s16652_s0 + $0x1e0] sm:$0xff] }
  0x22   : > { %4494 = vmatpush1.bf16.msra.mxu1 %v961_v53  ;;  %4042 = vmatprep.subr.bf16.mxu0 %v928_v58  ;;  %v587_v24 = vmax.f32 %v251_v13, 0.0  ;;  %v589_v25 = vmax.f32 %v253_v14, 0.0  ;;  %v925_v29 = vpack.c.bf16 %v593_v6, %v591_v5  ;;  %v957_v30 = vpack.c.bf16 %v657_v10, %v655_v9  ;;  %v313_v32 = vld [vmem:[%s16652_s0 + $0x1f0] sm:$0xff]  ;;  %v375_v33 = vld [vmem:[%s16652_s0 + $0x3e0] sm:$0xff]  ;;  %v308_v39 = vld [vmem:[%s16652_s0 + $0x1c8] sm:$0xff] }
  0x23   : > { %4495 = vmatprep.subr.bf16.mxu1 %v960_v1  ;;  %v924_v31 = vpack.c.bf16 %v590_v12, %v588_v11  ;;  %v377_v34 = vld [vmem:[%s16652_s0 + $0x3f0] sm:$0xff]  ;;  %v651_v35 = vmax.f32 %v315_v17, 0.0  ;;  %v653_v36 = vmax.f32 %v317_v21, 0.0  ;;  %v648_v37 = vmax.f32 %v312_v22, 0.0  ;;  %v310_v40 = vld [vmem:[%s16652_s0 + $0x1d8] sm:$0xff]  ;;  %v372_v47 = vld [vmem:[%s16652_s0 + $0x3c8] sm:$0xff] }
  0x24   : > { %v650_v38 = vmax.f32 %v314_v23, 0.0  ;;  %v956_v41 = vpack.c.bf16 %v654_v20, %v652_v19  ;;  %v712_v42 = vmax.f32 %v376_v26, 0.0  ;;  %v714_v43 = vmax.f32 %v378_v27, 0.0  ;;  %v374_v48 = vld [vmem:[%s16652_s0 + $0x3d8] sm:$0xff]  ;;  %v307_v53 = vld [vmem:[%s16652_s0 + $0x1c0] sm:$0xff]  ;;  %v309_v54 = vld [vmem:[%s16652_s0 + $0x1d0] sm:$0xff] }
  0x25   : > { %4043 = vmatpush1.bf16.msra.mxu0 %v927_v4  ;;  %v923_v44 = vpack.c.bf16 %v589_v25, %v587_v24  ;;  %v647_v45 = vmax.f32 %v311_v28, 0.0  ;;  %v649_v46 = vmax.f32 %v313_v32, 0.0  ;;  %v711_v49 = vmax.f32 %v375_v33, 0.0  ;;  %v371_v57 = vld [vmem:[%s16652_s0 + $0x3c0] sm:$0xff]  ;;  %v373_v61 = vld [vmem:[%s16652_s0 + $0x3d0] sm:$0xff]  ;;  %v304_v62 = vld [vmem:[%s16652_s0 + $0x1a8] sm:$0xff] }
  0x26   : > { %4496 = vmatpush1.bf16.msra.mxu1 %v959_v15  ;;  %4044 = vmatprep.subr.bf16.mxu0 %v926_v16  ;;  %v713_v50 = vmax.f32 %v377_v34, 0.0  ;;  %v644_v51 = vmax.f32 %v308_v39, 0.0  ;;  %v646_v52 = vmax.f32 %v310_v40, 0.0  ;;  %v955_v55 = vpack.c.bf16 %v653_v36, %v651_v35  ;;  %v306_v63 = vld [vmem:[%s16652_s0 + $0x1b8] sm:$0xff]  ;;  %v368_v2 = vld [vmem:[%s16652_s0 + $0x3a8] sm:$0xff]  ;;  %v303_v4 = vld [vmem:[%s16652_s0 + $0x1a0] sm:$0xff] }
  0x27   : > { %4497 = vmatprep.subr.bf16.mxu1 %v958_v18  ;;  %v954_v56 = vpack.c.bf16 %v650_v38, %v648_v37  ;;  %v986_v58 = vpack.c.bf16 %v714_v43, %v712_v42  ;;  %v708_v59 = vmax.f32 %v372_v47, 0.0  ;;  %v710_v60 = vmax.f32 %v374_v48, 0.0  ;;  %v370_v3 = vld [vmem:[%s16652_s0 + $0x3b8] sm:$0xff]  ;;  %v305_v8 = vld [vmem:[%s16652_s0 + $0x1b0] sm:$0xff]  ;;  %v367_v9 = vld [vmem:[%s16652_s0 + $0x3a0] sm:$0xff] }
  0x28   : > { %v643_v0 = vmax.f32 %v307_v53, 0.0  ;;  %v645_v1 = vmax.f32 %v309_v54, 0.0  ;;  %v953_v5 = vpack.c.bf16 %v649_v46, %v647_v45  ;;  %v985_v6 = vpack.c.bf16 %v713_v50, %v711_v49  ;;  %v369_v10 = vld [vmem:[%s16652_s0 + $0x3b0] sm:$0xff]  ;;  %v300_v15 = vld [vmem:[%s16652_s0 + $0x188] sm:$0xff]  ;;  %v302_v16 = vld [vmem:[%s16652_s0 + $0x198] sm:$0xff] }
  0x29   : > { %4045 = vmatpush1.bf16.msra.mxu0 %v925_v29  ;;  %v952_v7 = vpack.c.bf16 %v646_v52, %v644_v51  ;;  %v707_v11 = vmax.f32 %v371_v57, 0.0  ;;  %v709_v12 = vmax.f32 %v373_v61, 0.0  ;;  %v640_v13 = vmax.f32 %v304_v62, 0.0  ;;  %v364_v23 = vld [vmem:[%s16652_s0 + $0x388] sm:$0xff]  ;;  %v366_v24 = vld [vmem:[%s16652_s0 + $0x398] sm:$0xff]  ;;  %v299_v25 = vld [vmem:[%s16652_s0 + $0x180] sm:$0xff] }
  0x2a   : > { %4498 = vmatpush1.bf16.msra.mxu1 %v957_v30  ;;  %4046 = vmatprep.subr.bf16.mxu0 %v924_v31  ;;  %v642_v14 = vmax.f32 %v306_v63, 0.0  ;;  %v984_v17 = vpack.c.bf16 %v710_v60, %v708_v59  ;;  %v704_v18 = vmax.f32 %v368_v2, 0.0  ;;  %v706_v19 = vmax.f32 %v370_v3, 0.0  ;;  %v301_v30 = vld [vmem:[%s16652_s0 + $0x190] sm:$0xff]  ;;  %v363_v31 = vld [vmem:[%s16652_s0 + $0x380] sm:$0xff]  ;;  %v296_v35 = vld [vmem:[%s16652_s0 + $0x168] sm:$0xff] }
  0x2b   : > { %4499 = vmatprep.subr.bf16.mxu1 %v956_v41  ;;  %v951_v20 = vpack.c.bf16 %v645_v1, %v643_v0  ;;  %v639_v21 = vmax.f32 %v303_v4, 0.0  ;;  %v641_v22 = vmax.f32 %v305_v8, 0.0  ;;  %v703_v26 = vmax.f32 %v367_v9, 0.0  ;;  %v365_v34 = vld [vmem:[%s16652_s0 + $0x390] sm:$0xff]  ;;  %v298_v36 = vld [vmem:[%s16652_s0 + $0x178] sm:$0xff]  ;;  %v360_v40 = vld [vmem:[%s16652_s0 + $0x368] sm:$0xff] }
  0x2c   : > { %v705_v27 = vmax.f32 %v369_v10, 0.0  ;;  %v636_v28 = vmax.f32 %v300_v15, 0.0  ;;  %v638_v29 = vmax.f32 %v302_v16, 0.0  ;;  %v983_v32 = vpack.c.bf16 %v709_v12, %v707_v11  ;;  %v362_v41 = vld [vmem:[%s16652_s0 + $0x378] sm:$0xff]  ;;  %v295_v42 = vld [vmem:[%s16652_s0 + $0x160] sm:$0xff]  ;;  %v297_v45 = vld [vmem:[%s16652_s0 + $0x170] sm:$0xff] }
  0x2d   : > { %4047 = vmatpush1.bf16.msra.mxu0 %v923_v44  ;;  %v950_v33 = vpack.c.bf16 %v642_v14, %v640_v13  ;;  %v982_v37 = vpack.c.bf16 %v706_v19, %v704_v18  ;;  %v700_v38 = vmax.f32 %v364_v23, 0.0  ;;  %v702_v39 = vmax.f32 %v366_v24, 0.0  ;;  %v359_v46 = vld [vmem:[%s16652_s0 + $0x360] sm:$0xff]  ;;  %v361_v47 = vld [vmem:[%s16652_s0 + $0x370] sm:$0xff]  ;;  %v292_v51 = vld [vmem:[%s16652_s0 + $0x148] sm:$0xff] }
  0x2e   : > { %4500 = vmatpush1.bf16.msra.mxu1 %v955_v55  ;;  %4048 = vmatprep.subr.bf16.mxu0 %v954_v56  ;;  %v635_v43 = vmax.f32 %v299_v25, 0.0  ;;  %v637_v44 = vmax.f32 %v301_v30, 0.0  ;;  %v949_v48 = vpack.c.bf16 %v641_v22, %v639_v21  ;;  %v981_v49 = vpack.c.bf16 %v705_v27, %v703_v26  ;;  %v294_v52 = vld [vmem:[%s16652_s0 + $0x158] sm:$0xff]  ;;  %v356_v60 = vld [vmem:[%s16652_s0 + $0x348] sm:$0xff]  ;;  %v10556_v61 = vld [vmem:[%s11762_s12 + $0x4] ss:$44 sps:$4 sm:$0xff]  }
  0x2f   : > { %4501 = vmatprep.subr.bf16.mxu1 %v986_v58  ;;  %v948_v50 = vpack.c.bf16 %v638_v29, %v636_v28  ;;  %v699_v53 = vmax.f32 %v363_v31, 0.0  ;;  %v701_v54 = vmax.f32 %v365_v34, 0.0  ;;  %v632_v55 = vmax.f32 %v296_v35, 0.0  ;;  %v358_v1 = vld [vmem:[%s16652_s0 + $0x358] sm:$0xff]  ;;  %v291_v2 = vld [vmem:[%s16652_s0 + $0x140] sm:$0xff]  ;;  %v293_v3 = vld [vmem:[%s16652_s0 + $0x150] sm:$0xff]  ;;  %4064 = vmatprep.mubr.bf16.mxu0 %v10556_v61 }
  0x30   : > { %v634_v56 = vmax.f32 %v298_v36, 0.0  ;;  %v980_v57 = vpack.c.bf16 %v702_v39, %v700_v38  ;;  %v696_v58 = vmax.f32 %v360_v40, 0.0  ;;  %v698_v59 = vmax.f32 %v362_v41, 0.0  ;;  %v355_v8 = vld [vmem:[%s16652_s0 + $0x340] sm:$0xff]  ;;  %v357_v9 = vld [vmem:[%s16652_s0 + $0x350] sm:$0xff]  ;;  %v288_v13 = vld [vmem:[%s16652_s0 + $0x128] sm:$0xff] }
  0x31   : > { %4049 = vmatpush2.bf16.msra.mxu0 %v953_v5  ;;  %v947_v62 = vpack.c.bf16 %v637_v44, %v635_v43  ;;  %v631_v63 = vmax.f32 %v295_v42, 0.0  ;;  %v633_v0 = vmax.f32 %v297_v45, 0.0  ;;  %v695_v4 = vmax.f32 %v359_v46, 0.0  ;;  %v10559_v10 = vld [vmem:[%s11762_s12 + $0xc] ss:$44 sps:$4 sm:$0xff]   ;;  %v289_v22 = vld [vmem:[%s16652_s0 + $0x130] sm:$0xff] }
  0x32   : > { %4502 = vmatpush2.bf16.msra.mxu1 %v985_v6  ;;  %4050 = vmatprep.subr.bf16.mxu0 %v952_v7  ;;  %v697_v5 = vmax.f32 %v361_v47, 0.0  ;;  %v628_v6 = vmax.f32 %v292_v51, 0.0  ;;  %v630_v7 = vmax.f32 %v294_v52, 0.0  ;;  %v979_v11 = vpack.c.bf16 %v701_v54, %v699_v53  ;;  %v290_v14 = vld [vmem:[%s16652_s0 + $0x138] sm:$0xff]  ;;  %v352_v15 = vld [vmem:[%s16652_s0 + $0x328] sm:$0xff]  ;;  %v351_v27 = vld [vmem:[%s16652_s0 + $0x320] sm:$0xff] }
  0x33   : > { %4503 = vmatprep.subr.bf16.mxu1 %v984_v17  ;;  %v946_v12 = vpack.c.bf16 %v634_v56, %v632_v55  ;;  %v978_v16 = vpack.c.bf16 %v698_v59, %v696_v58  ;;  %v692_v17 = vmax.f32 %v356_v60, 0.0  ;;  %v694_v18 = vmax.f32 %v358_v1, 0.0  ;;  %v354_v19 = vld [vmem:[%s16652_s0 + $0x338] sm:$0xff]  ;;  %4517 = vmatprep.mubr.bf16.mxu1 %v10559_v10  ;;  %v353_v28 = vld [vmem:[%s16652_s0 + $0x330] sm:$0xff]  ;;  %v348_v38 = vld [vmem:[%s16652_s0 + $0x308] sm:$0xff] }
  0x34   : > { %v945_v21 = vpack.c.bf16 %v633_v0, %v631_v63  ;;  %v977_v23 = vpack.c.bf16 %v697_v5, %v695_v4  ;;  %v944_v24 = vpack.c.bf16 %v630_v7, %v628_v6  ;;  %v627_v25 = vmax.f32 %v291_v2, 0.0  ;;  %v286_v34 = vld [vmem:[%s16652_s0 + $0x118] sm:$0xff]  ;;  %v283_v45 = vld [vmem:[%s16652_s0 + $0x100] sm:$0xff]  ;;  %v285_v46 = vld [vmem:[%s16652_s0 + $0x110] sm:$0xff] }
  0x35   : > { %4051 = vmatpush2.bf16.msra.mxu0 %v951_v20  ;;  %v287_v20 = vld [vmem:[%s16652_s0 + $0x120] sm:$0xff]  ;;  %v629_v26 = vmax.f32 %v293_v3, 0.0  ;;  %v691_v29 = vmax.f32 %v355_v8, 0.0  ;;  %v693_v30 = vmax.f32 %v357_v9, 0.0  ;;  %v624_v31 = vmax.f32 %v288_v13, 0.0  ;;  %v350_v41 = vld [vmem:[%s16652_s0 + $0x318] sm:$0xff] }
  0x36   : > { %4504 = vmatpush2.bf16.msra.mxu1 %v983_v32  ;;  %4052 = vmatprep.subr.bf16.mxu0 %v950_v33  ;;  %v626_v32 = vmax.f32 %v290_v14, 0.0  ;;  %v284_v33 = vld [vmem:[%s16652_s0 + $0x108] sm:$0xff]  ;;  %v976_v35 = vpack.c.bf16 %v694_v18, %v692_v17  ;;  %v688_v36 = vmax.f32 %v352_v15, 0.0  ;;  %v623_v39 = vmax.f32 %v287_v20, 0.0  ;;  %v347_v47 = vld [vmem:[%s16652_s0 + $0x300] sm:$0xff]  ;;  %v349_v52 = vld [vmem:[%s16652_s0 + $0x310] sm:$0xff] }
  0x37   : > { %4505 = vmatprep.subr.bf16.mxu1 %v982_v37  ;;  %v690_v37 = vmax.f32 %v354_v19, 0.0  ;;  %v625_v40 = vmax.f32 %v289_v22, 0.0  ;;  %v943_v42 = vpack.c.bf16 %v629_v26, %v627_v25  ;;  %v687_v43 = vmax.f32 %v351_v27, 0.0  ;;  %v408_v53 = vld [vmem:[%s16652_s0 + $0x4e8] sm:$0xff]  ;;  %v410_v54 = vld [vmem:[%s16652_s0 + $0x4f8] sm:$0xff]  ;;  %v407_v1 = vld [vmem:[%s16652_s0 + $0x4e0] sm:$0xff] }
  0x38   : > { %v689_v44 = vmax.f32 %v353_v28, 0.0  ;;  %v622_v51 = vmax.f32 %v286_v34, 0.0  ;;  %v684_v56 = vmax.f32 %v348_v38, 0.0  ;;  %v472_v59 = vld [vmem:[%s16652_s0 + $0x6e8] sm:$0xff]  ;;  %v474_v60 = vld [vmem:[%s16652_s0 + $0x6f8] sm:$0xff]  ;;  %v621_v63 = vmax.f32 %v285_v46, 0.0 }
  0x39   : > { %4053 = vmatpush2.bf16.msra.mxu0 %v949_v48  ;;  %v975_v48 = vpack.c.bf16 %v693_v30, %v691_v29  ;;  %v974_v55 = vpack.c.bf16 %v690_v37, %v688_v36  ;;  %v941_v58 = vpack.c.bf16 %v625_v40, %v623_v39  ;;  %v683_v0 = vmax.f32 %v347_v47, 0.0  ;;  %v409_v2 = vld [vmem:[%s16652_s0 + $0x4f0] sm:$0xff]  ;;  %v471_v7 = vld [vmem:[%s16652_s0 + $0x6e0] sm:$0xff]  ;;  %v404_v9 = vld [vmem:[%s16652_s0 + $0x4c8] sm:$0xff] }
  0x3a   : > { %4506 = vmatpush2.bf16.msra.mxu1 %v981_v49  ;;  %4054 = vmatprep.subr.bf16.mxu0 %v948_v50  ;;  %v942_v49 = vpack.c.bf16 %v626_v32, %v624_v31  ;;  %v620_v50 = vmax.f32 %v284_v33, 0.0  ;;  %v973_v61 = vpack.c.bf16 %v689_v44, %v687_v43  ;;  %v685_v4 = vmax.f32 %v349_v52, 0.0  ;;  %v473_v8 = vld [vmem:[%s16652_s0 + $0x6f0] sm:$0xff]  ;;  %v406_v13 = vld [vmem:[%s16652_s0 + $0x4d8] sm:$0xff]  ;;  %v403_v14 = vld [vmem:[%s16652_s0 + $0x4c0] sm:$0xff] }
  0x3b   : > { %4507 = vmatprep.subr.bf16.mxu1 %v980_v57  ;;  %v686_v57 = vmax.f32 %v350_v41, 0.0  ;;  %v744_v5 = vmax.f32 %v408_v53, 0.0  ;;  %v746_v6 = vmax.f32 %v410_v54, 0.0  ;;  %v405_v15 = vld [vmem:[%s16652_s0 + $0x4d0] sm:$0xff]  ;;  %v743_v17 = vmax.f32 %v407_v1, 0.0  ;;  %v468_v19 = vld [vmem:[%s16652_s0 + $0x6c8] sm:$0xff] }
  0x3c   : > { %v940_v3 = vpack.c.bf16 %v622_v51, %v620_v50  ;;  %v745_v18 = vmax.f32 %v409_v2, 0.0  ;;  %v470_v20 = vld [vmem:[%s16652_s0 + $0x6d8] sm:$0xff]  ;;  %v10554_v22 = vld [vmem:[%s11762_s12] ss:$44 sps:$4 sm:$0xff]   ;;  %v809_v25 = vmax.f32 %v473_v8, 0.0  ;;  %v740_v29 = vmax.f32 %v404_v9, 0.0 }
  0x3d   : > { %4055 = vmatpush2.bf16.msra.mxu0 %v947_v62  ;;  %v619_v62 = vmax.f32 %v283_v45, 0.0  ;;  %v972_v10 = vpack.c.bf16 %v686_v57, %v684_v56  ;;  %v467_v26 = vld [vmem:[%s16652_s0 + $0x6c0] sm:$0xff]  ;;  %v10557_v27 = vld [vmem:[%s11762_s12 + $0x8] ss:$44 sps:$4 sm:$0xff]   ;;  %v742_v30 = vmax.f32 %v406_v13, 0.0  ;;  %v804_v33 = vmax.f32 %v468_v19, 0.0 }
  0x3e   : > { %4508 = vmatpush2.bf16.msra.mxu1 %v979_v11  ;;  %4056 = vmatprep.subr.bf16.mxu0 %v946_v12  ;;  %v808_v11 = vmax.f32 %v472_v59, 0.0  ;;  %v810_v12 = vmax.f32 %v474_v60, 0.0  ;;  %v469_v31 = vld [vmem:[%s16652_s0 + $0x6d0] sm:$0xff]  ;;  %v10560_v32 = vld [vmem:[%s11762_s12 + $0x5c] ss:$44 sps:$4 sm:$0xff]   ;;  %v806_v34 = vmax.f32 %v470_v20, 0.0  ;;  %v1001_v37 = vpack.c.bf16 %v745_v18, %v743_v17 }
  0x3f   : > { %4509 = vmatprep.subr.bf16.mxu1 %v978_v16  ;;  %v939_v16 = vpack.c.bf16 %v621_v63, %v619_v62  ;;  %v402_v36 = vld [vmem:[%s16652_s0 + $0x4b8] sm:$0xff]  ;;  %v10562_v38 = vld [vmem:[%s11762_s12 + $0x64] ss:$44 sps:$4 sm:$0xff]   ;;  %v739_v39 = vmax.f32 %v403_v14, 0.0  ;;  %v741_v40 = vmax.f32 %v405_v15, 0.0  ;;  %v803_v41 = vmax.f32 %v467_v26, 0.0 }
  0x40   : > { %v1034_v28 = vpack.c.bf16 %v810_v12, %v808_v11  ;;  %v805_v44 = vmax.f32 %v469_v31, 0.0  ;;  %v738_v46 = vmax.f32 %v402_v36, 0.0  ;;  %v399_v47 = vld [vmem:[%s16652_s0 + $0x4a0] sm:$0xff]  ;;  %v1000_v50 = vpack.c.bf16 %v742_v30, %v740_v29  ;;  %v397_v11 = vld [vmem:[%s16652_s0 + $0x490] sm:$0xff]  ;;  %v460_v12 = vld [vmem:[%s16652_s0 + $0x688] sm:$0xff] }
  0x41   : > { %4057 = vmatpush2.bf16.msra.mxu0 %v945_v21  ;;  %v971_v21 = vpack.c.bf16 %v685_v4, %v683_v0  ;;  %v1032_v53 = vpack.c.bf16 %v806_v34, %v804_v33  ;;  %v463_v54 = vld [vmem:[%s16652_s0 + $0x6a0] sm:$0xff]  ;;  %v999_v56 = vpack.c.bf16 %v741_v40, %v739_v39  ;;  %v735_v59 = vmax.f32 %v399_v47, 0.0  ;;  %v461_v19 = vld [vmem:[%s16652_s0 + $0x690] sm:$0xff]  ;;  %v392_v30 = vld [vmem:[%s16652_s0 + $0x468] sm:$0xff] }
  0x42   : > { %4510 = vmatpush2.bf16.msra.mxu1 %v977_v23  ;;  %4058 = vmatprep.subr.bf16.mxu0 %v944_v24  ;;  %v1002_v23 = vpack.c.bf16 %v746_v6, %v744_v5  ;;  %v807_v24 = vmax.f32 %v471_v7, 0.0  ;;  %v1031_v57 = vpack.c.bf16 %v805_v44, %v803_v41  ;;  %v799_v63 = vmax.f32 %v463_v54, 0.0  ;;  %v10565_v1 = vld [vmem:[%s11762_s12 + $0x60] ss:$44 sps:$4 sm:$0xff]   ;;  %v398_v6 = vld [vmem:[%s16652_s0 + $0x498] sm:$0xff] }
  0x43   : > { %4511 = vmatprep.subr.bf16.mxu1 %v976_v35  ;;  %v400_v35 = vld [vmem:[%s16652_s0 + $0x4a8] sm:$0xff]  ;;  %v10566_v2 = vld [vmem:[%s11762_s12 + $0xb4] ss:$44 sps:$4 sm:$0xff]   ;;  %v734_v9 = vmax.f32 %v398_v6, 0.0  ;;  %v733_v15 = vmax.f32 %v397_v11, 0.0  ;;  %v796_v17 = vmax.f32 %v460_v12, 0.0 }
  0x44   : > { %v1033_v43 = vpack.c.bf16 %v809_v25, %v807_v24  ;;  %v736_v45 = vmax.f32 %v400_v35, 0.0  ;;  %v396_v5 = vld [vmem:[%s16652_s0 + $0x488] sm:$0xff]  ;;  %v459_v18 = vld [vmem:[%s16652_s0 + $0x680] sm:$0xff]  ;;  %v10570_v24 = vld [vmem:[%s11762_s12 + $0xb0] ss:$44 sps:$4 sm:$0xff]  }
  0x45   : > { %4059 = vmatpush2.bf16.msra.mxu0 %v943_v42  ;;  %v464_v42 = vld [vmem:[%s16652_s0 + $0x6a8] sm:$0xff]  ;;  %v732_v8 = vmax.f32 %v396_v5, 0.0  ;;  %v10571_v25 = vld [vmem:[%s11762_s12 + $0xb8] ss:$44 sps:$4 sm:$0xff]   ;;  %v10574_v29 = vld [vmem:[%s11762_s12 + $0x114] ss:$44 sps:$4 sm:$0xff]  }
  0x46   : > { %4512 = vmatpush2.bf16.msra.mxu1 %v975_v48  ;;  %4060 = vmatprep.subr.bf16.mxu0 %v942_v49  ;;  %v401_v48 = vld [vmem:[%s16652_s0 + $0x4b0] sm:$0xff]  ;;  %v466_v49 = vld [vmem:[%s16652_s0 + $0x6b8] sm:$0xff]  ;;  %v800_v51 = vmax.f32 %v464_v42, 0.0  ;;  %v391_v34 = vld [vmem:[%s16652_s0 + $0x460] sm:$0xff] }
  0x47   : > { %4513 = vmatprep.subr.bf16.mxu1 %v974_v55  ;;  %v802_v52 = vmax.f32 %v466_v49, 0.0  ;;  %v465_v55 = vld [vmem:[%s16652_s0 + $0x6b0] sm:$0xff]  ;;  %v737_v60 = vmax.f32 %v401_v48, 0.0  ;;  %v996_v13 = vpack.c.bf16 %v734_v9, %v732_v8  ;;  %v394_v31 = vld [vmem:[%s16652_s0 + $0x478] sm:$0xff]  ;;  %v456_v36 = vld [vmem:[%s16652_s0 + $0x668] sm:$0xff] }
  0x48   : > { %v801_v0 = vmax.f32 %v465_v55, 0.0  ;;  %v730_v33 = vmax.f32 %v394_v31, 0.0  ;;  %v393_v35 = vld [vmem:[%s16652_s0 + $0x470] sm:$0xff]  ;;  %v458_v39 = vld [vmem:[%s16652_s0 + $0x678] sm:$0xff]  ;;  %v792_v40 = vmax.f32 %v456_v36, 0.0  ;;  %v455_v44 = vld [vmem:[%s16652_s0 + $0x660] sm:$0xff] }
  0x49   : > { %4061 = vmatpush2.bf16.msra.mxu0 %v941_v58  ;;  %v998_v58 = vpack.c.bf16 %v738_v46, %v736_v45  ;;  %v1030_v62 = vpack.c.bf16 %v802_v52, %v800_v51  ;;  %v997_v4 = vpack.c.bf16 %v737_v60, %v735_v59  ;;  %v794_v42 = vmax.f32 %v458_v39, 0.0  ;;  %v457_v45 = vld [vmem:[%s16652_s0 + $0x670] sm:$0xff]  ;;  %v10580_v52 = vld [vmem:[%s11762_s12 + $0x16c] ss:$44 sps:$4 sm:$0xff]   ;;  %v447_v31 = vld [vmem:[%s16652_s0 + $0x620] sm:$0xff] }
  0x4a   : > { %4514 = vmatpush2.bf16.msra.mxu1 %v973_v61  ;;  %4062 = vmatprep.subr.bf16.mxu0 %v940_v3  ;;  %v10564_v61 = vld [vmem:[%s11762_s12 + $0x58] ss:$44 sps:$4 sm:$0xff]   ;;  %v10568_v3 = vld [vmem:[%s11762_s12 + $0xbc] ss:$44 sps:$4 sm:$0xff]   ;;  %v1029_v7 = vpack.c.bf16 %v801_v0, %v799_v63  ;;  %v791_v49 = vmax.f32 %v455_v44, 0.0  ;;  %v453_v5 = vld [vmem:[%s16652_s0 + $0x650] sm:$0xff] }
  0x4b   : > { %4515 = vmatprep.subr.bf16.mxu1 %v972_v10  ;;  %v395_v10 = vld [vmem:[%s16652_s0 + $0x480] sm:$0xff]  ;;  %v10576_v46 = vld [vmem:[%s11762_s12 + $0x108] ss:$44 sps:$4 sm:$0xff]   ;;  %v10577_v47 = vld [vmem:[%s11762_s12 + $0x110] ss:$44 sps:$4 sm:$0xff]   ;;  %v1026_v48 = vpack.c.bf16 %v794_v42, %v792_v40  ;;  %v789_v9 = vmax.f32 %v453_v5, 0.0 }
  0x4c   : > { %v731_v14 = vmax.f32 %v395_v10, 0.0  ;;  %v10578_v51 = vld [vmem:[%s11762_s12 + $0x164] ss:$44 sps:$4 sm:$0xff]   ;;  %v10582_v54 = vld [vmem:[%s11762_s12 + $0x160] ss:$44 sps:$4 sm:$0xff]  }
  0x4d   : > { %4063 = vmatpush2.bf16.msra.mxu0 %v939_v16  ;;  %v462_v16 = vld [vmem:[%s16652_s0 + $0x698] sm:$0xff]  ;;  %v388_v55 = vld [vmem:[%s16652_s0 + $0x448] sm:$0xff]  ;;  %v10586_v10 = vld [vmem:[%s11762_s12 + $0x1c4] ss:$44 sps:$4 sm:$0xff]  }
  0x4e   : > { %4516 = vmatpush2.bf16.msra.mxu1 %v971_v21  ;;  %4938 = vmatprep.subr.bf16.mxu0 %v1002_v23  ;;  %v798_v20 = vmax.f32 %v462_v16, 0.0  ;;  %v795_v21 = vmax.f32 %v459_v18, 0.0  ;;  %v995_v23 = vpack.c.bf16 %v733_v15, %v731_v14  ;;  %v724_v59 = vmax.f32 %v388_v55, 0.0  ;;  %v452_v63 = vld [vmem:[%s16652_s0 + $0x648] sm:$0xff]  ;;  %v386_v15 = vld [vmem:[%s16652_s0 + $0x438] sm:$0xff]  ;;  %v379_v44 = vld [vmem:[%s16652_s0 + $0x400] sm:$0xff] }
  0x4f   : > { %5391 = vmatprep.subr.bf16.mxu1 %v1034_v28  ;;  %v10572_v28 = vld [vmem:[%s11762_s12 + $0x10c] ss:$44 sps:$4 sm:$0xff]   ;;  %v722_v18 = vmax.f32 %v386_v15, 0.0  ;;  %v445_v55 = vld [vmem:[%s16652_s0 + $0x610] sm:$0xff]  ;;  %v439_v5 = vld [vmem:[%s16652_s0 + $0x5e0] sm:$0xff] }
  0x50   : > { %4065 = vmatmul.mubr.bf16.vlgmr.msra.gmra.mxu0 %v10554_v22  ;;  %v797_v22 = vmax.f32 %v461_v19, 0.0  ;;  %v1028_v26 = vpack.c.bf16 %v798_v20, %v796_v17  ;;  %v384_v14 = vld [vmem:[%s16652_s0 + $0x428] sm:$0xff]  ;;  %v10588_v16 = vld [vmem:[%s11762_s12 + $0x1b8] ss:$44 sps:$4 sm:$0xff]   ;;  %v10590_v20 = vld [vmem:[%s11762_s12 + $0x214] ss:$44 sps:$4 sm:$0xff]  }
  0x51   : > { %4518 = vmatmul.mubr.bf16.vlgmr.msra.gmra.mxu1 %v10557_v27  ;;  %4939 = vmatpush1.bf16.msra.mxu0 %v1001_v37  ;;  %v727_v37 = vmax.f32 %v391_v34, 0.0  ;;  %v720_v17 = vmax.f32 %v384_v14, 0.0  ;;  %v10589_v19 = vld [vmem:[%s11762_s12 + $0x1c0] ss:$44 sps:$4 sm:$0xff]   ;;  %v783_v34 = vmax.f32 %v447_v31, 0.0  ;;  %v505_v15 = vld [vmem:[%s16652_s0 + $0x7f0] sm:$0xff] }
  0x52   : > { %5392 = vmatpush1.bf16.msra.mxu1 %v1033_v43  ;;  %4074 = vmatprep.mubr.bf16.mxu0 %v10560_v32  ;;  %v1027_v27 = vpack.c.bf16 %v797_v22, %v795_v21  ;;  %v728_v32 = vmax.f32 %v392_v30, 0.0  ;;  %v383_v22 = vld [vmem:[%s16652_s0 + $0x420] sm:$0xff]  ;;  %v10596_v40 = vld [vmem:[%s11762_s12 + $0x26c] ss:$44 sps:$4 sm:$0xff]  }
  0x53   : > { %4527 = vmatprep.mubr.bf16.mxu1 %v10562_v38  ;;  %4940 = vmatprep.subr.bf16.mxu0 %v1000_v50  ;;  %v729_v38 = vmax.f32 %v393_v35, 0.0  ;;  %v793_v50 = vmax.f32 %v457_v45, 0.0  ;;  %v990_v21 = vpack.c.bf16 %v722_v18, %v720_v17  ;;  %v10595_v39 = vld [vmem:[%s11762_s12 + $0x218] ss:$44 sps:$4 sm:$0xff]   ;;  %v380_v42 = vld [vmem:[%s16652_s0 + $0x408] sm:$0xff] }
  0x54   : > { %5393 = vmatprep.subr.bf16.mxu1 %v1032_v53  ;;  %v994_v41 = vpack.c.bf16 %v730_v33, %v728_v32  ;;  %v449_v32 = vld [vmem:[%s16652_s0 + $0x630] sm:$0xff]  ;;  %v716_v45 = vmax.f32 %v380_v42, 0.0 }
  0x55   : > { %4941 = vmatpush1.bf16.msra.mxu0 %v999_v56  ;;  %v993_v43 = vpack.c.bf16 %v729_v38, %v727_v37  ;;  %v1025_v53 = vpack.c.bf16 %v793_v50, %v791_v49  ;;  %v390_v56 = vld [vmem:[%s16652_s0 + $0x458] sm:$0xff]  ;;  %v785_v35 = vmax.f32 %v449_v32, 0.0  ;;  %v444_v49 = vld [vmem:[%s16652_s0 + $0x608] sm:$0xff] }
  0x56   : > { %5394 = vmatpush1.bf16.msra.mxu1 %v1031_v57  ;;  %4942 = vmatprep.subr.bf16.mxu0 %v998_v58  ;;  %v10583_v57 = vld [vmem:[%s11762_s12 + $0x168] ss:$44 sps:$4 sm:$0xff]   ;;  %v726_v60 = vmax.f32 %v390_v56, 0.0  ;;  %v10594_v38 = vld [vmem:[%s11762_s12 + $0x210] ss:$44 sps:$4 sm:$0xff]  }
  0x57   : > { %5395 = vmatprep.subr.bf16.mxu1 %v1030_v62  ;;  %v10584_v58 = vld [vmem:[%s11762_s12 + $0x1bc] ss:$44 sps:$4 sm:$0xff]   ;;  %v389_v62 = vld [vmem:[%s16652_s0 + $0x450] sm:$0xff]  ;;  %v1021_v37 = vpack.c.bf16 %v785_v35, %v783_v34  ;;  %v10612_v34 = vld [vmem:[%s11762_s12 + $0x318] ss:$44 sps:$4 sm:$0xff]  }
  0x58   : > { %4075 = vmatmul.mubr.bf16.gmra.mxu0 %v10564_v61  ;;  %v387_v61 = vld [vmem:[%s16652_s0 + $0x440] sm:$0xff]  ;;  %v992_v6 = vpack.c.bf16 %v726_v60, %v724_v59  ;;  %v446_v50 = vld [vmem:[%s16652_s0 + $0x618] sm:$0xff] }
  0x59   : > { %4528 = vmatmul.mubr.bf16.gmra.mxu1 %v10565_v1  ;;  %4084 = vmatprep.mubr.bf16.mxu0 %v10566_v2  ;;  %v723_v0 = vmax.f32 %v387_v61, 0.0  ;;  %v725_v1 = vmax.f32 %v389_v62, 0.0  ;;  %v454_v2 = vld [vmem:[%s16652_s0 + $0x658] sm:$0xff]  ;;  %v10600_v62 = vld [vmem:[%s11762_s12 + $0x268] ss:$44 sps:$4 sm:$0xff]  }
  0x5a   : > { %4537 = vmatprep.mubr.bf16.mxu1 %v10568_v3  ;;  %4943 = vmatpush1.bf16.msra.mxu0 %v997_v4  ;;  %v788_v3 = vmax.f32 %v452_v63, 0.0  ;;  %v451_v4 = vld [vmem:[%s16652_s0 + $0x640] sm:$0xff]  ;;  %v10601_v63 = vld [vmem:[%s11762_s12 + $0x270] ss:$44 sps:$4 sm:$0xff]  }
  0x5b   : > { %5396 = vmatpush1.bf16.msra.mxu1 %v1029_v7  ;;  %4944 = vmatprep.subr.bf16.mxu0 %v996_v13  ;;  %v790_v7 = vmax.f32 %v454_v2, 0.0  ;;  %v787_v8 = vmax.f32 %v451_v4, 0.0  ;;  %v991_v11 = vpack.c.bf16 %v725_v1, %v723_v0  ;;  %v10602_v0 = vld [vmem:[%s11762_s12 + $0x2c4] ss:$44 sps:$4 sm:$0xff]   ;;  %v10604_v1 = vld [vmem:[%s11762_s12 + $0x2cc] ss:$44 sps:$4 sm:$0xff]  }
  0x5c   : > { %5397 = vmatprep.subr.bf16.mxu1 %v1028_v26  ;;  %v440_v2 = vld [vmem:[%s16652_s0 + $0x5e8] sm:$0xff] }
  0x5d   : > { %v1024_v12 = vpack.c.bf16 %v790_v7, %v788_v3  ;;  %v1023_v13 = vpack.c.bf16 %v789_v9, %v787_v8  ;;  %v442_v3 = vld [vmem:[%s16652_s0 + $0x5f8] sm:$0xff]  ;;  %v776_v4 = vmax.f32 %v440_v2, 0.0  ;;  %v775_v8 = vmax.f32 %v439_v5, 0.0  ;;  %v10613_v35 = vld [vmem:[%s11762_s12 + $0x320] ss:$44 sps:$4 sm:$0xff]  }
  0x5e   : > { %4945 = vmatpush1.bf16.msra.mxu0 %v995_v23  ;;  %v385_v23 = vld [vmem:[%s16652_s0 + $0x430] sm:$0xff]  ;;  %v778_v7 = vmax.f32 %v442_v3, 0.0  ;;  %v496_v2 = vld [vmem:[%s16652_s0 + $0x7a8] sm:$0xff]  ;;  %v498_v3 = vld [vmem:[%s16652_s0 + $0x7b8] sm:$0xff] }
  0x5f   : > { %5398 = vmatpush1.bf16.msra.mxu1 %v1027_v27  ;;  %4946 = vmatprep.subr.bf16.mxu0 %v994_v41  ;;  %v721_v26 = vmax.f32 %v385_v23, 0.0  ;;  %v448_v27 = vld [vmem:[%s16652_s0 + $0x628] sm:$0xff]  ;;  %v10598_v41 = vld [vmem:[%s11762_s12 + $0x274] ss:$44 sps:$4 sm:$0xff]  }
  0x60   : > { %4085 = vmatmul.mubr.bf16.gmra.mxu0 %v10570_v24  ;;  %5399 = vmatprep.subr.bf16.mxu1 %v1026_v48  ;;  %v10592_v24 = vld [vmem:[%s11762_s12 + $0x21c] ss:$44 sps:$4 sm:$0xff]   ;;  %v715_v48 = vmax.f32 %v379_v44, 0.0  ;;  %v1018_v17 = vpack.c.bf16 %v778_v7, %v776_v4  ;;  %v501_v44 = vld [vmem:[%s16652_s0 + $0x7d0] sm:$0xff]  ;;  %v495_v4 = vld [vmem:[%s16652_s0 + $0x7a0] sm:$0xff]  ;;  %v834_v7 = vmax.f32 %v498_v3, 0.0 }
  0x61   : > { %4538 = vmatmul.mubr.bf16.gmra.mxu1 %v10571_v25  ;;  %4094 = vmatprep.mubr.bf16.mxu0 %v10572_v28  ;;  %v719_v25 = vmax.f32 %v383_v22, 0.0  ;;  %v450_v28 = vld [vmem:[%s16652_s0 + $0x638] sm:$0xff] }
  0x62   : > { %4547 = vmatprep.mubr.bf16.mxu1 %v10574_v29  ;;  %4947 = vmatpush1.bf16.msra.mxu0 %v993_v43  ;;  %v784_v29 = vmax.f32 %v448_v27, 0.0  ;;  %v786_v30 = vmax.f32 %v450_v28, 0.0  ;;  %v382_v43 = vld [vmem:[%s16652_s0 + $0x418] sm:$0xff] }
  0x63   : > { %5400 = vmatpush1.bf16.msra.mxu1 %v1025_v53  ;;  %4948 = vmatprep.subr.bf16.mxu0 %v992_v6  ;;  %v989_v33 = vpack.c.bf16 %v721_v26, %v719_v25  ;;  %v782_v53 = vmax.f32 %v446_v50, 0.0  ;;  %v441_v6 = vld [vmem:[%s16652_s0 + $0x5f0] sm:$0xff]  ;;  %v10608_v23 = vld [vmem:[%s11762_s12 + $0x31c] ss:$44 sps:$4 sm:$0xff]   ;;  %v10660_v3 = vld [vmem:[%s11762_s12 + $0x5d8] ss:$44 sps:$4 sm:$0xff]  }
  0x64   : > { %5401 = vmatprep.subr.bf16.mxu1 %v1024_v12  ;;  %v1022_v36 = vpack.c.bf16 %v786_v30, %v784_v29  ;;  %v777_v9 = vmax.f32 %v441_v6, 0.0  ;;  %v503_v12 = vld [vmem:[%s16652_s0 + $0x7e0] sm:$0xff]  ;;  %v436_v26 = vld [vmem:[%s16652_s0 + $0x5c8] sm:$0xff]  ;;  %v438_v27 = vld [vmem:[%s16652_s0 + $0x5d8] sm:$0xff]  ;;  %v832_v6 = vmax.f32 %v496_v2, 0.0 }
  0x65   : > { %v10610_v25 = vld [vmem:[%s11762_s12 + $0x324] ss:$44 sps:$4 sm:$0xff]   ;;  %v772_v28 = vmax.f32 %v436_v26, 0.0  ;;  %v774_v31 = vmax.f32 %v438_v27, 0.0 }
  0x66   : > { %4949 = vmatpush1.bf16.msra.mxu0 %v991_v11  ;;  %v506_v11 = vld [vmem:[%s16652_s0 + $0x7f8] sm:$0xff]  ;;  %v1017_v18 = vpack.c.bf16 %v777_v9, %v775_v8  ;;  %v435_v29 = vld [vmem:[%s16652_s0 + $0x5c0] sm:$0xff]  ;;  %v437_v30 = vld [vmem:[%s16652_s0 + $0x5d0] sm:$0xff]  ;;  %v831_v9 = vmax.f32 %v495_v4, 0.0 }
  0x67   : > { %5402 = vmatpush1.bf16.msra.mxu1 %v1023_v13  ;;  %4950 = vmatprep.subr.bf16.mxu0 %v990_v21  ;;  %v842_v14 = vmax.f32 %v506_v11, 0.0  ;;  %v10607_v21 = vld [vmem:[%s11762_s12 + $0x2c8] ss:$44 sps:$4 sm:$0xff]   ;;  %v771_v32 = vmax.f32 %v435_v29, 0.0  ;;  %v10618_v50 = vld [vmem:[%s11762_s12 + $0x370] ss:$44 sps:$4 sm:$0xff]  }
  0x68   : > { %4095 = vmatmul.mubr.bf16.gmra.mxu0 %v10576_v46  ;;  %5403 = vmatprep.subr.bf16.mxu1 %v1022_v36  ;;  %v718_v46 = vmax.f32 %v382_v43, 0.0  ;;  %v1016_v36 = vpack.c.bf16 %v774_v31, %v772_v28  ;;  %v499_v43 = vld [vmem:[%s16652_s0 + $0x7c0] sm:$0xff]  ;;  %v497_v8 = vld [vmem:[%s16652_s0 + $0x7b0] sm:$0xff]  ;;  %v492_v29 = vld [vmem:[%s16652_s0 + $0x788] sm:$0xff] }
  0x69   : > { %4548 = vmatmul.mubr.bf16.gmra.mxu1 %v10577_v47  ;;  %4104 = vmatprep.mubr.bf16.mxu0 %v10578_v51  ;;  %v381_v47 = vld [vmem:[%s16652_s0 + $0x410] sm:$0xff]  ;;  %v833_v11 = vmax.f32 %v497_v8, 0.0  ;;  %v427_v27 = vld [vmem:[%s16652_s0 + $0x580] sm:$0xff]  ;;  %v10644_v31 = vld [vmem:[%s11762_s12 + $0x52c] ss:$44 sps:$4 sm:$0xff]  }
  0x6a   : > { %4557 = vmatprep.mubr.bf16.mxu1 %v10580_v52  ;;  %4951 = vmatpush1.bf16.msra.mxu0 %v989_v33  ;;  %v717_v51 = vmax.f32 %v381_v47, 0.0  ;;  %v780_v52 = vmax.f32 %v444_v49, 0.0  ;;  %v988_v56 = vpack.c.bf16 %v718_v46, %v716_v45  ;;  %v773_v33 = vmax.f32 %v437_v30, 0.0  ;;  %v10616_v47 = vld [vmem:[%s11762_s12 + $0x37c] ss:$44 sps:$4 sm:$0xff]   ;;  %v429_v28 = vld [vmem:[%s16652_s0 + $0x590] sm:$0xff] }
  0x6b   : > { %5404 = vmatpush1.bf16.msra.mxu1 %v1021_v37  ;;  %v835_v45 = vmax.f32 %v499_v43, 0.0  ;;  %v837_v46 = vmax.f32 %v501_v44, 0.0  ;;  %v10642_v26 = vld [vmem:[%s11762_s12 + $0x4d0] ss:$44 sps:$4 sm:$0xff]   ;;  %v10643_v30 = vld [vmem:[%s11762_s12 + $0x4d8] ss:$44 sps:$4 sm:$0xff]  }
  0x6c   : > { %v987_v59 = vpack.c.bf16 %v717_v51, %v715_v48  ;;  %v1020_v60 = vpack.c.bf16 %v782_v53, %v780_v52  ;;  %4952 = vmatprep.subr.bf16.mxu0 %v988_v56  ;;  %v1015_v37 = vpack.c.bf16 %v773_v33, %v771_v32  ;;  %v10619_v51 = vld [vmem:[%s11762_s12 + $0x378] ss:$44 sps:$4 sm:$0xff]   ;;  %v10622_v53 = vld [vmem:[%s11762_s12 + $0x3d4] ss:$44 sps:$4 sm:$0xff]   ;;  %v763_v33 = vmax.f32 %v427_v27, 0.0  ;;  %v484_v27 = vld [vmem:[%s16652_s0 + $0x748] sm:$0xff] }
  0x6d   : > { %v1047_v49 = vpack.c.bf16 %v837_v46, %v835_v45  ;;  %v10620_v52 = vld [vmem:[%s11762_s12 + $0x3cc] ss:$44 sps:$4 sm:$0xff]   ;;  %v10626_v56 = vld [vmem:[%s11762_s12 + $0x424] ss:$44 sps:$4 sm:$0xff]   ;;  %v10646_v43 = vld [vmem:[%s11762_s12 + $0x534] ss:$44 sps:$4 sm:$0xff]  }
  0x6e   : > { %4953 = vmatpush1.bf16.msra.mxu0 %v987_v59  ;;  %5405 = vmatprep.subr.bf16.mxu1 %v1020_v60  ;;  %v434_v59 = vld [vmem:[%s16652_s0 + $0x5b8] sm:$0xff]  ;;  %v431_v60 = vld [vmem:[%s16652_s0 + $0x5a0] sm:$0xff]  ;;  %v10648_v46 = vld [vmem:[%s11762_s12 + $0x528] ss:$44 sps:$4 sm:$0xff]  }
  0x6f   : > { %4954 = vmatprep.subr.bf16.mxu0 %v1018_v17  ;;  %v10634_v17 = vld [vmem:[%s11762_s12 + $0x484] ss:$44 sps:$4 sm:$0xff]   ;;  %v10662_v8 = vld [vmem:[%s11762_s12 + $0x634] ss:$44 sps:$4 sm:$0xff]  }
  0x70   : > { %4105 = vmatmul.mubr.bf16.gmra.mxu0 %v10582_v54  ;;  %v443_v54 = vld [vmem:[%s16652_s0 + $0x600] sm:$0xff] }
  0x71   : > { %4558 = vmatmul.mubr.bf16.gmra.mxu1 %v10583_v57  ;;  %4114 = vmatprep.mubr.bf16.mxu0 %v10584_v58  ;;  %v779_v57 = vmax.f32 %v443_v54, 0.0  ;;  %v781_v58 = vmax.f32 %v445_v55, 0.0  ;;  %v10624_v54 = vld [vmem:[%s11762_s12 + $0x3c8] ss:$44 sps:$4 sm:$0xff]   ;;  %v10625_v55 = vld [vmem:[%s11762_s12 + $0x3d0] ss:$44 sps:$4 sm:$0xff]  }
  0x72   : > { %4567 = vmatprep.mubr.bf16.mxu1 %v10586_v10  ;;  %v504_v10 = vld [vmem:[%s16652_s0 + $0x7e8] sm:$0xff]  ;;  %4955 = vmatpush2.bf16.msra.mxu0 %v1017_v18  ;;  %v10636_v18 = vld [vmem:[%s11762_s12 + $0x478] ss:$44 sps:$4 sm:$0xff]  }
  0x73   : > { %v1019_v61 = vpack.c.bf16 %v781_v58, %v779_v57  ;;  %v840_v13 = vmax.f32 %v504_v10, 0.0  ;;  %4956 = vmatprep.subr.bf16.mxu0 %v1016_v36  ;;  %v10628_v57 = vld [vmem:[%s11762_s12 + $0x42c] ss:$44 sps:$4 sm:$0xff]   ;;  %v828_v36 = vmax.f32 %v492_v29, 0.0 }
  0x74   : > { %v432_v58 = vld [vmem:[%s16652_s0 + $0x5a8] sm:$0xff] }
  0x75   : > { %5406 = vmatpush1.bf16.msra.mxu1 %v1019_v61  ;;  %v1050_v22 = vpack.c.bf16 %v842_v14, %v840_v13  ;;  %v768_v61 = vmax.f32 %v432_v58, 0.0  ;;  %v10630_v13 = vld [vmem:[%s11762_s12 + $0x420] ss:$44 sps:$4 sm:$0xff]   ;;  %v1045_v14 = vpack.c.bf16 %v833_v11, %v831_v9 }
  0x76   : > { %4957 = vmatpush2.bf16.msra.mxu0 %v1015_v37 }
  0x77   : > { %5407 = vmatprep.subr.bf16.mxu1 %v1050_v22  ;;  %v428_v22 = vld [vmem:[%s16652_s0 + $0x588] sm:$0xff] }
  0x78   : > { %4115 = vmatmul.mubr.bf16.gmra.mxu0 %v10588_v16  ;;  %v839_v16 = vmax.f32 %v503_v12, 0.0  ;;  %v1046_v12 = vpack.c.bf16 %v834_v7, %v832_v6  ;;  %v489_v6 = vld [vmem:[%s16652_s0 + $0x770] sm:$0xff]  ;;  %v10661_v7 = vld [vmem:[%s11762_s12 + $0x5e0] ss:$44 sps:$4 sm:$0xff]  }
  0x79   : > { %4568 = vmatmul.mubr.bf16.gmra.mxu1 %v10589_v19  ;;  %4124 = vmatprep.mubr.bf16.mxu0 %v10590_v20  ;;  %v841_v19 = vmax.f32 %v505_v15, 0.0  ;;  %v10606_v20 = vld [vmem:[%s11762_s12 + $0x2c0] ss:$44 sps:$4 sm:$0xff]   ;;  %v10631_v15 = vld [vmem:[%s11762_s12 + $0x428] ss:$44 sps:$4 sm:$0xff]   ;;  %v825_v11 = vmax.f32 %v489_v6, 0.0 }
  0x7a   : > { %4577 = vmatprep.mubr.bf16.mxu1 %v10592_v24 }
  0x7b   : > { %v1049_v24 = vpack.c.bf16 %v841_v19, %v839_v16  ;;  %v10632_v16 = vld [vmem:[%s11762_s12 + $0x47c] ss:$44 sps:$4 sm:$0xff]   ;;  %v10637_v19 = vld [vmem:[%s11762_s12 + $0x480] ss:$44 sps:$4 sm:$0xff]  }
  0x7d   : > { %5408 = vmatpush2.bf16.msra.mxu1 %v1049_v24  ;;  %v764_v24 = vmax.f32 %v428_v22, 0.0  ;;  %v10674_v22 = vld [vmem:[%s11762_s12 + $0x6e4] ss:$44 sps:$4 sm:$0xff]  }
  0x80   : > { %4125 = vmatmul.mubr.bf16.gmra.mxu0 %v10594_v38  ;;  %v500_v38 = vld [vmem:[%s16652_s0 + $0x7c8] sm:$0xff] }
  0x81   : > { %4578 = vmatmul.mubr.bf16.gmra.mxu1 %v10595_v39  ;;  %4134 = vmatprep.mubr.bf16.mxu0 %v10596_v40  ;;  %v502_v39 = vld [vmem:[%s16652_s0 + $0x7d8] sm:$0xff]  ;;  %v10614_v40 = vld [vmem:[%s11762_s12 + $0x374] ss:$44 sps:$4 sm:$0xff]  }
  0x82   : > { %4587 = vmatprep.mubr.bf16.mxu1 %v10598_v41  ;;  %v836_v41 = vmax.f32 %v500_v38, 0.0  ;;  %v838_v42 = vmax.f32 %v502_v39, 0.0  ;;  %v491_v38 = vld [vmem:[%s16652_s0 + $0x780] sm:$0xff]  ;;  %v493_v39 = vld [vmem:[%s16652_s0 + $0x790] sm:$0xff] }
  0x84   : > { %v1048_v48 = vpack.c.bf16 %v838_v42, %v836_v41  ;;  %v827_v41 = vmax.f32 %v491_v38, 0.0  ;;  %v829_v42 = vmax.f32 %v493_v39, 0.0 }
  0x86   : > { %5409 = vmatprep.subr.bf16.mxu1 %v1048_v48  ;;  %v1043_v45 = vpack.c.bf16 %v829_v42, %v827_v41  ;;  %v10650_v48 = vld [vmem:[%s11762_s12 + $0x584] ss:$44 sps:$4 sm:$0xff]   ;;  %v10678_v42 = vld [vmem:[%s11762_s12 + $0x6e0] ss:$44 sps:$4 sm:$0xff]  }
  0x87   : > { %5410 = vmatpush2.bf16.msra.mxu1 %v1047_v49  ;;  %v10652_v49 = vld [vmem:[%s11762_s12 + $0x58c] ss:$44 sps:$4 sm:$0xff]  }
  0x88   : > { %4135 = vmatmul.mubr.bf16.gmra.mxu0 %v10600_v62  ;;  %v770_v62 = vmax.f32 %v434_v59, 0.0  ;;  %5411 = vmatprep.subr.bf16.mxu1 %v1046_v12  ;;  %v425_v59 = vld [vmem:[%s16652_s0 + $0x570] sm:$0xff] }
  0x89   : > { %4588 = vmatmul.mubr.bf16.gmra.mxu1 %v10601_v63  ;;  %4144 = vmatprep.mubr.bf16.mxu0 %v10602_v0  ;;  %v433_v63 = vld [vmem:[%s16652_s0 + $0x5b0] sm:$0xff]  ;;  %v767_v0 = vmax.f32 %v431_v60, 0.0 }
  0x8a   : > { %4597 = vmatprep.mubr.bf16.mxu1 %v10604_v1  ;;  %v769_v1 = vmax.f32 %v433_v63, 0.0  ;;  %v1014_v5 = vpack.c.bf16 %v770_v62, %v768_v61  ;;  %v761_v61 = vmax.f32 %v425_v59, 0.0  ;;  %v488_v62 = vld [vmem:[%s16652_s0 + $0x768] sm:$0xff]  ;;  %v490_v63 = vld [vmem:[%s16652_s0 + $0x778] sm:$0xff] }
  0x8b   : > { %5412 = vmatpush2.bf16.msra.mxu1 %v1045_v14  ;;  %v826_v2 = vmax.f32 %v490_v63, 0.0  ;;  %v10666_v14 = vld [vmem:[%s11762_s12 + $0x630] ss:$44 sps:$4 sm:$0xff]   ;;  %v480_v59 = vld [vmem:[%s16652_s0 + $0x728] sm:$0xff] }
  0x8c   : > { %v1013_v10 = vpack.c.bf16 %v769_v1, %v767_v0  ;;  %4958 = vmatprep.subr.bf16.mxu0 %v1014_v5  ;;  %v824_v1 = vmax.f32 %v488_v62, 0.0  ;;  %v487_v5 = vld [vmem:[%s16652_s0 + $0x760] sm:$0xff]  ;;  %v10692_v63 = vld [vmem:[%s11762_s12 + $0x7ec] ss:$44 sps:$4 sm:$0xff]  }
  0x8d   : > { %v10691_v62 = vld [vmem:[%s11762_s12 + $0x798] ss:$44 sps:$4 sm:$0xff]  }
  0x8e   : > { %4959 = vmatpush2.bf16.msra.mxu0 %v1013_v10  ;;  %v1042_v9 = vpack.c.bf16 %v826_v2, %v824_v1  ;;  %v823_v10 = vmax.f32 %v487_v5, 0.0  ;;  %v816_v1 = vmax.f32 %v480_v59, 0.0 }
  0x90   : > { %4145 = vmatmul.mubr.bf16.gmra.mxu0 %v10606_v20  ;;  %v10638_v20 = vld [vmem:[%s11762_s12 + $0x4d4] ss:$44 sps:$4 sm:$0xff]   ;;  %v1041_v12 = vpack.c.bf16 %v825_v11, %v823_v10  ;;  %v10697_v11 = vld [vmem:[%s11762_s12 + $0x7f0] ss:$44 sps:$4 sm:$0xff]  }
  0x91   : > { %4598 = vmatmul.mubr.bf16.gmra.mxu1 %v10607_v21  ;;  %4154 = vmatprep.mubr.bf16.mxu0 %v10608_v23  ;;  %v10640_v21 = vld [vmem:[%s11762_s12 + $0x4dc] ss:$44 sps:$4 sm:$0xff]  }
  0x92   : > { %4607 = vmatprep.mubr.bf16.mxu1 %v10610_v25  ;;  %v430_v23 = vld [vmem:[%s16652_s0 + $0x598] sm:$0xff]  ;;  %v10696_v10 = vld [vmem:[%s11762_s12 + $0x7e8] ss:$44 sps:$4 sm:$0xff]  }
  0x93   : > { %v766_v25 = vmax.f32 %v430_v23, 0.0 }
  0x95   : > { %v1012_v32 = vpack.c.bf16 %v766_v25, %v764_v24  ;;  %v419_v25 = vld [vmem:[%s16652_s0 + $0x540] sm:$0xff] }
  0x96   : > { %v755_v29 = vmax.f32 %v419_v25, 0.0 }
  0x97   : > { %4960 = vmatprep.subr.bf16.mxu0 %v1012_v32  ;;  %v820_v32 = vmax.f32 %v484_v27, 0.0 }
  0x98   : > { %4155 = vmatmul.mubr.bf16.gmra.mxu0 %v10612_v34  ;;  %v765_v34 = vmax.f32 %v429_v28, 0.0 }
  0x99   : > { %4608 = vmatmul.mubr.bf16.gmra.mxu1 %v10613_v35  ;;  %4164 = vmatprep.mubr.bf16.mxu0 %v10614_v40  ;;  %v494_v35 = vld [vmem:[%s16652_s0 + $0x798] sm:$0xff] }
  0x9a   : > { %4617 = vmatprep.mubr.bf16.mxu1 %v10616_v47  ;;  %v830_v37 = vmax.f32 %v494_v35, 0.0  ;;  %v1011_v40 = vpack.c.bf16 %v765_v34, %v763_v33  ;;  %v10649_v47 = vld [vmem:[%s11762_s12 + $0x530] ss:$44 sps:$4 sm:$0xff]   ;;  %v10676_v33 = vld [vmem:[%s11762_s12 + $0x6ec] ss:$44 sps:$4 sm:$0xff]   ;;  %v483_v35 = vld [vmem:[%s16652_s0 + $0x740] sm:$0xff] }
  0x9b   : > { %v819_v38 = vmax.f32 %v483_v35, 0.0 }
  0x9c   : > { %v1044_v44 = vpack.c.bf16 %v830_v37, %v828_v36  ;;  %4961 = vmatpush2.bf16.msra.mxu0 %v1011_v40  ;;  %v485_v36 = vld [vmem:[%s16652_s0 + $0x750] sm:$0xff] }
  0x9d   : > { %v821_v39 = vmax.f32 %v485_v36, 0.0 }
  0x9e   : > { %5413 = vmatprep.subr.bf16.mxu1 %v1044_v44  ;;  %v10680_v44 = vld [vmem:[%s11762_s12 + $0x73c] ss:$44 sps:$4 sm:$0xff]  }
  0x9f   : > { %5414 = vmatpush2.bf16.msra.mxu1 %v1043_v45  ;;  %v1039_v41 = vpack.c.bf16 %v821_v39, %v819_v38  ;;  %v10682_v45 = vld [vmem:[%s11762_s12 + $0x744] ss:$44 sps:$4 sm:$0xff]  }
  0xa0   : > { %4165 = vmatmul.mubr.bf16.gmra.mxu0 %v10618_v50  ;;  %v10654_v50 = vld [vmem:[%s11762_s12 + $0x580] ss:$44 sps:$4 sm:$0xff]   ;;  %5415 = vmatprep.subr.bf16.mxu1 %v1042_v9 }
  0xa1   : > { %4618 = vmatmul.mubr.bf16.gmra.mxu1 %v10619_v51  ;;  %4174 = vmatprep.mubr.bf16.mxu0 %v10620_v52  ;;  %v10655_v51 = vld [vmem:[%s11762_s12 + $0x588] ss:$44 sps:$4 sm:$0xff]  }
  0xa2   : > { %4627 = vmatprep.mubr.bf16.mxu1 %v10622_v53  ;;  %v10656_v52 = vld [vmem:[%s11762_s12 + $0x5dc] ss:$44 sps:$4 sm:$0xff]   ;;  %v10658_v53 = vld [vmem:[%s11762_s12 + $0x5e4] ss:$44 sps:$4 sm:$0xff]  }
  0xa3   : > { %5416 = vmatpush2.bf16.msra.mxu1 %v1041_v12  ;;  %v10698_v12 = vld [vmem:[%s11762_s12 + $0x844] ss:$44 sps:$4 sm:$0xff]  }
  0xa8   : > { %4175 = vmatmul.mubr.bf16.gmra.mxu0 %v10624_v54  ;;  %v424_v54 = vld [vmem:[%s16652_s0 + $0x568] sm:$0xff] }
  0xa9   : > { %4628 = vmatmul.mubr.bf16.gmra.mxu1 %v10625_v55  ;;  %4184 = vmatprep.mubr.bf16.mxu0 %v10626_v56  ;;  %v426_v55 = vld [vmem:[%s16652_s0 + $0x578] sm:$0xff]  ;;  %v423_v56 = vld [vmem:[%s16652_s0 + $0x560] sm:$0xff] }
  0xaa   : > { %4637 = vmatprep.mubr.bf16.mxu1 %v10628_v57  ;;  %v760_v57 = vmax.f32 %v424_v54, 0.0  ;;  %v762_v58 = vmax.f32 %v426_v55, 0.0  ;;  %v759_v60 = vmax.f32 %v423_v56, 0.0  ;;  %v417_v55 = vld [vmem:[%s16652_s0 + $0x530] sm:$0xff] }
  0xac   : > { %v1010_v0 = vpack.c.bf16 %v762_v58, %v760_v57  ;;  %v1009_v4 = vpack.c.bf16 %v761_v61, %v759_v60  ;;  %v10690_v57 = vld [vmem:[%s11762_s12 + $0x790] ss:$44 sps:$4 sm:$0xff]   ;;  %v753_v58 = vmax.f32 %v417_v55, 0.0  ;;  %v479_v61 = vld [vmem:[%s16652_s0 + $0x720] sm:$0xff] }
  0xad   : > { %v482_v60 = vld [vmem:[%s16652_s0 + $0x738] sm:$0xff] }
  0xae   : > { %4962 = vmatprep.subr.bf16.mxu0 %v1010_v0  ;;  %v818_v2 = vmax.f32 %v482_v60, 0.0  ;;  %v10715_v60 = vld [vmem:[%s11762_s12 + $0x8f8] ss:$44 sps:$4 sm:$0xff]  }
  0xaf   : > { %4963 = vmatpush2.bf16.msra.mxu0 %v1009_v4  ;;  %v815_v4 = vmax.f32 %v479_v61, 0.0  ;;  %v10716_v61 = vld [vmem:[%s11762_s12 + $0x94c] ss:$44 sps:$4 sm:$0xff]  }
  0xb0   : > { %4185 = vmatmul.mubr.bf16.gmra.mxu0 %v10630_v13  ;;  %v10664_v13 = vld [vmem:[%s11762_s12 + $0x63c] ss:$44 sps:$4 sm:$0xff]  }
  0xb1   : > { %4638 = vmatmul.mubr.bf16.gmra.mxu1 %v10631_v15  ;;  %4194 = vmatprep.mubr.bf16.mxu0 %v10632_v16  ;;  %v10667_v15 = vld [vmem:[%s11762_s12 + $0x638] ss:$44 sps:$4 sm:$0xff]  }
  0xb2   : > { %4647 = vmatprep.mubr.bf16.mxu1 %v10634_v17  ;;  %v10668_v16 = vld [vmem:[%s11762_s12 + $0x68c] ss:$44 sps:$4 sm:$0xff]   ;;  %v10670_v17 = vld [vmem:[%s11762_s12 + $0x694] ss:$44 sps:$4 sm:$0xff]  }
  0xb8   : > { %4195 = vmatmul.mubr.bf16.gmra.mxu0 %v10636_v18  ;;  %v10672_v18 = vld [vmem:[%s11762_s12 + $0x688] ss:$44 sps:$4 sm:$0xff]  }
  0xb9   : > { %4648 = vmatmul.mubr.bf16.gmra.mxu1 %v10637_v19  ;;  %4204 = vmatprep.mubr.bf16.mxu0 %v10638_v20  ;;  %v420_v19 = vld [vmem:[%s16652_s0 + $0x548] sm:$0xff]  ;;  %v422_v20 = vld [vmem:[%s16652_s0 + $0x558] sm:$0xff] }
  0xba   : > { %4657 = vmatprep.mubr.bf16.mxu1 %v10640_v21  ;;  %v10673_v21 = vld [vmem:[%s11762_s12 + $0x690] ss:$44 sps:$4 sm:$0xff]   ;;  %v756_v23 = vmax.f32 %v420_v19, 0.0  ;;  %v758_v24 = vmax.f32 %v422_v20, 0.0 }
  0xbb   : > { %v414_v19 = vld [vmem:[%s16652_s0 + $0x518] sm:$0xff] }
  0xbc   : > { %v1008_v28 = vpack.c.bf16 %v758_v24, %v756_v23  ;;  %v413_v23 = vld [vmem:[%s16652_s0 + $0x510] sm:$0xff]  ;;  %v476_v24 = vld [vmem:[%s16652_s0 + $0x708] sm:$0xff] }
  0xbd   : > { %v749_v27 = vmax.f32 %v413_v23, 0.0 }
  0xbe   : > { %4964 = vmatprep.subr.bf16.mxu0 %v1008_v28  ;;  %v478_v28 = vld [vmem:[%s16652_s0 + $0x718] sm:$0xff] }
  0xc0   : > { %4205 = vmatmul.mubr.bf16.gmra.mxu0 %v10642_v26  ;;  %v421_v26 = vld [vmem:[%s16652_s0 + $0x550] sm:$0xff] }
  0xc1   : > { %4658 = vmatmul.mubr.bf16.gmra.mxu1 %v10643_v30  ;;  %4214 = vmatprep.mubr.bf16.mxu0 %v10644_v31  ;;  %v757_v30 = vmax.f32 %v421_v26, 0.0  ;;  %v486_v31 = vld [vmem:[%s16652_s0 + $0x758] sm:$0xff] }
  0xc2   : > { %4667 = vmatprep.mubr.bf16.mxu1 %v10646_v43  ;;  %v822_v34 = vmax.f32 %v486_v31, 0.0  ;;  %v10679_v43 = vld [vmem:[%s11762_s12 + $0x6e8] ss:$44 sps:$4 sm:$0xff]   ;;  %v814_v31 = vmax.f32 %v478_v28, 0.0  ;;  %v10727_v28 = vld [vmem:[%s11762_s12 + $0x9ac] ss:$44 sps:$4 sm:$0xff]  }
  0xc3   : > { %v1007_v37 = vpack.c.bf16 %v757_v30, %v755_v29  ;;  %v812_v29 = vmax.f32 %v476_v24, 0.0 }
  0xc4   : > { %v1040_v40 = vpack.c.bf16 %v822_v34, %v820_v32  ;;  %v475_v32 = vld [vmem:[%s16652_s0 + $0x700] sm:$0xff] }
  0xc5   : > { %4965 = vmatpush2.bf16.msra.mxu0 %v1007_v37  ;;  %v811_v36 = vmax.f32 %v475_v32, 0.0 }
  0xc6   : > { %5417 = vmatprep.subr.bf16.mxu1 %v1040_v40  ;;  %v10708_v40 = vld [vmem:[%s11762_s12 + $0x898] ss:$44 sps:$4 sm:$0xff]  }
  0xc7   : > { %5418 = vmatpush2.bf16.msra.mxu1 %v1039_v41  ;;  %v1036_v41 = vpack.c.bf16 %v814_v31, %v812_v29 }
  0xc8   : > { %4215 = vmatmul.mubr.bf16.gmra.mxu0 %v10648_v46  ;;  %v10684_v46 = vld [vmem:[%s11762_s12 + $0x738] ss:$44 sps:$4 sm:$0xff]  }
  0xc9   : > { %4668 = vmatmul.mubr.bf16.gmra.mxu1 %v10649_v47  ;;  %4224 = vmatprep.mubr.bf16.mxu0 %v10650_v48  ;;  %v10685_v47 = vld [vmem:[%s11762_s12 + $0x740] ss:$44 sps:$4 sm:$0xff]  }
  0xca   : > { %4677 = vmatprep.mubr.bf16.mxu1 %v10652_v49  ;;  %v10686_v48 = vld [vmem:[%s11762_s12 + $0x794] ss:$44 sps:$4 sm:$0xff]   ;;  %v10688_v49 = vld [vmem:[%s11762_s12 + $0x79c] ss:$44 sps:$4 sm:$0xff]  }
  0xd0   : > { %4225 = vmatmul.mubr.bf16.gmra.mxu0 %v10654_v50  ;;  %v416_v50 = vld [vmem:[%s16652_s0 + $0x528] sm:$0xff] }
  0xd1   : > { %4678 = vmatmul.mubr.bf16.gmra.mxu1 %v10655_v51  ;;  %4234 = vmatprep.mubr.bf16.mxu0 %v10656_v52  ;;  %v418_v51 = vld [vmem:[%s16652_s0 + $0x538] sm:$0xff]  ;;  %v415_v52 = vld [vmem:[%s16652_s0 + $0x520] sm:$0xff] }
  0xd2   : > { %4687 = vmatprep.mubr.bf16.mxu1 %v10658_v53  ;;  %v752_v53 = vmax.f32 %v416_v50, 0.0  ;;  %v754_v54 = vmax.f32 %v418_v51, 0.0  ;;  %v751_v56 = vmax.f32 %v415_v52, 0.0  ;;  %v10712_v51 = vld [vmem:[%s11762_s12 + $0x8fc] ss:$44 sps:$4 sm:$0xff]  }
  0xd4   : > { %v1006_v0 = vpack.c.bf16 %v754_v54, %v752_v53  ;;  %v1005_v5 = vpack.c.bf16 %v753_v58, %v751_v56  ;;  %v10714_v58 = vld [vmem:[%s11762_s12 + $0x8f0] ss:$44 sps:$4 sm:$0xff]  }
  0xd6   : > { %4966 = vmatprep.subr.bf16.mxu0 %v1006_v0 }
  0xd7   : > { %4967 = vmatpush2.bf16.msra.mxu0 %v1005_v5 }
  0xd8   : > { %4235 = vmatmul.mubr.bf16.gmra.mxu0 %v10660_v3  ;;  %v481_v3 = vld [vmem:[%s16652_s0 + $0x730] sm:$0xff] }
  0xd9   : > { %4688 = vmatmul.mubr.bf16.gmra.mxu1 %v10661_v7  ;;  %4244 = vmatprep.mubr.bf16.mxu0 %v10662_v8  ;;  %v817_v6 = vmax.f32 %v481_v3, 0.0  ;;  %v1038_v7 = vpack.c.bf16 %v818_v2, %v816_v1  ;;  %v10694_v8 = vld [vmem:[%s11762_s12 + $0x7f4] ss:$44 sps:$4 sm:$0xff]  }
  0xda   : > { %4697 = vmatprep.mubr.bf16.mxu1 %v10664_v13  ;;  %v10700_v13 = vld [vmem:[%s11762_s12 + $0x84c] ss:$44 sps:$4 sm:$0xff]   ;;  %v10718_v3 = vld [vmem:[%s11762_s12 + $0x954] ss:$44 sps:$4 sm:$0xff]  }
  0xdb   : > { %v1037_v9 = vpack.c.bf16 %v817_v6, %v815_v4  ;;  %5419 = vmatprep.subr.bf16.mxu1 %v1038_v7 }
  0xdd   : > { %5420 = vmatpush2.bf16.msra.mxu1 %v1037_v9 }
  0xde   : > { %5421 = vmatprep.subr.bf16.mxu1 %v1036_v41 }
  0xe0   : > { %4245 = vmatmul.mubr.bf16.gmra.mxu0 %v10666_v14  ;;  %v10702_v14 = vld [vmem:[%s11762_s12 + $0x840] ss:$44 sps:$4 sm:$0xff]  }
  0xe1   : > { %4698 = vmatmul.mubr.bf16.gmra.mxu1 %v10667_v15  ;;  %4254 = vmatprep.mubr.bf16.mxu0 %v10668_v16  ;;  %v10703_v15 = vld [vmem:[%s11762_s12 + $0x848] ss:$44 sps:$4 sm:$0xff]  }
  0xe2   : > { %4707 = vmatprep.mubr.bf16.mxu1 %v10670_v17  ;;  %v10704_v16 = vld [vmem:[%s11762_s12 + $0x89c] ss:$44 sps:$4 sm:$0xff]   ;;  %v10706_v17 = vld [vmem:[%s11762_s12 + $0x8a4] ss:$44 sps:$4 sm:$0xff]  }
  0xe8   : > { %4255 = vmatmul.mubr.bf16.gmra.mxu0 %v10672_v18  ;;  %v412_v18 = vld [vmem:[%s16652_s0 + $0x508] sm:$0xff] }
  0xe9   : > { %4708 = vmatmul.mubr.bf16.gmra.mxu1 %v10673_v21  ;;  %4264 = vmatprep.mubr.bf16.mxu0 %v10674_v22  ;;  %v748_v20 = vmax.f32 %v412_v18, 0.0  ;;  %v750_v21 = vmax.f32 %v414_v19, 0.0  ;;  %v411_v22 = vld [vmem:[%s16652_s0 + $0x500] sm:$0xff]  ;;  %v10721_v18 = vld [vmem:[%s11762_s12 + $0x950] ss:$44 sps:$4 sm:$0xff]   ;;  %v584_v19 = vld [vmem:[%s16652_s0 + $0xa68] sm:$0xff] }
  0xea   : > { %4717 = vmatprep.mubr.bf16.mxu1 %v10676_v33  ;;  %v747_v26 = vmax.f32 %v411_v22, 0.0  ;;  %v477_v33 = vld [vmem:[%s16652_s0 + $0x710] sm:$0xff]  ;;  %v920_v24 = vmax.f32 %v584_v19, 0.0 }
  0xeb   : > { %v1004_v25 = vpack.c.bf16 %v750_v21, %v748_v20  ;;  %v813_v37 = vmax.f32 %v477_v33, 0.0  ;;  %v586_v20 = vld [vmem:[%s16652_s0 + $0xa78] sm:$0xff]  ;;  %v10724_v22 = vld [vmem:[%s11762_s12 + $0x9a4] ss:$44 sps:$4 sm:$0xff]  }
  0xec   : > { %v1003_v35 = vpack.c.bf16 %v749_v27, %v747_v26 }
  0xed   : > { %4968 = vmatprep.subr.bf16.mxu0 %v1004_v25  ;;  %v922_v25 = vmax.f32 %v586_v20, 0.0 }
  0xee   : > { %4969 = vmatpush2.bf16.msra.mxu0 %v1003_v35 }
  0xf0   : > { %4265 = vmatmul.mubr.bf16.gmra.mxu0 %v10678_v42 }
  0xf1   : > { %4718 = vmatmul.mubr.bf16.gmra.mxu1 %v10679_v43  ;;  %4274 = vmatprep.mubr.bf16.mxu0 %v10680_v44  ;;  %v10709_v43 = vld [vmem:[%s11762_s12 + $0x8a0] ss:$44 sps:$4 sm:$0xff]  }
  0xf2   : > { %4727 = vmatprep.mubr.bf16.mxu1 %v10682_v45  ;;  %v10710_v44 = vld [vmem:[%s11762_s12 + $0x8f4] ss:$44 sps:$4 sm:$0xff]   ;;  %v1035_v45 = vpack.c.bf16 %v813_v37, %v811_v36 }
  0xf3   : > { %v10722_v36 = vld [vmem:[%s11762_s12 + $0x9a0] ss:$44 sps:$4 sm:$0xff]  }
  0xf4   : > { %5422 = vmatpush2.bf16.msra.mxu1 %v1035_v45 }
  0xf8   : > { %4275 = vmatmul.mubr.bf16.gmra.mxu0 %v10684_v46 }
  0xf9   : > { %4728 = vmatmul.mubr.bf16.gmra.mxu1 %v10685_v47  ;;  %4284 = vmatprep.mubr.bf16.mxu0 %v10686_v48 }
  0xfa   : > { %4737 = vmatprep.mubr.bf16.mxu1 %v10688_v49 }
 0x100   : > { %4285 = vmatmul.mubr.bf16.gmra.mxu0 %v10690_v57 }
 0x101   : > { %4738 = vmatmul.mubr.bf16.gmra.mxu1 %v10691_v62  ;;  %4294 = vmatprep.mubr.bf16.mxu0 %v10692_v63 }
 0x102   : > { %4747 = vmatprep.mubr.bf16.mxu1 %v10694_v8 }
 0x108   : > { %4295 = vmatmul.mubr.bf16.gmra.mxu0 %v10696_v10  ;;  %v536_v10 = vld [vmem:[%s16652_s0 + $0x8e8] sm:$0xff] }
 0x109   : > { %4748 = vmatmul.mubr.bf16.gmra.mxu1 %v10697_v11  ;;  %4304 = vmatprep.mubr.bf16.mxu0 %v10698_v12  ;;  %v538_v11 = vld [vmem:[%s16652_s0 + $0x8f8] sm:$0xff] }
 0x10a   : > { %4757 = vmatprep.mubr.bf16.mxu1 %v10700_v13  ;;  %v10720_v13 = vld [vmem:[%s11762_s12 + $0x948] ss:$44 sps:$4 sm:$0xff]  }
 0x110   : > { %v4066_v30 = vpop.f32.mrf.mxu0  ;;  %4305 = vmatmul.mubr.bf16.gmra.mxu0 %v10702_v14  ;;  %v872_v14 = vmax.f32 %v536_v10, 0.0 }
 0x111   : > { %v4519_v34 = vpop.f32.mrf.mxu1  ;;  %4758 = vmatmul.mubr.bf16.gmra.mxu1 %v10703_v15  ;;  %4314 = vmatprep.mubr.bf16.mxu0 %v10704_v16  ;;  %v874_v15 = vmax.f32 %v538_v11, 0.0 }
 0x112   : > { %v12322_v38 = vadd.f32 %v4519_v34, %v4066_v30  ;;  %v4068_v39 = vpop.f32.mrf.mxu0  ;;  %4767 = vmatprep.mubr.bf16.mxu1 %v10706_v17  ;;  %v1090_v30 = vpack.c.bf16 %v922_v25, %v920_v24 }
 0x113   : > { %v4521_v42 = vpop.f32.mrf.mxu1  ;;  %v1066_v23 = vpack.c.bf16 %v874_v15, %v872_v14  ;;  %v10737_v15 = vld [vmem:[%s11762_s12 + $0xa58] ss:$44 sps:$4 sm:$0xff]  }
 0x114   : > { %v12327_v46 = vadd.f32 %v4521_v42, %v4068_v39  ;;  %v4070_v47 = vpop.f32.mrf.mxu0  ;;  %6305 = vmatprep.subr.bf16.mxu1 %v1090_v30  ;;  %v10725_v39 = vld [vmem:[%s11762_s12 + $0x9a8] ss:$44 sps:$4 sm:$0xff]  }
 0x115   : > { %v4523_v48 = vpop.f32.mrf.mxu1  ;;  %5844 = vmatprep.subr.bf16.mxu0 %v1066_v23  ;;  %v10745_v23 = vld [vmem:[%s11762_s12 + $0xab4] ss:$44 sps:$4 sm:$0xff]  }
 0x116   : > { %v12329_v49 = vadd.f32 %v4523_v48, %v4070_v47  ;;  %v4072_v50 = vpop.f32.mrf.mxu0  ;;  %v10733_v47 = vld [vmem:[%s11762_s12 + $0xa04] ss:$44 sps:$4 sm:$0xff]  }
 0x117   : > { %v4525_v52 = vpop.f32.mrf.mxu1 }
 0x118   : > { %v12332_v53 = vadd.f32 %v4525_v52, %v4072_v50  ;;  %v4076_v54 = vpop.f32.mrf.mxu0  ;;  %4315 = vmatmul.mubr.bf16.gmra.mxu0 %v10708_v40  ;;  %v10730_v40 = vld [vmem:[%s11762_s12 + $0x9fc] ss:$44 sps:$4 sm:$0xff]  }
 0x119   : > { %v4529_v55 = vpop.f32.mrf.mxu1  ;;  %4768 = vmatmul.mubr.bf16.gmra.mxu1 %v10709_v43  ;;  %4324 = vmatprep.mubr.bf16.mxu0 %v10710_v44 }
 0x11a   : > { %v12334_v56 = vadd.f32 %v4529_v55, %v4076_v54  ;;  %v4078_v57 = vpop.f32.mrf.mxu0  ;;  %4777 = vmatprep.mubr.bf16.mxu1 %v10712_v51 }
 0x11b   : > { %v4531_v59 = vpop.f32.mrf.mxu1 }
 0x11c   : > { %v12339_v62 = vadd.f32 %v4531_v59, %v4078_v57  ;;  %v4080_v63 = vpop.f32.mrf.mxu0  ;;  %v10728_v57 = vld [vmem:[%s11762_s12 + $0x9f8] ss:$44 sps:$4 sm:$0xff]   ;;  %v10731_v59 = vld [vmem:[%s11762_s12 + $0xa00] ss:$44 sps:$4 sm:$0xff]  }
 0x11d   : > { %v4533_v0 = vpop.f32.mrf.mxu1 }
 0x11e   : > { %v12341_v1 = vadd.f32 %v4533_v0, %v4080_v63  ;;  %v4082_v2 = vpop.f32.mrf.mxu0 }
 0x11f   : > { %v4535_v4 = vpop.f32.mrf.mxu1 }
 0x120   : > { %v12344_v5 = vadd.f32 %v4535_v4, %v4082_v2  ;;  %v4086_v6 = vpop.f32.mrf.mxu0  ;;  %4325 = vmatmul.mubr.bf16.gmra.mxu0 %v10714_v58  ;;  %v10739_v4 = vld [vmem:[%s11762_s12 + $0xa5c] ss:$44 sps:$4 sm:$0xff]  }
 0x121   : > { %v4539_v7 = vpop.f32.mrf.mxu1  ;;  %4778 = vmatmul.mubr.bf16.gmra.mxu1 %v10715_v60  ;;  %4334 = vmatprep.mubr.bf16.mxu0 %v10716_v61  ;;  %v10736_v60 = vld [vmem:[%s11762_s12 + $0xa54] ss:$44 sps:$4 sm:$0xff]  }
 0x122   : > { %v12346_v8 = vadd.f32 %v4539_v7, %v4086_v6  ;;  %v4088_v9 = vpop.f32.mrf.mxu0  ;;  %4787 = vmatprep.mubr.bf16.mxu1 %v10718_v3 }
 0x123   : > { %v4541_v12 = vpop.f32.mrf.mxu1 }
 0x124   : > { %v12355_v16 = vadd.f32 %v4541_v12, %v4088_v9  ;;  %v4090_v17 = vpop.f32.mrf.mxu0 }
 0x125   : > { %v4543_v21 = vpop.f32.mrf.mxu1 }
 0x126   : > { %v12365_v26 = vadd.f32 %v4543_v21, %v4090_v17  ;;  %v4092_v27 = vpop.f32.mrf.mxu0  ;;  %v10742_v17 = vld [vmem:[%s11762_s12 + $0xaac] ss:$44 sps:$4 sm:$0xff]  }
 0x127   : > { %v4545_v29 = vpop.f32.mrf.mxu1 }
 0x128   : > { %v12368_v31 = vadd.f32 %v4545_v29, %v4092_v27  ;;  %v4096_v32 = vpop.f32.mrf.mxu0  ;;  %4335 = vmatmul.mubr.bf16.gmra.mxu0 %v10720_v13  ;;  %v10734_v13 = vld [vmem:[%s11762_s12 + $0xa50] ss:$44 sps:$4 sm:$0xff]  }
 0x129   : > { %v4549_v33 = vpop.f32.mrf.mxu1  ;;  %4788 = vmatmul.mubr.bf16.gmra.mxu1 %v10721_v18  ;;  %4344 = vmatprep.mubr.bf16.mxu0 %v10724_v22 }
 0x12a   : > { %v12370_v34 = vadd.f32 %v4549_v33, %v4096_v32  ;;  %v4098_v35 = vpop.f32.mrf.mxu0  ;;  %4797 = vmatprep.mubr.bf16.mxu1 %v10727_v28  ;;  %v10740_v32 = vld [vmem:[%s11762_s12 + $0xaa8] ss:$44 sps:$4 sm:$0xff]  }
 0x12b   : > { %v4551_v37 = vpop.f32.mrf.mxu1 }
 0x12c   : > { %v12375_v41 = vadd.f32 %v4551_v37, %v4098_v35  ;;  %v4100_v42 = vpop.f32.mrf.mxu0  ;;  %v10743_v35 = vld [vmem:[%s11762_s12 + $0xab0] ss:$44 sps:$4 sm:$0xff]  }
 0x12d   : > { %v4553_v43 = vpop.f32.mrf.mxu1 }
 0x12e   : > { %v12377_v44 = vadd.f32 %v4553_v43, %v4100_v42  ;;  %v4102_v45 = vpop.f32.mrf.mxu0 }
 0x12f   : > { %v4555_v48 = vpop.f32.mrf.mxu1 }
 0x130   : > { %v12380_v50 = vadd.f32 %v4555_v48, %v4102_v45  ;;  %v4106_v51 = vpop.f32.mrf.mxu0  ;;  %4345 = vmatmul.mubr.bf16.gmra.mxu0 %v10722_v36  ;;  %v10748_v36 = vld [vmem:[%s11762_s12 + $0xb04] ss:$44 sps:$4 sm:$0xff]   ;;  %v10751_v45 = vld [vmem:[%s11762_s12 + $0xb0c] ss:$44 sps:$4 sm:$0xff]  }
 0x131   : > { %v4559_v52 = vpop.f32.mrf.mxu1  ;;  %4798 = vmatmul.mubr.bf16.gmra.mxu1 %v10725_v39  ;;  %4354 = vmatprep.mubr.bf16.mxu0 %v10730_v40 }
 0x132   : > { %v12382_v54 = vadd.f32 %v4559_v52, %v4106_v51  ;;  %v4108_v55 = vpop.f32.mrf.mxu0  ;;  %4807 = vmatprep.mubr.bf16.mxu1 %v10733_v47 }
 0x133   : > { %v4561_v58 = vpop.f32.mrf.mxu1 }
 0x134   : > { %v12387_v61 = vadd.f32 %v4561_v58, %v4108_v55  ;;  %v4110_v63 = vpop.f32.mrf.mxu0 }
 0x135   : > { %v4563_v0 = vpop.f32.mrf.mxu1 }
 0x136   : > { %v12389_v2 = vadd.f32 %v4563_v0, %v4110_v63  ;;  %v4112_v3 = vpop.f32.mrf.mxu0  ;;  %v10746_v63 = vld [vmem:[%s11762_s12 + $0xb00] ss:$44 sps:$4 sm:$0xff]   ;;  %v10749_v0 = vld [vmem:[%s11762_s12 + $0xb08] ss:$44 sps:$4 sm:$0xff]  }
 0x137   : > { %v4565_v6 = vpop.f32.mrf.mxu1 }
 0x138   : > { %v12392_v7 = vadd.f32 %v4565_v6, %v4112_v3  ;;  %v4116_v9 = vpop.f32.mrf.mxu0  ;;  %4355 = vmatmul.mubr.bf16.gmra.mxu0 %v10728_v57 }
 0x139   : > { %v4569_v10 = vpop.f32.mrf.mxu1  ;;  %4808 = vmatmul.mubr.bf16.gmra.mxu1 %v10731_v59  ;;  %4364 = vmatprep.mubr.bf16.mxu0 %v10736_v60 }
 0x13a   : > { %v12394_v11 = vadd.f32 %v4569_v10, %v4116_v9  ;;  %v4118_v12 = vpop.f32.mrf.mxu0  ;;  %4817 = vmatprep.mubr.bf16.mxu1 %v10739_v4  ;;  %v10754_v4 = vld [vmem:[%s11762_s12 + $0xb5c] ss:$44 sps:$4 sm:$0xff]   ;;  %v10757_v10 = vld [vmem:[%s11762_s12 + $0xb64] ss:$44 sps:$4 sm:$0xff]  }
 0x13b   : > { %v4571_v14 = vpop.f32.mrf.mxu1 }
 0x13c   : > { %v12399_v18 = vadd.f32 %v4571_v14, %v4118_v12  ;;  %v4120_v19 = vpop.f32.mrf.mxu0 }
 0x13d   : > { %v4573_v20 = vpop.f32.mrf.mxu1 }
 0x13e   : > { %v12401_v21 = vadd.f32 %v4573_v20, %v4120_v19  ;;  %v4122_v22 = vpop.f32.mrf.mxu0 }
 0x13f   : > { %v4575_v24 = vpop.f32.mrf.mxu1 }
 0x140   : > { %v12404_v25 = vadd.f32 %v4575_v24, %v4122_v22  ;;  %v4126_v27 = vpop.f32.mrf.mxu0  ;;  %4365 = vmatmul.mubr.bf16.gmra.mxu0 %v10734_v13  ;;  %v10752_v24 = vld [vmem:[%s11762_s12 + $0xb58] ss:$44 sps:$4 sm:$0xff]  }
 0x141   : > { %v4579_v28 = vpop.f32.mrf.mxu1  ;;  %4818 = vmatmul.mubr.bf16.gmra.mxu1 %v10737_v15  ;;  %4374 = vmatprep.mubr.bf16.mxu0 %v10742_v17 }
 0x142   : > { %v12406_v29 = vadd.f32 %v4579_v28, %v4126_v27  ;;  %v4128_v30 = vpop.f32.mrf.mxu0  ;;  %4827 = vmatprep.mubr.bf16.mxu1 %v10745_v23  ;;  %v10755_v28 = vld [vmem:[%s11762_s12 + $0xb60] ss:$44 sps:$4 sm:$0xff]  }
 0x143   : > { %v4581_v33 = vpop.f32.mrf.mxu1 }
 0x144   : > { %v12411_v37 = vadd.f32 %v4581_v33, %v4128_v30  ;;  %v4130_v39 = vpop.f32.mrf.mxu0  ;;  %v10760_v30 = vld [vmem:[%s11762_s12 + $0xbb4] ss:$44 sps:$4 sm:$0xff]  }
 0x145   : > { %v4583_v40 = vpop.f32.mrf.mxu1 }
 0x146   : > { %v12413_v42 = vadd.f32 %v4583_v40, %v4130_v39  ;;  %v4132_v43 = vpop.f32.mrf.mxu0 }
 0x147   : > { %v4585_v47 = vpop.f32.mrf.mxu1 }
 0x148   : > { %v12416_v48 = vadd.f32 %v4585_v47, %v4132_v43  ;;  %v4136_v51 = vpop.f32.mrf.mxu0  ;;  %4375 = vmatmul.mubr.bf16.gmra.mxu0 %v10740_v32 }
 0x149   : > { %v4589_v52 = vpop.f32.mrf.mxu1  ;;  %4828 = vmatmul.mubr.bf16.gmra.mxu1 %v10743_v35  ;;  %4384 = vmatprep.mubr.bf16.mxu0 %v10748_v36  ;;  %v10763_v35 = vld [vmem:[%s11762_s12 + $0xbbc] ss:$44 sps:$4 sm:$0xff]  }
 0x14a   : > { %v12418_v55 = vadd.f32 %v4589_v52, %v4136_v51  ;;  %v4138_v57 = vpop.f32.mrf.mxu0  ;;  %4837 = vmatprep.mubr.bf16.mxu1 %v10751_v45 }
 0x14b   : > { %v4591_v58 = vpop.f32.mrf.mxu1 }
 0x14c   : > { %v12420_v59 = vadd.f32 %v4591_v58, %v4138_v57  ;;  %v4140_v60 = vpop.f32.mrf.mxu0  ;;  %v10758_v58 = vld [vmem:[%s11762_s12 + $0xbb0] ss:$44 sps:$4 sm:$0xff]  }
 0x14d   : > { %v4593_v3 = vpop.f32.mrf.mxu1 }
 0x14e   : > { %v12425_v6 = vadd.f32 %v4593_v3, %v4140_v60  ;;  %v4142_v9 = vpop.f32.mrf.mxu0 }
 0x14f   : > { %v4595_v12 = vpop.f32.mrf.mxu1 }
 0x150   : > { %v12428_v13 = vadd.f32 %v4595_v12, %v4142_v9  ;;  %v4146_v14 = vpop.f32.mrf.mxu0  ;;  %4385 = vmatmul.mubr.bf16.gmra.mxu0 %v10746_v63  ;;  %v10761_v63 = vld [vmem:[%s11762_s12 + $0xbb8] ss:$44 sps:$4 sm:$0xff]   ;;  %v10769_v9 = vld [vmem:[%s11762_s12 + $0xc14] ss:$44 sps:$4 sm:$0xff]  }
 0x151   : > { %v4599_v15 = vpop.f32.mrf.mxu1  ;;  %4838 = vmatmul.mubr.bf16.gmra.mxu1 %v10749_v0  ;;  %4394 = vmatprep.mubr.bf16.mxu0 %v10754_v4  ;;  %v10766_v0 = vld [vmem:[%s11762_s12 + $0xc0c] ss:$44 sps:$4 sm:$0xff]  }
 0x152   : > { %v12430_v17 = vadd.f32 %v4599_v15, %v4146_v14  ;;  %v4148_v19 = vpop.f32.mrf.mxu0  ;;  %4847 = vmatprep.mubr.bf16.mxu1 %v10757_v10 }
 0x153   : > { %v4601_v20 = vpop.f32.mrf.mxu1 }
 0x154   : > { %16844 = vst [vmem:[#allocation2_spill] sm:$0xff] %v12430_v17  ;;  %v12432_v22 = vadd.f32 %v4601_v20, %v4148_v19  ;;  %v4150_v23 = vpop.f32.mrf.mxu0 }
 0x155   : > { %v4603_v27 = vpop.f32.mrf.mxu1 }
 0x156   : > { %16845 = vst [vmem:[#allocation3_spill] sm:$0xff] %v12432_v22  ;;  %v12437_v32 = vadd.f32 %v4603_v27, %v4150_v23  ;;  %v4152_v33 = vpop.f32.mrf.mxu0  ;;  %v10814_v22 = vld [vmem:[%s11762_s12 + $0x6c] ss:$44 sps:$4 sm:$0xff]  }
 0x157   : > { %v4605_v36 = vpop.f32.mrf.mxu1 }
 0x158   : > { %16846 = vst [vmem:[#allocation4_spill] sm:$0xff] %v12437_v32  ;;  %v12440_v39 = vadd.f32 %v4605_v36, %v4152_v33  ;;  %v4156_v40 = vpop.f32.mrf.mxu0  ;;  %4395 = vmatmul.mubr.bf16.gmra.mxu0 %v10752_v24  ;;  %v10767_v33 = vld [vmem:[%s11762_s12 + $0xc10] ss:$44 sps:$4 sm:$0xff]  }
 0x159   : > { %v4609_v43 = vpop.f32.mrf.mxu1  ;;  %4848 = vmatmul.mubr.bf16.gmra.mxu1 %v10755_v28  ;;  %4404 = vmatprep.mubr.bf16.mxu0 %v10760_v30  ;;  %v10764_v28 = vld [vmem:[%s11762_s12 + $0xc08] ss:$44 sps:$4 sm:$0xff]  }
 0x15a   : > { %16847 = vst [vmem:[#allocation5_spill] sm:$0xff] %v12440_v39  ;;  %v12442_v45 = vadd.f32 %v4609_v43, %v4156_v40  ;;  %v4158_v47 = vpop.f32.mrf.mxu0  ;;  %4857 = vmatprep.mubr.bf16.mxu1 %v10763_v35  ;;  %v10772_v35 = vld [vmem:[%s11762_s12 + $0xc64] ss:$44 sps:$4 sm:$0xff]   ;;  %v10775_v43 = vld [vmem:[%s11762_s12 + $0xc6c] ss:$44 sps:$4 sm:$0xff]  }
 0x15b   : > { %v4611_v51 = vpop.f32.mrf.mxu1 }
 0x15c   : > { %16848 = vst [vmem:[#allocation6_spill] sm:$0xff] %v12442_v45  ;;  %v12444_v52 = vadd.f32 %v4611_v51, %v4158_v47  ;;  %v4160_v57 = vpop.f32.mrf.mxu0 }
 0x15d   : > { %v4613_v60 = vpop.f32.mrf.mxu1 }
 0x15e   : > { %16849 = vst [vmem:[#allocation7_spill] sm:$0xff] %v12444_v52  ;;  %v12449_v3 = vadd.f32 %v4613_v60, %v4160_v57  ;;  %v4162_v4 = vpop.f32.mrf.mxu0 }
 0x15f   : > { %v4615_v10 = vpop.f32.mrf.mxu1 }
 0x160   : > { %16850 = vst [vmem:[#allocation8_spill] sm:$0xff] %v12449_v3  ;;  %v12452_v12 = vadd.f32 %v4615_v10, %v4162_v4  ;;  %v4166_v14 = vpop.f32.mrf.mxu0  ;;  %4405 = vmatmul.mubr.bf16.gmra.mxu0 %v10758_v58  ;;  %v10770_v10 = vld [vmem:[%s11762_s12 + $0xc60] ss:$44 sps:$4 sm:$0xff]  }
 0x161   : > { %v4619_v15 = vpop.f32.mrf.mxu1  ;;  %4858 = vmatmul.mubr.bf16.gmra.mxu1 %v10761_v63  ;;  %4414 = vmatprep.mubr.bf16.mxu0 %v10766_v0 }
 0x162   : > { %16851 = vst [vmem:[#allocation9_spill] sm:$0xff] %v12452_v12  ;;  %v12454_v19 = vadd.f32 %v4619_v15, %v4166_v14  ;;  %v4168_v20 = vpop.f32.mrf.mxu0  ;;  %4867 = vmatprep.mubr.bf16.mxu1 %v10769_v9  ;;  %v10773_v15 = vld [vmem:[%s11762_s12 + $0xc68] ss:$44 sps:$4 sm:$0xff]  }
 0x163   : > { %v4621_v23 = vpop.f32.mrf.mxu1 }
 0x164   : > { %16852 = vst [vmem:[#allocation10_spill] sm:$0xff] %v12454_v19  ;;  %v12456_v24 = vadd.f32 %v4621_v23, %v4168_v20  ;;  %v4170_v27 = vpop.f32.mrf.mxu0  ;;  %v10778_v20 = vld [vmem:[%s11762_s12 + $0xcbc] ss:$44 sps:$4 sm:$0xff]   ;;  %v10809_v19 = vld [vmem:[%s11762_s12 + $0x18] ss:$44 sps:$4 sm:$0xff]  }
 0x165   : > { %v4623_v30 = vpop.f32.mrf.mxu1 }
 0x166   : > { %16853 = vst [vmem:[#allocation11_spill] sm:$0xff] %v12456_v24  ;;  %v12461_v36 = vadd.f32 %v4623_v30, %v4170_v27  ;;  %v4172_v40 = vpop.f32.mrf.mxu0 }
 0x167   : > { %v4625_v47 = vpop.f32.mrf.mxu1 }
 0x168   : > { %16854 = vst [vmem:[#allocation12_spill] sm:$0xff] %v12461_v36  ;;  %v12464_v51 = vadd.f32 %v4625_v47, %v4172_v40  ;;  %v4176_v57 = vpop.f32.mrf.mxu0  ;;  %4415 = vmatmul.mubr.bf16.gmra.mxu0 %v10764_v28  ;;  %v10781_v28 = vld [vmem:[%s11762_s12 + $0xcc4] ss:$44 sps:$4 sm:$0xff]  }
 0x169   : > { %v4629_v58 = vpop.f32.mrf.mxu1  ;;  %4868 = vmatmul.mubr.bf16.gmra.mxu1 %v10767_v33  ;;  %4424 = vmatprep.mubr.bf16.mxu0 %v10772_v35 }
 0x16a   : > { %16855 = vst [vmem:[#allocation13_spill] sm:$0xff] %v12464_v51  ;;  %v12466_v60 = vadd.f32 %v4629_v58, %v4176_v57  ;;  %v4178_v63 = vpop.f32.mrf.mxu0  ;;  %4877 = vmatprep.mubr.bf16.mxu1 %v10775_v43  ;;  %v10806_v51 = vld [vmem:[%s11762_s12 + $0x10] ss:$44 sps:$4 sm:$0xff]  }
 0x16b   : > { %v4631_v0 = vpop.f32.mrf.mxu1 }
 0x16c   : > { %16856 = vst [vmem:[#allocation14_spill] sm:$0xff] %v12466_v60  ;;  %v12468_v4 = vadd.f32 %v4631_v0, %v4178_v63  ;;  %v4180_v9 = vpop.f32.mrf.mxu0  ;;  %v10776_v0 = vld [vmem:[%s11762_s12 + $0xcb8] ss:$44 sps:$4 sm:$0xff]  }
 0x16d   : > { %v4633_v14 = vpop.f32.mrf.mxu1 }
 0x16e   : > { %16857 = vst [vmem:[#allocation15_spill] sm:$0xff] %v12468_v4  ;;  %v12473_v23 = vadd.f32 %v4633_v14, %v4180_v9  ;;  %v4182_v27 = vpop.f32.mrf.mxu0  ;;  %v10779_v14 = vld [vmem:[%s11762_s12 + $0xcc0] ss:$44 sps:$4 sm:$0xff]  }
 0x16f   : > { %v4635_v30 = vpop.f32.mrf.mxu1 }
 0x170   : > { %16858 = vst [vmem:[#allocation16_spill] sm:$0xff] %v12473_v23  ;;  %v12476_v33 = vadd.f32 %v4635_v30, %v4182_v27  ;;  %v4186_v35 = vpop.f32.mrf.mxu0  ;;  %4425 = vmatmul.mubr.bf16.gmra.mxu0 %v10770_v10  ;;  %v10784_v23 = vld [vmem:[%s11762_s12 + $0xd14] ss:$44 sps:$4 sm:$0xff]   ;;  %v10787_v30 = vld [vmem:[%s11762_s12 + $0xd1c] ss:$44 sps:$4 sm:$0xff]  }
 0x171   : > { %v4639_v40 = vpop.f32.mrf.mxu1  ;;  %4878 = vmatmul.mubr.bf16.gmra.mxu1 %v10773_v15  ;;  %4434 = vmatprep.mubr.bf16.mxu0 %v10778_v20 }
 0x172   : > { %16859 = vst [vmem:[#allocation17_spill] sm:$0xff] %v12476_v33  ;;  %v12478_v43 = vadd.f32 %v4639_v40, %v4186_v35  ;;  %v4188_v47 = vpop.f32.mrf.mxu0  ;;  %4887 = vmatprep.mubr.bf16.mxu1 %v10781_v28  ;;  %v10790_v33 = vld [vmem:[%s11762_s12 + $0xd6c] ss:$44 sps:$4 sm:$0xff]  }
 0x173   : > { %v4641_v57 = vpop.f32.mrf.mxu1 }
 0x174   : > { %16860 = vst [vmem:[#allocation18_spill] sm:$0xff] %v12478_v43  ;;  %v12480_v58 = vadd.f32 %v4641_v57, %v4188_v47  ;;  %v4190_v63 = vpop.f32.mrf.mxu0  ;;  %v10785_v43 = vld [vmem:[%s11762_s12 + $0xd18] ss:$44 sps:$4 sm:$0xff]  }
 0x175   : > { %v4643_v9 = vpop.f32.mrf.mxu1 }
 0x176   : > { %16861 = vst [vmem:[#allocation19_spill] sm:$0xff] %v12480_v58  ;;  %v12485_v27 = vadd.f32 %v4643_v9, %v4190_v63  ;;  %v4192_v10 = vpop.f32.mrf.mxu0 }
 0x177   : > { %v4645_v15 = vpop.f32.mrf.mxu1 }
 0x178   : > { %16862 = vst [vmem:[#allocation20_spill] sm:$0xff] %v12485_v27  ;;  %v12488_v20 = vadd.f32 %v4645_v15, %v4192_v10  ;;  %v4196_v35 = vpop.f32.mrf.mxu0  ;;  %4435 = vmatmul.mubr.bf16.gmra.mxu0 %v10776_v0  ;;  %v10782_v27 = vld [vmem:[%s11762_s12 + $0xd10] ss:$44 sps:$4 sm:$0xff]   ;;  %v10793_v15 = vld [vmem:[%s11762_s12 + $0xd74] ss:$44 sps:$4 sm:$0xff]  }
 0x179   : > { %v4649_v28 = vpop.f32.mrf.mxu1  ;;  %4888 = vmatmul.mubr.bf16.gmra.mxu1 %v10779_v14  ;;  %4444 = vmatprep.mubr.bf16.mxu0 %v10784_v23 }
 0x17a   : > { %16863 = vst [vmem:[#allocation21_spill] sm:$0xff] %v12488_v20  ;;  %v12490_v40 = vadd.f32 %v4649_v28, %v4196_v35  ;;  %v4198_v47 = vpop.f32.mrf.mxu0  ;;  %4897 = vmatprep.mubr.bf16.mxu1 %v10787_v30  ;;  %v10796_v20 = vld [vmem:[%s11762_s12 + $0xdc4] ss:$44 sps:$4 sm:$0xff]  }
 0x17b   : > { %v4651_v57 = vpop.f32.mrf.mxu1 }
 0x17c   : > { %16864 = vst [vmem:[#allocation22_spill] sm:$0xff] %v12490_v40  ;;  %v12492_v63 = vadd.f32 %v4651_v57, %v4198_v47  ;;  %v4200_v9 = vpop.f32.mrf.mxu0  ;;  %v10791_v40 = vld [vmem:[%s11762_s12 + $0xd70] ss:$44 sps:$4 sm:$0xff]  }
 0x17d   : > { %v4653_v58 = vpop.f32.mrf.mxu1 }
 0x17e   : > { %16865 = vst [vmem:[#allocation23_spill] sm:$0xff] %v12492_v63  ;;  %v12497_v10 = vadd.f32 %v4653_v58, %v4200_v9  ;;  %v4202_v0 = vpop.f32.mrf.mxu0 }
 0x17f   : > { %v4655_v14 = vpop.f32.mrf.mxu1 }
 0x180   : > { %16866 = vst [vmem:[#allocation24_spill] sm:$0xff] %v12497_v10  ;;  %v12500_v23 = vadd.f32 %v4655_v14, %v4202_v0  ;;  %v4206_v35 = vpop.f32.mrf.mxu0  ;;  %4445 = vmatmul.mubr.bf16.gmra.mxu0 %v10782_v27  ;;  %v10788_v10 = vld [vmem:[%s11762_s12 + $0xd68] ss:$44 sps:$4 sm:$0xff]   ;;  %v10799_v14 = vld [vmem:[%s11762_s12 + $0xdcc] ss:$44 sps:$4 sm:$0xff]  }
 0x181   : > { %v4659_v30 = vpop.f32.mrf.mxu1  ;;  %4898 = vmatmul.mubr.bf16.gmra.mxu1 %v10785_v43  ;;  %4454 = vmatprep.mubr.bf16.mxu0 %v10790_v33 }
 0x182   : > { %16867 = vst [vmem:[#allocation25_spill] sm:$0xff] %v12500_v23  ;;  %v12502_v28 = vadd.f32 %v4659_v30, %v4206_v35  ;;  %v4208_v47 = vpop.f32.mrf.mxu0  ;;  %4907 = vmatprep.mubr.bf16.mxu1 %v10793_v15  ;;  %v10802_v23 = vld [vmem:[%s11762_s12 + $0xe1c] ss:$44 sps:$4 sm:$0xff]  }
 0x183   : > { %v4661_v58 = vpop.f32.mrf.mxu1 }
 0x184   : > { %16868 = vst [vmem:[#allocation26_spill] sm:$0xff] %v12502_v28  ;;  %v12504_v57 = vadd.f32 %v4661_v58, %v4208_v47  ;;  %v4210_v9 = vpop.f32.mrf.mxu0  ;;  %v10797_v28 = vld [vmem:[%s11762_s12 + $0xdc8] ss:$44 sps:$4 sm:$0xff]  }
 0x185   : > { %v4663_v63 = vpop.f32.mrf.mxu1 }
 0x186   : > { %16869 = vst [vmem:[#allocation27_spill] sm:$0xff] %v12504_v57  ;;  %v12509_v0 = vadd.f32 %v4663_v63, %v4210_v9  ;;  %v4212_v27 = vpop.f32.mrf.mxu0 }
 0x187   : > { %v4665_v43 = vpop.f32.mrf.mxu1 }
 0x188   : > { %16870 = vst [vmem:[#allocation28_spill] sm:$0xff] %v12509_v0  ;;  %v12512_v33 = vadd.f32 %v4665_v43, %v4212_v27  ;;  %v4216_v35 = vpop.f32.mrf.mxu0  ;;  %4455 = vmatmul.mubr.bf16.gmra.mxu0 %v10788_v10  ;;  %v10794_v0 = vld [vmem:[%s11762_s12 + $0xdc0] ss:$44 sps:$4 sm:$0xff]   ;;  %v10805_v43 = vld [vmem:[%s11762_s12 + $0xe24] ss:$44 sps:$4 sm:$0xff]  }
 0x189   : > { %v4669_v15 = vpop.f32.mrf.mxu1  ;;  %4908 = vmatmul.mubr.bf16.gmra.mxu1 %v10791_v40  ;;  %4464 = vmatprep.mubr.bf16.mxu0 %v10796_v20 }
 0x18a   : > { %16871 = vst [vmem:[#allocation29_spill] sm:$0xff] %v12512_v33  ;;  %v12514_v30 = vadd.f32 %v4669_v15, %v4216_v35  ;;  %v4218_v47 = vpop.f32.mrf.mxu0  ;;  %4917 = vmatprep.mubr.bf16.mxu1 %v10799_v14  ;;  %v10808_v33 = vld [vmem:[%s11762_s12 + $0x14] ss:$44 sps:$4 sm:$0xff]  }
 0x18b   : > { %v4671_v63 = vpop.f32.mrf.mxu1 }
 0x18c   : > { %16872 = vst [vmem:[#allocation30_spill] sm:$0xff] %v12514_v30  ;;  %v12516_v58 = vadd.f32 %v4671_v63, %v4218_v47  ;;  %v4220_v9 = vpop.f32.mrf.mxu0 }
 0x18d   : > { %v4673_v57 = vpop.f32.mrf.mxu1 }
 0x18e   : > { %16873 = vst [vmem:[#allocation31_spill] sm:$0xff] %v12516_v58  ;;  %v12521_v27 = vadd.f32 %v4673_v57, %v4220_v9  ;;  %v4222_v10 = vpop.f32.mrf.mxu0  ;;  %v10803_v58 = vld [vmem:[%s11762_s12 + $0xe20] ss:$44 sps:$4 sm:$0xff]  }
 0x18f   : > { %v4675_v40 = vpop.f32.mrf.mxu1 }
 0x190   : > { %16874 = vst [vmem:[#allocation32_spill] sm:$0xff] %v12521_v27  ;;  %v12524_v20 = vadd.f32 %v4675_v40, %v4222_v10  ;;  %v4226_v35 = vpop.f32.mrf.mxu0  ;;  %4465 = vmatmul.mubr.bf16.gmra.mxu0 %v10794_v0  ;;  %v10800_v27 = vld [vmem:[%s11762_s12 + $0xe18] ss:$44 sps:$4 sm:$0xff]  }
 0x191   : > { %v4679_v14 = vpop.f32.mrf.mxu1  ;;  %4918 = vmatmul.mubr.bf16.gmra.mxu1 %v10797_v28  ;;  %4474 = vmatprep.mubr.bf16.mxu0 %v10802_v23  ;;  %v535_v0 = vld [vmem:[%s16652_s0 + $0x8e0] sm:$0xff]  ;;  %v537_v23 = vld [vmem:[%s16652_s0 + $0x8f0] sm:$0xff] }
 0x192   : > { %16875 = vst [vmem:[#allocation33_spill] sm:$0xff] %v12524_v20  ;;  %v12526_v15 = vadd.f32 %v4679_v14, %v4226_v35  ;;  %v4228_v47 = vpop.f32.mrf.mxu0  ;;  %4927 = vmatprep.mubr.bf16.mxu1 %v10805_v43  ;;  %v10811_v43 = vld [vmem:[%s11762_s12 + $0x1c] ss:$44 sps:$4 sm:$0xff]   ;;  %v583_v40 = vld [vmem:[%s16652_s0 + $0xa60] sm:$0xff]  ;;  %v585_v35 = vld [vmem:[%s16652_s0 + $0xa70] sm:$0xff] }
 0x193   : > { %v4681_v57 = vpop.f32.mrf.mxu1  ;;  %v919_v20 = vmax.f32 %v583_v40, 0.0  ;;  %v921_v4 = vmax.f32 %v585_v35, 0.0  ;;  %v528_v40 = vld [vmem:[%s16652_s0 + $0x8a8] sm:$0xff] }
 0x194   : > { %16876 = vst [vmem:[#allocation34_spill] sm:$0xff] %v12526_v15  ;;  %v12528_v63 = vadd.f32 %v4681_v57, %v4228_v47  ;;  %v4230_v9 = vpop.f32.mrf.mxu0  ;;  %v873_v15 = vmax.f32 %v537_v23, 0.0  ;;  %v864_v45 = vmax.f32 %v528_v40, 0.0 }
 0x195   : > { %v4683_v30 = vpop.f32.mrf.mxu1  ;;  %v1089_v12 = vpack.c.bf16 %v921_v4, %v919_v20  ;;  %v529_v4 = vld [vmem:[%s16652_s0 + $0x8b0] sm:$0xff] }
 0x196   : > { %16877 = vst [vmem:[#allocation35_spill] sm:$0xff] %v12528_v63  ;;  %v12539_v28 = vadd.f32 %v4683_v30, %v4230_v9  ;;  %v4232_v10 = vpop.f32.mrf.mxu0  ;;  %v871_v63 = vmax.f32 %v535_v0, 0.0  ;;  %v532_v30 = vld [vmem:[%s16652_s0 + $0x8c8] sm:$0xff]  ;;  %v534_v9 = vld [vmem:[%s16652_s0 + $0x8d8] sm:$0xff] }
 0x197   : > { %v4685_v14 = vpop.f32.mrf.mxu1 }
 0x198   : > { %16878 = vst [vmem:[#allocation36_spill] sm:$0xff] %v12539_v28  ;;  %v12548_v47 = vadd.f32 %v4685_v14, %v4232_v10  ;;  %v4236_v57 = vpop.f32.mrf.mxu0  ;;  %4475 = vmatmul.mubr.bf16.gmra.mxu0 %v10800_v27  ;;  %v580_v10 = vld [vmem:[%s16652_s0 + $0xa48] sm:$0xff]  ;;  %v582_v27 = vld [vmem:[%s16652_s0 + $0xa58] sm:$0xff]  ;;  %v868_v14 = vmax.f32 %v532_v30, 0.0  ;;  %v1065_v36 = vpack.c.bf16 %v873_v15, %v871_v63 }
 0x199   : > { %v4689_v28 = vpop.f32.mrf.mxu1  ;;  %4928 = vmatmul.mubr.bf16.gmra.mxu1 %v10803_v58  ;;  %4970 = vmatprep.mubr.bf16.mxu0 %v10808_v33  ;;  %v531_v58 = vld [vmem:[%s16652_s0 + $0x8c0] sm:$0xff]  ;;  %v533_v33 = vld [vmem:[%s16652_s0 + $0x8d0] sm:$0xff]  ;;  %v916_v30 = vmax.f32 %v580_v10, 0.0 }
 0x19a   : > { %16879 = vst [vmem:[#allocation37_spill] sm:$0xff] %v12548_v47  ;;  %v12562_v0 = vadd.f32 %v4689_v28, %v4236_v57  ;;  %v4238_v23 = vpop.f32.mrf.mxu0  ;;  %5423 = vmatprep.mubr.bf16.mxu1 %v10811_v43  ;;  %v870_v47 = vmax.f32 %v534_v9, 0.0  ;;  %v530_v28 = vld [vmem:[%s16652_s0 + $0x8b8] sm:$0xff]  ;;  %v579_v43 = vld [vmem:[%s16652_s0 + $0xa40] sm:$0xff]  ;;  %v581_v57 = vld [vmem:[%s16652_s0 + $0xa50] sm:$0xff]  ;;  %v918_v9 = vmax.f32 %v582_v27, 0.0 }
 0x19b   : > { %v4691_v35 = vpop.f32.mrf.mxu1  ;;  %v867_v3 = vmax.f32 %v531_v58, 0.0  ;;  %v869_v52 = vmax.f32 %v533_v33, 0.0  ;;  %v866_v17 = vmax.f32 %v530_v28, 0.0  ;;  %v917_v15 = vmax.f32 %v581_v57, 0.0  ;;  %v10817_v10 = vld [vmem:[%s11762_s12 + $0x74] ss:$44 sps:$4 sm:$0xff]  }
 0x19c   : > { %16880 = vst [vmem:[#allocation38_spill] sm:$0xff] %v12562_v0  ;;  %v12582_v0 = vadd.f32 %v4691_v35, %v4238_v23  ;;  %v4240_v60 = vpop.f32.mrf.mxu0  ;;  %v527_v23 = vld [vmem:[%s16652_s0 + $0x8a0] sm:$0xff]  ;;  %v915_v35 = vmax.f32 %v579_v43, 0.0  ;;  %v1064_v27 = vpack.c.bf16 %v870_v47, %v868_v14  ;;  %v526_v58 = vld [vmem:[%s16652_s0 + $0x898] sm:$0xff]  ;;  %v1088_v33 = vpack.c.bf16 %v918_v9, %v916_v30 }
 0x19d   : > { %v4693_v24 = vpop.f32.mrf.mxu1  ;;  %v1063_v47 = vpack.c.bf16 %v869_v52, %v867_v3  ;;  %v863_v14 = vmax.f32 %v527_v23, 0.0  ;;  %v865_v43 = vmax.f32 %v529_v4, 0.0  ;;  %v523_v52 = vld [vmem:[%s16652_s0 + $0x880] sm:$0xff]  ;;  %v525_v3 = vld [vmem:[%s16652_s0 + $0x890] sm:$0xff] }
 0x19e   : > { %v12586_v39 = vadd.f32 %v4693_v24, %v4240_v60  ;;  %v4242_v32 = vpop.f32.mrf.mxu0  ;;  %v524_v60 = vld [vmem:[%s16652_s0 + $0x888] sm:$0xff]  ;;  %v1087_v57 = vpack.c.bf16 %v917_v15, %v915_v35  ;;  %v10815_v23 = vld [vmem:[%s11762_s12 + $0x70] ss:$44 sps:$4 sm:$0xff]  }
 0x19f   : > { %v4695_v63 = vpop.f32.mrf.mxu1  ;;  %v860_v30 = vmax.f32 %v524_v60, 0.0  ;;  %v10820_v35 = vld [vmem:[%s11762_s12 + $0xc4] ss:$44 sps:$4 sm:$0xff]   ;;  %v1061_v4 = vpack.c.bf16 %v865_v43, %v863_v14  ;;  %v861_v60 = vmax.f32 %v525_v3, 0.0  ;;  %v516_v14 = vld [vmem:[%s16652_s0 + $0x848] sm:$0xff] }
 0x1a0   : > { %v12596_v20 = vadd.f32 %v4695_v63, %v4242_v32  ;;  %v4246_v24 = vpop.f32.mrf.mxu0  ;;  %4971 = vmatmul.mubr.bf16.vlgmr.msra.gmra.mxu0 %v10806_v51  ;;  %v1062_v51 = vpack.c.bf16 %v866_v17, %v864_v45  ;;  %v10812_v45 = vld [vmem:[%s11762_s12 + $0x68] ss:$44 sps:$4 sm:$0xff]  }
 0x1a1   : > { %v4699_v40 = vpop.f32.mrf.mxu1  ;;  %5424 = vmatmul.mubr.bf16.vlgmr.msra.gmra.mxu1 %v10809_v19  ;;  %5845 = vmatpush1.bf16.msra.mxu0 %v1065_v36  ;;  %v862_v19 = vmax.f32 %v526_v58, 0.0  ;;  %v522_v36 = vld [vmem:[%s16652_s0 + $0x878] sm:$0xff] }
 0x1a2   : > { %v12604_v28 = vadd.f32 %v4699_v40, %v4246_v24  ;;  %v4248_v32 = vpop.f32.mrf.mxu0  ;;  %6306 = vmatpush1.bf16.msra.mxu1 %v1089_v12  ;;  %4980 = vmatprep.mubr.bf16.mxu0 %v10814_v22  ;;  %v520_v12 = vld [vmem:[%s16652_s0 + $0x868] sm:$0xff]  ;;  %v859_v24 = vmax.f32 %v523_v52, 0.0 }
 0x1a3   : > { %v4701_v63 = vpop.f32.mrf.mxu1  ;;  %5433 = vmatprep.mubr.bf16.mxu1 %v10817_v10  ;;  %5846 = vmatprep.subr.bf16.mxu0 %v1064_v27  ;;  %v10823_v27 = vld [vmem:[%s11762_s12 + $0xcc] ss:$44 sps:$4 sm:$0xff]   ;;  %v1060_v40 = vpack.c.bf16 %v862_v19, %v860_v30 }
 0x1a4   : > { %v12612_v22 = vadd.f32 %v4701_v63, %v4248_v32  ;;  %v4250_v17 = vpop.f32.mrf.mxu0  ;;  %6307 = vmatprep.subr.bf16.mxu1 %v1088_v33  ;;  %v856_v32 = vmax.f32 %v520_v12, 0.0  ;;  %v858_v63 = vmax.f32 %v522_v36, 0.0  ;;  %v519_v33 = vld [vmem:[%s16652_s0 + $0x860] sm:$0xff]  ;;  %v1059_v19 = vpack.c.bf16 %v861_v60, %v859_v24  ;;  %v512_v60 = vld [vmem:[%s16652_s0 + $0x828] sm:$0xff] }
 0x1a5   : > { %v4703_v9 = vpop.f32.mrf.mxu1  ;;  %5847 = vmatpush1.bf16.msra.mxu0 %v1063_v47  ;;  %v521_v47 = vld [vmem:[%s16652_s0 + $0x870] sm:$0xff]  ;;  %v855_v52 = vmax.f32 %v519_v33, 0.0  ;;  %v852_v36 = vmax.f32 %v516_v14, 0.0  ;;  %v10818_v24 = vld [vmem:[%s11762_s12 + $0xc0] ss:$44 sps:$4 sm:$0xff]  }
 0x1a6   : > { %v12623_v15 = vadd.f32 %v4703_v9, %v4250_v17  ;;  %v4252_v10 = vpop.f32.mrf.mxu0  ;;  %5848 = vmatprep.subr.bf16.mxu0 %v1062_v51  ;;  %6308 = vmatpush1.bf16.msra.mxu1 %v1087_v57  ;;  %v518_v51 = vld [vmem:[%s16652_s0 + $0x858] sm:$0xff]  ;;  %v857_v3 = vmax.f32 %v521_v47, 0.0  ;;  %v1058_v12 = vpack.c.bf16 %v858_v63, %v856_v32  ;;  %v10821_v32 = vld [vmem:[%s11762_s12 + $0xc8] ss:$44 sps:$4 sm:$0xff]  }
 0x1a7   : > { %v4705_v58 = vpop.f32.mrf.mxu1  ;;  %v10826_v63 = vld [vmem:[%s11762_s12 + $0x11c] ss:$44 sps:$4 sm:$0xff]  }
 0x1a8   : > { %v12632_v17 = vadd.f32 %v4705_v58, %v4252_v10  ;;  %v4256_v9 = vpop.f32.mrf.mxu0  ;;  %4981 = vmatmul.mubr.bf16.gmra.mxu0 %v10812_v45  ;;  %v854_v10 = vmax.f32 %v518_v51, 0.0  ;;  %v514_v58 = vld [vmem:[%s16652_s0 + $0x838] sm:$0xff]  ;;  %v1057_v14 = vpack.c.bf16 %v857_v3, %v855_v52 }
 0x1a9   : > { %v4709_v43 = vpop.f32.mrf.mxu1  ;;  %5434 = vmatmul.mubr.bf16.gmra.mxu1 %v10815_v23  ;;  %4990 = vmatprep.mubr.bf16.mxu0 %v10820_v35  ;;  %v515_v23 = vld [vmem:[%s16652_s0 + $0x840] sm:$0xff]  ;;  %v517_v35 = vld [vmem:[%s16652_s0 + $0x850] sm:$0xff] }
 0x1aa   : > { %16881 = vst [vmem:[#allocation39_spill] sm:$0xff] %v12632_v17  ;;  %v12640_v57 = vadd.f32 %v4709_v43, %v4256_v9  ;;  %v4258_v30 = vpop.f32.mrf.mxu0  ;;  %5443 = vmatprep.mubr.bf16.mxu1 %v10823_v27  ;;  %5849 = vmatpush1.bf16.msra.mxu0 %v1061_v4  ;;  %v10829_v9 = vld [vmem:[%s11762_s12 + $0x124] ss:$44 sps:$4 sm:$0xff]   ;;  %v851_v51 = vmax.f32 %v515_v23, 0.0  ;;  %v853_v43 = vmax.f32 %v517_v35, 0.0 }
 0x1ab   : > { %v4711_v45 = vpop.f32.mrf.mxu1  ;;  %5850 = vmatprep.subr.bf16.mxu0 %v1060_v40  ;;  %v511_v17 = vld [vmem:[%s16652_s0 + $0x820] sm:$0xff] }
 0x1ac   : > { %16882 = vst [vmem:[#allocation40_spill] sm:$0xff] %v12640_v57  ;;  %v12648_v27 = vadd.f32 %v4711_v45, %v4258_v30  ;;  %v4260_v4 = vpop.f32.mrf.mxu0  ;;  %v1056_v45 = vpack.c.bf16 %v854_v10, %v852_v36  ;;  %v850_v57 = vmax.f32 %v514_v58, 0.0  ;;  %v847_v36 = vmax.f32 %v511_v17, 0.0  ;;  %v10824_v58 = vld [vmem:[%s11762_s12 + $0x118] ss:$44 sps:$4 sm:$0xff]  }
 0x1ad   : > { %v4713_v40 = vpop.f32.mrf.mxu1  ;;  %v10832_v17 = vld [vmem:[%s11762_s12 + $0x174] ss:$44 sps:$4 sm:$0xff]  }
 0x1ae   : > { %16883 = vst [vmem:[#allocation41_spill] sm:$0xff] %v12648_v27  ;;  %v12659_v33 = vadd.f32 %v4713_v40, %v4260_v4  ;;  %v4262_v47 = vpop.f32.mrf.mxu0  ;;  %5851 = vmatpush1.bf16.msra.mxu0 %v1059_v19  ;;  %v848_v27 = vmax.f32 %v512_v60, 0.0  ;;  %v513_v4 = vld [vmem:[%s16652_s0 + $0x830] sm:$0xff] }
 0x1af   : > { %v4715_v30 = vpop.f32.mrf.mxu1  ;;  %5852 = vmatprep.subr.bf16.mxu0 %v1058_v12  ;;  %v1055_v12 = vpack.c.bf16 %v853_v43, %v851_v51  ;;  %v849_v10 = vmax.f32 %v513_v4, 0.0 }
 0x1b0   : > { %16884 = vst [vmem:[#allocation42_spill] sm:$0xff] %v12659_v33  ;;  %v12668_v40 = vadd.f32 %v4715_v30, %v4262_v47  ;;  %v4266_v33 = vpop.f32.mrf.mxu0  ;;  %4991 = vmatmul.mubr.bf16.gmra.mxu0 %v10818_v24  ;;  %v1054_v35 = vpack.c.bf16 %v850_v57, %v848_v27  ;;  %v10827_v47 = vld [vmem:[%s11762_s12 + $0x120] ss:$44 sps:$4 sm:$0xff]   ;;  %v10835_v27 = vld [vmem:[%s11762_s12 + $0x17c] ss:$44 sps:$4 sm:$0xff]  }
 0x1b1   : > { %v4719_v19 = vpop.f32.mrf.mxu1  ;;  %5444 = vmatmul.mubr.bf16.gmra.mxu1 %v10821_v32  ;;  %5000 = vmatprep.mubr.bf16.mxu0 %v10826_v63  ;;  %v508_v32 = vld [vmem:[%s16652_s0 + $0x808] sm:$0xff]  ;;  %v510_v63 = vld [vmem:[%s16652_s0 + $0x818] sm:$0xff]  ;;  %v1053_v43 = vpack.c.bf16 %v849_v10, %v847_v36  ;;  %v507_v30 = vld [vmem:[%s16652_s0 + $0x800] sm:$0xff] }
 0x1b2   : > { %v12670_v52 = vadd.f32 %v4719_v19, %v4266_v33  ;;  %v4268_v3 = vpop.f32.mrf.mxu0  ;;  %5453 = vmatprep.mubr.bf16.mxu1 %v10829_v9  ;;  %5853 = vmatpush1.bf16.msra.mxu0 %v1057_v14  ;;  %v844_v9 = vmax.f32 %v508_v32, 0.0  ;;  %v846_v14 = vmax.f32 %v510_v63, 0.0 }
 0x1b3   : > { %v4721_v23 = vpop.f32.mrf.mxu1  ;;  %5854 = vmatprep.subr.bf16.mxu0 %v1056_v45  ;;  %v509_v45 = vld [vmem:[%s16652_s0 + $0x810] sm:$0xff] }
 0x1b4   : > { %16885 = vst [vmem:[#allocation43_spill] sm:$0xff] %v12670_v52  ;;  %v12672_v60 = vadd.f32 %v4721_v23, %v4268_v3  ;;  %v4270_v24 = vpop.f32.mrf.mxu0  ;;  %v1052_v19 = vpack.c.bf16 %v846_v14, %v844_v9  ;;  %v843_v3 = vmax.f32 %v507_v30, 0.0  ;;  %v845_v23 = vmax.f32 %v509_v45, 0.0  ;;  %v10830_v14 = vld [vmem:[%s11762_s12 + $0x170] ss:$44 sps:$4 sm:$0xff]  }
 0x1b5   : > { %v4723_v33 = vpop.f32.mrf.mxu1  ;;  %v10833_v30 = vld [vmem:[%s11762_s12 + $0x178] ss:$44 sps:$4 sm:$0xff]  }
 0x1b6   : > { %16886 = vst [vmem:[#allocation44_spill] sm:$0xff] %v12672_v60  ;;  %v12683_v51 = vadd.f32 %v4723_v33, %v4270_v24  ;;  %v4272_v57 = vpop.f32.mrf.mxu0  ;;  %5855 = vmatpush1.bf16.msra.mxu0 %v1055_v12 }
 0x1b7   : > { %v4725_v4 = vpop.f32.mrf.mxu1  ;;  %5856 = vmatprep.subr.bf16.mxu0 %v1054_v35  ;;  %v1051_v35 = vpack.c.bf16 %v845_v23, %v843_v3 }
 0x1b8   : > { %16887 = vst [vmem:[#allocation45_spill] sm:$0xff] %v12683_v51  ;;  %v12692_v24 = vadd.f32 %v4725_v4, %v4272_v57  ;;  %v4276_v32 = vpop.f32.mrf.mxu0  ;;  %5001 = vmatmul.mubr.bf16.gmra.mxu0 %v10824_v58  ;;  %v10838_v58 = vld [vmem:[%s11762_s12 + $0x1cc] ss:$44 sps:$4 sm:$0xff]  }
 0x1b9   : > { %v4729_v12 = vpop.f32.mrf.mxu1  ;;  %5454 = vmatmul.mubr.bf16.gmra.mxu1 %v10827_v47  ;;  %5010 = vmatprep.mubr.bf16.mxu0 %v10832_v17  ;;  %v10841_v17 = vld [vmem:[%s11762_s12 + $0x1d4] ss:$44 sps:$4 sm:$0xff]  }
 0x1ba   : > { %16888 = vst [vmem:[#allocation46_spill] sm:$0xff] %v12692_v24  ;;  %v12694_v36 = vadd.f32 %v4729_v12, %v4276_v32  ;;  %v4278_v10 = vpop.f32.mrf.mxu0  ;;  %5463 = vmatprep.mubr.bf16.mxu1 %v10835_v27  ;;  %5857 = vmatpush1.bf16.msra.mxu0 %v1053_v43 }
 0x1bb   : > { %v4731_v63 = vpop.f32.mrf.mxu1  ;;  %5858 = vmatprep.subr.bf16.mxu0 %v1052_v19 }
 0x1bc   : > { %16889 = vst [vmem:[#allocation47_spill] sm:$0xff] %v12694_v36  ;;  %v12696_v33 = vadd.f32 %v4731_v63, %v4278_v10  ;;  %v4280_v9 = vpop.f32.mrf.mxu0 }
 0x1bd   : > { %v4733_v57 = vpop.f32.mrf.mxu1 }
 0x1be   : > { %16890 = vst [vmem:[#allocation48_spill] sm:$0xff] %v12696_v33  ;;  %v12701_v45 = vadd.f32 %v4733_v57, %v4280_v9  ;;  %v4282_v47 = vpop.f32.mrf.mxu0  ;;  %5859 = vmatpush1.bf16.msra.mxu0 %v1051_v35  ;;  %v10836_v35 = vld [vmem:[%s11762_s12 + $0x1c8] ss:$44 sps:$4 sm:$0xff]   ;;  %v10839_v9 = vld [vmem:[%s11762_s12 + $0x1d0] ss:$44 sps:$4 sm:$0xff]  }
 0x1bf   : > { %v4735_v4 = vpop.f32.mrf.mxu1  ;;  %v10844_v57 = vld [vmem:[%s11762_s12 + $0x224] ss:$44 sps:$4 sm:$0xff]  }
 0x1c0   : > { %16891 = vst [vmem:[#allocation49_spill] sm:$0xff] %v12701_v45  ;;  %v12704_v27 = vadd.f32 %v4735_v4, %v4282_v47  ;;  %v4286_v43 = vpop.f32.mrf.mxu0  ;;  %5011 = vmatmul.mubr.bf16.gmra.mxu0 %v10830_v14  ;;  %v10847_v4 = vld [vmem:[%s11762_s12 + $0x22c] ss:$44 sps:$4 sm:$0xff]   ;;  %v10853_v33 = vld [vmem:[%s11762_s12 + $0x284] ss:$44 sps:$4 sm:$0xff]  }
 0x1c1   : > { %v4739_v19 = vpop.f32.mrf.mxu1  ;;  %5464 = vmatmul.mubr.bf16.gmra.mxu1 %v10833_v30  ;;  %5020 = vmatprep.mubr.bf16.mxu0 %v10838_v58 }
 0x1c2   : > { %16892 = vst [vmem:[#allocation50_spill] sm:$0xff] %v12704_v27  ;;  %v12706_v3 = vadd.f32 %v4739_v19, %v4286_v43  ;;  %v4288_v23 = vpop.f32.mrf.mxu0  ;;  %5473 = vmatprep.mubr.bf16.mxu1 %v10841_v17 }
 0x1c3   : > { %v4741_v32 = vpop.f32.mrf.mxu1 }
 0x1c4   : > { %16893 = vst [vmem:[#allocation51_spill] sm:$0xff] %v12706_v3  ;;  %v12708_v12 = vadd.f32 %v4741_v32, %v4288_v23  ;;  %v4290_v10 = vpop.f32.mrf.mxu0  ;;  %v10842_v32 = vld [vmem:[%s11762_s12 + $0x220] ss:$44 sps:$4 sm:$0xff]   ;;  %v10850_v3 = vld [vmem:[%s11762_s12 + $0x27c] ss:$44 sps:$4 sm:$0xff]  }
 0x1c5   : > { %v4743_v63 = vpop.f32.mrf.mxu1 }
 0x1c6   : > { %16894 = vst [vmem:[#allocation52_spill] sm:$0xff] %v12708_v12  ;;  %v12713_v47 = vadd.f32 %v4743_v63, %v4290_v10  ;;  %v4292_v14 = vpop.f32.mrf.mxu0  ;;  %v568_v10 = vld [vmem:[%s16652_s0 + $0x9e8] sm:$0xff]  ;;  %v570_v63 = vld [vmem:[%s16652_s0 + $0x9f8] sm:$0xff] }
 0x1c7   : > { %v4745_v30 = vpop.f32.mrf.mxu1  ;;  %v578_v12 = vld [vmem:[%s16652_s0 + $0xa38] sm:$0xff] }
 0x1c8   : > { %16895 = vst [vmem:[#allocation53_spill] sm:$0xff] %v12713_v47  ;;  %v12716_v58 = vadd.f32 %v4745_v30, %v4292_v14  ;;  %v4296_v43 = vpop.f32.mrf.mxu0  ;;  %5021 = vmatmul.mubr.bf16.gmra.mxu0 %v10836_v35  ;;  %v567_v35 = vld [vmem:[%s16652_s0 + $0x9e0] sm:$0xff]  ;;  %v904_v14 = vmax.f32 %v568_v10, 0.0  ;;  %v906_v30 = vmax.f32 %v570_v63, 0.0  ;;  %v576_v47 = vld [vmem:[%s16652_s0 + $0xa28] sm:$0xff] }
 0x1c9   : > { %v4749_v17 = vpop.f32.mrf.mxu1  ;;  %5474 = vmatmul.mubr.bf16.gmra.mxu1 %v10839_v9  ;;  %5030 = vmatprep.mubr.bf16.mxu0 %v10844_v57  ;;  %v10845_v57 = vld [vmem:[%s11762_s12 + $0x228] ss:$44 sps:$4 sm:$0xff]   ;;  %v575_v10 = vld [vmem:[%s16652_s0 + $0xa20] sm:$0xff]  ;;  %v912_v27 = vmax.f32 %v576_v47, 0.0 }
 0x1ca   : > { %16896 = vst [vmem:[#allocation54_spill] sm:$0xff] %v12716_v58  ;;  %v12718_v19 = vadd.f32 %v4749_v17, %v4296_v43  ;;  %v4298_v23 = vpop.f32.mrf.mxu0  ;;  %5483 = vmatprep.mubr.bf16.mxu1 %v10847_v4  ;;  %v569_v4 = vld [vmem:[%s16652_s0 + $0x9f0] sm:$0xff]  ;;  %v903_v43 = vmax.f32 %v567_v35, 0.0  ;;  %v1082_v35 = vpack.c.bf16 %v906_v30, %v904_v14 }
 0x1cb   : > { %v4751_v9 = vpop.f32.mrf.mxu1  ;;  %v905_v58 = vmax.f32 %v569_v4, 0.0  ;;  %v911_v4 = vmax.f32 %v575_v10, 0.0 }
 0x1cc   : > { %16897 = vst [vmem:[#allocation55_spill] sm:$0xff] %v12718_v19  ;;  %v12734_v17 = vadd.f32 %v4751_v9, %v4298_v23  ;;  %v4300_v19 = vpop.f32.mrf.mxu0  ;;  %v914_v23 = vmax.f32 %v578_v12, 0.0  ;;  %v577_v9 = vld [vmem:[%s16652_s0 + $0xa30] sm:$0xff]  ;;  %5860 = vmatprep.subr.bf16.mxu0 %v1082_v35 }
 0x1cd   : > { %v4753_v63 = vpop.f32.mrf.mxu1  ;;  %v1081_v36 = vpack.c.bf16 %v905_v58, %v903_v43  ;;  %v913_v24 = vmax.f32 %v577_v9, 0.0  ;;  %v10851_v43 = vld [vmem:[%s11762_s12 + $0x280] ss:$44 sps:$4 sm:$0xff]  }
 0x1ce   : > { %16898 = vst [vmem:[#allocation56_spill] sm:$0xff] %v12734_v17  ;;  %v12749_v17 = vadd.f32 %v4753_v63, %v4300_v19  ;;  %v4302_v45 = vpop.f32.mrf.mxu0  ;;  %v1086_v60 = vpack.c.bf16 %v914_v23, %v912_v27 }
 0x1cf   : > { %v4755_v51 = vpop.f32.mrf.mxu1  ;;  %v1085_v12 = vpack.c.bf16 %v913_v24, %v911_v4  ;;  %5861 = vmatpush2.bf16.msra.mxu0 %v1081_v36  ;;  %v10856_v24 = vld [vmem:[%s11762_s12 + $0x2d4] ss:$44 sps:$4 sm:$0xff]  }
 0x1d0   : > { %v12752_v52 = vadd.f32 %v4755_v51, %v4302_v45  ;;  %v4306_v14 = vpop.f32.mrf.mxu0  ;;  %5031 = vmatmul.mubr.bf16.gmra.mxu0 %v10842_v32  ;;  %6309 = vmatprep.subr.bf16.mxu1 %v1086_v60  ;;  %v10848_v45 = vld [vmem:[%s11762_s12 + $0x278] ss:$44 sps:$4 sm:$0xff]  }
 0x1d1   : > { %v4759_v47 = vpop.f32.mrf.mxu1  ;;  %5484 = vmatmul.mubr.bf16.gmra.mxu1 %v10845_v57  ;;  %5040 = vmatprep.mubr.bf16.mxu0 %v10850_v3  ;;  %v10859_v57 = vld [vmem:[%s11762_s12 + $0x2dc] ss:$44 sps:$4 sm:$0xff]  }
 0x1d2   : > { %v12754_v19 = vadd.f32 %v4759_v47, %v4306_v14  ;;  %v4308_v30 = vpop.f32.mrf.mxu0  ;;  %5493 = vmatprep.mubr.bf16.mxu1 %v10853_v33  ;;  %6310 = vmatpush1.bf16.msra.mxu1 %v1085_v12  ;;  %v10854_v12 = vld [vmem:[%s11762_s12 + $0x2d0] ss:$44 sps:$4 sm:$0xff]  }
 0x1d3   : > { %v4761_v58 = vpop.f32.mrf.mxu1 }
 0x1d4   : > { %16899 = vst [vmem:[#allocation57_spill] sm:$0xff] %v12754_v19  ;;  %v12756_v27 = vadd.f32 %v4761_v58, %v4308_v30  ;;  %v4310_v51 = vpop.f32.mrf.mxu0  ;;  %v10857_v30 = vld [vmem:[%s11762_s12 + $0x2d8] ss:$44 sps:$4 sm:$0xff]  }
 0x1d5   : > { %v4763_v32 = vpop.f32.mrf.mxu1  ;;  %v10862_v58 = vld [vmem:[%s11762_s12 + $0x32c] ss:$44 sps:$4 sm:$0xff]  }
 0x1d6   : > { %16900 = vst [vmem:[#allocation58_spill] sm:$0xff] %v12756_v27  ;;  %v12761_v10 = vadd.f32 %v4763_v32, %v4310_v51  ;;  %v4312_v3 = vpop.f32.mrf.mxu0  ;;  %v10919_v19 = vld [vmem:[%s11762_s12 + $0x64c] ss:$44 sps:$4 sm:$0xff]  }
 0x1d7   : > { %v4765_v63 = vpop.f32.mrf.mxu1 }
 0x1d8   : > { %16901 = vst [vmem:[#allocation59_spill] sm:$0xff] %v12761_v10  ;;  %v12764_v33 = vadd.f32 %v4765_v63, %v4312_v3  ;;  %v4316_v36 = vpop.f32.mrf.mxu0  ;;  %5041 = vmatmul.mubr.bf16.gmra.mxu0 %v10848_v45  ;;  %v10865_v45 = vld [vmem:[%s11762_s12 + $0x334] ss:$44 sps:$4 sm:$0xff]   ;;  %v10863_v10 = vld [vmem:[%s11762_s12 + $0x330] ss:$44 sps:$4 sm:$0xff]  }
 0x1d9   : > { %v4769_v60 = vpop.f32.mrf.mxu1  ;;  %5494 = vmatmul.mubr.bf16.gmra.mxu1 %v10851_v43  ;;  %5050 = vmatprep.mubr.bf16.mxu0 %v10856_v24  ;;  %v564_v43 = vld [vmem:[%s16652_s0 + $0x9c8] sm:$0xff]  ;;  %v566_v24 = vld [vmem:[%s16652_s0 + $0x9d8] sm:$0xff] }
 0x1da   : > { %16902 = vst [vmem:[#allocation60_spill] sm:$0xff] %v12764_v33  ;;  %v12766_v35 = vadd.f32 %v4769_v60, %v4316_v36  ;;  %v4318_v23 = vpop.f32.mrf.mxu0  ;;  %5503 = vmatprep.mubr.bf16.mxu1 %v10859_v57  ;;  %v900_v57 = vmax.f32 %v564_v43, 0.0  ;;  %v902_v63 = vmax.f32 %v566_v24, 0.0 }
 0x1db   : > { %v4771_v9 = vpop.f32.mrf.mxu1 }
 0x1dc   : > { %16903 = vst [vmem:[#allocation61_spill] sm:$0xff] %v12766_v35  ;;  %v12768_v4 = vadd.f32 %v4771_v9, %v4318_v23  ;;  %v4320_v14 = vpop.f32.mrf.mxu0  ;;  %v563_v23 = vld [vmem:[%s16652_s0 + $0x9c0] sm:$0xff]  ;;  %v565_v9 = vld [vmem:[%s16652_s0 + $0x9d0] sm:$0xff] }
 0x1dd   : > { %v4773_v47 = vpop.f32.mrf.mxu1  ;;  %v899_v43 = vmax.f32 %v563_v23, 0.0  ;;  %v10860_v35 = vld [vmem:[%s11762_s12 + $0x328] ss:$44 sps:$4 sm:$0xff]  }
 0x1de   : > { %16904 = vst [vmem:[#allocation62_spill] sm:$0xff] %v12768_v4  ;;  %v12773_v51 = vadd.f32 %v4773_v47, %v4320_v14  ;;  %v4322_v32 = vpop.f32.mrf.mxu0  ;;  %v1080_v47 = vpack.c.bf16 %v902_v63, %v900_v57  ;;  %v10871_v63 = vld [vmem:[%s11762_s12 + $0x38c] ss:$44 sps:$4 sm:$0xff]  }
 0x1df   : > { %v4775_v3 = vpop.f32.mrf.mxu1 }
 0x1e0   : > { %16905 = vst [vmem:[#allocation63_spill] sm:$0xff] %v12773_v51  ;;  %v12782_v36 = vadd.f32 %v4775_v3, %v4322_v32  ;;  %v4326_v60 = vpop.f32.mrf.mxu0  ;;  %5051 = vmatmul.mubr.bf16.gmra.mxu0 %v10854_v12  ;;  %v901_v32 = vmax.f32 %v565_v9, 0.0  ;;  %5862 = vmatprep.subr.bf16.mxu0 %v1080_v47 }
 0x1e1   : > { %v4779_v14 = vpop.f32.mrf.mxu1  ;;  %5504 = vmatmul.mubr.bf16.gmra.mxu1 %v10857_v30  ;;  %5060 = vmatprep.mubr.bf16.mxu0 %v10862_v58  ;;  %v10868_v30 = vld [vmem:[%s11762_s12 + $0x384] ss:$44 sps:$4 sm:$0xff]  }
 0x1e2   : > { %16906 = vst [vmem:[#allocation64_spill] sm:$0xff] %v12782_v36  ;;  %v12790_v24 = vadd.f32 %v4779_v14, %v4326_v60  ;;  %v4328_v12 = vpop.f32.mrf.mxu0  ;;  %5513 = vmatprep.mubr.bf16.mxu1 %v10865_v45  ;;  %v1079_v36 = vpack.c.bf16 %v901_v32, %v899_v43  ;;  %v10866_v43 = vld [vmem:[%s11762_s12 + $0x380] ss:$44 sps:$4 sm:$0xff]  }
 0x1e3   : > { %v4781_v3 = vpop.f32.mrf.mxu1 }
 0x1e4   : > { %16907 = vst [vmem:[#allocation65_spill] sm:$0xff] %v12790_v24  ;;  %v12792_v51 = vadd.f32 %v4781_v3, %v4328_v12  ;;  %v4330_v4 = vpop.f32.mrf.mxu0  ;;  %5863 = vmatpush2.bf16.msra.mxu0 %v1079_v36  ;;  %v10869_v12 = vld [vmem:[%s11762_s12 + $0x388] ss:$44 sps:$4 sm:$0xff]  }
 0x1e5   : > { %v4783_v33 = vpop.f32.mrf.mxu1  ;;  %v10874_v3 = vld [vmem:[%s11762_s12 + $0x3dc] ss:$44 sps:$4 sm:$0xff]  }
 0x1e6   : > { %16908 = vst [vmem:[#allocation66_spill] sm:$0xff] %v12792_v51  ;;  %v12797_v58 = vadd.f32 %v4783_v33, %v4330_v4  ;;  %v4332_v57 = vpop.f32.mrf.mxu0 }
 0x1e7   : > { %v4785_v60 = vpop.f32.mrf.mxu1 }
 0x1e8   : > { %16909 = vst [vmem:[#allocation67_spill] sm:$0xff] %v12797_v58  ;;  %v12800_v45 = vadd.f32 %v4785_v60, %v4332_v57  ;;  %v4336_v23 = vpop.f32.mrf.mxu0  ;;  %5061 = vmatmul.mubr.bf16.gmra.mxu0 %v10860_v35  ;;  %v10877_v60 = vld [vmem:[%s11762_s12 + $0x3e4] ss:$44 sps:$4 sm:$0xff]  }
 0x1e9   : > { %v4789_v9 = vpop.f32.mrf.mxu1  ;;  %5514 = vmatmul.mubr.bf16.gmra.mxu1 %v10863_v10  ;;  %5070 = vmatprep.mubr.bf16.mxu0 %v10868_v30 }
 0x1ea   : > { %16910 = vst [vmem:[#allocation68_spill] sm:$0xff] %v12800_v45  ;;  %v12802_v14 = vadd.f32 %v4789_v9, %v4336_v23  ;;  %v4338_v47 = vpop.f32.mrf.mxu0  ;;  %5523 = vmatprep.mubr.bf16.mxu1 %v10871_v63 }
 0x1eb   : > { %v4791_v33 = vpop.f32.mrf.mxu1 }
 0x1ec   : > { %16911 = vst [vmem:[#allocation69_spill] sm:$0xff] %v12802_v14  ;;  %v12804_v4 = vadd.f32 %v4791_v33, %v4338_v47  ;;  %v4340_v36 = vpop.f32.mrf.mxu0  ;;  %v10880_v14 = vld [vmem:[%s11762_s12 + $0x434] ss:$44 sps:$4 sm:$0xff]  }
 0x1ed   : > { %v4793_v32 = vpop.f32.mrf.mxu1 }
 0x1ee   : > { %16912 = vst [vmem:[#allocation70_spill] sm:$0xff] %v12804_v4  ;;  %v12809_v57 = vadd.f32 %v4793_v32, %v4340_v36  ;;  %v4342_v35 = vpop.f32.mrf.mxu0  ;;  %v10875_v4 = vld [vmem:[%s11762_s12 + $0x3e0] ss:$44 sps:$4 sm:$0xff]  }
 0x1ef   : > { %v4795_v10 = vpop.f32.mrf.mxu1 }
 0x1f0   : > { %16913 = vst [vmem:[#allocation71_spill] sm:$0xff] %v12809_v57  ;;  %v12812_v30 = vadd.f32 %v4795_v10, %v4342_v35  ;;  %v4346_v23 = vpop.f32.mrf.mxu0  ;;  %5071 = vmatmul.mubr.bf16.gmra.mxu0 %v10866_v43  ;;  %v10872_v57 = vld [vmem:[%s11762_s12 + $0x3d8] ss:$44 sps:$4 sm:$0xff]   ;;  %v560_v43 = vld [vmem:[%s16652_s0 + $0x9a8] sm:$0xff] }
 0x1f1   : > { %v4799_v63 = vpop.f32.mrf.mxu1  ;;  %5524 = vmatmul.mubr.bf16.gmra.mxu1 %v10869_v12  ;;  %5080 = vmatprep.mubr.bf16.mxu0 %v10874_v3  ;;  %v562_v12 = vld [vmem:[%s16652_s0 + $0x9b8] sm:$0xff]  ;;  %v559_v3 = vld [vmem:[%s16652_s0 + $0x9a0] sm:$0xff] }
 0x1f2   : > { %16914 = vst [vmem:[#allocation72_spill] sm:$0xff] %v12812_v30  ;;  %v12814_v9 = vadd.f32 %v4799_v63, %v4346_v23  ;;  %v4348_v47 = vpop.f32.mrf.mxu0  ;;  %5533 = vmatprep.mubr.bf16.mxu1 %v10877_v60  ;;  %v10883_v10 = vld [vmem:[%s11762_s12 + $0x43c] ss:$44 sps:$4 sm:$0xff]   ;;  %v896_v23 = vmax.f32 %v560_v43, 0.0  ;;  %v898_v63 = vmax.f32 %v562_v12, 0.0 }
 0x1f3   : > { %v4801_v33 = vpop.f32.mrf.mxu1 }
 0x1f4   : > { %16915 = vst [vmem:[#allocation73_spill] sm:$0xff] %v12814_v9  ;;  %v12816_v36 = vadd.f32 %v4801_v33, %v4348_v47  ;;  %v4350_v32 = vpop.f32.mrf.mxu0  ;;  %v561_v47 = vld [vmem:[%s16652_s0 + $0x9b0] sm:$0xff]  ;;  %v895_v33 = vmax.f32 %v559_v3, 0.0  ;;  %v1078_v51 = vpack.c.bf16 %v898_v63, %v896_v23  ;;  %v10886_v23 = vld [vmem:[%s11762_s12 + $0x48c] ss:$44 sps:$4 sm:$0xff]  }
 0x1f5   : > { %v4803_v45 = vpop.f32.mrf.mxu1  ;;  %v897_v9 = vmax.f32 %v561_v47, 0.0  ;;  %v10878_v47 = vld [vmem:[%s11762_s12 + $0x430] ss:$44 sps:$4 sm:$0xff]  }
 0x1f6   : > { %16916 = vst [vmem:[#allocation74_spill] sm:$0xff] %v12816_v36  ;;  %v12830_v35 = vadd.f32 %v4803_v45, %v4350_v32  ;;  %v4352_v60 = vpop.f32.mrf.mxu0  ;;  %5864 = vmatprep.subr.bf16.mxu0 %v1078_v51 }
 0x1f7   : > { %v4805_v36 = vpop.f32.mrf.mxu1  ;;  %v1077_v32 = vpack.c.bf16 %v897_v9, %v895_v33 }
 0x1f8   : > { %16917 = vst [vmem:[#allocation75_spill] sm:$0xff] %v12830_v35  ;;  %v12836_v30 = vadd.f32 %v4805_v36, %v4352_v60  ;;  %v4356_v58 = vpop.f32.mrf.mxu0  ;;  %5081 = vmatmul.mubr.bf16.gmra.mxu0 %v10872_v57 }
 0x1f9   : > { %v4809_v45 = vpop.f32.mrf.mxu1  ;;  %5534 = vmatmul.mubr.bf16.gmra.mxu1 %v10875_v4  ;;  %5090 = vmatprep.mubr.bf16.mxu0 %v10880_v14  ;;  %v10889_v4 = vld [vmem:[%s11762_s12 + $0x494] ss:$44 sps:$4 sm:$0xff]  }
 0x1fa   : > { %16918 = vst [vmem:[#allocation76_spill] sm:$0xff] %v12836_v30  ;;  %v12838_v43 = vadd.f32 %v4809_v45, %v4356_v58  ;;  %v4358_v12 = vpop.f32.mrf.mxu0  ;;  %5543 = vmatprep.mubr.bf16.mxu1 %v10883_v10  ;;  %5865 = vmatpush2.bf16.msra.mxu0 %v1077_v32  ;;  %v10881_v30 = vld [vmem:[%s11762_s12 + $0x438] ss:$44 sps:$4 sm:$0xff]  }
 0x1fb   : > { %v4811_v3 = vpop.f32.mrf.mxu1 }
 0x1fc   : > { %16919 = vst [vmem:[#allocation77_spill] sm:$0xff] %v12838_v43  ;;  %v12840_v36 = vadd.f32 %v4811_v3, %v4358_v12  ;;  %v4360_v60 = vpop.f32.mrf.mxu0 }
 0x1fd   : > { %v4813_v57 = vpop.f32.mrf.mxu1 }
 0x1fe   : > { %16920 = vst [vmem:[#allocation78_spill] sm:$0xff] %v12840_v36  ;;  %v12845_v63 = vadd.f32 %v4813_v57, %v4360_v60  ;;  %v4362_v14 = vpop.f32.mrf.mxu0  ;;  %v10884_v60 = vld [vmem:[%s11762_s12 + $0x488] ss:$44 sps:$4 sm:$0xff]   ;;  %v10892_v36 = vld [vmem:[%s11762_s12 + $0x4e4] ss:$44 sps:$4 sm:$0xff]  }
 0x1ff   : > { %v4815_v58 = vpop.f32.mrf.mxu1 }
 0x200   : > { %16921 = vst [vmem:[#allocation79_spill] sm:$0xff] %v12845_v63  ;;  %v12848_v9 = vadd.f32 %v4815_v58, %v4362_v14  ;;  %v4366_v51 = vpop.f32.mrf.mxu0  ;;  %5091 = vmatmul.mubr.bf16.gmra.mxu0 %v10878_v47  ;;  %v10887_v63 = vld [vmem:[%s11762_s12 + $0x490] ss:$44 sps:$4 sm:$0xff]   ;;  %v10895_v47 = vld [vmem:[%s11762_s12 + $0x4ec] ss:$44 sps:$4 sm:$0xff]  }
 0x201   : > { %v4819_v10 = vpop.f32.mrf.mxu1  ;;  %5544 = vmatmul.mubr.bf16.gmra.mxu1 %v10881_v30  ;;  %5100 = vmatprep.mubr.bf16.mxu0 %v10886_v23 }
 0x202   : > { %16922 = vst [vmem:[#allocation80_spill] sm:$0xff] %v12848_v9  ;;  %v12850_v33 = vadd.f32 %v4819_v10, %v4366_v51  ;;  %v4368_v45 = vpop.f32.mrf.mxu0  ;;  %5553 = vmatprep.mubr.bf16.mxu1 %v10889_v4  ;;  %v556_v4 = vld [vmem:[%s16652_s0 + $0x988] sm:$0xff]  ;;  %v558_v51 = vld [vmem:[%s16652_s0 + $0x998] sm:$0xff] }
 0x203   : > { %v4821_v32 = vpop.f32.mrf.mxu1 }
 0x204   : > { %16923 = vst [vmem:[#allocation81_spill] sm:$0xff] %v12850_v33  ;;  %v12852_v12 = vadd.f32 %v4821_v32, %v4368_v45  ;;  %v4370_v3 = vpop.f32.mrf.mxu0  ;;  %v892_v45 = vmax.f32 %v556_v4, 0.0  ;;  %v894_v32 = vmax.f32 %v558_v51, 0.0  ;;  %v10893_v4 = vld [vmem:[%s11762_s12 + $0x4e8] ss:$44 sps:$4 sm:$0xff]  }
 0x205   : > { %v4823_v57 = vpop.f32.mrf.mxu1 }
 0x206   : > { %16924 = vst [vmem:[#allocation82_spill] sm:$0xff] %v12852_v12  ;;  %v12857_v14 = vadd.f32 %v4823_v57, %v4370_v3  ;;  %v4372_v58 = vpop.f32.mrf.mxu0  ;;  %v10901_v12 = vld [vmem:[%s11762_s12 + $0x544] ss:$44 sps:$4 sm:$0xff]  }
 0x207   : > { %v4825_v9 = vpop.f32.mrf.mxu1 }
 0x208   : > { %16925 = vst [vmem:[#allocation83_spill] sm:$0xff] %v12857_v14  ;;  %v12860_v43 = vadd.f32 %v4825_v9, %v4372_v58  ;;  %v4376_v30 = vpop.f32.mrf.mxu0  ;;  %5101 = vmatmul.mubr.bf16.gmra.mxu0 %v10884_v60  ;;  %v10890_v58 = vld [vmem:[%s11762_s12 + $0x4e0] ss:$44 sps:$4 sm:$0xff]  }
 0x209   : > { %v4829_v23 = vpop.f32.mrf.mxu1  ;;  %5554 = vmatmul.mubr.bf16.gmra.mxu1 %v10887_v63  ;;  %5110 = vmatprep.mubr.bf16.mxu0 %v10892_v36  ;;  %v555_v36 = vld [vmem:[%s16652_s0 + $0x980] sm:$0xff]  ;;  %v557_v63 = vld [vmem:[%s16652_s0 + $0x990] sm:$0xff] }
 0x20a   : > { %16926 = vst [vmem:[#allocation84_spill] sm:$0xff] %v12860_v43  ;;  %v12868_v10 = vadd.f32 %v4829_v23, %v4376_v30  ;;  %v4378_v9 = vpop.f32.mrf.mxu0  ;;  %5563 = vmatprep.mubr.bf16.mxu1 %v10895_v47  ;;  %v1076_v30 = vpack.c.bf16 %v894_v32, %v892_v45  ;;  %v891_v23 = vmax.f32 %v555_v36, 0.0  ;;  %v10898_v43 = vld [vmem:[%s11762_s12 + $0x53c] ss:$44 sps:$4 sm:$0xff]  }
 0x20b   : > { %v4831_v3 = vpop.f32.mrf.mxu1 }
 0x20c   : > { %16927 = vst [vmem:[#allocation85_spill] sm:$0xff] %v12868_v10  ;;  %v12876_v60 = vadd.f32 %v4831_v3, %v4378_v9  ;;  %v4380_v57 = vpop.f32.mrf.mxu0  ;;  %v893_v10 = vmax.f32 %v557_v63, 0.0  ;;  %5866 = vmatprep.subr.bf16.mxu0 %v1076_v30 }
 0x20d   : > { %v4833_v47 = vpop.f32.mrf.mxu1 }
 0x20e   : > { %16928 = vst [vmem:[#allocation86_spill] sm:$0xff] %v12876_v60  ;;  %v12881_v51 = vadd.f32 %v4833_v47, %v4380_v57  ;;  %v4382_v14 = vpop.f32.mrf.mxu0  ;;  %v1075_v33 = vpack.c.bf16 %v893_v10, %v891_v23  ;;  %v10896_v57 = vld [vmem:[%s11762_s12 + $0x538] ss:$44 sps:$4 sm:$0xff]   ;;  %v10907_v47 = vld [vmem:[%s11762_s12 + $0x59c] ss:$44 sps:$4 sm:$0xff]  }
 0x20f   : > { %v4835_v35 = vpop.f32.mrf.mxu1 }
 0x210   : > { %16929 = vst [vmem:[#allocation87_spill] sm:$0xff] %v12881_v51  ;;  %v12884_v24 = vadd.f32 %v4835_v35, %v4382_v14  ;;  %v4386_v9 = vpop.f32.mrf.mxu0  ;;  %5111 = vmatmul.mubr.bf16.gmra.mxu0 %v10890_v58  ;;  %v10899_v35 = vld [vmem:[%s11762_s12 + $0x540] ss:$44 sps:$4 sm:$0xff]  }
 0x211   : > { %v4839_v45 = vpop.f32.mrf.mxu1  ;;  %5564 = vmatmul.mubr.bf16.gmra.mxu1 %v10893_v4  ;;  %5120 = vmatprep.mubr.bf16.mxu0 %v10898_v43  ;;  %v10904_v14 = vld [vmem:[%s11762_s12 + $0x594] ss:$44 sps:$4 sm:$0xff]  }
 0x212   : > { %16930 = vst [vmem:[#allocation88_spill] sm:$0xff] %v12884_v24  ;;  %v12886_v32 = vadd.f32 %v4839_v45, %v4386_v9  ;;  %v4388_v3 = vpop.f32.mrf.mxu0  ;;  %5573 = vmatprep.mubr.bf16.mxu1 %v10901_v12  ;;  %5867 = vmatpush2.bf16.msra.mxu0 %v1075_v33  ;;  %v10916_v24 = vld [vmem:[%s11762_s12 + $0x644] ss:$44 sps:$4 sm:$0xff]  }
 0x213   : > { %v4841_v36 = vpop.f32.mrf.mxu1 }
 0x214   : > { %16931 = vst [vmem:[#allocation89_spill] sm:$0xff] %v12886_v32  ;;  %v12888_v63 = vadd.f32 %v4841_v36, %v4388_v3  ;;  %v4390_v10 = vpop.f32.mrf.mxu0  ;;  %v10910_v32 = vld [vmem:[%s11762_s12 + $0x5ec] ss:$44 sps:$4 sm:$0xff]  }
 0x215   : > { %v4843_v30 = vpop.f32.mrf.mxu1 }
 0x216   : > { %16932 = vst [vmem:[#allocation90_spill] sm:$0xff] %v12888_v63  ;;  %v12893_v23 = vadd.f32 %v4843_v30, %v4390_v10  ;;  %v4392_v58 = vpop.f32.mrf.mxu0  ;;  %v10902_v30 = vld [vmem:[%s11762_s12 + $0x590] ss:$44 sps:$4 sm:$0xff]   ;;  %v10905_v63 = vld [vmem:[%s11762_s12 + $0x598] ss:$44 sps:$4 sm:$0xff]  }
 0x217   : > { %v4845_v43 = vpop.f32.mrf.mxu1 }
 0x218   : > { %16933 = vst [vmem:[#allocation91_spill] sm:$0xff] %v12893_v23  ;;  %v12896_v4 = vadd.f32 %v4845_v43, %v4392_v58  ;;  %v4396_v12 = vpop.f32.mrf.mxu0  ;;  %5121 = vmatmul.mubr.bf16.gmra.mxu0 %v10896_v57  ;;  %v10913_v57 = vld [vmem:[%s11762_s12 + $0x5f4] ss:$44 sps:$4 sm:$0xff]  }
 0x219   : > { %v4849_v33 = vpop.f32.mrf.mxu1  ;;  %5574 = vmatmul.mubr.bf16.gmra.mxu1 %v10899_v35  ;;  %5130 = vmatprep.mubr.bf16.mxu0 %v10904_v14  ;;  %v552_v35 = vld [vmem:[%s16652_s0 + $0x968] sm:$0xff]  ;;  %v554_v14 = vld [vmem:[%s16652_s0 + $0x978] sm:$0xff] }
 0x21a   : > { %16934 = vst [vmem:[#allocation92_spill] sm:$0xff] %v12896_v4  ;;  %v12898_v9 = vadd.f32 %v4849_v33, %v4396_v12  ;;  %v4398_v45 = vpop.f32.mrf.mxu0  ;;  %5583 = vmatprep.mubr.bf16.mxu1 %v10907_v47  ;;  %v551_v47 = vld [vmem:[%s16652_s0 + $0x960] sm:$0xff] }
 0x21b   : > { %v4851_v3 = vpop.f32.mrf.mxu1 }
 0x21c   : > { %16935 = vst [vmem:[#allocation93_spill] sm:$0xff] %v12898_v9  ;;  %v12900_v36 = vadd.f32 %v4851_v3, %v4398_v45  ;;  %v4400_v10 = vpop.f32.mrf.mxu0  ;;  %v890_v45 = vmax.f32 %v554_v14, 0.0  ;;  %v553_v3 = vld [vmem:[%s16652_s0 + $0x970] sm:$0xff]  ;;  %v572_v9 = vld [vmem:[%s16652_s0 + $0xa08] sm:$0xff] }
 0x21d   : > { %v4853_v23 = vpop.f32.mrf.mxu1  ;;  %v908_v14 = vmax.f32 %v572_v9, 0.0 }
 0x21e   : > { %16936 = vst [vmem:[#allocation94_spill] sm:$0xff] %v12900_v36  ;;  %v12905_v58 = vadd.f32 %v4853_v23, %v4400_v10  ;;  %v4402_v43 = vpop.f32.mrf.mxu0  ;;  %v888_v23 = vmax.f32 %v552_v35, 0.0  ;;  %v887_v10 = vmax.f32 %v551_v47, 0.0  ;;  %v889_v36 = vmax.f32 %v553_v3, 0.0  ;;  %v573_v47 = vld [vmem:[%s16652_s0 + $0xa10] sm:$0xff] }
 0x21f   : > { %v4855_v4 = vpop.f32.mrf.mxu1 }
 0x220   : > { %16937 = vst [vmem:[#allocation95_spill] sm:$0xff] %v12905_v58  ;;  %v12917_v12 = vadd.f32 %v4855_v4, %v4402_v43  ;;  %v4406_v33 = vpop.f32.mrf.mxu0  ;;  %5131 = vmatmul.mubr.bf16.gmra.mxu0 %v10902_v30  ;;  %v574_v4 = vld [vmem:[%s16652_s0 + $0xa18] sm:$0xff]  ;;  %v1074_v35 = vpack.c.bf16 %v890_v45, %v888_v23  ;;  %v10908_v23 = vld [vmem:[%s11762_s12 + $0x5e8] ss:$44 sps:$4 sm:$0xff]  }
 0x221   : > { %v4859_v58 = vpop.f32.mrf.mxu1  ;;  %5584 = vmatmul.mubr.bf16.gmra.mxu1 %v10905_v63  ;;  %5140 = vmatprep.mubr.bf16.mxu0 %v10910_v32  ;;  %v910_v63 = vmax.f32 %v574_v4, 0.0  ;;  %v571_v32 = vld [vmem:[%s16652_s0 + $0xa00] sm:$0xff]  ;;  %v10911_v4 = vld [vmem:[%s11762_s12 + $0x5f0] ss:$44 sps:$4 sm:$0xff]  }
 0x222   : > { %16938 = vst [vmem:[#allocation96_spill] sm:$0xff] %v12917_v12  ;;  %v12928_v30 = vadd.f32 %v4859_v58, %v4406_v33  ;;  %v4408_v43 = vpop.f32.mrf.mxu0  ;;  %5593 = vmatprep.mubr.bf16.mxu1 %v10913_v57  ;;  %v1073_v12 = vpack.c.bf16 %v889_v36, %v887_v10  ;;  %v907_v58 = vmax.f32 %v571_v32, 0.0  ;;  %v909_v33 = vmax.f32 %v573_v47, 0.0  ;;  %5868 = vmatprep.subr.bf16.mxu0 %v1074_v35 }
 0x223   : > { %v4861_v3 = vpop.f32.mrf.mxu1  ;;  %v1084_v9 = vpack.c.bf16 %v910_v63, %v908_v14 }
 0x224   : > { %16939 = vst [vmem:[#allocation97_spill] sm:$0xff] %v12928_v30  ;;  %v12936_v30 = vadd.f32 %v4861_v3, %v4408_v43  ;;  %v4410_v57 = vpop.f32.mrf.mxu0  ;;  %5869 = vmatpush2.bf16.msra.mxu0 %v1073_v12  ;;  %v1083_v51 = vpack.c.bf16 %v909_v33, %v907_v58  ;;  %v10914_v3 = vld [vmem:[%s11762_s12 + $0x640] ss:$44 sps:$4 sm:$0xff]   ;;  %v10922_v33 = vld [vmem:[%s11762_s12 + $0x69c] ss:$44 sps:$4 sm:$0xff]  }
 0x225   : > { %v4863_v45 = vpop.f32.mrf.mxu1  ;;  %6311 = vmatprep.subr.bf16.mxu1 %v1084_v9 }
 0x226   : > { %v12941_v60 = vadd.f32 %v4863_v45, %v4410_v57  ;;  %v4412_v27 = vpop.f32.mrf.mxu0  ;;  %6312 = vmatpush1.bf16.msra.mxu1 %v1083_v51  ;;  %v10917_v51 = vld [vmem:[%s11762_s12 + $0x648] ss:$44 sps:$4 sm:$0xff]  }
 0x227   : > { %v4865_v36 = vpop.f32.mrf.mxu1 }
 0x228   : > { %v12944_v10 = vadd.f32 %v4865_v36, %v4412_v27  ;;  %v4416_v43 = vpop.f32.mrf.mxu0  ;;  %5141 = vmatmul.mubr.bf16.gmra.mxu0 %v10908_v23  ;;  %v10925_v23 = vld [vmem:[%s11762_s12 + $0x6a4] ss:$44 sps:$4 sm:$0xff]  }
 0x229   : > { %v4869_v35 = vpop.f32.mrf.mxu1  ;;  %5594 = vmatmul.mubr.bf16.gmra.mxu1 %v10911_v4  ;;  %5150 = vmatprep.mubr.bf16.mxu0 %v10916_v24 }
 0x22a   : > { %v12946_v12 = vadd.f32 %v4869_v35, %v4416_v43  ;;  %v4418_v14 = vpop.f32.mrf.mxu0  ;;  %5603 = vmatprep.mubr.bf16.mxu1 %v10919_v19  ;;  %v548_v35 = vld [vmem:[%s16652_s0 + $0x948] sm:$0xff] }
 0x22b   : > { %v4871_v63 = vpop.f32.mrf.mxu1 }
 0x22c   : > { %16940 = vst [vmem:[#allocation98_spill] sm:$0xff] %v12946_v12  ;;  %v12948_v32 = vadd.f32 %v4871_v63, %v4418_v14  ;;  %v4420_v47 = vpop.f32.mrf.mxu0  ;;  %v550_v14 = vld [vmem:[%s16652_s0 + $0x958] sm:$0xff] }
 0x22d   : > { %v4873_v58 = vpop.f32.mrf.mxu1 }
 0x22e   : > { %16941 = vst [vmem:[#allocation99_spill] sm:$0xff] %v12948_v32  ;;  %v12953_v27 = vadd.f32 %v4873_v58, %v4420_v47  ;;  %v4422_v57 = vpop.f32.mrf.mxu0  ;;  %v10923_v58 = vld [vmem:[%s11762_s12 + $0x6a0] ss:$44 sps:$4 sm:$0xff]  }
 0x22f   : > { %v4875_v9 = vpop.f32.mrf.mxu1 }
 0x230   : > { %16942 = vst [vmem:[#allocation100_spill] sm:$0xff] %v12953_v27  ;;  %v12956_v24 = vadd.f32 %v4875_v9, %v4422_v57  ;;  %v4426_v45 = vpop.f32.mrf.mxu0  ;;  %5151 = vmatmul.mubr.bf16.gmra.mxu0 %v10914_v3  ;;  %v10920_v3 = vld [vmem:[%s11762_s12 + $0x698] ss:$44 sps:$4 sm:$0xff]   ;;  %v10928_v9 = vld [vmem:[%s11762_s12 + $0x6f4] ss:$44 sps:$4 sm:$0xff]  }
 0x231   : > { %v4879_v19 = vpop.f32.mrf.mxu1  ;;  %5604 = vmatmul.mubr.bf16.gmra.mxu1 %v10917_v51  ;;  %5160 = vmatprep.mubr.bf16.mxu0 %v10922_v33  ;;  %v884_v51 = vmax.f32 %v548_v35, 0.0  ;;  %v886_v33 = vmax.f32 %v550_v14, 0.0 }
 0x232   : > { %16943 = vst [vmem:[#allocation101_spill] sm:$0xff] %v12956_v24  ;;  %v12958_v4 = vadd.f32 %v4879_v19, %v4426_v45  ;;  %v4428_v36 = vpop.f32.mrf.mxu0  ;;  %5613 = vmatprep.mubr.bf16.mxu1 %v10925_v23  ;;  %v547_v23 = vld [vmem:[%s16652_s0 + $0x940] sm:$0xff]  ;;  %v549_v45 = vld [vmem:[%s16652_s0 + $0x950] sm:$0xff] }
 0x233   : > { %v4881_v43 = vpop.f32.mrf.mxu1  ;;  %v885_v24 = vmax.f32 %v549_v45, 0.0  ;;  %v10929_v45 = vld [vmem:[%s11762_s12 + $0x6f8] ss:$44 sps:$4 sm:$0xff]  }
 0x234   : > { %16944 = vst [vmem:[#allocation102_spill] sm:$0xff] %v12958_v4  ;;  %v12966_v63 = vadd.f32 %v4881_v43, %v4428_v36  ;;  %v4430_v47 = vpop.f32.mrf.mxu0  ;;  %v10931_v36 = vld [vmem:[%s11762_s12 + $0x6fc] ss:$44 sps:$4 sm:$0xff]   ;;  %v1072_v43 = vpack.c.bf16 %v886_v33, %v884_v51 }
 0x235   : > { %v4883_v57 = vpop.f32.mrf.mxu1 }
 0x236   : > { %16945 = vst [vmem:[#allocation103_spill] sm:$0xff] %v12966_v63  ;;  %v12977_v19 = vadd.f32 %v4883_v57, %v4430_v47  ;;  %v4432_v4 = vpop.f32.mrf.mxu0  ;;  %v883_v63 = vmax.f32 %v547_v23, 0.0  ;;  %5870 = vmatprep.subr.bf16.mxu0 %v1072_v43 }
 0x237   : > { %v4885_v27 = vpop.f32.mrf.mxu1 }
 0x238   : > { %16946 = vst [vmem:[#allocation104_spill] sm:$0xff] %v12977_v19  ;;  %v12980_v35 = vadd.f32 %v4885_v27, %v4432_v4  ;;  %v4436_v14 = vpop.f32.mrf.mxu0  ;;  %5161 = vmatmul.mubr.bf16.gmra.mxu0 %v10920_v3  ;;  %v1071_v32 = vpack.c.bf16 %v885_v24, %v883_v63  ;;  %v10926_v4 = vld [vmem:[%s11762_s12 + $0x6f0] ss:$44 sps:$4 sm:$0xff]   ;;  %v10934_v3 = vld [vmem:[%s11762_s12 + $0x74c] ss:$44 sps:$4 sm:$0xff]  }
 0x239   : > { %v4889_v12 = vpop.f32.mrf.mxu1  ;;  %5614 = vmatmul.mubr.bf16.gmra.mxu1 %v10923_v58  ;;  %5170 = vmatprep.mubr.bf16.mxu0 %v10928_v9  ;;  %v10937_v63 = vld [vmem:[%s11762_s12 + $0x754] ss:$44 sps:$4 sm:$0xff]  }
 0x23a   : > { %16947 = vst [vmem:[#allocation105_spill] sm:$0xff] %v12980_v35  ;;  %v12982_v47 = vadd.f32 %v4889_v12, %v4436_v14  ;;  %v4438_v57 = vpop.f32.mrf.mxu0  ;;  %5623 = vmatprep.mubr.bf16.mxu1 %v10931_v36  ;;  %5871 = vmatpush2.bf16.msra.mxu0 %v1071_v32 }
 0x23b   : > { %v4891_v51 = vpop.f32.mrf.mxu1 }
 0x23c   : > { %16948 = vst [vmem:[#allocation106_spill] sm:$0xff] %v12982_v47  ;;  %v12984_v33 = vadd.f32 %v4891_v51, %v4438_v57  ;;  %v4440_v27 = vpop.f32.mrf.mxu0 }
 0x23d   : > { %v4893_v23 = vpop.f32.mrf.mxu1 }
 0x23e   : > { %16949 = vst [vmem:[#allocation107_spill] sm:$0xff] %v12984_v33  ;;  %v12989_v35 = vadd.f32 %v4893_v23, %v4440_v27  ;;  %v4442_v24 = vpop.f32.mrf.mxu0  ;;  %v10932_v27 = vld [vmem:[%s11762_s12 + $0x748] ss:$44 sps:$4 sm:$0xff]   ;;  %v10940_v33 = vld [vmem:[%s11762_s12 + $0x7a4] ss:$44 sps:$4 sm:$0xff]  }
 0x23f   : > { %v4895_v58 = vpop.f32.mrf.mxu1 }
 0x240   : > { %16950 = vst [vmem:[#allocation108_spill] sm:$0xff] %v12989_v35  ;;  %v12992_v12 = vadd.f32 %v4895_v58, %v4442_v24  ;;  %v4446_v9 = vpop.f32.mrf.mxu0  ;;  %5171 = vmatmul.mubr.bf16.gmra.mxu0 %v10926_v4  ;;  %v10935_v35 = vld [vmem:[%s11762_s12 + $0x750] ss:$44 sps:$4 sm:$0xff]   ;;  %v10943_v4 = vld [vmem:[%s11762_s12 + $0x7ac] ss:$44 sps:$4 sm:$0xff]  }
 0x241   : > { %v4899_v32 = vpop.f32.mrf.mxu1  ;;  %5624 = vmatmul.mubr.bf16.gmra.mxu1 %v10929_v45  ;;  %5180 = vmatprep.mubr.bf16.mxu0 %v10934_v3 }
 0x242   : > { %16951 = vst [vmem:[#allocation109_spill] sm:$0xff] %v12992_v12  ;;  %v12994_v36 = vadd.f32 %v4899_v32, %v4446_v9  ;;  %v4448_v43 = vpop.f32.mrf.mxu0  ;;  %5633 = vmatprep.mubr.bf16.mxu1 %v10937_v63  ;;  %v544_v63 = vld [vmem:[%s16652_s0 + $0x928] sm:$0xff]  ;;  %v546_v9 = vld [vmem:[%s16652_s0 + $0x938] sm:$0xff] }
 0x243   : > { %v4901_v14 = vpop.f32.mrf.mxu1 }
 0x244   : > { %16952 = vst [vmem:[#allocation110_spill] sm:$0xff] %v12994_v36  ;;  %v12996_v57 = vadd.f32 %v4901_v14, %v4448_v43  ;;  %v4450_v51 = vpop.f32.mrf.mxu0  ;;  %v545_v14 = vld [vmem:[%s16652_s0 + $0x930] sm:$0xff] }
 0x245   : > { %v4903_v23 = vpop.f32.mrf.mxu1 }
 0x246   : > { %16953 = vst [vmem:[#allocation111_spill] sm:$0xff] %v12996_v57  ;;  %v13001_v24 = vadd.f32 %v4903_v23, %v4450_v51  ;;  %v4452_v58 = vpop.f32.mrf.mxu0  ;;  %v881_v23 = vmax.f32 %v545_v14, 0.0 }
 0x247   : > { %v4905_v12 = vpop.f32.mrf.mxu1 }
 0x248   : > { %16954 = vst [vmem:[#allocation112_spill] sm:$0xff] %v13001_v24  ;;  %v13004_v47 = vadd.f32 %v4905_v12, %v4452_v58  ;;  %v4456_v45 = vpop.f32.mrf.mxu0  ;;  %5181 = vmatmul.mubr.bf16.gmra.mxu0 %v10932_v27  ;;  %v543_v12 = vld [vmem:[%s16652_s0 + $0x920] sm:$0xff] }
 0x249   : > { %v4909_v3 = vpop.f32.mrf.mxu1  ;;  %5634 = vmatmul.mubr.bf16.gmra.mxu1 %v10935_v35  ;;  %5190 = vmatprep.mubr.bf16.mxu0 %v10940_v33  ;;  %v880_v35 = vmax.f32 %v544_v63, 0.0  ;;  %v882_v33 = vmax.f32 %v546_v9, 0.0  ;;  %v879_v51 = vmax.f32 %v543_v12, 0.0  ;;  %v10938_v24 = vld [vmem:[%s11762_s12 + $0x7a0] ss:$44 sps:$4 sm:$0xff]  }
 0x24a   : > { %16955 = vst [vmem:[#allocation113_spill] sm:$0xff] %v13004_v47  ;;  %v13015_v32 = vadd.f32 %v4909_v3, %v4456_v45  ;;  %v4458_v43 = vpop.f32.mrf.mxu0  ;;  %5643 = vmatprep.mubr.bf16.mxu1 %v10943_v4  ;;  %v10941_v45 = vld [vmem:[%s11762_s12 + $0x7a8] ss:$44 sps:$4 sm:$0xff]   ;;  %v10949_v9 = vld [vmem:[%s11762_s12 + $0x804] ss:$44 sps:$4 sm:$0xff]  }
 0x24b   : > { %v4911_v27 = vpop.f32.mrf.mxu1  ;;  %v1070_v57 = vpack.c.bf16 %v882_v33, %v880_v35  ;;  %v10946_v3 = vld [vmem:[%s11762_s12 + $0x7fc] ss:$44 sps:$4 sm:$0xff]  }
 0x24c   : > { %16956 = vst [vmem:[#allocation114_spill] sm:$0xff] %v13015_v32  ;;  %v13020_v58 = vadd.f32 %v4911_v27, %v4458_v43  ;;  %v4460_v47 = vpop.f32.mrf.mxu0  ;;  %v1069_v32 = vpack.c.bf16 %v881_v23, %v879_v51  ;;  %v10944_v51 = vld [vmem:[%s11762_s12 + $0x7f8] ss:$44 sps:$4 sm:$0xff]   ;;  %v10952_v23 = vld [vmem:[%s11762_s12 + $0x854] ss:$44 sps:$4 sm:$0xff]  }
 0x24d   : > { %v4913_v36 = vpop.f32.mrf.mxu1  ;;  %5872 = vmatprep.subr.bf16.mxu0 %v1070_v57 }
 0x24e   : > { %v13025_v4 = vadd.f32 %v4913_v36, %v4460_v47  ;;  %v4462_v63 = vpop.f32.mrf.mxu0  ;;  %5873 = vmatpush2.bf16.msra.mxu0 %v1069_v32  ;;  %v10947_v32 = vld [vmem:[%s11762_s12 + $0x800] ss:$44 sps:$4 sm:$0xff]  }
 0x24f   : > { %v4915_v19 = vpop.f32.mrf.mxu1 }
 0x250   : > { %16957 = vst [vmem:[#allocation115_spill] sm:$0xff] %v13025_v4  ;;  %v13028_v12 = vadd.f32 %v4915_v19, %v4462_v63  ;;  %v4466_v43 = vpop.f32.mrf.mxu0  ;;  %5191 = vmatmul.mubr.bf16.gmra.mxu0 %v10938_v24  ;;  %v10955_v63 = vld [vmem:[%s11762_s12 + $0x85c] ss:$44 sps:$4 sm:$0xff]  }
 0x251   : > { %v4919_v35 = vpop.f32.mrf.mxu1  ;;  %5644 = vmatmul.mubr.bf16.gmra.mxu1 %v10941_v45  ;;  %5200 = vmatprep.mubr.bf16.mxu0 %v10946_v3 }
 0x252   : > { %16958 = vst [vmem:[#allocation116_spill] sm:$0xff] %v13028_v12  ;;  %v13030_v33 = vadd.f32 %v4919_v35, %v4466_v43  ;;  %v4468_v47 = vpop.f32.mrf.mxu0  ;;  %5653 = vmatprep.mubr.bf16.mxu1 %v10949_v9  ;;  %v10958_v12 = vld [vmem:[%s11762_s12 + $0x8ac] ss:$44 sps:$4 sm:$0xff]  }
 0x253   : > { %v4921_v36 = vpop.f32.mrf.mxu1 }
 0x254   : > { %16959 = vst [vmem:[#allocation117_spill] sm:$0xff] %v13030_v33  ;;  %v13032_v14 = vadd.f32 %v4921_v36, %v4468_v47  ;;  %v4470_v57 = vpop.f32.mrf.mxu0 }
 0x255   : > { %v4923_v27 = vpop.f32.mrf.mxu1 }
 0x256   : > { %16960 = vst [vmem:[#allocation118_spill] sm:$0xff] %v13032_v14  ;;  %v13037_v19 = vadd.f32 %v4923_v27, %v4470_v57  ;;  %v4472_v24 = vpop.f32.mrf.mxu0  ;;  %v10953_v14 = vld [vmem:[%s11762_s12 + $0x858] ss:$44 sps:$4 sm:$0xff]  }
 0x257   : > { %v4925_v45 = vpop.f32.mrf.mxu1 }
 0x258   : > { %16961 = vst [vmem:[#allocation119_spill] sm:$0xff] %v13037_v19  ;;  %v13040_v3 = vadd.f32 %v4925_v45, %v4472_v24  ;;  %v4476_v43 = vpop.f32.mrf.mxu0  ;;  %5201 = vmatmul.mubr.bf16.gmra.mxu0 %v10944_v51  ;;  %v10950_v19 = vld [vmem:[%s11762_s12 + $0x850] ss:$44 sps:$4 sm:$0xff]   ;;  %v540_v51 = vld [vmem:[%s16652_s0 + $0x908] sm:$0xff] }
 0x259   : > { %v4929_v9 = vpop.f32.mrf.mxu1  ;;  %5654 = vmatmul.mubr.bf16.gmra.mxu1 %v10947_v32  ;;  %5210 = vmatprep.mubr.bf16.mxu0 %v10952_v23  ;;  %v542_v32 = vld [vmem:[%s16652_s0 + $0x918] sm:$0xff]  ;;  %v876_v45 = vmax.f32 %v540_v51, 0.0 }
 0x25a   : > { %16962 = vst [vmem:[#allocation120_spill] sm:$0xff] %v13040_v3  ;;  %v13042_v35 = vadd.f32 %v4929_v9, %v4476_v43  ;;  %v4478_v47 = vpop.f32.mrf.mxu0  ;;  %5663 = vmatprep.mubr.bf16.mxu1 %v10955_v63  ;;  %v10961_v63 = vld [vmem:[%s11762_s12 + $0x8b4] ss:$44 sps:$4 sm:$0xff]   ;;  %v878_v43 = vmax.f32 %v542_v32, 0.0 }
 0x25b   : > { %v4931_v36 = vpop.f32.mrf.mxu1 }
 0x25c   : > { %16963 = vst [vmem:[#allocation121_spill] sm:$0xff] %v13042_v35  ;;  %v13044_v57 = vadd.f32 %v4931_v36, %v4478_v47  ;;  %v4480_v27 = vpop.f32.mrf.mxu0  ;;  %v539_v47 = vld [vmem:[%s16652_s0 + $0x900] sm:$0xff]  ;;  %v541_v36 = vld [vmem:[%s16652_s0 + $0x910] sm:$0xff] }
 0x25d   : > { %v4933_v33 = vpop.f32.mrf.mxu1 }
 0x25e   : > { %16964 = vst [vmem:[#allocation122_spill] sm:$0xff] %v13044_v57  ;;  %v13055_v23 = vadd.f32 %v4933_v33, %v4480_v27  ;;  %v4482_v24 = vpop.f32.mrf.mxu0  ;;  %v1068_v33 = vpack.c.bf16 %v878_v43, %v876_v45  ;;  %v875_v27 = vmax.f32 %v539_v47, 0.0  ;;  %v10956_v43 = vld [vmem:[%s11762_s12 + $0x8a8] ss:$44 sps:$4 sm:$0xff]  }
 0x25f   : > { %v4935_v9 = vpop.f32.mrf.mxu1 }
 0x260   : > { %16965 = vst [vmem:[#allocation123_spill] sm:$0xff] %v13055_v23  ;;  %v13064_v57 = vadd.f32 %v4935_v9, %v4482_v24  ;;  %v4972_v35 = vpop.f32.mrf.mxu0  ;;  %5211 = vmatmul.mubr.bf16.gmra.mxu0 %v10950_v19  ;;  %v877_v23 = vmax.f32 %v541_v36, 0.0  ;;  %5874 = vmatprep.subr.bf16.mxu0 %v1068_v33 }
 0x261   : > { %v4973_v51 = vadd.f32 %v4972_v35, %v12322_v38  ;;  %v5425_v32 = vpop.f32.mrf.mxu1  ;;  %5664 = vmatmul.mubr.bf16.gmra.mxu1 %v10953_v14  ;;  %5220 = vmatprep.mubr.bf16.mxu0 %v10958_v12  ;;  %v10959_v35 = vld [vmem:[%s11762_s12 + $0x8b0] ss:$44 sps:$4 sm:$0xff]  }
 0x262   : > { %16966 = vst [vmem:[#allocation124_spill] sm:$0xff] %v13064_v57  ;;  %v4974_v3 = vpop.f32.mrf.mxu0  ;;  %5673 = vmatprep.mubr.bf16.mxu1 %v10961_v63  ;;  %v1067_v4 = vpack.c.bf16 %v877_v23, %v875_v27  ;;  %v10964_v12 = vld [vmem:[%s11762_s12 + $0x904] ss:$44 sps:$4 sm:$0xff]   ;;  %v10967_v57 = vld [vmem:[%s11762_s12 + $0x90c] ss:$44 sps:$4 sm:$0xff]  }
 0x263   : > { %v13067_v24 = vadd.f32 %v5425_v32, %v4973_v51  ;;  %v4975_v19 = vadd.f32 %v4974_v3, %v12327_v46  ;;  %v5427_v9 = vpop.f32.mrf.mxu1 }
 0x264   : > { %v4976_v45 = vpop.f32.mrf.mxu0  ;;  %5875 = vmatpush2.bf16.msra.mxu0 %v1067_v4 }
 0x265   : > { %v13071_v47 = vadd.f32 %v5427_v9, %v4975_v19  ;;  %v4977_v38 = vadd.f32 %v4976_v45, %v12329_v49  ;;  %v5429_v14 = vpop.f32.mrf.mxu1  ;;  %v10962_v9 = vld [vmem:[%s11762_s12 + $0x900] ss:$44 sps:$4 sm:$0xff]  }
 0x266   : > { %v4978_v36 = vpop.f32.mrf.mxu0 }
 0x267   : > { %v13077_v63 = vadd.f32 %v5429_v14, %v4977_v38  ;;  %v4979_v23 = vadd.f32 %v4978_v36, %v12332_v53  ;;  %v5431_v33 = vpop.f32.mrf.mxu1  ;;  %v10965_v14 = vld [vmem:[%s11762_s12 + $0x908] ss:$44 sps:$4 sm:$0xff]  }
 0x268   : > { %v4982_v46 = vpop.f32.mrf.mxu0  ;;  %5221 = vmatmul.mubr.bf16.gmra.mxu0 %v10956_v43 }
 0x269   : > { %v13080_v3 = vadd.f32 %v5431_v33, %v4979_v23  ;;  %v4983_v4 = vadd.f32 %v4982_v46, %v12334_v56  ;;  %v5435_v49 = vpop.f32.mrf.mxu1  ;;  %5674 = vmatmul.mubr.bf16.gmra.mxu1 %v10959_v35  ;;  %5230 = vmatprep.mubr.bf16.mxu0 %v10964_v12  ;;  %v10970_v56 = vld [vmem:[%s11762_s12 + $0x95c] ss:$44 sps:$4 sm:$0xff]   ;;  %v10973_v23 = vld [vmem:[%s11762_s12 + $0x964] ss:$44 sps:$4 sm:$0xff]  }
 0x26a   : > { %v4984_v27 = vpop.f32.mrf.mxu0  ;;  %5683 = vmatprep.mubr.bf16.mxu1 %v10967_v57 }
 0x26b   : > { %v13083_v51 = vadd.f32 %v5435_v49, %v4983_v4  ;;  %v4985_v32 = vadd.f32 %v4984_v27, %v12339_v62  ;;  %v5437_v53 = vpop.f32.mrf.mxu1  ;;  %v16657_v62 = vmov 0  }
 0x26c   : > { %v4986_v19 = vpop.f32.mrf.mxu0  ;;  %10552 = vset.pattern.permute.xlu0 %v16657_v62  ;;  %10553 = vset.pattern.permute.xlu1 %v16657_v62  ;;  %v11007_v62 = vld [vmem:[%s11762_s12 + $0xb70] ss:$44 sps:$4 sm:$0xff]  }
 0x26d   : > { %v13087_v45 = vadd.f32 %v5437_v53, %v4985_v32  ;;  %v4987_v43 = vadd.f32 %v4986_v19, %v12341_v1  ;;  %v5439_v38 = vpop.f32.mrf.mxu1  ;;  %v10968_v19 = vld [vmem:[%s11762_s12 + $0x958] ss:$44 sps:$4 sm:$0xff]  }
 0x26e   : > { %v4988_v36 = vpop.f32.mrf.mxu0 }
 0x26f   : > { %v13093_v35 = vadd.f32 %v5439_v38, %v4987_v43  ;;  %v4989_v57 = vadd.f32 %v4988_v36, %v12344_v5  ;;  %v5441_v12 = vpop.f32.mrf.mxu1  ;;  %v10971_v38 = vld [vmem:[%s11762_s12 + $0x960] ss:$44 sps:$4 sm:$0xff]  }
 0x270   : > { %v4992_v33 = vpop.f32.mrf.mxu0  ;;  %5231 = vmatmul.mubr.bf16.gmra.mxu0 %v10962_v9 }
 0x271   : > { %v13097_v46 = vadd.f32 %v5441_v12, %v4989_v57  ;;  %v4993_v1 = vadd.f32 %v4992_v33, %v12346_v8  ;;  %v5445_v4 = vpop.f32.mrf.mxu1  ;;  %5684 = vmatmul.mubr.bf16.gmra.mxu1 %v10965_v14  ;;  %5240 = vmatprep.mubr.bf16.mxu0 %v10970_v56  ;;  %v10976_v14 = vld [vmem:[%s11762_s12 + $0x9b4] ss:$44 sps:$4 sm:$0xff]   ;;  %v10979_v56 = vld [vmem:[%s11762_s12 + $0x9bc] ss:$44 sps:$4 sm:$0xff]  }
 0x272   : > { %v4994_v49 = vpop.f32.mrf.mxu0  ;;  %5693 = vmatprep.mubr.bf16.mxu1 %v10973_v23 }
 0x273   : > { %v13101_v5 = vadd.f32 %v5445_v4, %v4993_v1  ;;  %v4995_v27 = vadd.f32 %v4994_v49, %v12355_v16  ;;  %v5447_v32 = vpop.f32.mrf.mxu1 }
 0x274   : > { %v4996_v53 = vpop.f32.mrf.mxu0 }
 0x275   : > { %v13105_v9 = vadd.f32 %v5447_v32, %v4995_v27  ;;  %v4997_v8 = vadd.f32 %v4996_v53, %v12365_v26  ;;  %v5449_v43 = vpop.f32.mrf.mxu1  ;;  %v10974_v53 = vld [vmem:[%s11762_s12 + $0x9b0] ss:$44 sps:$4 sm:$0xff]  }
 0x276   : > { %v4998_v36 = vpop.f32.mrf.mxu0 }
 0x277   : > { %v13111_v57 = vadd.f32 %v5449_v43, %v4997_v8  ;;  %v4999_v23 = vadd.f32 %v4998_v36, %v12368_v31  ;;  %v5451_v12 = vpop.f32.mrf.mxu1  ;;  %v10977_v36 = vld [vmem:[%s11762_s12 + $0x9b8] ss:$44 sps:$4 sm:$0xff]  }
 0x278   : > { %v5002_v33 = vpop.f32.mrf.mxu0  ;;  %5241 = vmatmul.mubr.bf16.gmra.mxu0 %v10968_v19 }
 0x279   : > { %v13114_v16 = vadd.f32 %v5451_v12, %v4999_v23  ;;  %v5003_v1 = vadd.f32 %v5002_v33, %v12370_v34  ;;  %v5455_v26 = vpop.f32.mrf.mxu1  ;;  %5694 = vmatmul.mubr.bf16.gmra.mxu1 %v10971_v38  ;;  %5250 = vmatprep.mubr.bf16.mxu0 %v10976_v14  ;;  %v10982_v34 = vld [vmem:[%s11762_s12 + $0xa0c] ss:$44 sps:$4 sm:$0xff]   ;;  %v10985_v12 = vld [vmem:[%s11762_s12 + $0xa14] ss:$44 sps:$4 sm:$0xff]  }
 0x27a   : > { %v5004_v4 = vpop.f32.mrf.mxu0  ;;  %5703 = vmatprep.mubr.bf16.mxu1 %v10979_v56 }
 0x27b   : > { %v13117_v49 = vadd.f32 %v5455_v26, %v5003_v1  ;;  %v5005_v27 = vadd.f32 %v5004_v4, %v12375_v41  ;;  %v5457_v31 = vpop.f32.mrf.mxu1 }
 0x27c   : > { %v5006_v32 = vpop.f32.mrf.mxu0 }
 0x27d   : > { %v13121_v19 = vadd.f32 %v5457_v31, %v5005_v27  ;;  %v5007_v8 = vadd.f32 %v5006_v32, %v12377_v44  ;;  %v5459_v43 = vpop.f32.mrf.mxu1  ;;  %v10980_v32 = vld [vmem:[%s11762_s12 + $0xa08] ss:$44 sps:$4 sm:$0xff]  }
 0x27e   : > { %v5008_v23 = vpop.f32.mrf.mxu0 }
 0x27f   : > { %v13127_v38 = vadd.f32 %v5459_v43, %v5007_v8  ;;  %v5009_v14 = vadd.f32 %v5008_v23, %v12380_v50  ;;  %v5461_v56 = vpop.f32.mrf.mxu1  ;;  %v10983_v23 = vld [vmem:[%s11762_s12 + $0xa10] ss:$44 sps:$4 sm:$0xff]  }
 0x280   : > { %v5012_v33 = vpop.f32.mrf.mxu0  ;;  %5251 = vmatmul.mubr.bf16.gmra.mxu0 %v10974_v53 }
 0x281   : > { %v13130_v41 = vadd.f32 %v5461_v56, %v5009_v14  ;;  %v5013_v1 = vadd.f32 %v5012_v33, %v12382_v54  ;;  %v5465_v44 = vpop.f32.mrf.mxu1  ;;  %5704 = vmatmul.mubr.bf16.gmra.mxu1 %v10977_v36  ;;  %5260 = vmatprep.mubr.bf16.mxu0 %v10982_v34  ;;  %v10988_v54 = vld [vmem:[%s11762_s12 + $0xa64] ss:$44 sps:$4 sm:$0xff]   ;;  %v10991_v56 = vld [vmem:[%s11762_s12 + $0xa6c] ss:$44 sps:$4 sm:$0xff]  }
 0x282   : > { %v5014_v26 = vpop.f32.mrf.mxu0  ;;  %5713 = vmatprep.mubr.bf16.mxu1 %v10985_v12 }
 0x283   : > { %v13133_v4 = vadd.f32 %v5465_v44, %v5013_v1  ;;  %v5015_v27 = vadd.f32 %v5014_v26, %v12387_v61  ;;  %v5467_v50 = vpop.f32.mrf.mxu1 }
 0x284   : > { %v5016_v31 = vpop.f32.mrf.mxu0 }
 0x285   : > { %v13137_v53 = vadd.f32 %v5467_v50, %v5015_v27  ;;  %v5017_v8 = vadd.f32 %v5016_v31, %v12389_v2  ;;  %v5469_v43 = vpop.f32.mrf.mxu1  ;;  %v10986_v31 = vld [vmem:[%s11762_s12 + $0xa60] ss:$44 sps:$4 sm:$0xff]  }
 0x286   : > { %v5018_v14 = vpop.f32.mrf.mxu0 }
 0x287   : > { %v13143_v36 = vadd.f32 %v5469_v43, %v5017_v8  ;;  %v5019_v34 = vadd.f32 %v5018_v14, %v12392_v7  ;;  %v5471_v12 = vpop.f32.mrf.mxu1  ;;  %v10989_v14 = vld [vmem:[%s11762_s12 + $0xa68] ss:$44 sps:$4 sm:$0xff]  }
 0x288   : > { %v5022_v33 = vpop.f32.mrf.mxu0  ;;  %5261 = vmatmul.mubr.bf16.gmra.mxu0 %v10980_v32 }
 0x289   : > { %v13146_v61 = vadd.f32 %v5471_v12, %v5019_v34  ;;  %v5023_v1 = vadd.f32 %v5022_v33, %v12394_v11  ;;  %v5475_v2 = vpop.f32.mrf.mxu1  ;;  %5714 = vmatmul.mubr.bf16.gmra.mxu1 %v10983_v23  ;;  %5270 = vmatprep.mubr.bf16.mxu0 %v10988_v54  ;;  %v10994_v11 = vld [vmem:[%s11762_s12 + $0xabc] ss:$44 sps:$4 sm:$0xff]   ;;  %v10997_v12 = vld [vmem:[%s11762_s12 + $0xac4] ss:$44 sps:$4 sm:$0xff]  }
 0x28a   : > { %v5024_v44 = vpop.f32.mrf.mxu0  ;;  %5723 = vmatprep.mubr.bf16.mxu1 %v10991_v56 }
 0x28b   : > { %v13149_v26 = vadd.f32 %v5475_v2, %v5023_v1  ;;  %v5025_v27 = vadd.f32 %v5024_v44, %v12399_v18  ;;  %v5477_v7 = vpop.f32.mrf.mxu1 }
 0x28c   : > { %v5026_v50 = vpop.f32.mrf.mxu0 }
 0x28d   : > { %v13153_v32 = vadd.f32 %v5477_v7, %v5025_v27  ;;  %v5027_v8 = vadd.f32 %v5026_v50, %v12401_v21  ;;  %v5479_v43 = vpop.f32.mrf.mxu1  ;;  %v10992_v50 = vld [vmem:[%s11762_s12 + $0xab8] ss:$44 sps:$4 sm:$0xff]  }
 0x28e   : > { %v5028_v34 = vpop.f32.mrf.mxu0 }
 0x28f   : > { %v13159_v23 = vadd.f32 %v5479_v43, %v5027_v8  ;;  %v5029_v54 = vadd.f32 %v5028_v34, %v12404_v25  ;;  %v5481_v56 = vpop.f32.mrf.mxu1  ;;  %v10995_v34 = vld [vmem:[%s11762_s12 + $0xac0] ss:$44 sps:$4 sm:$0xff]  }
 0x290   : > { %v5032_v33 = vpop.f32.mrf.mxu0  ;;  %5271 = vmatmul.mubr.bf16.gmra.mxu0 %v10986_v31 }
 0x291   : > { %v13162_v18 = vadd.f32 %v5481_v56, %v5029_v54  ;;  %v5033_v1 = vadd.f32 %v5032_v33, %v12406_v29  ;;  %v5485_v21 = vpop.f32.mrf.mxu1  ;;  %5724 = vmatmul.mubr.bf16.gmra.mxu1 %v10989_v14  ;;  %5280 = vmatprep.mubr.bf16.mxu0 %v10994_v11  ;;  %v11000_v29 = vld [vmem:[%s11762_s12 + $0xb14] ss:$44 sps:$4 sm:$0xff]   ;;  %v11003_v56 = vld [vmem:[%s11762_s12 + $0xb1c] ss:$44 sps:$4 sm:$0xff]  }
 0x292   : > { %v5034_v2 = vpop.f32.mrf.mxu0  ;;  %5733 = vmatprep.mubr.bf16.mxu1 %v10997_v12 }
 0x293   : > { %v13165_v44 = vadd.f32 %v5485_v21, %v5033_v1  ;;  %v5035_v27 = vadd.f32 %v5034_v2, %v12411_v37  ;;  %v5487_v25 = vpop.f32.mrf.mxu1 }
 0x294   : > { %v5036_v7 = vpop.f32.mrf.mxu0 }
 0x295   : > { %v13169_v31 = vadd.f32 %v5487_v25, %v5035_v27  ;;  %v5037_v8 = vadd.f32 %v5036_v7, %v12413_v42  ;;  %v5489_v43 = vpop.f32.mrf.mxu1  ;;  %v10998_v7 = vld [vmem:[%s11762_s12 + $0xb10] ss:$44 sps:$4 sm:$0xff]  }
 0x296   : > { %v5038_v54 = vpop.f32.mrf.mxu0 }
 0x297   : > { %v13175_v14 = vadd.f32 %v5489_v43, %v5037_v8  ;;  %v5039_v11 = vadd.f32 %v5038_v54, %v12416_v48  ;;  %v5491_v12 = vpop.f32.mrf.mxu1  ;;  %v11001_v54 = vld [vmem:[%s11762_s12 + $0xb18] ss:$44 sps:$4 sm:$0xff]  }
 0x298   : > { %v5042_v33 = vpop.f32.mrf.mxu0  ;;  %5281 = vmatmul.mubr.bf16.gmra.mxu0 %v10992_v50 }
 0x299   : > { %v13178_v37 = vadd.f32 %v5491_v12, %v5039_v11  ;;  %v5043_v1 = vadd.f32 %v5042_v33, %v12418_v55  ;;  %v5495_v42 = vpop.f32.mrf.mxu1  ;;  %5734 = vmatmul.mubr.bf16.gmra.mxu1 %v10995_v34  ;;  %5290 = vmatprep.mubr.bf16.mxu0 %v11000_v29  ;;  %v11006_v55 = vld [vmem:[%s11762_s12 + $0xb6c] ss:$44 sps:$4 sm:$0xff]   ;;  %v11009_v12 = vld [vmem:[%s11762_s12 + $0xb74] ss:$44 sps:$4 sm:$0xff]  }
 0x29a   : > { %v5044_v21 = vpop.f32.mrf.mxu0  ;;  %5743 = vmatprep.mubr.bf16.mxu1 %v11003_v56 }
 0x29b   : > { %v13181_v2 = vadd.f32 %v5495_v42, %v5043_v1  ;;  %v5045_v27 = vadd.f32 %v5044_v21, %v12420_v59  ;;  %v5497_v48 = vpop.f32.mrf.mxu1  ;;  %v16968_v1 = vld [vmem:[#allocation2_spill] sm:$0xff] }
 0x29c   : > { %v5046_v25 = vpop.f32.mrf.mxu0 }
 0x29d   : > { %v13185_v50 = vadd.f32 %v5497_v48, %v5045_v27  ;;  %v5047_v8 = vadd.f32 %v5046_v25, %v12425_v6  ;;  %v5499_v43 = vpop.f32.mrf.mxu1  ;;  %v16970_v48 = vld [vmem:[#allocation3_spill] sm:$0xff] }
 0x29e   : > { %v5048_v11 = vpop.f32.mrf.mxu0 }
 0x29f   : > { %v13191_v34 = vadd.f32 %v5499_v43, %v5047_v8  ;;  %v5049_v29 = vadd.f32 %v5048_v11, %v12428_v13  ;;  %v5501_v56 = vpop.f32.mrf.mxu1  ;;  %v11004_v43 = vld [vmem:[%s11762_s12 + $0xb68] ss:$44 sps:$4 sm:$0xff]  }
 0x2a0   : > { %v5052_v33 = vpop.f32.mrf.mxu0  ;;  %5291 = vmatmul.mubr.bf16.gmra.mxu0 %v10998_v7  ;;  %v16972_v11 = vld [vmem:[#allocation4_spill] sm:$0xff] }
 0x2a1   : > { %16967 = vst [vmem:[#allocation125_spill] sm:$0xff] %v13191_v34  ;;  %v13194_v59 = vadd.f32 %v5501_v56, %v5049_v29  ;;  %v5053_v42 = vadd.f32 %v5052_v33, %v16968_v1  ;;  %v5505_v6 = vpop.f32.mrf.mxu1  ;;  %5744 = vmatmul.mubr.bf16.gmra.mxu1 %v11001_v54  ;;  %5300 = vmatprep.mubr.bf16.mxu0 %v11006_v55  ;;  %v11012_v33 = vld [vmem:[%s11762_s12 + $0xbc4] ss:$44 sps:$4 sm:$0xff]   ;;  %v11015_v34 = vld [vmem:[%s11762_s12 + $0xbcc] ss:$44 sps:$4 sm:$0xff]  }
 0x2a2   : > { %v5054_v21 = vpop.f32.mrf.mxu0  ;;  %5753 = vmatprep.mubr.bf16.mxu1 %v11009_v12  ;;  %v16974_v55 = vld [vmem:[#allocation5_spill] sm:$0xff] }
 0x2a3   : > { %v13197_v27 = vadd.f32 %v5505_v6, %v5053_v42  ;;  %v5055_v25 = vadd.f32 %v5054_v21, %v16970_v48  ;;  %v5507_v13 = vpop.f32.mrf.mxu1  ;;  %v16976_v48 = vld [vmem:[#allocation6_spill] sm:$0xff] }
 0x2a4   : > { %v5056_v8 = vpop.f32.mrf.mxu0 }
 0x2a5   : > { %16969 = vst [vmem:[#allocation2_spill] sm:$0xff] %v13197_v27  ;;  %v13201_v7 = vadd.f32 %v5507_v13, %v5055_v25  ;;  %v5057_v29 = vadd.f32 %v5056_v8, %v16972_v11  ;;  %v5509_v56 = vpop.f32.mrf.mxu1  ;;  %v11021_v27 = vld [vmem:[%s11762_s12 + $0xc24] ss:$44 sps:$4 sm:$0xff]  }
 0x2a6   : > { %v5058_v1 = vpop.f32.mrf.mxu0 }
 0x2a7   : > { %16971 = vst [vmem:[#allocation3_spill] sm:$0xff] %v13201_v7  ;;  %v13207_v54 = vadd.f32 %v5509_v56, %v5057_v29  ;;  %v5059_v12 = vadd.f32 %v5058_v1, %v16974_v55  ;;  %v5511_v42 = vpop.f32.mrf.mxu1  ;;  %v16978_v29 = vld [vmem:[#allocation7_spill] sm:$0xff] }
 0x2a8   : > { %v5062_v6 = vpop.f32.mrf.mxu0  ;;  %5301 = vmatmul.mubr.bf16.gmra.mxu0 %v11004_v43  ;;  %v11013_v7 = vld [vmem:[%s11762_s12 + $0xbc8] ss:$44 sps:$4 sm:$0xff]  }
 0x2a9   : > { %16973 = vst [vmem:[#allocation4_spill] sm:$0xff] %v13207_v54  ;;  %v13210_v21 = vadd.f32 %v5511_v42, %v5059_v12  ;;  %v5063_v25 = vadd.f32 %v5062_v6, %v16976_v48  ;;  %v5515_v13 = vpop.f32.mrf.mxu1  ;;  %5754 = vmatmul.mubr.bf16.gmra.mxu1 %v11007_v62  ;;  %5310 = vmatprep.mubr.bf16.mxu0 %v11012_v33  ;;  %v11010_v54 = vld [vmem:[%s11762_s12 + $0xbc0] ss:$44 sps:$4 sm:$0xff]   ;;  %v16980_v12 = vld [vmem:[#allocation8_spill] sm:$0xff]  ;;  %v11018_v6 = vld [vmem:[%s11762_s12 + $0xc1c] ss:$44 sps:$4 sm:$0xff]  }
 0x2aa   : > { %v5064_v8 = vpop.f32.mrf.mxu0  ;;  %5763 = vmatprep.mubr.bf16.mxu1 %v11015_v34  ;;  %v16982_v33 = vld [vmem:[#allocation9_spill] sm:$0xff] }
 0x2ab   : > { %16975 = vst [vmem:[#allocation5_spill] sm:$0xff] %v13210_v21  ;;  %v13213_v11 = vadd.f32 %v5515_v13, %v5063_v25  ;;  %v5065_v56 = vadd.f32 %v5064_v8, %v16978_v29  ;;  %v5517_v1 = vpop.f32.mrf.mxu1  ;;  %v16984_v29 = vld [vmem:[#allocation10_spill] sm:$0xff] }
 0x2ac   : > { %v5066_v55 = vpop.f32.mrf.mxu0 }
 0x2ad   : > { %16977 = vst [vmem:[#allocation6_spill] sm:$0xff] %v13213_v11  ;;  %v13217_v43 = vadd.f32 %v5517_v1, %v5065_v56  ;;  %v5067_v42 = vadd.f32 %v5066_v55, %v16980_v12  ;;  %v5519_v21 = vpop.f32.mrf.mxu1  ;;  %v16986_v12 = vld [vmem:[#allocation11_spill] sm:$0xff] }
 0x2ae   : > { %v5068_v48 = vpop.f32.mrf.mxu0  ;;  %v11027_v11 = vld [vmem:[%s11762_s12 + $0xc7c] ss:$44 sps:$4 sm:$0xff]  }
 0x2af   : > { %16979 = vst [vmem:[#allocation7_spill] sm:$0xff] %v13217_v43  ;;  %v13223_v62 = vadd.f32 %v5519_v21, %v5067_v42  ;;  %v5069_v34 = vadd.f32 %v5068_v48, %v16982_v33  ;;  %v5521_v25 = vpop.f32.mrf.mxu1  ;;  %v11019_v43 = vld [vmem:[%s11762_s12 + $0xc20] ss:$44 sps:$4 sm:$0xff]  }
 0x2b0   : > { %v5072_v13 = vpop.f32.mrf.mxu0  ;;  %5311 = vmatmul.mubr.bf16.gmra.mxu0 %v11010_v54 }
 0x2b1   : > { %16981 = vst [vmem:[#allocation8_spill] sm:$0xff] %v13223_v62  ;;  %v13226_v8 = vadd.f32 %v5521_v25, %v5069_v34  ;;  %v5073_v56 = vadd.f32 %v5072_v13, %v16984_v29  ;;  %v5525_v1 = vpop.f32.mrf.mxu1  ;;  %5764 = vmatmul.mubr.bf16.gmra.mxu1 %v11013_v7  ;;  %5320 = vmatprep.mubr.bf16.mxu0 %v11018_v6  ;;  %v11016_v62 = vld [vmem:[%s11762_s12 + $0xc18] ss:$44 sps:$4 sm:$0xff]   ;;  %v16988_v34 = vld [vmem:[#allocation12_spill] sm:$0xff] }
 0x2b2   : > { %v5074_v55 = vpop.f32.mrf.mxu0  ;;  %5773 = vmatprep.mubr.bf16.mxu1 %v11021_v27  ;;  %v11024_v13 = vld [vmem:[%s11762_s12 + $0xc74] ss:$44 sps:$4 sm:$0xff]   ;;  %v16990_v6 = vld [vmem:[#allocation13_spill] sm:$0xff] }
 0x2b3   : > { %16983 = vst [vmem:[#allocation9_spill] sm:$0xff] %v13226_v8  ;;  %v13229_v21 = vadd.f32 %v5525_v1, %v5073_v56  ;;  %v5075_v42 = vadd.f32 %v5074_v55, %v16986_v12  ;;  %v5527_v48 = vpop.f32.mrf.mxu1  ;;  %v16992_v12 = vld [vmem:[#allocation14_spill] sm:$0xff] }
 0x2b4   : > { %v5076_v33 = vpop.f32.mrf.mxu0 }
 0x2b5   : > { %16985 = vst [vmem:[#allocation10_spill] sm:$0xff] %v13229_v21  ;;  %v13233_v54 = vadd.f32 %v5527_v48, %v5075_v42  ;;  %v5077_v25 = vadd.f32 %v5076_v33, %v16988_v34  ;;  %v5529_v8 = vpop.f32.mrf.mxu1  ;;  %v16994_v34 = vld [vmem:[#allocation15_spill] sm:$0xff]  ;;  %v11033_v21 = vld [vmem:[%s11762_s12 + $0xcd4] ss:$44 sps:$4 sm:$0xff]  }
 0x2b6   : > { %v5078_v29 = vpop.f32.mrf.mxu0 }
 0x2b7   : > { %16987 = vst [vmem:[#allocation11_spill] sm:$0xff] %v13233_v54  ;;  %v13239_v7 = vadd.f32 %v5529_v8, %v5077_v25  ;;  %v5079_v27 = vadd.f32 %v5078_v29, %v16990_v6  ;;  %v5531_v56 = vpop.f32.mrf.mxu1  ;;  %v11025_v54 = vld [vmem:[%s11762_s12 + $0xc78] ss:$44 sps:$4 sm:$0xff]  }
 0x2b8   : > { %v5082_v1 = vpop.f32.mrf.mxu0  ;;  %5321 = vmatmul.mubr.bf16.gmra.mxu0 %v11016_v62 }
 0x2b9   : > { %16989 = vst [vmem:[#allocation12_spill] sm:$0xff] %v13239_v7  ;;  %v13242_v55 = vadd.f32 %v5531_v56, %v5079_v27  ;;  %v5083_v42 = vadd.f32 %v5082_v1, %v16992_v12  ;;  %v5535_v48 = vpop.f32.mrf.mxu1  ;;  %5774 = vmatmul.mubr.bf16.gmra.mxu1 %v11019_v43  ;;  %5330 = vmatprep.mubr.bf16.mxu0 %v11024_v13  ;;  %v11022_v7 = vld [vmem:[%s11762_s12 + $0xc70] ss:$44 sps:$4 sm:$0xff]   ;;  %v11030_v1 = vld [vmem:[%s11762_s12 + $0xccc] ss:$44 sps:$4 sm:$0xff]  }
 0x2ba   : > { %v5084_v33 = vpop.f32.mrf.mxu0  ;;  %5783 = vmatprep.mubr.bf16.mxu1 %v11027_v11  ;;  %v16996_v27 = vld [vmem:[#allocation16_spill] sm:$0xff]  ;;  %v16998_v13 = vld [vmem:[#allocation17_spill] sm:$0xff] }
 0x2bb   : > { %16991 = vst [vmem:[#allocation13_spill] sm:$0xff] %v13242_v55  ;;  %v13245_v8 = vadd.f32 %v5535_v48, %v5083_v42  ;;  %v5085_v25 = vadd.f32 %v5084_v33, %v16994_v34  ;;  %v5537_v29 = vpop.f32.mrf.mxu1  ;;  %v17000_v34 = vld [vmem:[#allocation18_spill] sm:$0xff] }
 0x2bc   : > { %v5086_v6 = vpop.f32.mrf.mxu0 }
 0x2bd   : > { %16993 = vst [vmem:[#allocation14_spill] sm:$0xff] %v13245_v8  ;;  %v13249_v62 = vadd.f32 %v5537_v29, %v5085_v25  ;;  %v5087_v56 = vadd.f32 %v5086_v6, %v16996_v27  ;;  %v5539_v55 = vpop.f32.mrf.mxu1  ;;  %v17002_v27 = vld [vmem:[#allocation19_spill] sm:$0xff] }
 0x2be   : > { %v5088_v12 = vpop.f32.mrf.mxu0  ;;  %v11039_v8 = vld [vmem:[%s11762_s12 + $0xd2c] ss:$44 sps:$4 sm:$0xff]  }
 0x2bf   : > { %16995 = vst [vmem:[#allocation15_spill] sm:$0xff] %v13249_v62  ;;  %v13255_v43 = vadd.f32 %v5539_v55, %v5087_v56  ;;  %v5089_v11 = vadd.f32 %v5088_v12, %v16998_v13  ;;  %v5541_v42 = vpop.f32.mrf.mxu1  ;;  %v11031_v62 = vld [vmem:[%s11762_s12 + $0xcd0] ss:$44 sps:$4 sm:$0xff]  }
 0x2c0   : > { %v5092_v48 = vpop.f32.mrf.mxu0  ;;  %5331 = vmatmul.mubr.bf16.gmra.mxu0 %v11022_v7 }
 0x2c1   : > { %16997 = vst [vmem:[#allocation16_spill] sm:$0xff] %v13255_v43  ;;  %v13258_v33 = vadd.f32 %v5541_v42, %v5089_v11  ;;  %v5093_v25 = vadd.f32 %v5092_v48, %v17000_v34  ;;  %v5545_v29 = vpop.f32.mrf.mxu1  ;;  %5784 = vmatmul.mubr.bf16.gmra.mxu1 %v11025_v54  ;;  %5340 = vmatprep.mubr.bf16.mxu0 %v11030_v1  ;;  %v11028_v43 = vld [vmem:[%s11762_s12 + $0xcc8] ss:$44 sps:$4 sm:$0xff]   ;;  %v11036_v48 = vld [vmem:[%s11762_s12 + $0xd24] ss:$44 sps:$4 sm:$0xff]   ;;  %v17006_v1 = vld [vmem:[#allocation21_spill] sm:$0xff] }
 0x2c2   : > { %v5094_v6 = vpop.f32.mrf.mxu0  ;;  %5793 = vmatprep.mubr.bf16.mxu1 %v11033_v21  ;;  %v17004_v11 = vld [vmem:[#allocation20_spill] sm:$0xff] }
 0x2c3   : > { %16999 = vst [vmem:[#allocation17_spill] sm:$0xff] %v13258_v33  ;;  %v13261_v55 = vadd.f32 %v5545_v29, %v5093_v25  ;;  %v5095_v56 = vadd.f32 %v5094_v6, %v17002_v27  ;;  %v5547_v12 = vpop.f32.mrf.mxu1  ;;  %v17008_v27 = vld [vmem:[#allocation22_spill] sm:$0xff] }
 0x2c4   : > { %v5096_v13 = vpop.f32.mrf.mxu0 }
 0x2c5   : > { %17001 = vst [vmem:[#allocation18_spill] sm:$0xff] %v13261_v55  ;;  %v13265_v7 = vadd.f32 %v5547_v12, %v5095_v56  ;;  %v5097_v42 = vadd.f32 %v5096_v13, %v17004_v11  ;;  %v5549_v33 = vpop.f32.mrf.mxu1  ;;  %v17010_v11 = vld [vmem:[#allocation23_spill] sm:$0xff]  ;;  %v11045_v55 = vld [vmem:[%s11762_s12 + $0xd84] ss:$44 sps:$4 sm:$0xff]  }
 0x2c6   : > { %v5098_v34 = vpop.f32.mrf.mxu0 }
 0x2c7   : > { %17003 = vst [vmem:[#allocation19_spill] sm:$0xff] %v13265_v7  ;;  %v13271_v54 = vadd.f32 %v5549_v33, %v5097_v42  ;;  %v5099_v21 = vadd.f32 %v5098_v34, %v17006_v1  ;;  %v5551_v25 = vpop.f32.mrf.mxu1  ;;  %v11037_v7 = vld [vmem:[%s11762_s12 + $0xd28] ss:$44 sps:$4 sm:$0xff]  }
 0x2c8   : > { %v5102_v29 = vpop.f32.mrf.mxu0  ;;  %5341 = vmatmul.mubr.bf16.gmra.mxu0 %v11028_v43 }
 0x2c9   : > { %17005 = vst [vmem:[#allocation20_spill] sm:$0xff] %v13271_v54  ;;  %v13274_v6 = vadd.f32 %v5551_v25, %v5099_v21  ;;  %v5103_v56 = vadd.f32 %v5102_v29, %v17008_v27  ;;  %v5555_v12 = vpop.f32.mrf.mxu1  ;;  %5794 = vmatmul.mubr.bf16.gmra.mxu1 %v11031_v62  ;;  %5350 = vmatprep.mubr.bf16.mxu0 %v11036_v48  ;;  %v11034_v54 = vld [vmem:[%s11762_s12 + $0xd20] ss:$44 sps:$4 sm:$0xff]   ;;  %v17012_v21 = vld [vmem:[#allocation24_spill] sm:$0xff]  ;;  %v11042_v29 = vld [vmem:[%s11762_s12 + $0xd7c] ss:$44 sps:$4 sm:$0xff]  }
 0x2ca   : > { %v5104_v13 = vpop.f32.mrf.mxu0  ;;  %5803 = vmatprep.mubr.bf16.mxu1 %v11039_v8  ;;  %v17014_v48 = vld [vmem:[#allocation25_spill] sm:$0xff] }
 0x2cb   : > { %17007 = vst [vmem:[#allocation21_spill] sm:$0xff] %v13274_v6  ;;  %v13277_v33 = vadd.f32 %v5555_v12, %v5103_v56  ;;  %v5105_v42 = vadd.f32 %v5104_v13, %v17010_v11  ;;  %v5557_v34 = vpop.f32.mrf.mxu1  ;;  %v17016_v11 = vld [vmem:[#allocation26_spill] sm:$0xff] }
 0x2cc   : > { %v5106_v1 = vpop.f32.mrf.mxu0 }
 0x2cd   : > { %17009 = vst [vmem:[#allocation22_spill] sm:$0xff] %v13277_v33  ;;  %v13281_v43 = vadd.f32 %v5557_v34, %v5105_v42  ;;  %v5107_v25 = vadd.f32 %v5106_v1, %v17012_v21  ;;  %v5559_v6 = vpop.f32.mrf.mxu1  ;;  %v17018_v21 = vld [vmem:[#allocation27_spill] sm:$0xff] }
 0x2ce   : > { %v5108_v27 = vpop.f32.mrf.mxu0  ;;  %v11051_v33 = vld [vmem:[%s11762_s12 + $0xddc] ss:$44 sps:$4 sm:$0xff]  }
 0x2cf   : > { %17011 = vst [vmem:[#allocation23_spill] sm:$0xff] %v13281_v43  ;;  %v13287_v62 = vadd.f32 %v5559_v6, %v5107_v25  ;;  %v5109_v8 = vadd.f32 %v5108_v27, %v17014_v48  ;;  %v5561_v56 = vpop.f32.mrf.mxu1  ;;  %v11043_v43 = vld [vmem:[%s11762_s12 + $0xd80] ss:$44 sps:$4 sm:$0xff]  }
 0x2d0   : > { %v5112_v12 = vpop.f32.mrf.mxu0  ;;  %5351 = vmatmul.mubr.bf16.gmra.mxu0 %v11034_v54 }
 0x2d1   : > { %17013 = vst [vmem:[#allocation24_spill] sm:$0xff] %v13287_v62  ;;  %v13290_v13 = vadd.f32 %v5561_v56, %v5109_v8  ;;  %v5113_v42 = vadd.f32 %v5112_v12, %v17016_v11  ;;  %v5565_v34 = vpop.f32.mrf.mxu1  ;;  %5804 = vmatmul.mubr.bf16.gmra.mxu1 %v11037_v7  ;;  %5360 = vmatprep.mubr.bf16.mxu0 %v11042_v29  ;;  %v11040_v62 = vld [vmem:[%s11762_s12 + $0xd78] ss:$44 sps:$4 sm:$0xff]   ;;  %v17020_v8 = vld [vmem:[#allocation28_spill] sm:$0xff] }
 0x2d2   : > { %v5114_v1 = vpop.f32.mrf.mxu0  ;;  %5813 = vmatprep.mubr.bf16.mxu1 %v11045_v55  ;;  %v11048_v12 = vld [vmem:[%s11762_s12 + $0xdd4] ss:$44 sps:$4 sm:$0xff]   ;;  %v17022_v29 = vld [vmem:[#allocation29_spill] sm:$0xff] }
 0x2d3   : > { %17015 = vst [vmem:[#allocation25_spill] sm:$0xff] %v13290_v13  ;;  %v13293_v6 = vadd.f32 %v5565_v34, %v5113_v42  ;;  %v5115_v25 = vadd.f32 %v5114_v1, %v17018_v21  ;;  %v5567_v27 = vpop.f32.mrf.mxu1  ;;  %v17024_v21 = vld [vmem:[#allocation30_spill] sm:$0xff] }
 0x2d4   : > { %v5116_v48 = vpop.f32.mrf.mxu0 }
 0x2d5   : > { %17017 = vst [vmem:[#allocation26_spill] sm:$0xff] %v13293_v6  ;;  %v13297_v54 = vadd.f32 %v5567_v27, %v5115_v25  ;;  %v5117_v56 = vadd.f32 %v5116_v48, %v17020_v8  ;;  %v5569_v13 = vpop.f32.mrf.mxu1  ;;  %v17026_v8 = vld [vmem:[#allocation31_spill] sm:$0xff]  ;;  %v11057_v6 = vld [vmem:[%s11762_s12 + $0xe34] ss:$44 sps:$4 sm:$0xff]  }
 0x2d6   : > { %v5118_v11 = vpop.f32.mrf.mxu0 }
 0x2d7   : > { %17019 = vst [vmem:[#allocation27_spill] sm:$0xff] %v13297_v54  ;;  %v13303_v7 = vadd.f32 %v5569_v13, %v5117_v56  ;;  %v5119_v55 = vadd.f32 %v5118_v11, %v17022_v29  ;;  %v5571_v42 = vpop.f32.mrf.mxu1  ;;  %v11049_v54 = vld [vmem:[%s11762_s12 + $0xdd8] ss:$44 sps:$4 sm:$0xff]  }
 0x2d8   : > { %v5122_v34 = vpop.f32.mrf.mxu0  ;;  %5361 = vmatmul.mubr.bf16.gmra.mxu0 %v11040_v62 }
 0x2d9   : > { %17021 = vst [vmem:[#allocation28_spill] sm:$0xff] %v13303_v7  ;;  %v13306_v1 = vadd.f32 %v5571_v42, %v5119_v55  ;;  %v5123_v25 = vadd.f32 %v5122_v34, %v17024_v21  ;;  %v5575_v27 = vpop.f32.mrf.mxu1  ;;  %5814 = vmatmul.mubr.bf16.gmra.mxu1 %v11043_v43  ;;  %5370 = vmatprep.mubr.bf16.mxu0 %v11048_v12  ;;  %v11046_v7 = vld [vmem:[%s11762_s12 + $0xdd0] ss:$44 sps:$4 sm:$0xff]   ;;  %v11054_v34 = vld [vmem:[%s11762_s12 + $0xe2c] ss:$44 sps:$4 sm:$0xff]  }
 0x2da   : > { %v5124_v48 = vpop.f32.mrf.mxu0  ;;  %5823 = vmatprep.mubr.bf16.mxu1 %v11051_v33  ;;  %v17028_v55 = vld [vmem:[#allocation32_spill] sm:$0xff]  ;;  %v17030_v12 = vld [vmem:[#allocation33_spill] sm:$0xff] }
 0x2db   : > { %17023 = vst [vmem:[#allocation29_spill] sm:$0xff] %v13306_v1  ;;  %v13309_v13 = vadd.f32 %v5575_v27, %v5123_v25  ;;  %v5125_v56 = vadd.f32 %v5124_v48, %v17026_v8  ;;  %v5577_v11 = vpop.f32.mrf.mxu1  ;;  %v17032_v8 = vld [vmem:[#allocation34_spill] sm:$0xff] }
 0x2dc   : > { %v5126_v29 = vpop.f32.mrf.mxu0 }
 0x2dd   : > { %17025 = vst [vmem:[#allocation30_spill] sm:$0xff] %v13309_v13  ;;  %v13313_v62 = vadd.f32 %v5577_v11, %v5125_v56  ;;  %v5127_v42 = vadd.f32 %v5126_v29, %v17028_v55  ;;  %v5579_v1 = vpop.f32.mrf.mxu1  ;;  %v11060_v13 = vld [vmem:[%s11762_s12 + $0x24] ss:$44 sps:$4 sm:$0xff]  }
 0x2de   : > { %v5128_v21 = vpop.f32.mrf.mxu0 }
 0x2df   : > { %17027 = vst [vmem:[#allocation31_spill] sm:$0xff] %v13313_v62  ;;  %v13319_v43 = vadd.f32 %v5579_v1, %v5127_v42  ;;  %v5129_v33 = vadd.f32 %v5128_v21, %v17030_v12  ;;  %v5581_v25 = vpop.f32.mrf.mxu1  ;;  %v17033_v1 = vld [vmem:[#allocation35_spill] sm:$0xff] }
 0x2e0   : > { %v5132_v27 = vpop.f32.mrf.mxu0  ;;  %5371 = vmatmul.mubr.bf16.gmra.mxu0 %v11046_v7  ;;  %v11052_v12 = vld [vmem:[%s11762_s12 + $0xe28] ss:$44 sps:$4 sm:$0xff]  }
 0x2e1   : > { %17029 = vst [vmem:[#allocation32_spill] sm:$0xff] %v13319_v43  ;;  %v13322_v48 = vadd.f32 %v5581_v25, %v5129_v33  ;;  %v5133_v56 = vadd.f32 %v5132_v27, %v17032_v8  ;;  %v5585_v11 = vpop.f32.mrf.mxu1  ;;  %5824 = vmatmul.mubr.bf16.gmra.mxu1 %v11049_v54  ;;  %5380 = vmatprep.mubr.bf16.mxu0 %v11054_v34  ;;  %v17034_v7 = vld [vmem:[#allocation36_spill] sm:$0xff]  ;;  %v17036_v54 = vld [vmem:[#allocation37_spill] sm:$0xff] }
 0x2e2   : > { %v5134_v29 = vpop.f32.mrf.mxu0  ;;  %5833 = vmatprep.mubr.bf16.mxu1 %v11057_v6 }
 0x2e3   : > { %17031 = vst [vmem:[#allocation33_spill] sm:$0xff] %v13322_v48  ;;  %v13325_v55 = vadd.f32 %v5585_v11, %v5133_v56  ;;  %v5135_v42 = vadd.f32 %v5134_v29, %v17033_v1  ;;  %v5587_v43 = vpop.f32.mrf.mxu1  ;;  %v11055_v48 = vld [vmem:[%s11762_s12 + $0xe30] ss:$44 sps:$4 sm:$0xff]   ;;  %v17037_v29 = vld [vmem:[#allocation38_spill] sm:$0xff] }
 0x2e4   : > { %v5136_v21 = vpop.f32.mrf.mxu0 }
 0x2e5   : > { %v13329_v62 = vadd.f32 %v5587_v43, %v5135_v42  ;;  %v5137_v33 = vadd.f32 %v5136_v21, %v17034_v7  ;;  %v5589_v25 = vpop.f32.mrf.mxu1  ;;  %v17038_v21 = vmov 0  }
 0x2e6   : > { %v5138_v27 = vpop.f32.mrf.mxu0 }
 0x2e7   : > { %v13334_v8 = vadd.f32 %v5589_v25, %v5137_v33  ;;  %v5139_v6 = vadd.f32 %v5138_v27, %v17036_v54  ;;  %v5591_v34 = vpop.f32.mrf.mxu1  ;;  %v11058_v54 = vld [vmem:[%s11762_s12 + $0x20] ss:$44 sps:$4 sm:$0xff]  }
 0x2e8   : > { %v5142_v56 = vpop.f32.mrf.mxu0  ;;  %5381 = vmatmul.mubr.bf16.gmra.mxu0 %v11052_v12 }
 0x2e9   : > { %17035 = vst [vmem:[#allocation34_spill] sm:$0xff] %v13334_v8  ;;  %v13337_v11 = vadd.f32 %v5591_v34, %v5139_v6  ;;  %v5143_v43 = vadd.f32 %v5142_v56, %v17037_v29  ;;  %v5595_v1 = vpop.f32.mrf.mxu1  ;;  %5834 = vmatmul.mubr.bf16.gmra.mxu1 %v11055_v48  ;;  %5876 = vmatprep.mubr.bf16.mxu0 %v11060_v13  ;;  %v11061_v8 = vld [vmem:[%s11762_s12 + $0x28] ss:$44 sps:$4 sm:$0xff]  }
 0x2ea   : > { %v5144_v42 = vpop.f32.mrf.mxu0  ;;  %6329 = vmatprep.mubr.bf16.mxu1 %v17038_v21  ;;  %v11064_v56 = vld [vmem:[%s11762_s12 + $0x7c] ss:$44 sps:$4 sm:$0xff]  }
 0x2eb   : > { %v13341_v7 = vadd.f32 %v5595_v1, %v5143_v43  ;;  %v5145_v33 = vadd.f32 %v5144_v42, %v12582_v0  ;;  %v5597_v25 = vpop.f32.mrf.mxu1 }
 0x2ec   : > { %v5146_v27 = vpop.f32.mrf.mxu0 }
 0x2ed   : > { %v13345_v12 = vadd.f32 %v5597_v25, %v5145_v33  ;;  %v5147_v6 = vadd.f32 %v5146_v27, %v12586_v39  ;;  %v5599_v34 = vpop.f32.mrf.mxu1 }
 0x2ee   : > { %v5148_v29 = vpop.f32.mrf.mxu0 }
 0x2ef   : > { %v13350_v13 = vadd.f32 %v5599_v34, %v5147_v6  ;;  %v5149_v48 = vadd.f32 %v5148_v29, %v12596_v20  ;;  %v5601_v43 = vpop.f32.mrf.mxu1 }
 0x2f0   : > { %v5152_v1 = vpop.f32.mrf.mxu0  ;;  %5877 = vmatmul.mubr.bf16.vlgmr.msra.gmra.mxu0 %v11058_v54  ;;  %v11062_v54 = vld [vmem:[%s11762_s12 + $0x78] ss:$44 sps:$4 sm:$0xff]  }
 0x2f1   : > { %17039 = vst [vmem:[#allocation35_spill] sm:$0xff] %v13350_v13  ;;  %v13353_v0 = vadd.f32 %v5601_v43, %v5149_v48  ;;  %v5153_v42 = vadd.f32 %v5152_v1, %v12604_v28  ;;  %v5605_v39 = vpop.f32.mrf.mxu1  ;;  %10497 = vmatmul.mubr.msk.bf16.vlgmr.msra.gmra.mxu1 %vm3905_vm0, %v11061_v8  ;;  %5886 = vmatprep.mubr.bf16.mxu0 %v11064_v56  ;;  %v11065_v28 = vld [vmem:[%s11762_s12 + $0x80] ss:$44 sps:$4 sm:$0xff]  }
 0x2f2   : > { %v5154_v33 = vpop.f32.mrf.mxu0  ;;  %6339 = vmatprep.mubr.bf16.mxu1 %v17038_v21  ;;  %v11068_v43 = vld [vmem:[%s11762_s12 + $0xd4] ss:$44 sps:$4 sm:$0xff]   ;;  %v17042_v56 = vld [vmem:[#allocation39_spill] sm:$0xff] }
 0x2f3   : > { %v13358_v25 = vadd.f32 %v5605_v39, %v5153_v42  ;;  %v5155_v20 = vadd.f32 %v5154_v33, %v12612_v22  ;;  %v5607_v27 = vpop.f32.mrf.mxu1  ;;  %v17044_v33 = vld [vmem:[#allocation40_spill] sm:$0xff] }
 0x2f4   : > { %v5156_v6 = vpop.f32.mrf.mxu0 }
 0x2f5   : > { %v13362_v34 = vadd.f32 %v5607_v27, %v5155_v20  ;;  %v5157_v29 = vadd.f32 %v5156_v6, %v12623_v15  ;;  %v5609_v48 = vpop.f32.mrf.mxu1 }
 0x2f6   : > { %v5158_v1 = vpop.f32.mrf.mxu0 }
 0x2f7   : > { %17040 = vst [vmem:[#allocation36_spill] sm:$0xff] %v13362_v34  ;;  %v13367_v8 = vadd.f32 %v5609_v48, %v5157_v29  ;;  %v5159_v13 = vadd.f32 %v5158_v1, %v17042_v56  ;;  %v5611_v42 = vpop.f32.mrf.mxu1  ;;  %v17046_v29 = vld [vmem:[#allocation41_spill] sm:$0xff] }
 0x2f8   : > { %v5162_v39 = vpop.f32.mrf.mxu0  ;;  %5887 = vmatmul.mubr.bf16.gmra.mxu0 %v11062_v54  ;;  %v11066_v54 = vld [vmem:[%s11762_s12 + $0xd0] ss:$44 sps:$4 sm:$0xff]  }
 0x2f9   : > { %17041 = vst [vmem:[#allocation37_spill] sm:$0xff] %v13367_v8  ;;  %v13370_v22 = vadd.f32 %v5611_v42, %v5159_v13  ;;  %v5163_v20 = vadd.f32 %v5162_v39, %v17044_v33  ;;  %v5615_v27 = vpop.f32.mrf.mxu1  ;;  %10498 = vmatmul.mubr.msk.bf16.gmra.mxu1 %vm3905_vm0, %v11065_v28  ;;  %5896 = vmatprep.mubr.bf16.mxu0 %v11068_v43  ;;  %v17048_v13 = vld [vmem:[#allocation42_spill] sm:$0xff]  ;;  %v11072_v33 = vld [vmem:[%s11762_s12 + $0x12c] ss:$44 sps:$4 sm:$0xff]  }
 0x2fa   : > { %v5164_v15 = vpop.f32.mrf.mxu0  ;;  %6349 = vmatprep.mubr.bf16.mxu1 %v17038_v21  ;;  %v11069_v39 = vld [vmem:[%s11762_s12 + $0xd8] ss:$44 sps:$4 sm:$0xff]  }
 0x2fb   : > { %17043 = vst [vmem:[#allocation38_spill] sm:$0xff] %v13370_v22  ;;  %v13375_v6 = vadd.f32 %v5615_v27, %v5163_v20  ;;  %v5165_v48 = vadd.f32 %v5164_v15, %v17046_v29  ;;  %v5617_v1 = vpop.f32.mrf.mxu1  ;;  %v17051_v29 = vld [vmem:[#allocation43_spill] sm:$0xff] }
 0x2fc   : > { %v5166_v56 = vpop.f32.mrf.mxu0 }
 0x2fd   : > { %17045 = vst [vmem:[#allocation39_spill] sm:$0xff] %v13375_v6  ;;  %v13379_v8 = vadd.f32 %v5617_v1, %v5165_v48  ;;  %v5167_v42 = vadd.f32 %v5166_v56, %v17048_v13  ;;  %v5619_v22 = vpop.f32.mrf.mxu1  ;;  %v17053_v13 = vld [vmem:[#allocation44_spill] sm:$0xff] }
 0x2fe   : > { %v5168_v34 = vpop.f32.mrf.mxu0 }
 0x2ff   : > { %17047 = vst [vmem:[#allocation40_spill] sm:$0xff] %v13379_v8  ;;  %v13384_v28 = vadd.f32 %v5619_v22, %v5167_v42  ;;  %v5169_v43 = vadd.f32 %v5168_v34, %v12668_v40  ;;  %v5621_v20 = vpop.f32.mrf.mxu1 }
 0x300   : > { %v5172_v27 = vpop.f32.mrf.mxu0  ;;  %5897 = vmatmul.mubr.bf16.gmra.mxu0 %v11066_v54  ;;  %v11070_v54 = vld [vmem:[%s11762_s12 + $0x128] ss:$44 sps:$4 sm:$0xff]  }
 0x301   : > { %17049 = vst [vmem:[#allocation41_spill] sm:$0xff] %v13384_v28  ;;  %v13387_v15 = vadd.f32 %v5621_v20, %v5169_v43  ;;  %v5173_v48 = vadd.f32 %v5172_v27, %v17051_v29  ;;  %v5625_v1 = vpop.f32.mrf.mxu1  ;;  %10499 = vmatmul.mubr.msk.bf16.gmra.mxu1 %vm3905_vm0, %v11069_v39  ;;  %5906 = vmatprep.mubr.bf16.mxu0 %v11072_v33  ;;  %v17055_v43 = vld [vmem:[#allocation45_spill] sm:$0xff]  ;;  %v11076_v29 = vld [vmem:[%s11762_s12 + $0x184] ss:$44 sps:$4 sm:$0xff]  }
 0x302   : > { %v5174_v56 = vpop.f32.mrf.mxu0  ;;  %6359 = vmatprep.mubr.bf16.mxu1 %v17038_v21  ;;  %v11073_v27 = vld [vmem:[%s11762_s12 + $0x130] ss:$44 sps:$4 sm:$0xff]   ;;  %v17057_v33 = vld [vmem:[#allocation46_spill] sm:$0xff] }
 0x303   : > { %17050 = vst [vmem:[#allocation42_spill] sm:$0xff] %v13387_v15  ;;  %v13392_v22 = vadd.f32 %v5625_v1, %v5173_v48  ;;  %v5175_v40 = vadd.f32 %v5174_v56, %v17053_v13  ;;  %v5627_v34 = vpop.f32.mrf.mxu1  ;;  %v17059_v13 = vld [vmem:[#allocation47_spill] sm:$0xff] }
 0x304   : > { %v5176_v42 = vpop.f32.mrf.mxu0 }
 0x305   : > { %17052 = vst [vmem:[#allocation43_spill] sm:$0xff] %v13392_v22  ;;  %v13396_v28 = vadd.f32 %v5627_v34, %v5175_v40  ;;  %v5177_v20 = vadd.f32 %v5176_v42, %v17055_v43  ;;  %v5629_v15 = vpop.f32.mrf.mxu1  ;;  %v17061_v43 = vld [vmem:[#allocation48_spill] sm:$0xff] }
 0x306   : > { %v5178_v8 = vpop.f32.mrf.mxu0 }
 0x307   : > { %17054 = vst [vmem:[#allocation44_spill] sm:$0xff] %v13396_v28  ;;  %v13401_v39 = vadd.f32 %v5629_v15, %v5177_v20  ;;  %v5179_v6 = vadd.f32 %v5178_v8, %v17057_v33  ;;  %v5631_v48 = vpop.f32.mrf.mxu1 }
 0x308   : > { %v5182_v1 = vpop.f32.mrf.mxu0  ;;  %5907 = vmatmul.mubr.bf16.gmra.mxu0 %v11070_v54  ;;  %v11074_v54 = vld [vmem:[%s11762_s12 + $0x180] ss:$44 sps:$4 sm:$0xff]  }
 0x309   : > { %17056 = vst [vmem:[#allocation45_spill] sm:$0xff] %v13401_v39  ;;  %v13404_v56 = vadd.f32 %v5631_v48, %v5179_v6  ;;  %v5183_v40 = vadd.f32 %v5182_v1, %v17059_v13  ;;  %v5635_v34 = vpop.f32.mrf.mxu1  ;;  %10500 = vmatmul.mubr.msk.bf16.gmra.mxu1 %vm3905_vm0, %v11073_v27  ;;  %5916 = vmatprep.mubr.bf16.mxu0 %v11076_v29  ;;  %v17063_v6 = vld [vmem:[#allocation49_spill] sm:$0xff]  ;;  %v11077_v1 = vld [vmem:[%s11762_s12 + $0x188] ss:$44 sps:$4 sm:$0xff]   ;;  %v17065_v29 = vld [vmem:[#allocation50_spill] sm:$0xff] }
 0x30a   : > { %v5184_v42 = vpop.f32.mrf.mxu0  ;;  %6369 = vmatprep.mubr.bf16.mxu1 %v17038_v21  ;;  %v11080_v13 = vld [vmem:[%s11762_s12 + $0x1dc] ss:$44 sps:$4 sm:$0xff]  }
 0x30b   : > { %17058 = vst [vmem:[#allocation46_spill] sm:$0xff] %v13404_v56  ;;  %v13409_v15 = vadd.f32 %v5635_v34, %v5183_v40  ;;  %v5185_v8 = vadd.f32 %v5184_v42, %v17061_v43  ;;  %v5637_v20 = vpop.f32.mrf.mxu1  ;;  %v17067_v43 = vld [vmem:[#allocation51_spill] sm:$0xff] }
 0x30c   : > { %v5186_v33 = vpop.f32.mrf.mxu0 }
 0x30d   : > { %17060 = vst [vmem:[#allocation47_spill] sm:$0xff] %v13409_v15  ;;  %v13413_v39 = vadd.f32 %v5637_v20, %v5185_v8  ;;  %v5187_v48 = vadd.f32 %v5186_v33, %v17063_v6  ;;  %v5639_v56 = vpop.f32.mrf.mxu1  ;;  %v17069_v6 = vld [vmem:[#allocation52_spill] sm:$0xff] }
 0x30e   : > { %v5188_v28 = vpop.f32.mrf.mxu0 }
 0x30f   : > { %17062 = vst [vmem:[#allocation48_spill] sm:$0xff] %v13413_v39  ;;  %v13418_v27 = vadd.f32 %v5639_v56, %v5187_v48  ;;  %v5189_v22 = vadd.f32 %v5188_v28, %v17065_v29  ;;  %v5641_v40 = vpop.f32.mrf.mxu1 }
 0x310   : > { %v5192_v34 = vpop.f32.mrf.mxu0  ;;  %5917 = vmatmul.mubr.bf16.gmra.mxu0 %v11074_v54  ;;  %v11078_v54 = vld [vmem:[%s11762_s12 + $0x1d8] ss:$44 sps:$4 sm:$0xff]  }
 0x311   : > { %17064 = vst [vmem:[#allocation49_spill] sm:$0xff] %v13418_v27  ;;  %v13421_v42 = vadd.f32 %v5641_v40, %v5189_v22  ;;  %v5193_v8 = vadd.f32 %v5192_v34, %v17067_v43  ;;  %v5645_v20 = vpop.f32.mrf.mxu1  ;;  %10501 = vmatmul.mubr.msk.bf16.gmra.mxu1 %vm3905_vm0, %v11077_v1  ;;  %5926 = vmatprep.mubr.bf16.mxu0 %v11080_v13  ;;  %v17071_v22 = vld [vmem:[#allocation53_spill] sm:$0xff]  ;;  %v11081_v34 = vld [vmem:[%s11762_s12 + $0x1e0] ss:$44 sps:$4 sm:$0xff]  }
 0x312   : > { %v5194_v33 = vpop.f32.mrf.mxu0  ;;  %6379 = vmatprep.mubr.bf16.mxu1 %v17038_v21  ;;  %v11084_v43 = vld [vmem:[%s11762_s12 + $0x234] ss:$44 sps:$4 sm:$0xff]  }
 0x313   : > { %17066 = vst [vmem:[#allocation50_spill] sm:$0xff] %v13421_v42  ;;  %v13426_v56 = vadd.f32 %v5645_v20, %v5193_v8  ;;  %v5195_v28 = vadd.f32 %v5194_v33, %v17069_v6  ;;  %v5647_v48 = vpop.f32.mrf.mxu1  ;;  %v17073_v13 = vld [vmem:[#allocation54_spill] sm:$0xff]  ;;  %v17075_v6 = vld [vmem:[#allocation55_spill] sm:$0xff] }
 0x314   : > { %v5196_v29 = vpop.f32.mrf.mxu0 }
 0x315   : > { %17068 = vst [vmem:[#allocation51_spill] sm:$0xff] %v13426_v56  ;;  %v13430_v27 = vadd.f32 %v5647_v48, %v5195_v28  ;;  %v5197_v40 = vadd.f32 %v5196_v29, %v17071_v22  ;;  %v5649_v42 = vpop.f32.mrf.mxu1  ;;  %v17077_v22 = vld [vmem:[#allocation56_spill] sm:$0xff] }
 0x316   : > { %v5198_v15 = vpop.f32.mrf.mxu0 }
 0x317   : > { %17070 = vst [vmem:[#allocation52_spill] sm:$0xff] %v13430_v27  ;;  %v13435_v1 = vadd.f32 %v5649_v42, %v5197_v40  ;;  %v5199_v39 = vadd.f32 %v5198_v15, %v17073_v13  ;;  %v5651_v8 = vpop.f32.mrf.mxu1 }
 0x318   : > { %v5202_v20 = vpop.f32.mrf.mxu0  ;;  %5927 = vmatmul.mubr.bf16.gmra.mxu0 %v11078_v54  ;;  %v11082_v54 = vld [vmem:[%s11762_s12 + $0x230] ss:$44 sps:$4 sm:$0xff]  }
 0x319   : > { %17072 = vst [vmem:[#allocation53_spill] sm:$0xff] %v13435_v1  ;;  %v13438_v33 = vadd.f32 %v5651_v8, %v5199_v39  ;;  %v5203_v28 = vadd.f32 %v5202_v20, %v17075_v6  ;;  %v5655_v48 = vpop.f32.mrf.mxu1  ;;  %10502 = vmatmul.mubr.msk.bf16.gmra.mxu1 %vm3905_vm0, %v11081_v34  ;;  %5936 = vmatprep.mubr.bf16.mxu0 %v11084_v43  ;;  %v11085_v20 = vld [vmem:[%s11762_s12 + $0x238] ss:$44 sps:$4 sm:$0xff]  }
 0x31a   : > { %v5204_v29 = vpop.f32.mrf.mxu0  ;;  %6389 = vmatprep.mubr.bf16.mxu1 %v17038_v21  ;;  %v11088_v6 = vld [vmem:[%s11762_s12 + $0x28c] ss:$44 sps:$4 sm:$0xff]  }
 0x31b   : > { %17074 = vst [vmem:[#allocation54_spill] sm:$0xff] %v13438_v33  ;;  %v13443_v42 = vadd.f32 %v5655_v48, %v5203_v28  ;;  %v5205_v15 = vadd.f32 %v5204_v29, %v17077_v22  ;;  %v5657_v40 = vpop.f32.mrf.mxu1  ;;  %v17081_v22 = vld [vmem:[#allocation57_spill] sm:$0xff] }
 0x31c   : > { %v5206_v13 = vpop.f32.mrf.mxu0 }
 0x31d   : > { %17076 = vst [vmem:[#allocation55_spill] sm:$0xff] %v13443_v42  ;;  %v13447_v1 = vadd.f32 %v5657_v40, %v5205_v15  ;;  %v5207_v39 = vadd.f32 %v5206_v13, %v12749_v17  ;;  %v5659_v8 = vpop.f32.mrf.mxu1 }
 0x31e   : > { %v5208_v33 = vpop.f32.mrf.mxu0 }
 0x31f   : > { %17078 = vst [vmem:[#allocation56_spill] sm:$0xff] %v13447_v1  ;;  %v13452_v34 = vadd.f32 %v5659_v8, %v5207_v39  ;;  %v5209_v43 = vadd.f32 %v5208_v33, %v12752_v52  ;;  %v5661_v28 = vpop.f32.mrf.mxu1  ;;  %v17083_v39 = vld [vmem:[#allocation58_spill] sm:$0xff] }
 0x320   : > { %v5212_v48 = vpop.f32.mrf.mxu0  ;;  %5937 = vmatmul.mubr.bf16.gmra.mxu0 %v11082_v54  ;;  %v11086_v54 = vld [vmem:[%s11762_s12 + $0x288] ss:$44 sps:$4 sm:$0xff]  }
 0x321   : > { %17079 = vst [vmem:[#allocation126_spill] sm:$0xff] %v13452_v34  ;;  %v13455_v29 = vadd.f32 %v5661_v28, %v5209_v43  ;;  %v5213_v15 = vadd.f32 %v5212_v48, %v17081_v22  ;;  %v5665_v40 = vpop.f32.mrf.mxu1  ;;  %10503 = vmatmul.mubr.msk.bf16.gmra.mxu1 %vm3905_vm0, %v11085_v20  ;;  %5946 = vmatprep.mubr.bf16.mxu0 %v11088_v6  ;;  %v17085_v43 = vld [vmem:[#allocation59_spill] sm:$0xff]  ;;  %v11089_v48 = vld [vmem:[%s11762_s12 + $0x290] ss:$44 sps:$4 sm:$0xff]  }
 0x322   : > { %v5214_v17 = vpop.f32.mrf.mxu0  ;;  %6399 = vmatprep.mubr.bf16.mxu1 %v17038_v21  ;;  %v11092_v22 = vld [vmem:[%s11762_s12 + $0x2e4] ss:$44 sps:$4 sm:$0xff]  }
 0x323   : > { %17080 = vst [vmem:[#allocation127_spill] sm:$0xff] %v13455_v29  ;;  %v13460_v13 = vadd.f32 %v5665_v40, %v5213_v15  ;;  %v5215_v52 = vadd.f32 %v5214_v17, %v17083_v39  ;;  %v5667_v33 = vpop.f32.mrf.mxu1  ;;  %v17086_v6 = vld [vmem:[#allocation60_spill] sm:$0xff]  ;;  %v17087_v39 = vld [vmem:[#allocation61_spill] sm:$0xff] }
 0x324   : > { %v5216_v8 = vpop.f32.mrf.mxu0 }
 0x325   : > { %17082 = vst [vmem:[#allocation57_spill] sm:$0xff] %v13460_v13  ;;  %v13464_v34 = vadd.f32 %v5667_v33, %v5215_v52  ;;  %v5217_v28 = vadd.f32 %v5216_v8, %v17085_v43  ;;  %v5669_v29 = vpop.f32.mrf.mxu1  ;;  %v17089_v43 = vld [vmem:[#allocation62_spill] sm:$0xff] }
 0x326   : > { %v5218_v42 = vpop.f32.mrf.mxu0 }
 0x327   : > { %17084 = vst [vmem:[#allocation58_spill] sm:$0xff] %v13464_v34  ;;  %v13469_v20 = vadd.f32 %v5669_v29, %v5217_v28  ;;  %v5219_v1 = vadd.f32 %v5218_v42, %v17086_v6  ;;  %v5671_v15 = vpop.f32.mrf.mxu1 }
 0x328   : > { %v5222_v40 = vpop.f32.mrf.mxu0  ;;  %5947 = vmatmul.mubr.bf16.gmra.mxu0 %v11086_v54  ;;  %v11090_v54 = vld [vmem:[%s11762_s12 + $0x2e0] ss:$44 sps:$4 sm:$0xff]  }
 0x329   : > { %v13472_v17 = vadd.f32 %v5671_v15, %v5219_v1  ;;  %v5223_v52 = vadd.f32 %v5222_v40, %v17087_v39  ;;  %v5675_v33 = vpop.f32.mrf.mxu1  ;;  %10504 = vmatmul.mubr.msk.bf16.gmra.mxu1 %vm3905_vm0, %v11089_v48  ;;  %5956 = vmatprep.mubr.bf16.mxu0 %v11092_v22  ;;  %v17091_v1 = vld [vmem:[#allocation63_spill] sm:$0xff]  ;;  %v17093_v22 = vld [vmem:[#allocation64_spill] sm:$0xff] }
 0x32a   : > { %v5224_v8 = vpop.f32.mrf.mxu0  ;;  %6409 = vmatprep.mubr.bf16.mxu1 %v17038_v21  ;;  %v11093_v40 = vld [vmem:[%s11762_s12 + $0x2e8] ss:$44 sps:$4 sm:$0xff]  }
 0x32b   : > { %v13477_v29 = vadd.f32 %v5675_v33, %v5223_v52  ;;  %v5225_v42 = vadd.f32 %v5224_v8, %v17089_v43  ;;  %v5677_v28 = vpop.f32.mrf.mxu1  ;;  %v11096_v39 = vld [vmem:[%s11762_s12 + $0x33c] ss:$44 sps:$4 sm:$0xff]  }
 0x32c   : > { %v5226_v6 = vpop.f32.mrf.mxu0  ;;  %v17095_v43 = vld [vmem:[#allocation65_spill] sm:$0xff] }
 0x32d   : > { %17088 = vst [vmem:[#allocation59_spill] sm:$0xff] %v13477_v29  ;;  %v13481_v13 = vadd.f32 %v5677_v28, %v5225_v42  ;;  %v5227_v15 = vadd.f32 %v5226_v6, %v17091_v1  ;;  %v5679_v34 = vpop.f32.mrf.mxu1  ;;  %v17097_v1 = vld [vmem:[#allocation66_spill] sm:$0xff] }
 0x32e   : > { %v5228_v56 = vpop.f32.mrf.mxu0 }
 0x32f   : > { %17090 = vst [vmem:[#allocation60_spill] sm:$0xff] %v13481_v13  ;;  %v13486_v48 = vadd.f32 %v5679_v34, %v5227_v15  ;;  %v5229_v27 = vadd.f32 %v5228_v56, %v17093_v22  ;;  %v5681_v52 = vpop.f32.mrf.mxu1 }
 0x330   : > { %v5232_v33 = vpop.f32.mrf.mxu0  ;;  %5957 = vmatmul.mubr.bf16.gmra.mxu0 %v11090_v54  ;;  %v11094_v54 = vld [vmem:[%s11762_s12 + $0x338] ss:$44 sps:$4 sm:$0xff]  }
 0x331   : > { %17092 = vst [vmem:[#allocation61_spill] sm:$0xff] %v13486_v48  ;;  %v13489_v8 = vadd.f32 %v5681_v52, %v5229_v27  ;;  %v5233_v42 = vadd.f32 %v5232_v33, %v17095_v43  ;;  %v5685_v28 = vpop.f32.mrf.mxu1  ;;  %10505 = vmatmul.mubr.msk.bf16.gmra.mxu1 %vm3905_vm0, %v11093_v40  ;;  %5966 = vmatprep.mubr.bf16.mxu0 %v11096_v39  ;;  %v17099_v27 = vld [vmem:[#allocation67_spill] sm:$0xff]  ;;  %v11100_v43 = vld [vmem:[%s11762_s12 + $0x394] ss:$44 sps:$4 sm:$0xff]  }
 0x332   : > { %v5234_v6 = vpop.f32.mrf.mxu0  ;;  %6419 = vmatprep.mubr.bf16.mxu1 %v17038_v21  ;;  %v11097_v33 = vld [vmem:[%s11762_s12 + $0x340] ss:$44 sps:$4 sm:$0xff]   ;;  %v17101_v39 = vld [vmem:[#allocation68_spill] sm:$0xff] }
 0x333   : > { %17094 = vst [vmem:[#allocation62_spill] sm:$0xff] %v13489_v8  ;;  %v13494_v34 = vadd.f32 %v5685_v28, %v5233_v42  ;;  %v5235_v56 = vadd.f32 %v5234_v6, %v17097_v1  ;;  %v5687_v15 = vpop.f32.mrf.mxu1  ;;  %v17103_v1 = vld [vmem:[#allocation69_spill] sm:$0xff] }
 0x334   : > { %v5236_v22 = vpop.f32.mrf.mxu0 }
 0x335   : > { %17096 = vst [vmem:[#allocation63_spill] sm:$0xff] %v13494_v34  ;;  %v13498_v29 = vadd.f32 %v5687_v15, %v5235_v56  ;;  %v5237_v52 = vadd.f32 %v5236_v22, %v17099_v27  ;;  %v5689_v13 = vpop.f32.mrf.mxu1  ;;  %v17105_v27 = vld [vmem:[#allocation70_spill] sm:$0xff] }
 0x336   : > { %v5238_v8 = vpop.f32.mrf.mxu0 }
 0x337   : > { %17098 = vst [vmem:[#allocation64_spill] sm:$0xff] %v13498_v29  ;;  %v13503_v40 = vadd.f32 %v5689_v13, %v5237_v52  ;;  %v5239_v48 = vadd.f32 %v5238_v8, %v17101_v39  ;;  %v5691_v42 = vpop.f32.mrf.mxu1 }
 0x338   : > { %v5242_v28 = vpop.f32.mrf.mxu0  ;;  %5967 = vmatmul.mubr.bf16.gmra.mxu0 %v11094_v54  ;;  %v11098_v54 = vld [vmem:[%s11762_s12 + $0x390] ss:$44 sps:$4 sm:$0xff]  }
 0x339   : > { %17100 = vst [vmem:[#allocation65_spill] sm:$0xff] %v13503_v40  ;;  %v13506_v6 = vadd.f32 %v5691_v42, %v5239_v48  ;;  %v5243_v56 = vadd.f32 %v5242_v28, %v17103_v1  ;;  %v5695_v15 = vpop.f32.mrf.mxu1  ;;  %10506 = vmatmul.mubr.msk.bf16.gmra.mxu1 %vm3905_vm0, %v11097_v33  ;;  %5976 = vmatprep.mubr.bf16.mxu0 %v11100_v43  ;;  %v17107_v48 = vld [vmem:[#allocation71_spill] sm:$0xff]  ;;  %v11101_v28 = vld [vmem:[%s11762_s12 + $0x398] ss:$44 sps:$4 sm:$0xff]   ;;  %v17109_v43 = vld [vmem:[#allocation72_spill] sm:$0xff] }
 0x33a   : > { %v5244_v22 = vpop.f32.mrf.mxu0  ;;  %6429 = vmatprep.mubr.bf16.mxu1 %v17038_v21  ;;  %v11104_v1 = vld [vmem:[%s11762_s12 + $0x3ec] ss:$44 sps:$4 sm:$0xff]  }
 0x33b   : > { %17102 = vst [vmem:[#allocation66_spill] sm:$0xff] %v13506_v6  ;;  %v13511_v13 = vadd.f32 %v5695_v15, %v5243_v56  ;;  %v5245_v8 = vadd.f32 %v5244_v22, %v17105_v27  ;;  %v5697_v52 = vpop.f32.mrf.mxu1  ;;  %v17111_v27 = vld [vmem:[#allocation73_spill] sm:$0xff] }
 0x33c   : > { %v5246_v39 = vpop.f32.mrf.mxu0 }
 0x33d   : > { %17104 = vst [vmem:[#allocation67_spill] sm:$0xff] %v13511_v13  ;;  %v13515_v34 = vadd.f32 %v5697_v52, %v5245_v8  ;;  %v5247_v42 = vadd.f32 %v5246_v39, %v17107_v48  ;;  %v5699_v29 = vpop.f32.mrf.mxu1  ;;  %v17113_v48 = vld [vmem:[#allocation74_spill] sm:$0xff] }
 0x33e   : > { %v5248_v6 = vpop.f32.mrf.mxu0 }
 0x33f   : > { %17106 = vst [vmem:[#allocation68_spill] sm:$0xff] %v13515_v34  ;;  %v13520_v33 = vadd.f32 %v5699_v29, %v5247_v42  ;;  %v5249_v40 = vadd.f32 %v5248_v6, %v17109_v43  ;;  %v5701_v56 = vpop.f32.mrf.mxu1 }
 0x340   : > { %v5252_v15 = vpop.f32.mrf.mxu0  ;;  %5977 = vmatmul.mubr.bf16.gmra.mxu0 %v11098_v54  ;;  %v11102_v54 = vld [vmem:[%s11762_s12 + $0x3e8] ss:$44 sps:$4 sm:$0xff]  }
 0x341   : > { %17108 = vst [vmem:[#allocation69_spill] sm:$0xff] %v13520_v33  ;;  %v13523_v22 = vadd.f32 %v5701_v56, %v5249_v40  ;;  %v5253_v8 = vadd.f32 %v5252_v15, %v17111_v27  ;;  %v5705_v52 = vpop.f32.mrf.mxu1  ;;  %10507 = vmatmul.mubr.msk.bf16.gmra.mxu1 %vm3905_vm0, %v11101_v28  ;;  %5986 = vmatprep.mubr.bf16.mxu0 %v11104_v1  ;;  %v17115_v40 = vld [vmem:[#allocation75_spill] sm:$0xff]  ;;  %v11105_v15 = vld [vmem:[%s11762_s12 + $0x3f0] ss:$44 sps:$4 sm:$0xff]  }
 0x342   : > { %v5254_v39 = vpop.f32.mrf.mxu0  ;;  %6439 = vmatprep.mubr.bf16.mxu1 %v17038_v21  ;;  %v11108_v27 = vld [vmem:[%s11762_s12 + $0x444] ss:$44 sps:$4 sm:$0xff]  }
 0x343   : > { %17110 = vst [vmem:[#allocation70_spill] sm:$0xff] %v13523_v22  ;;  %v13528_v29 = vadd.f32 %v5705_v52, %v5253_v8  ;;  %v5255_v6 = vadd.f32 %v5254_v39, %v17113_v48  ;;  %v5707_v42 = vpop.f32.mrf.mxu1  ;;  %v17117_v1 = vld [vmem:[#allocation76_spill] sm:$0xff]  ;;  %v17119_v48 = vld [vmem:[#allocation77_spill] sm:$0xff] }
 0x344   : > { %v5256_v43 = vpop.f32.mrf.mxu0 }
 0x345   : > { %17112 = vst [vmem:[#allocation71_spill] sm:$0xff] %v13528_v29  ;;  %v13532_v13 = vadd.f32 %v5707_v42, %v5255_v6  ;;  %v5257_v56 = vadd.f32 %v5256_v43, %v17115_v40  ;;  %v5709_v34 = vpop.f32.mrf.mxu1  ;;  %v17121_v40 = vld [vmem:[#allocation78_spill] sm:$0xff] }
 0x346   : > { %v5258_v22 = vpop.f32.mrf.mxu0 }
 0x347   : > { %17114 = vst [vmem:[#allocation72_spill] sm:$0xff] %v13532_v13  ;;  %v13537_v28 = vadd.f32 %v5709_v34, %v5257_v56  ;;  %v5259_v33 = vadd.f32 %v5258_v22, %v17117_v1  ;;  %v5711_v8 = vpop.f32.mrf.mxu1 }
 0x348   : > { %v5262_v52 = vpop.f32.mrf.mxu0  ;;  %5987 = vmatmul.mubr.bf16.gmra.mxu0 %v11102_v54  ;;  %v11106_v54 = vld [vmem:[%s11762_s12 + $0x440] ss:$44 sps:$4 sm:$0xff]  }
 0x349   : > { %17116 = vst [vmem:[#allocation73_spill] sm:$0xff] %v13537_v28  ;;  %v13540_v39 = vadd.f32 %v5711_v8, %v5259_v33  ;;  %v5263_v6 = vadd.f32 %v5262_v52, %v17119_v48  ;;  %v5715_v42 = vpop.f32.mrf.mxu1  ;;  %10508 = vmatmul.mubr.msk.bf16.gmra.mxu1 %vm3905_vm0, %v11105_v15  ;;  %5996 = vmatprep.mubr.bf16.mxu0 %v11108_v27  ;;  %v17123_v33 = vld [vmem:[#allocation79_spill] sm:$0xff]  ;;  %v17125_v27 = vld [vmem:[#allocation80_spill] sm:$0xff] }
 0x34a   : > { %v5264_v43 = vpop.f32.mrf.mxu0  ;;  %6449 = vmatprep.mubr.bf16.mxu1 %v17038_v21  ;;  %v11109_v52 = vld [vmem:[%s11762_s12 + $0x448] ss:$44 sps:$4 sm:$0xff]  }
 0x34b   : > { %17118 = vst [vmem:[#allocation74_spill] sm:$0xff] %v13540_v39  ;;  %v13545_v34 = vadd.f32 %v5715_v42, %v5263_v6  ;;  %v5265_v22 = vadd.f32 %v5264_v43, %v17121_v40  ;;  %v5717_v56 = vpop.f32.mrf.mxu1  ;;  %v11112_v48 = vld [vmem:[%s11762_s12 + $0x49c] ss:$44 sps:$4 sm:$0xff]  }
 0x34c   : > { %v5266_v1 = vpop.f32.mrf.mxu0  ;;  %v17127_v40 = vld [vmem:[#allocation81_spill] sm:$0xff] }
 0x34d   : > { %17120 = vst [vmem:[#allocation75_spill] sm:$0xff] %v13545_v34  ;;  %v13549_v29 = vadd.f32 %v5717_v56, %v5265_v22  ;;  %v5267_v8 = vadd.f32 %v5266_v1, %v17123_v33  ;;  %v5719_v13 = vpop.f32.mrf.mxu1  ;;  %v17129_v33 = vld [vmem:[#allocation82_spill] sm:$0xff] }
 0x34e   : > { %v5268_v39 = vpop.f32.mrf.mxu0 }
 0x34f   : > { %17122 = vst [vmem:[#allocation76_spill] sm:$0xff] %v13549_v29  ;;  %v13554_v15 = vadd.f32 %v5719_v13, %v5267_v8  ;;  %v5269_v28 = vadd.f32 %v5268_v39, %v17125_v27  ;;  %v5721_v6 = vpop.f32.mrf.mxu1 }
 0x350   : > { %v5272_v42 = vpop.f32.mrf.mxu0  ;;  %5997 = vmatmul.mubr.bf16.gmra.mxu0 %v11106_v54  ;;  %v11110_v54 = vld [vmem:[%s11762_s12 + $0x498] ss:$44 sps:$4 sm:$0xff]  }
 0x351   : > { %17124 = vst [vmem:[#allocation77_spill] sm:$0xff] %v13554_v15  ;;  %v13557_v43 = vadd.f32 %v5721_v6, %v5269_v28  ;;  %v5273_v22 = vadd.f32 %v5272_v42, %v17127_v40  ;;  %v5725_v56 = vpop.f32.mrf.mxu1  ;;  %10509 = vmatmul.mubr.msk.bf16.gmra.mxu1 %vm3905_vm0, %v11109_v52  ;;  %6006 = vmatprep.mubr.bf16.mxu0 %v11112_v48  ;;  %v17131_v28 = vld [vmem:[#allocation83_spill] sm:$0xff]  ;;  %v11116_v40 = vld [vmem:[%s11762_s12 + $0x4f4] ss:$44 sps:$4 sm:$0xff]  }
 0x352   : > { %v5274_v1 = vpop.f32.mrf.mxu0  ;;  %6459 = vmatprep.mubr.bf16.mxu1 %v17038_v21  ;;  %v11113_v42 = vld [vmem:[%s11762_s12 + $0x4a0] ss:$44 sps:$4 sm:$0xff]   ;;  %v17133_v48 = vld [vmem:[#allocation84_spill] sm:$0xff] }
 0x353   : > { %17126 = vst [vmem:[#allocation78_spill] sm:$0xff] %v13557_v43  ;;  %v13562_v13 = vadd.f32 %v5725_v56, %v5273_v22  ;;  %v5275_v39 = vadd.f32 %v5274_v1, %v17129_v33  ;;  %v5727_v8 = vpop.f32.mrf.mxu1  ;;  %v17135_v33 = vld [vmem:[#allocation85_spill] sm:$0xff] }
 0x354   : > { %v5276_v27 = vpop.f32.mrf.mxu0 }
 0x355   : > { %17128 = vst [vmem:[#allocation79_spill] sm:$0xff] %v13562_v13  ;;  %v13566_v34 = vadd.f32 %v5727_v8, %v5275_v39  ;;  %v5277_v6 = vadd.f32 %v5276_v27, %v17131_v28  ;;  %v5729_v29 = vpop.f32.mrf.mxu1  ;;  %v17137_v28 = vld [vmem:[#allocation86_spill] sm:$0xff] }
 0x356   : > { %v5278_v43 = vpop.f32.mrf.mxu0 }
 0x357   : > { %17130 = vst [vmem:[#allocation80_spill] sm:$0xff] %v13566_v34  ;;  %v13571_v52 = vadd.f32 %v5729_v29, %v5277_v6  ;;  %v5279_v15 = vadd.f32 %v5278_v43, %v17133_v48  ;;  %v5731_v22 = vpop.f32.mrf.mxu1 }
 0x358   : > { %v5282_v56 = vpop.f32.mrf.mxu0  ;;  %6007 = vmatmul.mubr.bf16.gmra.mxu0 %v11110_v54  ;;  %v11114_v54 = vld [vmem:[%s11762_s12 + $0x4f0] ss:$44 sps:$4 sm:$0xff]  }
 0x359   : > { %17132 = vst [vmem:[#allocation81_spill] sm:$0xff] %v13571_v52  ;;  %v13574_v1 = vadd.f32 %v5731_v22, %v5279_v15  ;;  %v5283_v39 = vadd.f32 %v5282_v56, %v17135_v33  ;;  %v5735_v8 = vpop.f32.mrf.mxu1  ;;  %10510 = vmatmul.mubr.msk.bf16.gmra.mxu1 %vm3905_vm0, %v11113_v42  ;;  %6016 = vmatprep.mubr.bf16.mxu0 %v11116_v40  ;;  %v17139_v15 = vld [vmem:[#allocation87_spill] sm:$0xff]  ;;  %v11117_v56 = vld [vmem:[%s11762_s12 + $0x4f8] ss:$44 sps:$4 sm:$0xff]   ;;  %v17141_v40 = vld [vmem:[#allocation88_spill] sm:$0xff] }
 0x35a   : > { %v5284_v27 = vpop.f32.mrf.mxu0  ;;  %6469 = vmatprep.mubr.bf16.mxu1 %v17038_v21  ;;  %v11120_v33 = vld [vmem:[%s11762_s12 + $0x54c] ss:$44 sps:$4 sm:$0xff]  }
 0x35b   : > { %17134 = vst [vmem:[#allocation82_spill] sm:$0xff] %v13574_v1  ;;  %v13579_v29 = vadd.f32 %v5735_v8, %v5283_v39  ;;  %v5285_v43 = vadd.f32 %v5284_v27, %v17137_v28  ;;  %v5737_v6 = vpop.f32.mrf.mxu1  ;;  %v17143_v28 = vld [vmem:[#allocation89_spill] sm:$0xff] }
 0x35c   : > { %v5286_v48 = vpop.f32.mrf.mxu0 }
 0x35d   : > { %17136 = vst [vmem:[#allocation83_spill] sm:$0xff] %v13579_v29  ;;  %v13583_v13 = vadd.f32 %v5737_v6, %v5285_v43  ;;  %v5287_v22 = vadd.f32 %v5286_v48, %v17139_v15  ;;  %v5739_v34 = vpop.f32.mrf.mxu1  ;;  %v17145_v15 = vld [vmem:[#allocation90_spill] sm:$0xff] }
 0x35e   : > { %v5288_v1 = vpop.f32.mrf.mxu0 }
 0x35f   : > { %17138 = vst [vmem:[#allocation84_spill] sm:$0xff] %v13583_v13  ;;  %v13588_v42 = vadd.f32 %v5739_v34, %v5287_v22  ;;  %v5289_v52 = vadd.f32 %v5288_v1, %v17141_v40  ;;  %v5741_v39 = vpop.f32.mrf.mxu1 }
 0x360   : > { %v5292_v8 = vpop.f32.mrf.mxu0  ;;  %6017 = vmatmul.mubr.bf16.gmra.mxu0 %v11114_v54  ;;  %v11118_v54 = vld [vmem:[%s11762_s12 + $0x548] ss:$44 sps:$4 sm:$0xff]  }
 0x361   : > { %17140 = vst [vmem:[#allocation85_spill] sm:$0xff] %v13588_v42  ;;  %v13591_v27 = vadd.f32 %v5741_v39, %v5289_v52  ;;  %v5293_v43 = vadd.f32 %v5292_v8, %v17143_v28  ;;  %v5745_v6 = vpop.f32.mrf.mxu1  ;;  %10511 = vmatmul.mubr.msk.bf16.gmra.mxu1 %vm3905_vm0, %v11117_v56  ;;  %6026 = vmatprep.mubr.bf16.mxu0 %v11120_v33  ;;  %v17147_v52 = vld [vmem:[#allocation91_spill] sm:$0xff]  ;;  %v11121_v8 = vld [vmem:[%s11762_s12 + $0x550] ss:$44 sps:$4 sm:$0xff]  }
 0x362   : > { %v5294_v48 = vpop.f32.mrf.mxu0  ;;  %6479 = vmatprep.mubr.bf16.mxu1 %v17038_v21  ;;  %v11124_v28 = vld [vmem:[%s11762_s12 + $0x5a4] ss:$44 sps:$4 sm:$0xff]  }
 0x363   : > { %17142 = vst [vmem:[#allocation86_spill] sm:$0xff] %v13591_v27  ;;  %v13596_v34 = vadd.f32 %v5745_v6, %v5293_v43  ;;  %v5295_v1 = vadd.f32 %v5294_v48, %v17145_v15  ;;  %v5747_v22 = vpop.f32.mrf.mxu1  ;;  %v17149_v33 = vld [vmem:[#allocation92_spill] sm:$0xff]  ;;  %v17151_v15 = vld [vmem:[#allocation93_spill] sm:$0xff] }
 0x364   : > { %v5296_v40 = vpop.f32.mrf.mxu0 }
 0x365   : > { %17144 = vst [vmem:[#allocation87_spill] sm:$0xff] %v13596_v34  ;;  %v13600_v29 = vadd.f32 %v5747_v22, %v5295_v1  ;;  %v5297_v39 = vadd.f32 %v5296_v40, %v17147_v52  ;;  %v5749_v13 = vpop.f32.mrf.mxu1  ;;  %v17153_v52 = vld [vmem:[#allocation94_spill] sm:$0xff] }
 0x366   : > { %v5298_v27 = vpop.f32.mrf.mxu0 }
 0x367   : > { %17146 = vst [vmem:[#allocation88_spill] sm:$0xff] %v13600_v29  ;;  %v13605_v56 = vadd.f32 %v5749_v13, %v5297_v39  ;;  %v5299_v42 = vadd.f32 %v5298_v27, %v17149_v33  ;;  %v5751_v43 = vpop.f32.mrf.mxu1 }
 0x368   : > { %v5302_v6 = vpop.f32.mrf.mxu0  ;;  %6027 = vmatmul.mubr.bf16.gmra.mxu0 %v11118_v54  ;;  %v11122_v54 = vld [vmem:[%s11762_s12 + $0x5a0] ss:$44 sps:$4 sm:$0xff]  }
 0x369   : > { %17148 = vst [vmem:[#allocation89_spill] sm:$0xff] %v13605_v56  ;;  %v13608_v48 = vadd.f32 %v5751_v43, %v5299_v42  ;;  %v5303_v1 = vadd.f32 %v5302_v6, %v17151_v15  ;;  %v5755_v22 = vpop.f32.mrf.mxu1  ;;  %10512 = vmatmul.mubr.msk.bf16.gmra.mxu1 %vm3905_vm0, %v11121_v8  ;;  %6036 = vmatprep.mubr.bf16.mxu0 %v11124_v28  ;;  %v17155_v42 = vld [vmem:[#allocation95_spill] sm:$0xff]  ;;  %v17156_v28 = vld [vmem:[#allocation96_spill] sm:$0xff] }
 0x36a   : > { %v5304_v40 = vpop.f32.mrf.mxu0  ;;  %6489 = vmatprep.mubr.bf16.mxu1 %v17038_v21  ;;  %v11125_v6 = vld [vmem:[%s11762_s12 + $0x5a8] ss:$44 sps:$4 sm:$0xff]  }
 0x36b   : > { %17150 = vst [vmem:[#allocation90_spill] sm:$0xff] %v13608_v48  ;;  %v13613_v13 = vadd.f32 %v5755_v22, %v5303_v1  ;;  %v5305_v27 = vadd.f32 %v5304_v40, %v17153_v52  ;;  %v5757_v39 = vpop.f32.mrf.mxu1  ;;  %v11128_v15 = vld [vmem:[%s11762_s12 + $0x5fc] ss:$44 sps:$4 sm:$0xff]  }
 0x36c   : > { %v5306_v33 = vpop.f32.mrf.mxu0  ;;  %v17157_v52 = vld [vmem:[#allocation97_spill] sm:$0xff] }
 0x36d   : > { %17152 = vst [vmem:[#allocation91_spill] sm:$0xff] %v13613_v13  ;;  %v13617_v34 = vadd.f32 %v5757_v39, %v5305_v27  ;;  %v5307_v43 = vadd.f32 %v5306_v33, %v17155_v42  ;;  %v5759_v29 = vpop.f32.mrf.mxu1 }
 0x36e   : > { %v5308_v48 = vpop.f32.mrf.mxu0 }
 0x36f   : > { %17154 = vst [vmem:[#allocation92_spill] sm:$0xff] %v13617_v34  ;;  %v13622_v8 = vadd.f32 %v5759_v29, %v5307_v43  ;;  %v5309_v56 = vadd.f32 %v5308_v48, %v17156_v28  ;;  %v5761_v1 = vpop.f32.mrf.mxu1 }
 0x370   : > { %v5312_v22 = vpop.f32.mrf.mxu0  ;;  %6037 = vmatmul.mubr.bf16.gmra.mxu0 %v11122_v54  ;;  %v11126_v54 = vld [vmem:[%s11762_s12 + $0x5f8] ss:$44 sps:$4 sm:$0xff]  }
 0x371   : > { %v13625_v40 = vadd.f32 %v5761_v1, %v5309_v56  ;;  %v5313_v27 = vadd.f32 %v5312_v22, %v17157_v52  ;;  %v5765_v39 = vpop.f32.mrf.mxu1  ;;  %10513 = vmatmul.mubr.msk.bf16.gmra.mxu1 %vm3905_vm0, %v11125_v6  ;;  %6046 = vmatprep.mubr.bf16.mxu0 %v11128_v15  ;;  %v11129_v22 = vld [vmem:[%s11762_s12 + $0x600] ss:$44 sps:$4 sm:$0xff]  }
 0x372   : > { %v5314_v33 = vpop.f32.mrf.mxu0  ;;  %6499 = vmatprep.mubr.bf16.mxu1 %v17038_v21  ;;  %v11132_v52 = vld [vmem:[%s11762_s12 + $0x654] ss:$44 sps:$4 sm:$0xff]  }
 0x373   : > { %v13630_v29 = vadd.f32 %v5765_v39, %v5313_v27  ;;  %v5315_v48 = vadd.f32 %v5314_v33, %v12936_v30  ;;  %v5767_v42 = vpop.f32.mrf.mxu1  ;;  %v17161_v33 = vld [vmem:[#allocation98_spill] sm:$0xff] }
 0x374   : > { %v5316_v43 = vpop.f32.mrf.mxu0 }
 0x375   : > { %17158 = vst [vmem:[#allocation93_spill] sm:$0xff] %v13630_v29  ;;  %v13634_v28 = vadd.f32 %v5767_v42, %v5315_v48  ;;  %v5317_v56 = vadd.f32 %v5316_v43, %v12941_v60  ;;  %v5769_v1 = vpop.f32.mrf.mxu1 }
 0x376   : > { %v5318_v13 = vpop.f32.mrf.mxu0 }
 0x377   : > { %17159 = vst [vmem:[#allocation94_spill] sm:$0xff] %v13634_v28  ;;  %v13639_v6 = vadd.f32 %v5769_v1, %v5317_v56  ;;  %v5319_v15 = vadd.f32 %v5318_v13, %v12944_v10  ;;  %v5771_v27 = vpop.f32.mrf.mxu1  ;;  %v17163_v56 = vld [vmem:[#allocation99_spill] sm:$0xff] }
 0x378   : > { %v5322_v39 = vpop.f32.mrf.mxu0  ;;  %6047 = vmatmul.mubr.bf16.gmra.mxu0 %v11126_v54  ;;  %v11130_v54 = vld [vmem:[%s11762_s12 + $0x650] ss:$44 sps:$4 sm:$0xff]  }
 0x379   : > { %v13642_v30 = vadd.f32 %v5771_v27, %v5319_v15  ;;  %v5323_v48 = vadd.f32 %v5322_v39, %v17161_v33  ;;  %v5775_v42 = vpop.f32.mrf.mxu1  ;;  %10514 = vmatmul.mubr.msk.bf16.gmra.mxu1 %vm3905_vm0, %v11129_v22  ;;  %6056 = vmatprep.mubr.bf16.mxu0 %v11132_v52  ;;  %v17165_v15 = vld [vmem:[#allocation100_spill] sm:$0xff]  ;;  %v11133_v39 = vld [vmem:[%s11762_s12 + $0x658] ss:$44 sps:$4 sm:$0xff]  }
 0x37a   : > { %v5324_v60 = vpop.f32.mrf.mxu0  ;;  %6509 = vmatprep.mubr.bf16.mxu1 %v17038_v21  ;;  %v11136_v33 = vld [vmem:[%s11762_s12 + $0x6ac] ss:$44 sps:$4 sm:$0xff]  }
 0x37b   : > { %17160 = vst [vmem:[#allocation95_spill] sm:$0xff] %v13642_v30  ;;  %v13647_v43 = vadd.f32 %v5775_v42, %v5323_v48  ;;  %v5325_v10 = vadd.f32 %v5324_v60, %v17163_v56  ;;  %v5777_v13 = vpop.f32.mrf.mxu1  ;;  %v17167_v52 = vld [vmem:[#allocation101_spill] sm:$0xff]  ;;  %v17169_v56 = vld [vmem:[#allocation102_spill] sm:$0xff] }
 0x37c   : > { %v5326_v1 = vpop.f32.mrf.mxu0 }
 0x37d   : > { %17162 = vst [vmem:[#allocation96_spill] sm:$0xff] %v13647_v43  ;;  %v13651_v29 = vadd.f32 %v5777_v13, %v5325_v10  ;;  %v5327_v27 = vadd.f32 %v5326_v1, %v17165_v15  ;;  %v5779_v28 = vpop.f32.mrf.mxu1  ;;  %v17171_v15 = vld [vmem:[#allocation103_spill] sm:$0xff] }
 0x37e   : > { %v5328_v34 = vpop.f32.mrf.mxu0 }
 0x37f   : > { %17164 = vst [vmem:[#allocation97_spill] sm:$0xff] %v13651_v29  ;;  %v13656_v22 = vadd.f32 %v5779_v28, %v5327_v27  ;;  %v5329_v30 = vadd.f32 %v5328_v34, %v17167_v52  ;;  %v5781_v48 = vpop.f32.mrf.mxu1 }
 0x380   : > { %v5332_v42 = vpop.f32.mrf.mxu0  ;;  %6057 = vmatmul.mubr.bf16.gmra.mxu0 %v11130_v54  ;;  %v11134_v54 = vld [vmem:[%s11762_s12 + $0x6a8] ss:$44 sps:$4 sm:$0xff]  }
 0x381   : > { %17166 = vst [vmem:[#allocation98_spill] sm:$0xff] %v13656_v22  ;;  %v13659_v60 = vadd.f32 %v5781_v48, %v5329_v30  ;;  %v5333_v10 = vadd.f32 %v5332_v42, %v17169_v56  ;;  %v5785_v13 = vpop.f32.mrf.mxu1  ;;  %10515 = vmatmul.mubr.msk.bf16.gmra.mxu1 %vm3905_vm0, %v11133_v39  ;;  %6066 = vmatprep.mubr.bf16.mxu0 %v11136_v33  ;;  %v17173_v30 = vld [vmem:[#allocation104_spill] sm:$0xff]  ;;  %v17175_v33 = vld [vmem:[#allocation105_spill] sm:$0xff] }
 0x382   : > { %v5334_v1 = vpop.f32.mrf.mxu0  ;;  %6519 = vmatprep.mubr.bf16.mxu1 %v17038_v21  ;;  %v11137_v42 = vld [vmem:[%s11762_s12 + $0x6b0] ss:$44 sps:$4 sm:$0xff]  }
 0x383   : > { %17168 = vst [vmem:[#allocation99_spill] sm:$0xff] %v13659_v60  ;;  %v13664_v28 = vadd.f32 %v5785_v13, %v5333_v10  ;;  %v5335_v34 = vadd.f32 %v5334_v1, %v17171_v15  ;;  %v5787_v27 = vpop.f32.mrf.mxu1  ;;  %v11140_v56 = vld [vmem:[%s11762_s12 + $0x704] ss:$44 sps:$4 sm:$0xff]  }
 0x384   : > { %v5336_v52 = vpop.f32.mrf.mxu0  ;;  %v17177_v15 = vld [vmem:[#allocation106_spill] sm:$0xff] }
 0x385   : > { %17170 = vst [vmem:[#allocation100_spill] sm:$0xff] %v13664_v28  ;;  %v13668_v43 = vadd.f32 %v5787_v27, %v5335_v34  ;;  %v5337_v48 = vadd.f32 %v5336_v52, %v17173_v30  ;;  %v5789_v29 = vpop.f32.mrf.mxu1  ;;  %v17179_v30 = vld [vmem:[#allocation107_spill] sm:$0xff] }
 0x386   : > { %v5338_v60 = vpop.f32.mrf.mxu0 }
 0x387   : > { %17172 = vst [vmem:[#allocation101_spill] sm:$0xff] %v13668_v43  ;;  %v13673_v39 = vadd.f32 %v5789_v29, %v5337_v48  ;;  %v5339_v22 = vadd.f32 %v5338_v60, %v17175_v33  ;;  %v5791_v10 = vpop.f32.mrf.mxu1 }
 0x388   : > { %v5342_v13 = vpop.f32.mrf.mxu0  ;;  %6067 = vmatmul.mubr.bf16.gmra.mxu0 %v11134_v54  ;;  %v11138_v54 = vld [vmem:[%s11762_s12 + $0x700] ss:$44 sps:$4 sm:$0xff]  }
 0x389   : > { %17174 = vst [vmem:[#allocation102_spill] sm:$0xff] %v13673_v39  ;;  %v13676_v1 = vadd.f32 %v5791_v10, %v5339_v22  ;;  %v5343_v34 = vadd.f32 %v5342_v13, %v17177_v15  ;;  %v5795_v27 = vpop.f32.mrf.mxu1  ;;  %10516 = vmatmul.mubr.msk.bf16.gmra.mxu1 %vm3905_vm0, %v11137_v42  ;;  %6076 = vmatprep.mubr.bf16.mxu0 %v11140_v56  ;;  %v17181_v22 = vld [vmem:[#allocation108_spill] sm:$0xff]  ;;  %v11144_v15 = vld [vmem:[%s11762_s12 + $0x75c] ss:$44 sps:$4 sm:$0xff]  }
 0x38a   : > { %v5344_v52 = vpop.f32.mrf.mxu0  ;;  %6529 = vmatprep.mubr.bf16.mxu1 %v17038_v21  ;;  %v11141_v13 = vld [vmem:[%s11762_s12 + $0x708] ss:$44 sps:$4 sm:$0xff]   ;;  %v17183_v56 = vld [vmem:[#allocation109_spill] sm:$0xff] }
 0x38b   : > { %17176 = vst [vmem:[#allocation103_spill] sm:$0xff] %v13676_v1  ;;  %v13681_v29 = vadd.f32 %v5795_v27, %v5343_v34  ;;  %v5345_v60 = vadd.f32 %v5344_v52, %v17179_v30  ;;  %v5797_v48 = vpop.f32.mrf.mxu1  ;;  %v17185_v30 = vld [vmem:[#allocation110_spill] sm:$0xff] }
 0x38c   : > { %v5346_v33 = vpop.f32.mrf.mxu0 }
 0x38d   : > { %17178 = vst [vmem:[#allocation104_spill] sm:$0xff] %v13681_v29  ;;  %v13685_v28 = vadd.f32 %v5797_v48, %v5345_v60  ;;  %v5347_v10 = vadd.f32 %v5346_v33, %v17181_v22  ;;  %v5799_v43 = vpop.f32.mrf.mxu1  ;;  %v17187_v22 = vld [vmem:[#allocation111_spill] sm:$0xff] }
 0x38e   : > { %v5348_v1 = vpop.f32.mrf.mxu0 }
 0x38f   : > { %17180 = vst [vmem:[#allocation105_spill] sm:$0xff] %v13685_v28  ;;  %v13690_v42 = vadd.f32 %v5799_v43, %v5347_v10  ;;  %v5349_v39 = vadd.f32 %v5348_v1, %v17183_v56  ;;  %v5801_v34 = vpop.f32.mrf.mxu1 }
 0x390   : > { %v5352_v27 = vpop.f32.mrf.mxu0  ;;  %6077 = vmatmul.mubr.bf16.gmra.mxu0 %v11138_v54  ;;  %v11142_v54 = vld [vmem:[%s11762_s12 + $0x758] ss:$44 sps:$4 sm:$0xff]  }
 0x391   : > { %17182 = vst [vmem:[#allocation106_spill] sm:$0xff] %v13690_v42  ;;  %v13693_v52 = vadd.f32 %v5801_v34, %v5349_v39  ;;  %v5353_v60 = vadd.f32 %v5352_v27, %v17185_v30  ;;  %v5805_v48 = vpop.f32.mrf.mxu1  ;;  %10517 = vmatmul.mubr.msk.bf16.gmra.mxu1 %vm3905_vm0, %v11141_v13  ;;  %6086 = vmatprep.mubr.bf16.mxu0 %v11144_v15  ;;  %v17189_v39 = vld [vmem:[#allocation112_spill] sm:$0xff]  ;;  %v11145_v27 = vld [vmem:[%s11762_s12 + $0x760] ss:$44 sps:$4 sm:$0xff]   ;;  %v17190_v15 = vld [vmem:[#allocation113_spill] sm:$0xff] }
 0x392   : > { %v5354_v33 = vpop.f32.mrf.mxu0  ;;  %6539 = vmatprep.mubr.bf16.mxu1 %v17038_v21  ;;  %v11148_v30 = vld [vmem:[%s11762_s12 + $0x7b4] ss:$44 sps:$4 sm:$0xff]  }
 0x393   : > { %17184 = vst [vmem:[#allocation107_spill] sm:$0xff] %v13693_v52  ;;  %v13698_v43 = vadd.f32 %v5805_v48, %v5353_v60  ;;  %v5355_v1 = vadd.f32 %v5354_v33, %v17187_v22  ;;  %v5807_v10 = vpop.f32.mrf.mxu1  ;;  %v17192_v22 = vld [vmem:[#allocation114_spill] sm:$0xff] }
 0x394   : > { %v5356_v56 = vpop.f32.mrf.mxu0 }
 0x395   : > { %17186 = vst [vmem:[#allocation108_spill] sm:$0xff] %v13698_v43  ;;  %v13702_v29 = vadd.f32 %v5807_v10, %v5355_v1  ;;  %v5357_v34 = vadd.f32 %v5356_v56, %v17189_v39  ;;  %v5809_v28 = vpop.f32.mrf.mxu1 }
 0x396   : > { %v5358_v52 = vpop.f32.mrf.mxu0 }
 0x397   : > { %17188 = vst [vmem:[#allocation109_spill] sm:$0xff] %v13702_v29  ;;  %v13707_v13 = vadd.f32 %v5809_v28, %v5357_v34  ;;  %v5359_v42 = vadd.f32 %v5358_v52, %v17190_v15  ;;  %v5811_v60 = vpop.f32.mrf.mxu1 }
 0x398   : > { %v5362_v48 = vpop.f32.mrf.mxu0  ;;  %6087 = vmatmul.mubr.bf16.gmra.mxu0 %v11142_v54  ;;  %v11146_v54 = vld [vmem:[%s11762_s12 + $0x7b0] ss:$44 sps:$4 sm:$0xff]  }
 0x399   : > { %v13710_v33 = vadd.f32 %v5811_v60, %v5359_v42  ;;  %v5363_v1 = vadd.f32 %v5362_v48, %v17192_v22  ;;  %v5815_v10 = vpop.f32.mrf.mxu1  ;;  %10518 = vmatmul.mubr.msk.bf16.gmra.mxu1 %vm3905_vm0, %v11145_v27  ;;  %6096 = vmatprep.mubr.bf16.mxu0 %v11148_v30  ;;  %v17195_v42 = vld [vmem:[#allocation115_spill] sm:$0xff]  ;;  %v11149_v48 = vld [vmem:[%s11762_s12 + $0x7b8] ss:$44 sps:$4 sm:$0xff]   ;;  %v17197_v30 = vld [vmem:[#allocation116_spill] sm:$0xff] }
 0x39a   : > { %v5364_v56 = vpop.f32.mrf.mxu0  ;;  %6549 = vmatprep.mubr.bf16.mxu1 %v17038_v21  ;;  %v11152_v22 = vld [vmem:[%s11762_s12 + $0x80c] ss:$44 sps:$4 sm:$0xff]  }
 0x39b   : > { %17191 = vst [vmem:[#allocation110_spill] sm:$0xff] %v13710_v33  ;;  %v13715_v28 = vadd.f32 %v5815_v10, %v5363_v1  ;;  %v5365_v52 = vadd.f32 %v5364_v56, %v13020_v58  ;;  %v5817_v39 = vpop.f32.mrf.mxu1  ;;  %v17199_v56 = vld [vmem:[#allocation117_spill] sm:$0xff] }
 0x39c   : > { %v5366_v34 = vpop.f32.mrf.mxu0 }
 0x39d   : > { %17193 = vst [vmem:[#allocation111_spill] sm:$0xff] %v13715_v28  ;;  %v13719_v15 = vadd.f32 %v5817_v39, %v5365_v52  ;;  %v5367_v60 = vadd.f32 %v5366_v34, %v17195_v42  ;;  %v5819_v43 = vpop.f32.mrf.mxu1  ;;  %v17201_v42 = vld [vmem:[#allocation118_spill] sm:$0xff] }
 0x39e   : > { %v5368_v29 = vpop.f32.mrf.mxu0 }
 0x39f   : > { %17194 = vst [vmem:[#allocation112_spill] sm:$0xff] %v13719_v15  ;;  %v13724_v27 = vadd.f32 %v5819_v43, %v5367_v60  ;;  %v5369_v33 = vadd.f32 %v5368_v29, %v17197_v30  ;;  %v5821_v1 = vpop.f32.mrf.mxu1 }
 0x3a0   : > { %v5372_v10 = vpop.f32.mrf.mxu0  ;;  %6097 = vmatmul.mubr.bf16.gmra.mxu0 %v11146_v54  ;;  %v11150_v54 = vld [vmem:[%s11762_s12 + $0x808] ss:$44 sps:$4 sm:$0xff]  }
 0x3a1   : > { %17196 = vst [vmem:[#allocation113_spill] sm:$0xff] %v13724_v27  ;;  %v13727_v58 = vadd.f32 %v5821_v1, %v5369_v33  ;;  %v5373_v52 = vadd.f32 %v5372_v10, %v17199_v56  ;;  %v5825_v39 = vpop.f32.mrf.mxu1  ;;  %10519 = vmatmul.mubr.msk.bf16.gmra.mxu1 %vm3905_vm0, %v11149_v48  ;;  %6106 = vmatprep.mubr.bf16.mxu0 %v11152_v22  ;;  %v17203_v33 = vld [vmem:[#allocation119_spill] sm:$0xff]  ;;  %v11153_v10 = vld [vmem:[%s11762_s12 + $0x810] ss:$44 sps:$4 sm:$0xff]  }
 0x3a2   : > { %v5374_v34 = vpop.f32.mrf.mxu0  ;;  %6559 = vmatprep.mubr.bf16.mxu1 %v17038_v21  ;;  %v11156_v56 = vld [vmem:[%s11762_s12 + $0x864] ss:$44 sps:$4 sm:$0xff]  }
 0x3a3   : > { %17198 = vst [vmem:[#allocation114_spill] sm:$0xff] %v13727_v58  ;;  %v13732_v43 = vadd.f32 %v5825_v39, %v5373_v52  ;;  %v5375_v29 = vadd.f32 %v5374_v34, %v17201_v42  ;;  %v5827_v60 = vpop.f32.mrf.mxu1  ;;  %v17205_v22 = vld [vmem:[#allocation120_spill] sm:$0xff]  ;;  %v17207_v42 = vld [vmem:[#allocation121_spill] sm:$0xff] }
 0x3a4   : > { %v5376_v30 = vpop.f32.mrf.mxu0 }
 0x3a5   : > { %17200 = vst [vmem:[#allocation115_spill] sm:$0xff] %v13732_v43  ;;  %v13736_v28 = vadd.f32 %v5827_v60, %v5375_v29  ;;  %v5377_v1 = vadd.f32 %v5376_v30, %v17203_v33  ;;  %v5829_v15 = vpop.f32.mrf.mxu1  ;;  %v17209_v33 = vld [vmem:[#allocation122_spill] sm:$0xff] }
 0x3a6   : > { %v5378_v58 = vpop.f32.mrf.mxu0 }
 0x3a7   : > { %17202 = vst [vmem:[#allocation116_spill] sm:$0xff] %v13736_v28  ;;  %v13741_v48 = vadd.f32 %v5829_v15, %v5377_v1  ;;  %v5379_v27 = vadd.f32 %v5378_v58, %v17205_v22  ;;  %v5831_v52 = vpop.f32.mrf.mxu1 }
 0x3a8   : > { %v5382_v39 = vpop.f32.mrf.mxu0  ;;  %6107 = vmatmul.mubr.bf16.gmra.mxu0 %v11150_v54  ;;  %v11154_v54 = vld [vmem:[%s11762_s12 + $0x860] ss:$44 sps:$4 sm:$0xff]  }
 0x3a9   : > { %17204 = vst [vmem:[#allocation117_spill] sm:$0xff] %v13741_v48  ;;  %v13744_v34 = vadd.f32 %v5831_v52, %v5379_v27  ;;  %v5383_v29 = vadd.f32 %v5382_v39, %v17207_v42  ;;  %v5835_v60 = vpop.f32.mrf.mxu1  ;;  %10520 = vmatmul.mubr.msk.bf16.gmra.mxu1 %vm3905_vm0, %v11153_v10  ;;  %6116 = vmatprep.mubr.bf16.mxu0 %v11156_v56  ;;  %v17211_v27 = vld [vmem:[#allocation123_spill] sm:$0xff]  ;;  %v17213_v56 = vld [vmem:[#allocation124_spill] sm:$0xff] }
 0x3aa   : > { %v5384_v30 = vpop.f32.mrf.mxu0  ;;  %6569 = vmatprep.mubr.bf16.mxu1 %v17038_v21  ;;  %v11157_v39 = vld [vmem:[%s11762_s12 + $0x868] ss:$44 sps:$4 sm:$0xff]  }
 0x3ab   : > { %17206 = vst [vmem:[#allocation118_spill] sm:$0xff] %v13744_v34  ;;  %v13749_v15 = vadd.f32 %v5835_v60, %v5383_v29  ;;  %v5385_v58 = vadd.f32 %v5384_v30, %v17209_v33  ;;  %v5837_v1 = vpop.f32.mrf.mxu1  ;;  %v11160_v42 = vld [vmem:[%s11762_s12 + $0x8bc] ss:$44 sps:$4 sm:$0xff]  }
 0x3ac   : > { %v5386_v22 = vpop.f32.mrf.mxu0 }
 0x3ad   : > { %17208 = vst [vmem:[#allocation119_spill] sm:$0xff] %v13749_v15  ;;  %v13753_v43 = vadd.f32 %v5837_v1, %v5385_v58  ;;  %v5387_v52 = vadd.f32 %v5386_v22, %v17211_v27  ;;  %v5839_v28 = vpop.f32.mrf.mxu1  ;;  %v11158_v27 = vld [vmem:[%s11762_s12 + $0x8b8] ss:$44 sps:$4 sm:$0xff]  }
 0x3ae   : > { %v5388_v34 = vpop.f32.mrf.mxu0 }
 0x3af   : > { %17210 = vst [vmem:[#allocation120_spill] sm:$0xff] %v13753_v43  ;;  %v13758_v10 = vadd.f32 %v5839_v28, %v5387_v52  ;;  %v5389_v48 = vadd.f32 %v5388_v34, %v17213_v56  ;;  %v5841_v29 = vpop.f32.mrf.mxu1  ;;  %v11161_v56 = vld [vmem:[%s11762_s12 + $0x8c0] ss:$44 sps:$4 sm:$0xff]  }
 0x3b0   : > { %v5878_v60 = vpop.f32.mrf.mxu0  ;;  %6117 = vmatmul.mubr.bf16.gmra.mxu0 %v11154_v54 }
 0x3b1   : > { %17212 = vst [vmem:[#allocation121_spill] sm:$0xff] %v13758_v10  ;;  %v13761_v30 = vadd.f32 %v5841_v29, %v5389_v48  ;;  %v6331_v33 = vpop.f32.mrf.mxu1  ;;  %10521 = vmatmul.mubr.msk.bf16.gmra.mxu1 %vm3905_vm0, %v11157_v39  ;;  %6126 = vmatprep.mubr.bf16.mxu0 %v11160_v42  ;;  %v5879_v58 = vadd.f32 %v5878_v60, %v13067_v24  ;;  %v11164_v29 = vld [vmem:[%s11762_s12 + $0x914] ss:$44 sps:$4 sm:$0xff]  }
 0x3b2   : > { %v5880_v1 = vpop.f32.mrf.mxu0  ;;  %6579 = vmatprep.mubr.bf16.mxu1 %v17038_v21 }
 0x3b3   : > { %17214 = vst [vmem:[#allocation122_spill] sm:$0xff] %v13761_v30  ;;  %v5881_v28 = vadd.f32 %v5880_v1, %v13071_v47  ;;  %v6333_v22 = vpop.f32.mrf.mxu1  ;;  %v13773_v39 = vadd.f32 %v6331_v33, %v5879_v58 }
 0x3b4   : > { %v5882_v34 = vpop.f32.mrf.mxu0 }
 0x3b5   : > { %v13768_v54 = vadd.f32 %v6333_v22, %v5881_v28  ;;  %v5883_v48 = vadd.f32 %v5882_v34, %v13077_v63  ;;  %v6335_v52 = vpop.f32.mrf.mxu1 }
 0x3b6   : > { %v5884_v42 = vpop.f32.mrf.mxu0 }
 0x3b7   : > { %v5885_v24 = vadd.f32 %v5884_v42, %v13080_v3  ;;  %v6337_v60 = vpop.f32.mrf.mxu1  ;;  %v6751_v47 = vsel %vm6750_vm1, %v13768_v54, 0.0  ;;  %v7088_v1 = vmul.f32 %v13768_v54, %v13768_v54  ;;  %v13780_v10 = vadd.f32 %v6335_v52, %v5883_v48 }
 0x3b8   : > { %v5888_v28 = vpop.f32.mrf.mxu0  ;;  %6127 = vmatmul.mubr.bf16.gmra.mxu0 %v11158_v27  ;;  %v6752_v63 = vadd.f32 %v6751_v47, %v13773_v39  ;;  %v7087_v27 = vmul.f32 %v13773_v39, %v13773_v39 }
 0x3b9   : > { %v13783_v22 = vadd.f32 %v6337_v60, %v5885_v24  ;;  %v6341_v33 = vpop.f32.mrf.mxu1  ;;  %10522 = vmatmul.mubr.msk.bf16.gmra.mxu1 %vm3905_vm0, %v11161_v56  ;;  %v7255_v3 = vsel %vm6750_vm1, %v7088_v1, 0.0  ;;  %6136 = vmatprep.mubr.bf16.mxu0 %v11164_v29  ;;  %v5889_v58 = vadd.f32 %v5888_v28, %v13083_v51  ;;  %v11162_v29 = vld [vmem:[%s11762_s12 + $0x910] ss:$44 sps:$4 sm:$0xff]   ;;  %v7089_v51 = vmul.f32 %v13780_v10, %v13780_v10  ;;  %v11165_v28 = vld [vmem:[%s11762_s12 + $0x918] ss:$44 sps:$4 sm:$0xff]  }
 0x3ba   : > { %v5890_v34 = vpop.f32.mrf.mxu0  ;;  %6753 = vadd.xlane.f32.xlu0 %v6752_v63  ;;  %6589 = vmatprep.mubr.bf16.mxu1 %v17038_v21  ;;  %v7256_v24 = vadd.f32 %v7255_v3, %v7087_v27 }
 0x3bb   : > { %v5891_v48 = vadd.f32 %v5890_v34, %v13087_v45  ;;  %v6343_v52 = vpop.f32.mrf.mxu1  ;;  %v7090_v56 = vmul.f32 %v13783_v22, %v13783_v22  ;;  %v6755_v63 = vsel %vm6750_vm1, %v13783_v22, 0.0  ;;  %v11168_v45 = vld [vmem:[%s11762_s12 + $0x96c] ss:$44 sps:$4 sm:$0xff]   ;;  %v13804_v34 = vadd.f32 %v6341_v33, %v5889_v58 }
 0x3bc   : > { %v5892_v42 = vpop.f32.mrf.mxu0  ;;  %v6756_v33 = vadd.f32 %v6755_v63, %v13780_v10 }
 0x3bd   : > { %v13797_v60 = vadd.f32 %v6343_v52, %v5891_v48  ;;  %v6345_v47 = vpop.f32.mrf.mxu1  ;;  %v7259_v1 = vsel %vm6750_vm1, %v7090_v56, 0.0  ;;  %17216 = vst [vmem:[#allocation124_spill] sm:$0xff] %v13804_v34  ;;  %v5893_v56 = vadd.f32 %v5892_v42, %v13093_v35 }
 0x3be   : > { %v5894_v30 = vpop.f32.mrf.mxu0  ;;  %7257 = vadd.xlane.f32.xlu0 %v7256_v24  ;;  %v7260_v15 = vadd.f32 %v7259_v1, %v7089_v51 }
 0x3bf   : > { %17215 = vst [vmem:[#allocation123_spill] sm:$0xff] %v13797_v60  ;;  %v5895_v3 = vadd.f32 %v5894_v30, %v13097_v46  ;;  %v6347_v27 = vpop.f32.mrf.mxu1  ;;  %v6759_v48 = vsel %vm6750_vm1, %v13797_v60, 0.0  ;;  %v7092_v52 = vmul.f32 %v13797_v60, %v13797_v60 }
 0x3c0   : > { %v5898_v43 = vpop.f32.mrf.mxu0  ;;  %6137 = vmatmul.mubr.bf16.gmra.mxu0 %v11162_v29  ;;  %7261 = vadd.xlane.f32.xlu1 %v7260_v15  ;;  %v6760_v35 = vadd.f32 %v6759_v48, %v13804_v34  ;;  %v7091_v15 = vmul.f32 %v13804_v34, %v13804_v34  ;;  %v11169_v48 = vld [vmem:[%s11762_s12 + $0x970] ss:$44 sps:$4 sm:$0xff]  }
 0x3c1   : > { %v13813_v58 = vadd.f32 %v6347_v27, %v5895_v3  ;;  %v6351_v24 = vpop.f32.mrf.mxu1  ;;  %10523 = vmatmul.mubr.msk.bf16.gmra.mxu1 %vm3905_vm0, %v11165_v28  ;;  %v7263_v46 = vsel %vm6750_vm1, %v7092_v52, 0.0  ;;  %6146 = vmatprep.mubr.bf16.mxu0 %v11168_v45  ;;  %v5899_v30 = vadd.f32 %v5898_v43, %v13101_v5  ;;  %v13827_v43 = vadd.f32 %v6345_v47, %v5893_v56  ;;  %v11166_v45 = vld [vmem:[%s11762_s12 + $0x968] ss:$44 sps:$4 sm:$0xff]   ;;  %v11172_v52 = vld [vmem:[%s11762_s12 + $0x9c4] ss:$44 sps:$4 sm:$0xff]  }
 0x3c2   : > { %v5900_v51 = vpop.f32.mrf.mxu0  ;;  %6757 = vadd.xlane.f32.xlu0 %v6756_v33  ;;  %6599 = vmatprep.mubr.bf16.mxu1 %v17038_v21  ;;  %v7264_v63 = vadd.f32 %v7263_v46, %v7091_v15 }
 0x3c3   : > { %v5901_v42 = vadd.f32 %v5900_v51, %v13105_v9  ;;  %v6353_v29 = vpop.f32.mrf.mxu1  ;;  %v6763_v1 = vsel %vm6750_vm1, %v13813_v58, 0.0  ;;  %v7094_v5 = vmul.f32 %v13813_v58, %v13813_v58  ;;  %v13834_v33 = vadd.f32 %v6351_v24, %v5899_v30 }
 0x3c4   : > { %v5902_v28 = vpop.f32.mrf.mxu0  ;;  %6761 = vadd.xlane.f32.xlu1 %v6760_v35  ;;  %v6764_v51 = vadd.f32 %v6763_v1, %v13827_v43  ;;  %v7093_v30 = vmul.f32 %v13827_v43, %v13827_v43 }
 0x3c5   : > { %v13830_v3 = vadd.f32 %v6353_v29, %v5901_v42  ;;  %v6355_v27 = vpop.f32.mrf.mxu1  ;;  %17218 = vst [vmem:[#allocation129_spill] sm:$0xff] %v13834_v33  ;;  %v7267_v56 = vsel %vm6750_vm1, %v7094_v5, 0.0  ;;  %v5903_v35 = vadd.f32 %v5902_v28, %v13111_v57  ;;  %v7095_v28 = vmul.f32 %v13834_v33, %v13834_v33 }
 0x3c6   : > { %v5904_v9 = vpop.f32.mrf.mxu0  ;;  %7265 = vadd.xlane.f32.xlu0 %v7264_v63  ;;  %v7268_v5 = vadd.f32 %v7267_v56, %v7093_v30  ;;  %v11173_v56 = vld [vmem:[%s11762_s12 + $0x9c8] ss:$44 sps:$4 sm:$0xff]  }
 0x3c7   : > { %17217 = vst [vmem:[#allocation128_spill] sm:$0xff] %v13830_v3  ;;  %v5905_v60 = vadd.f32 %v5904_v9, %v13114_v16  ;;  %v6357_v34 = vpop.f32.mrf.mxu1  ;;  %v6767_v47 = vsel %vm6750_vm1, %v13830_v3, 0.0  ;;  %v7096_v46 = vmul.f32 %v13830_v3, %v13830_v3  ;;  %v11170_v9 = vld [vmem:[%s11762_s12 + $0x9c0] ss:$44 sps:$4 sm:$0xff]  }
 0x3c8   : > { %v5908_v15 = vpop.f32.mrf.mxu0  ;;  %6147 = vmatmul.mubr.bf16.gmra.mxu0 %v11166_v45  ;;  %6765 = vadd.xlane.f32.xlu1 %v6764_v51  ;;  %v6768_v24 = vadd.f32 %v6767_v47, %v13834_v33 }
 0x3c9   : > { %v13847_v16 = vadd.f32 %v6357_v34, %v5905_v60  ;;  %v6361_v42 = vpop.f32.mrf.mxu1  ;;  %10524 = vmatmul.mubr.msk.bf16.gmra.mxu1 %vm3905_vm0, %v11169_v48  ;;  %v7271_v29 = vsel %vm6750_vm1, %v7096_v46, 0.0  ;;  %6156 = vmatprep.mubr.bf16.mxu0 %v11172_v52  ;;  %v5909_v1 = vadd.f32 %v5908_v15, %v13117_v49  ;;  %v13860_v49 = vadd.f32 %v6355_v27, %v5903_v35  ;;  %v11176_v46 = vld [vmem:[%s11762_s12 + $0xa1c] ss:$44 sps:$4 sm:$0xff]  }
 0x3ca   : > { %v5910_v57 = vpop.f32.mrf.mxu0  ;;  %6769 = vadd.xlane.f32.xlu0 %v6768_v24  ;;  %6609 = vmatprep.mubr.bf16.mxu1 %v17038_v21  ;;  %v7272_v52 = vadd.f32 %v7271_v29, %v7095_v28 }
 0x3cb   : > { %17219 = vst [vmem:[#allocation130_spill] sm:$0xff] %v13847_v16  ;;  %v5911_v60 = vadd.f32 %v5910_v57, %v13121_v19  ;;  %v6363_v34 = vpop.f32.mrf.mxu1  ;;  %v6771_v63 = vsel %vm6750_vm1, %v13847_v16, 0.0  ;;  %v7098_v45 = vmul.f32 %v13847_v16, %v13847_v16  ;;  %17220 = vst [vmem:[#allocation131_spill] sm:$0xff] %v13860_v49  ;;  %v13867_v15 = vadd.f32 %v6361_v42, %v5909_v1 }
 0x3cc   : > { %v5912_v48 = vpop.f32.mrf.mxu0  ;;  %7269 = vadd.xlane.f32.xlu1 %v7268_v5  ;;  %v6772_v24 = vadd.f32 %v6771_v63, %v13860_v49  ;;  %v7097_v1 = vmul.f32 %v13860_v49, %v13860_v49 }
 0x3cd   : > { %v13863_v51 = vadd.f32 %v6363_v34, %v5911_v60  ;;  %v6365_v47 = vpop.f32.mrf.mxu1  ;;  %17222 = vst [vmem:[#allocation133_spill] sm:$0xff] %v13867_v15  ;;  %v7275_v35 = vsel %vm6750_vm1, %v7098_v45, 0.0  ;;  %v5913_v5 = vadd.f32 %v5912_v48, %v13127_v38  ;;  %v7099_v48 = vmul.f32 %v13867_v15, %v13867_v15 }
 0x3ce   : > { %v5914_v19 = vpop.f32.mrf.mxu0  ;;  %7273 = vadd.xlane.f32.xlu0 %v7272_v52  ;;  %v7276_v45 = vadd.f32 %v7275_v35, %v7097_v1  ;;  %v11177_v35 = vld [vmem:[%s11762_s12 + $0xa20] ss:$44 sps:$4 sm:$0xff]  }
 0x3cf   : > { %17221 = vst [vmem:[#allocation132_spill] sm:$0xff] %v13863_v51  ;;  %v5915_v30 = vadd.f32 %v5914_v19, %v13130_v41  ;;  %v6367_v57 = vpop.f32.mrf.mxu1  ;;  %v6775_v27 = vsel %vm6750_vm1, %v13863_v51, 0.0  ;;  %v7100_v29 = vmul.f32 %v13863_v51, %v13863_v51 }
 0x3d0   : > { %v5918_v28 = vpop.f32.mrf.mxu0  ;;  %6157 = vmatmul.mubr.bf16.gmra.mxu0 %v11170_v9  ;;  %6773 = vadd.xlane.f32.xlu1 %v6772_v24  ;;  %v6776_v42 = vadd.f32 %v6775_v27, %v13867_v15 }
 0x3d1   : > { %v13880_v41 = vadd.f32 %v6367_v57, %v5915_v30  ;;  %v6371_v60 = vpop.f32.mrf.mxu1  ;;  %10525 = vmatmul.mubr.msk.bf16.gmra.mxu1 %vm3905_vm0, %v11173_v56  ;;  %v7279_v34 = vsel %vm6750_vm1, %v7100_v29, 0.0  ;;  %6166 = vmatprep.mubr.bf16.mxu0 %v11176_v46  ;;  %v5919_v63 = vadd.f32 %v5918_v28, %v13133_v4  ;;  %v13893_v4 = vadd.f32 %v6365_v47, %v5913_v5  ;;  %v11174_v30 = vld [vmem:[%s11762_s12 + $0xa18] ss:$44 sps:$4 sm:$0xff]   ;;  %v11180_v29 = vld [vmem:[%s11762_s12 + $0xa74] ss:$44 sps:$4 sm:$0xff]  }
 0x3d2   : > { %v5920_v38 = vpop.f32.mrf.mxu0  ;;  %6777 = vadd.xlane.f32.xlu0 %v6776_v42  ;;  %6619 = vmatprep.mubr.bf16.mxu1 %v17038_v21  ;;  %v7280_v24 = vadd.f32 %v7279_v34, %v7099_v48 }
 0x3d3   : > { %17223 = vst [vmem:[#allocation134_spill] sm:$0xff] %v13880_v41  ;;  %v5921_v52 = vadd.f32 %v5920_v38, %v13137_v53  ;;  %v6373_v9 = vpop.f32.mrf.mxu1  ;;  %v6779_v56 = vsel %vm6750_vm1, %v13880_v41, 0.0  ;;  %v7102_v46 = vmul.f32 %v13880_v41, %v13880_v41  ;;  %17224 = vst [vmem:[#allocation135_spill] sm:$0xff] %v13893_v4  ;;  %v13900_v28 = vadd.f32 %v6371_v60, %v5919_v63 }
 0x3d4   : > { %v5922_v19 = vpop.f32.mrf.mxu0  ;;  %7277 = vadd.xlane.f32.xlu1 %v7276_v45  ;;  %v6780_v42 = vadd.f32 %v6779_v56, %v13893_v4  ;;  %v7101_v63 = vmul.f32 %v13893_v4, %v13893_v4 }
 0x3d5   : > { %v13896_v57 = vadd.f32 %v6373_v9, %v5921_v52  ;;  %v6375_v27 = vpop.f32.mrf.mxu1  ;;  %17226 = vst [vmem:[#allocation137_spill] sm:$0xff] %v13900_v28  ;;  %v7283_v5 = vsel %vm6750_vm1, %v7102_v46, 0.0  ;;  %v5923_v45 = vadd.f32 %v5922_v19, %v13143_v36  ;;  %v7103_v19 = vmul.f32 %v13900_v28, %v13900_v28 }
 0x3d6   : > { %v5924_v53 = vpop.f32.mrf.mxu0  ;;  %7281 = vadd.xlane.f32.xlu0 %v7280_v24  ;;  %v7284_v46 = vadd.f32 %v7283_v5, %v7101_v63  ;;  %v11181_v5 = vld [vmem:[%s11762_s12 + $0xa78] ss:$44 sps:$4 sm:$0xff]  }
 0x3d7   : > { %17225 = vst [vmem:[#allocation136_spill] sm:$0xff] %v13896_v57  ;;  %v5925_v1 = vadd.f32 %v5924_v53, %v13146_v61  ;;  %v6377_v38 = vpop.f32.mrf.mxu1  ;;  %v6783_v47 = vsel %vm6750_vm1, %v13896_v57, 0.0  ;;  %v7104_v34 = vmul.f32 %v13896_v57, %v13896_v57 }
 0x3d8   : > { %v5928_v48 = vpop.f32.mrf.mxu0  ;;  %6167 = vmatmul.mubr.bf16.gmra.mxu0 %v11174_v30  ;;  %6781 = vadd.xlane.f32.xlu1 %v6780_v42  ;;  %v6784_v60 = vadd.f32 %v6783_v47, %v13900_v28 }
 0x3d9   : > { %v13913_v61 = vadd.f32 %v6377_v38, %v5925_v1  ;;  %v6381_v52 = vpop.f32.mrf.mxu1  ;;  %10526 = vmatmul.mubr.msk.bf16.gmra.mxu1 %vm3905_vm0, %v11177_v35  ;;  %v7287_v9 = vsel %vm6750_vm1, %v7104_v34, 0.0  ;;  %6176 = vmatprep.mubr.bf16.mxu0 %v11180_v29  ;;  %v5929_v56 = vadd.f32 %v5928_v48, %v13149_v26  ;;  %v13926_v26 = vadd.f32 %v6375_v27, %v5923_v45  ;;  %v11178_v1 = vld [vmem:[%s11762_s12 + $0xa70] ss:$44 sps:$4 sm:$0xff]   ;;  %v11184_v34 = vld [vmem:[%s11762_s12 + $0xacc] ss:$44 sps:$4 sm:$0xff]  }
 0x3da   : > { %v5930_v36 = vpop.f32.mrf.mxu0  ;;  %6785 = vadd.xlane.f32.xlu0 %v6784_v60  ;;  %6629 = vmatprep.mubr.bf16.mxu1 %v17038_v21  ;;  %v7288_v42 = vadd.f32 %v7287_v9, %v7103_v19 }
 0x3db   : > { %17227 = vst [vmem:[#allocation138_spill] sm:$0xff] %v13913_v61  ;;  %v5931_v24 = vadd.f32 %v5930_v36, %v13153_v32  ;;  %v6383_v30 = vpop.f32.mrf.mxu1  ;;  %v6787_v35 = vsel %vm6750_vm1, %v13913_v61, 0.0  ;;  %v7106_v29 = vmul.f32 %v13913_v61, %v13913_v61  ;;  %17228 = vst [vmem:[#allocation139_spill] sm:$0xff] %v13926_v26  ;;  %v13933_v48 = vadd.f32 %v6381_v52, %v5929_v56 }
 0x3dc   : > { %v5932_v53 = vpop.f32.mrf.mxu0  ;;  %7285 = vadd.xlane.f32.xlu1 %v7284_v46  ;;  %v6788_v60 = vadd.f32 %v6787_v35, %v13926_v26  ;;  %v7105_v56 = vmul.f32 %v13926_v26, %v13926_v26 }
 0x3dd   : > { %v13929_v38 = vadd.f32 %v6383_v30, %v5931_v24  ;;  %v6385_v47 = vpop.f32.mrf.mxu1  ;;  %17230 = vst [vmem:[#allocation141_spill] sm:$0xff] %v13933_v48  ;;  %v7291_v45 = vsel %vm6750_vm1, %v7106_v29, 0.0  ;;  %v5933_v46 = vadd.f32 %v5932_v53, %v13159_v23  ;;  %v7107_v53 = vmul.f32 %v13933_v48, %v13933_v48 }
 0x3de   : > { %v5934_v32 = vpop.f32.mrf.mxu0  ;;  %7289 = vadd.xlane.f32.xlu0 %v7288_v42  ;;  %v7292_v29 = vadd.f32 %v7291_v45, %v7105_v56  ;;  %v11185_v45 = vld [vmem:[%s11762_s12 + $0xad0] ss:$44 sps:$4 sm:$0xff]  }
 0x3df   : > { %17229 = vst [vmem:[#allocation140_spill] sm:$0xff] %v13929_v38  ;;  %v5935_v63 = vadd.f32 %v5934_v32, %v13162_v18  ;;  %v6387_v36 = vpop.f32.mrf.mxu1  ;;  %v6791_v27 = vsel %vm6750_vm1, %v13929_v38, 0.0  ;;  %v7108_v9 = vmul.f32 %v13929_v38, %v13929_v38 }
 0x3e0   : > { %v5938_v19 = vpop.f32.mrf.mxu0  ;;  %6177 = vmatmul.mubr.bf16.gmra.mxu0 %v11178_v1  ;;  %6789 = vadd.xlane.f32.xlu1 %v6788_v60  ;;  %v6792_v52 = vadd.f32 %v6791_v27, %v13933_v48 }
 0x3e1   : > { %v13946_v18 = vadd.f32 %v6387_v36, %v5935_v63  ;;  %v6391_v24 = vpop.f32.mrf.mxu1  ;;  %10527 = vmatmul.mubr.msk.bf16.gmra.mxu1 %vm3905_vm0, %v11181_v5  ;;  %v7295_v30 = vsel %vm6750_vm1, %v7108_v9, 0.0  ;;  %6186 = vmatprep.mubr.bf16.mxu0 %v11184_v34  ;;  %v5939_v35 = vadd.f32 %v5938_v19, %v13165_v44  ;;  %v13959_v44 = vadd.f32 %v6385_v47, %v5933_v46  ;;  %v11182_v63 = vld [vmem:[%s11762_s12 + $0xac8] ss:$44 sps:$4 sm:$0xff]   ;;  %v11188_v9 = vld [vmem:[%s11762_s12 + $0xb24] ss:$44 sps:$4 sm:$0xff]  }
 0x3e2   : > { %v5940_v23 = vpop.f32.mrf.mxu0  ;;  %6793 = vadd.xlane.f32.xlu0 %v6792_v52  ;;  %6639 = vmatprep.mubr.bf16.mxu1 %v17038_v21  ;;  %v7296_v60 = vadd.f32 %v7295_v30, %v7107_v53 }
 0x3e3   : > { %17231 = vst [vmem:[#allocation142_spill] sm:$0xff] %v13946_v18  ;;  %v5941_v42 = vadd.f32 %v5940_v23, %v13169_v31  ;;  %v6393_v1 = vpop.f32.mrf.mxu1  ;;  %v6795_v5 = vsel %vm6750_vm1, %v13946_v18, 0.0  ;;  %v7110_v34 = vmul.f32 %v13946_v18, %v13946_v18  ;;  %17232 = vst [vmem:[#allocation143_spill] sm:$0xff] %v13959_v44  ;;  %v13966_v19 = vadd.f32 %v6391_v24, %v5939_v35 }
 0x3e4   : > { %v5942_v32 = vpop.f32.mrf.mxu0  ;;  %7293 = vadd.xlane.f32.xlu1 %v7292_v29  ;;  %v6796_v52 = vadd.f32 %v6795_v5, %v13959_v44  ;;  %v7109_v35 = vmul.f32 %v13959_v44, %v13959_v44 }
 0x3e5   : > { %v13962_v36 = vadd.f32 %v6393_v1, %v5941_v42  ;;  %v6395_v27 = vpop.f32.mrf.mxu1  ;;  %17234 = vst [vmem:[#allocation145_spill] sm:$0xff] %v13966_v19  ;;  %v7299_v46 = vsel %vm6750_vm1, %v7110_v34, 0.0  ;;  %v5943_v29 = vadd.f32 %v5942_v32, %v13175_v14  ;;  %v7111_v32 = vmul.f32 %v13966_v19, %v13966_v19 }
 0x3e6   : > { %v5944_v31 = vpop.f32.mrf.mxu0  ;;  %7297 = vadd.xlane.f32.xlu0 %v7296_v60  ;;  %v7300_v34 = vadd.f32 %v7299_v46, %v7109_v35  ;;  %v11189_v46 = vld [vmem:[%s11762_s12 + $0xb28] ss:$44 sps:$4 sm:$0xff]  }
 0x3e7   : > { %17233 = vst [vmem:[#allocation144_spill] sm:$0xff] %v13962_v36  ;;  %v5945_v56 = vadd.f32 %v5944_v31, %v13178_v37  ;;  %v6397_v23 = vpop.f32.mrf.mxu1  ;;  %v6799_v47 = vsel %vm6750_vm1, %v13962_v36, 0.0  ;;  %v7112_v30 = vmul.f32 %v13962_v36, %v13962_v36 }
 0x3e8   : > { %v5948_v53 = vpop.f32.mrf.mxu0  ;;  %6187 = vmatmul.mubr.bf16.gmra.mxu0 %v11182_v63  ;;  %6797 = vadd.xlane.f32.xlu1 %v6796_v52  ;;  %v6800_v24 = vadd.f32 %v6799_v47, %v13966_v19 }
 0x3e9   : > { %v13979_v37 = vadd.f32 %v6397_v23, %v5945_v56  ;;  %v6401_v42 = vpop.f32.mrf.mxu1  ;;  %10528 = vmatmul.mubr.msk.bf16.gmra.mxu1 %vm3905_vm0, %v11185_v45  ;;  %v7303_v1 = vsel %vm6750_vm1, %v7112_v30, 0.0  ;;  %6196 = vmatprep.mubr.bf16.mxu0 %v11188_v9  ;;  %v5949_v5 = vadd.f32 %v5948_v53, %v13181_v2  ;;  %v13992_v2 = vadd.f32 %v6395_v27, %v5943_v29  ;;  %v11186_v56 = vld [vmem:[%s11762_s12 + $0xb20] ss:$44 sps:$4 sm:$0xff]   ;;  %v11192_v30 = vld [vmem:[%s11762_s12 + $0xb7c] ss:$44 sps:$4 sm:$0xff]  }
 0x3ea   : > { %v5950_v14 = vpop.f32.mrf.mxu0  ;;  %6801 = vadd.xlane.f32.xlu0 %v6800_v24  ;;  %6649 = vmatprep.mubr.bf16.mxu1 %v17038_v21  ;;  %v7304_v52 = vadd.f32 %v7303_v1, %v7111_v32 }
 0x3eb   : > { %17235 = vst [vmem:[#allocation146_spill] sm:$0xff] %v13979_v37  ;;  %v5951_v60 = vadd.f32 %v5950_v14, %v13185_v50  ;;  %v6403_v63 = vpop.f32.mrf.mxu1  ;;  %v6803_v45 = vsel %vm6750_vm1, %v13979_v37, 0.0  ;;  %v7114_v9 = vmul.f32 %v13979_v37, %v13979_v37  ;;  %17236 = vst [vmem:[#allocation147_spill] sm:$0xff] %v13992_v2  ;;  %v13999_v53 = vadd.f32 %v6401_v42, %v5949_v5 }
 0x3ec   : > { %v5952_v31 = vpop.f32.mrf.mxu0  ;;  %7301 = vadd.xlane.f32.xlu1 %v7300_v34  ;;  %v6804_v24 = vadd.f32 %v6803_v45, %v13992_v2  ;;  %v17239_v34 = vld [vmem:[#allocation125_spill] sm:$0xff]  ;;  %v7113_v5 = vmul.f32 %v13992_v2, %v13992_v2 }
 0x3ed   : > { %v13995_v23 = vadd.f32 %v6403_v63, %v5951_v60  ;;  %v6405_v47 = vpop.f32.mrf.mxu1  ;;  %17238 = vst [vmem:[#allocation149_spill] sm:$0xff] %v13999_v53  ;;  %v7307_v29 = vsel %vm6750_vm1, %v7114_v9, 0.0  ;;  %v5953_v32 = vadd.f32 %v5952_v31, %v17239_v34  ;;  %v17241_v9 = vld [vmem:[#allocation2_spill] sm:$0xff] }
 0x3ee   : > { %v5954_v50 = vpop.f32.mrf.mxu0  ;;  %7305 = vadd.xlane.f32.xlu0 %v7304_v52 }
 0x3ef   : > { %17237 = vst [vmem:[#allocation148_spill] sm:$0xff] %v13995_v23  ;;  %v5955_v35 = vadd.f32 %v5954_v50, %v13194_v59  ;;  %v6407_v14 = vpop.f32.mrf.mxu1  ;;  %v6807_v27 = vsel %vm6750_vm1, %v13995_v23, 0.0  ;;  %v7116_v1 = vmul.f32 %v13995_v23, %v13995_v23  ;;  %v7115_v50 = vmul.f32 %v13999_v53, %v13999_v53 }
 0x3f0   : > { %v5958_v60 = vpop.f32.mrf.mxu0  ;;  %6197 = vmatmul.mubr.bf16.gmra.mxu0 %v11186_v56  ;;  %6805 = vadd.xlane.f32.xlu1 %v6804_v24  ;;  %v6808_v42 = vadd.f32 %v6807_v27, %v13999_v53  ;;  %v7308_v56 = vadd.f32 %v7307_v29, %v7113_v5  ;;  %v17242_v24 = vld [vmem:[#allocation3_spill] sm:$0xff]  ;;  %v14025_v27 = vadd.f32 %v6405_v47, %v5953_v32  ;;  %v11190_v29 = vld [vmem:[%s11762_s12 + $0xb78] ss:$44 sps:$4 sm:$0xff]  }
 0x3f1   : > { %v14012_v59 = vadd.f32 %v6407_v14, %v5955_v35  ;;  %v6411_v63 = vpop.f32.mrf.mxu1  ;;  %10529 = vmatmul.mubr.msk.bf16.gmra.mxu1 %vm3905_vm0, %v11189_v46  ;;  %v7311_v45 = vsel %vm6750_vm1, %v7116_v1, 0.0  ;;  %6206 = vmatprep.mubr.bf16.mxu0 %v11192_v30  ;;  %v5959_v52 = vadd.f32 %v5958_v60, %v17241_v9  ;;  %v11193_v5 = vld [vmem:[%s11762_s12 + $0xb80] ss:$44 sps:$4 sm:$0xff]   ;;  %v17246_v53 = vld [vmem:[#allocation5_spill] sm:$0xff] }
 0x3f2   : > { %v5960_v31 = vpop.f32.mrf.mxu0  ;;  %6809 = vadd.xlane.f32.xlu0 %v6808_v42  ;;  %6659 = vmatprep.mubr.bf16.mxu1 %v17038_v21  ;;  %17243 = vst [vmem:[#allocation2_spill] sm:$0xff] %v14025_v27  ;;  %v7312_v34 = vadd.f32 %v7311_v45, %v7115_v50  ;;  %v11196_v9 = vld [vmem:[%s11762_s12 + $0xbd4] ss:$44 sps:$4 sm:$0xff]  }
 0x3f3   : > { %17240 = vst [vmem:[#allocation125_spill] sm:$0xff] %v14012_v59  ;;  %v5961_v35 = vadd.f32 %v5960_v31, %v17242_v24  ;;  %v6413_v14 = vpop.f32.mrf.mxu1  ;;  %v6811_v46 = vsel %vm6750_vm1, %v14012_v59, 0.0  ;;  %v7118_v30 = vmul.f32 %v14012_v59, %v14012_v59  ;;  %v14032_v23 = vadd.f32 %v6411_v63, %v5959_v52 }
 0x3f4   : > { %v5962_v1 = vpop.f32.mrf.mxu0  ;;  %7309 = vadd.xlane.f32.xlu1 %v7308_v56  ;;  %v6812_v24 = vadd.f32 %v6811_v46, %v14025_v27  ;;  %v17247_v56 = vld [vmem:[#allocation4_spill] sm:$0xff]  ;;  %v7117_v52 = vmul.f32 %v14025_v27, %v14025_v27 }
 0x3f5   : > { %v14028_v60 = vadd.f32 %v6413_v14, %v5961_v35  ;;  %v6415_v42 = vpop.f32.mrf.mxu1  ;;  %17245 = vst [vmem:[#allocation150_spill] sm:$0xff] %v14032_v23  ;;  %v7315_v32 = vsel %vm6750_vm1, %v7118_v30, 0.0  ;;  %v5963_v50 = vadd.f32 %v5962_v1, %v17247_v56  ;;  %v17249_v30 = vld [vmem:[#allocation6_spill] sm:$0xff] }
 0x3f6   : > { %v5964_v31 = vpop.f32.mrf.mxu0  ;;  %7313 = vadd.xlane.f32.xlu0 %v7312_v34 }
 0x3f7   : > { %17244 = vst [vmem:[#allocation3_spill] sm:$0xff] %v14028_v60  ;;  %v5965_v36 = vadd.f32 %v5964_v31, %v17246_v53  ;;  %v6417_v59 = vpop.f32.mrf.mxu1  ;;  %v6815_v47 = vsel %vm6750_vm1, %v14028_v60, 0.0  ;;  %v7120_v45 = vmul.f32 %v14028_v60, %v14028_v60  ;;  %v7119_v31 = vmul.f32 %v14032_v23, %v14032_v23 }
 0x3f8   : > { %v5968_v35 = vpop.f32.mrf.mxu0  ;;  %6207 = vmatmul.mubr.bf16.gmra.mxu0 %v11190_v29  ;;  %6813 = vadd.xlane.f32.xlu1 %v6812_v24  ;;  %v6816_v63 = vadd.f32 %v6815_v47, %v14032_v23  ;;  %v7316_v29 = vadd.f32 %v7315_v32, %v7117_v52  ;;  %v14058_v47 = vadd.f32 %v6415_v42, %v5963_v50  ;;  %v11194_v32 = vld [vmem:[%s11762_s12 + $0xbd0] ss:$44 sps:$4 sm:$0xff]   ;;  %v11197_v52 = vld [vmem:[%s11762_s12 + $0xbd8] ss:$44 sps:$4 sm:$0xff]  }
 0x3f9   : > { %v14045_v53 = vadd.f32 %v6417_v59, %v5965_v36  ;;  %v6421_v14 = vpop.f32.mrf.mxu1  ;;  %10530 = vmatmul.mubr.msk.bf16.gmra.mxu1 %vm3905_vm0, %v11193_v5  ;;  %v7319_v46 = vsel %vm6750_vm1, %v7120_v45, 0.0  ;;  %6216 = vmatprep.mubr.bf16.mxu0 %v11196_v9  ;;  %v5969_v34 = vadd.f32 %v5968_v35, %v17249_v30  ;;  %v17250_v36 = vld [vmem:[#allocation7_spill] sm:$0xff]  ;;  %v17254_v23 = vld [vmem:[#allocation9_spill] sm:$0xff] }
 0x3fa   : > { %v5970_v1 = vpop.f32.mrf.mxu0  ;;  %6817 = vadd.xlane.f32.xlu0 %v6816_v63  ;;  %6669 = vmatprep.mubr.bf16.mxu1 %v17038_v21  ;;  %17251 = vst [vmem:[#allocation4_spill] sm:$0xff] %v14058_v47  ;;  %v7320_v56 = vadd.f32 %v7319_v46, %v7119_v31  ;;  %v11200_v30 = vld [vmem:[%s11762_s12 + $0xc2c] ss:$44 sps:$4 sm:$0xff]  }
 0x3fb   : > { %17248 = vst [vmem:[#allocation5_spill] sm:$0xff] %v14045_v53  ;;  %v5971_v59 = vadd.f32 %v5970_v1, %v17250_v36  ;;  %v6423_v24 = vpop.f32.mrf.mxu1  ;;  %v6819_v5 = vsel %vm6750_vm1, %v14045_v53, 0.0  ;;  %v7122_v9 = vmul.f32 %v14045_v53, %v14045_v53  ;;  %v14065_v60 = vadd.f32 %v6421_v14, %v5969_v34 }
 0x3fc   : > { %v5972_v45 = vpop.f32.mrf.mxu0  ;;  %7317 = vadd.xlane.f32.xlu1 %v7316_v29  ;;  %v6820_v36 = vadd.f32 %v6819_v5, %v14058_v47  ;;  %v17255_v29 = vld [vmem:[#allocation8_spill] sm:$0xff]  ;;  %v7121_v34 = vmul.f32 %v14058_v47, %v14058_v47 }
 0x3fd   : > { %v14061_v35 = vadd.f32 %v6423_v24, %v5971_v59  ;;  %v6425_v63 = vpop.f32.mrf.mxu1  ;;  %17253 = vst [vmem:[#allocation7_spill] sm:$0xff] %v14065_v60  ;;  %v7323_v50 = vsel %vm6750_vm1, %v7122_v9, 0.0  ;;  %v5973_v31 = vadd.f32 %v5972_v45, %v17255_v29  ;;  %v17257_v9 = vld [vmem:[#allocation10_spill] sm:$0xff] }
 0x3fe   : > { %v5974_v1 = vpop.f32.mrf.mxu0  ;;  %7321 = vadd.xlane.f32.xlu0 %v7320_v56 }
 0x3ff   : > { %17252 = vst [vmem:[#allocation6_spill] sm:$0xff] %v14061_v35  ;;  %v5975_v27 = vadd.f32 %v5974_v1, %v17254_v23  ;;  %v6427_v53 = vpop.f32.mrf.mxu1  ;;  %v6823_v42 = vsel %vm6750_vm1, %v14061_v35, 0.0  ;;  %v7124_v46 = vmul.f32 %v14061_v35, %v14061_v35  ;;  %v7123_v1 = vmul.f32 %v14065_v60, %v14065_v60 }
 0x400   : > { %v5978_v59 = vpop.f32.mrf.mxu0  ;;  %6217 = vmatmul.mubr.bf16.gmra.mxu0 %v11194_v32  ;;  %6821 = vadd.xlane.f32.xlu1 %v6820_v36  ;;  %v6824_v14 = vadd.f32 %v6823_v42, %v14065_v60  ;;  %v7324_v32 = vadd.f32 %v7323_v50, %v7121_v34  ;;  %v14091_v42 = vadd.f32 %v6425_v63, %v5973_v31  ;;  %v11198_v50 = vld [vmem:[%s11762_s12 + $0xc28] ss:$44 sps:$4 sm:$0xff]   ;;  %v11201_v34 = vld [vmem:[%s11762_s12 + $0xc30] ss:$44 sps:$4 sm:$0xff]  }
 0x401   : > { %v14078_v23 = vadd.f32 %v6427_v53, %v5975_v27  ;;  %v6431_v24 = vpop.f32.mrf.mxu1  ;;  %10531 = vmatmul.mubr.msk.bf16.gmra.mxu1 %vm3905_vm0, %v11197_v52  ;;  %v7327_v5 = vsel %vm6750_vm1, %v7124_v46, 0.0  ;;  %6226 = vmatprep.mubr.bf16.mxu0 %v11200_v30  ;;  %v5979_v56 = vadd.f32 %v5978_v59, %v17257_v9  ;;  %v17258_v27 = vld [vmem:[#allocation11_spill] sm:$0xff]  ;;  %v11204_v9 = vld [vmem:[%s11762_s12 + $0xc84] ss:$44 sps:$4 sm:$0xff]   ;;  %v17262_v60 = vld [vmem:[#allocation13_spill] sm:$0xff] }
 0x402   : > { %v5980_v45 = vpop.f32.mrf.mxu0  ;;  %6825 = vadd.xlane.f32.xlu0 %v6824_v14  ;;  %6679 = vmatprep.mubr.bf16.mxu1 %v17038_v21  ;;  %17259 = vst [vmem:[#allocation8_spill] sm:$0xff] %v14091_v42  ;;  %v7328_v29 = vadd.f32 %v7327_v5, %v7123_v1 }
 0x403   : > { %17256 = vst [vmem:[#allocation9_spill] sm:$0xff] %v14078_v23  ;;  %v5981_v53 = vadd.f32 %v5980_v45, %v17258_v27  ;;  %v6433_v36 = vpop.f32.mrf.mxu1  ;;  %v6827_v52 = vsel %vm6750_vm1, %v14078_v23, 0.0  ;;  %v7126_v30 = vmul.f32 %v14078_v23, %v14078_v23  ;;  %v14098_v35 = vadd.f32 %v6431_v24, %v5979_v56 }
 0x404   : > { %v5982_v46 = vpop.f32.mrf.mxu0  ;;  %7325 = vadd.xlane.f32.xlu1 %v7324_v32  ;;  %v6828_v27 = vadd.f32 %v6827_v52, %v14091_v42  ;;  %v17263_v32 = vld [vmem:[#allocation12_spill] sm:$0xff]  ;;  %v7125_v56 = vmul.f32 %v14091_v42, %v14091_v42 }
 0x405   : > { %v14094_v59 = vadd.f32 %v6433_v36, %v5981_v53  ;;  %v6435_v14 = vpop.f32.mrf.mxu1  ;;  %17261 = vst [vmem:[#allocation11_spill] sm:$0xff] %v14098_v35  ;;  %v7331_v31 = vsel %vm6750_vm1, %v7126_v30, 0.0  ;;  %v5983_v1 = vadd.f32 %v5982_v46, %v17263_v32  ;;  %v17265_v30 = vld [vmem:[#allocation14_spill] sm:$0xff] }
 0x406   : > { %v5984_v45 = vpop.f32.mrf.mxu0  ;;  %7329 = vadd.xlane.f32.xlu0 %v7328_v29 }
 0x407   : > { %17260 = vst [vmem:[#allocation10_spill] sm:$0xff] %v14094_v59  ;;  %v5985_v47 = vadd.f32 %v5984_v45, %v17262_v60  ;;  %v6437_v23 = vpop.f32.mrf.mxu1  ;;  %v6831_v63 = vsel %vm6750_vm1, %v14094_v59, 0.0  ;;  %v7128_v5 = vmul.f32 %v14094_v59, %v14094_v59  ;;  %v7127_v45 = vmul.f32 %v14098_v35, %v14098_v35 }
 0x408   : > { %v5988_v53 = vpop.f32.mrf.mxu0  ;;  %6227 = vmatmul.mubr.bf16.gmra.mxu0 %v11198_v50  ;;  %6829 = vadd.xlane.f32.xlu1 %v6828_v27  ;;  %v6832_v24 = vadd.f32 %v6831_v63, %v14098_v35  ;;  %v7332_v50 = vadd.f32 %v7331_v31, %v7125_v56  ;;  %v14124_v63 = vadd.f32 %v6435_v14, %v5983_v1  ;;  %v11202_v31 = vld [vmem:[%s11762_s12 + $0xc80] ss:$44 sps:$4 sm:$0xff]   ;;  %v11205_v56 = vld [vmem:[%s11762_s12 + $0xc88] ss:$44 sps:$4 sm:$0xff]   ;;  %v17270_v35 = vld [vmem:[#allocation17_spill] sm:$0xff] }
 0x409   : > { %v14111_v60 = vadd.f32 %v6437_v23, %v5985_v47  ;;  %v6441_v36 = vpop.f32.mrf.mxu1  ;;  %10532 = vmatmul.mubr.msk.bf16.gmra.mxu1 %vm3905_vm0, %v11201_v34  ;;  %v7335_v52 = vsel %vm6750_vm1, %v7128_v5, 0.0  ;;  %6236 = vmatprep.mubr.bf16.mxu0 %v11204_v9  ;;  %v5989_v29 = vadd.f32 %v5988_v53, %v17265_v30  ;;  %v17266_v47 = vld [vmem:[#allocation15_spill] sm:$0xff] }
 0x40a   : > { %v5990_v46 = vpop.f32.mrf.mxu0  ;;  %6833 = vadd.xlane.f32.xlu0 %v6832_v24  ;;  %6689 = vmatprep.mubr.bf16.mxu1 %v17038_v21  ;;  %17267 = vst [vmem:[#allocation12_spill] sm:$0xff] %v14124_v63  ;;  %v7336_v32 = vadd.f32 %v7335_v52, %v7127_v45  ;;  %v11208_v30 = vld [vmem:[%s11762_s12 + $0xcdc] ss:$44 sps:$4 sm:$0xff]  }
 0x40b   : > { %17264 = vst [vmem:[#allocation13_spill] sm:$0xff] %v14111_v60  ;;  %v5991_v23 = vadd.f32 %v5990_v46, %v17266_v47  ;;  %v6443_v27 = vpop.f32.mrf.mxu1  ;;  %v6835_v34 = vsel %vm6750_vm1, %v14111_v60, 0.0  ;;  %v7130_v9 = vmul.f32 %v14111_v60, %v14111_v60  ;;  %v14131_v59 = vadd.f32 %v6441_v36, %v5989_v29 }
 0x40c   : > { %v5992_v5 = vpop.f32.mrf.mxu0  ;;  %7333 = vadd.xlane.f32.xlu1 %v7332_v50  ;;  %v6836_v47 = vadd.f32 %v6835_v34, %v14124_v63  ;;  %v17271_v50 = vld [vmem:[#allocation16_spill] sm:$0xff]  ;;  %v7129_v29 = vmul.f32 %v14124_v63, %v14124_v63 }
 0x40d   : > { %v14127_v53 = vadd.f32 %v6443_v27, %v5991_v23  ;;  %v6445_v24 = vpop.f32.mrf.mxu1  ;;  %17269 = vst [vmem:[#allocation15_spill] sm:$0xff] %v14131_v59  ;;  %v7339_v1 = vsel %vm6750_vm1, %v7130_v9, 0.0  ;;  %v5993_v45 = vadd.f32 %v5992_v5, %v17271_v50  ;;  %v17273_v9 = vld [vmem:[#allocation18_spill] sm:$0xff] }
 0x40e   : > { %v5994_v46 = vpop.f32.mrf.mxu0  ;;  %7337 = vadd.xlane.f32.xlu0 %v7336_v32 }
 0x40f   : > { %17268 = vst [vmem:[#allocation14_spill] sm:$0xff] %v14127_v53  ;;  %v5995_v42 = vadd.f32 %v5994_v46, %v17270_v35  ;;  %v6447_v60 = vpop.f32.mrf.mxu1  ;;  %v6839_v14 = vsel %vm6750_vm1, %v14127_v53, 0.0  ;;  %v7132_v52 = vmul.f32 %v14127_v53, %v14127_v53  ;;  %v7131_v46 = vmul.f32 %v14131_v59, %v14131_v59 }
 0x410   : > { %v5998_v23 = vpop.f32.mrf.mxu0  ;;  %6237 = vmatmul.mubr.bf16.gmra.mxu0 %v11202_v31  ;;  %6837 = vadd.xlane.f32.xlu1 %v6836_v47  ;;  %v6840_v36 = vadd.f32 %v6839_v14, %v14131_v59  ;;  %v7340_v31 = vadd.f32 %v7339_v1, %v7129_v29  ;;  %v14157_v14 = vadd.f32 %v6445_v24, %v5993_v45  ;;  %v11206_v1 = vld [vmem:[%s11762_s12 + $0xcd8] ss:$44 sps:$4 sm:$0xff]   ;;  %v11209_v29 = vld [vmem:[%s11762_s12 + $0xce0] ss:$44 sps:$4 sm:$0xff]  }
 0x411   : > { %v14144_v35 = vadd.f32 %v6447_v60, %v5995_v42  ;;  %v6451_v27 = vpop.f32.mrf.mxu1  ;;  %10533 = vmatmul.mubr.msk.bf16.gmra.mxu1 %vm3905_vm0, %v11205_v56  ;;  %v7343_v34 = vsel %vm6750_vm1, %v7132_v52, 0.0  ;;  %6246 = vmatprep.mubr.bf16.mxu0 %v11208_v30  ;;  %v5999_v32 = vadd.f32 %v5998_v23, %v17273_v9  ;;  %v17274_v42 = vld [vmem:[#allocation19_spill] sm:$0xff]  ;;  %v11212_v9 = vld [vmem:[%s11762_s12 + $0xd34] ss:$44 sps:$4 sm:$0xff]   ;;  %v17278_v59 = vld [vmem:[#allocation21_spill] sm:$0xff] }
 0x412   : > { %v6000_v5 = vpop.f32.mrf.mxu0  ;;  %6841 = vadd.xlane.f32.xlu0 %v6840_v36  ;;  %6699 = vmatprep.mubr.bf16.mxu1 %v17038_v21  ;;  %17275 = vst [vmem:[#allocation16_spill] sm:$0xff] %v14157_v14  ;;  %v7344_v50 = vadd.f32 %v7343_v34, %v7131_v46 }
 0x413   : > { %17272 = vst [vmem:[#allocation17_spill] sm:$0xff] %v14144_v35  ;;  %v6001_v60 = vadd.f32 %v6000_v5, %v17274_v42  ;;  %v6453_v47 = vpop.f32.mrf.mxu1  ;;  %v6843_v56 = vsel %vm6750_vm1, %v14144_v35, 0.0  ;;  %v7134_v30 = vmul.f32 %v14144_v35, %v14144_v35  ;;  %v14164_v53 = vadd.f32 %v6451_v27, %v5999_v32 }
 0x414   : > { %v6002_v52 = vpop.f32.mrf.mxu0  ;;  %7341 = vadd.xlane.f32.xlu1 %v7340_v31  ;;  %v6844_v42 = vadd.f32 %v6843_v56, %v14157_v14  ;;  %v17279_v31 = vld [vmem:[#allocation20_spill] sm:$0xff]  ;;  %v7133_v32 = vmul.f32 %v14157_v14, %v14157_v14 }
 0x415   : > { %v14160_v23 = vadd.f32 %v6453_v47, %v6001_v60  ;;  %v6455_v36 = vpop.f32.mrf.mxu1  ;;  %17277 = vst [vmem:[#allocation19_spill] sm:$0xff] %v14164_v53  ;;  %v7347_v45 = vsel %vm6750_vm1, %v7134_v30, 0.0  ;;  %v6003_v46 = vadd.f32 %v6002_v52, %v17279_v31  ;;  %v17281_v30 = vld [vmem:[#allocation22_spill] sm:$0xff] }
 0x416   : > { %v6004_v5 = vpop.f32.mrf.mxu0  ;;  %7345 = vadd.xlane.f32.xlu0 %v7344_v50 }
 0x417   : > { %17276 = vst [vmem:[#allocation18_spill] sm:$0xff] %v14160_v23  ;;  %v6005_v63 = vadd.f32 %v6004_v5, %v17278_v59  ;;  %v6457_v35 = vpop.f32.mrf.mxu1  ;;  %v6847_v24 = vsel %vm6750_vm1, %v14160_v23, 0.0  ;;  %v7136_v34 = vmul.f32 %v14160_v23, %v14160_v23  ;;  %v7135_v5 = vmul.f32 %v14164_v53, %v14164_v53 }
 0x418   : > { %v6008_v60 = vpop.f32.mrf.mxu0  ;;  %6247 = vmatmul.mubr.bf16.gmra.mxu0 %v11206_v1  ;;  %6845 = vadd.xlane.f32.xlu1 %v6844_v42  ;;  %v6848_v27 = vadd.f32 %v6847_v24, %v14164_v53  ;;  %v7348_v1 = vadd.f32 %v7347_v45, %v7133_v32  ;;  %v14190_v24 = vadd.f32 %v6455_v36, %v6003_v46  ;;  %v11210_v45 = vld [vmem:[%s11762_s12 + $0xd30] ss:$44 sps:$4 sm:$0xff]   ;;  %v11213_v32 = vld [vmem:[%s11762_s12 + $0xd38] ss:$44 sps:$4 sm:$0xff]  }
 0x419   : > { %v14177_v59 = vadd.f32 %v6457_v35, %v6005_v63  ;;  %v6461_v47 = vpop.f32.mrf.mxu1  ;;  %10534 = vmatmul.mubr.msk.bf16.gmra.mxu1 %vm3905_vm0, %v11209_v29  ;;  %v7351_v56 = vsel %vm6750_vm1, %v7136_v34, 0.0  ;;  %6256 = vmatprep.mubr.bf16.mxu0 %v11212_v9  ;;  %v6009_v50 = vadd.f32 %v6008_v60, %v17281_v30  ;;  %v17282_v63 = vld [vmem:[#allocation23_spill] sm:$0xff]  ;;  %v17286_v53 = vld [vmem:[#allocation25_spill] sm:$0xff] }
 0x41a   : > { %v6010_v52 = vpop.f32.mrf.mxu0  ;;  %6849 = vadd.xlane.f32.xlu0 %v6848_v27  ;;  %6709 = vmatprep.mubr.bf16.mxu1 %v17038_v21  ;;  %17283 = vst [vmem:[#allocation20_spill] sm:$0xff] %v14190_v24  ;;  %v7352_v31 = vadd.f32 %v7351_v56, %v7135_v5  ;;  %v11216_v30 = vld [vmem:[%s11762_s12 + $0xd8c] ss:$44 sps:$4 sm:$0xff]  }
 0x41b   : > { %17280 = vst [vmem:[#allocation21_spill] sm:$0xff] %v14177_v59  ;;  %v6011_v35 = vadd.f32 %v6010_v52, %v17282_v63  ;;  %v6463_v42 = vpop.f32.mrf.mxu1  ;;  %v6851_v29 = vsel %vm6750_vm1, %v14177_v59, 0.0  ;;  %v7138_v9 = vmul.f32 %v14177_v59, %v14177_v59  ;;  %v14197_v23 = vadd.f32 %v6461_v47, %v6009_v50 }
 0x41c   : > { %v6012_v34 = vpop.f32.mrf.mxu0  ;;  %7349 = vadd.xlane.f32.xlu1 %v7348_v1  ;;  %v6852_v63 = vadd.f32 %v6851_v29, %v14190_v24  ;;  %v17287_v1 = vld [vmem:[#allocation24_spill] sm:$0xff]  ;;  %v7137_v50 = vmul.f32 %v14190_v24, %v14190_v24 }
 0x41d   : > { %v14193_v60 = vadd.f32 %v6463_v42, %v6011_v35  ;;  %v6465_v27 = vpop.f32.mrf.mxu1  ;;  %17285 = vst [vmem:[#allocation23_spill] sm:$0xff] %v14197_v23  ;;  %v7355_v46 = vsel %vm6750_vm1, %v7138_v9, 0.0  ;;  %v6013_v5 = vadd.f32 %v6012_v34, %v17287_v1  ;;  %v17289_v9 = vld [vmem:[#allocation26_spill] sm:$0xff] }
 0x41e   : > { %v6014_v52 = vpop.f32.mrf.mxu0  ;;  %7353 = vadd.xlane.f32.xlu0 %v7352_v31 }
 0x41f   : > { %17284 = vst [vmem:[#allocation22_spill] sm:$0xff] %v14193_v60  ;;  %v6015_v14 = vadd.f32 %v6014_v52, %v17286_v53  ;;  %v6467_v59 = vpop.f32.mrf.mxu1  ;;  %v6855_v36 = vsel %vm6750_vm1, %v14193_v60, 0.0  ;;  %v7140_v56 = vmul.f32 %v14193_v60, %v14193_v60  ;;  %v7139_v52 = vmul.f32 %v14197_v23, %v14197_v23 }
 0x420   : > { %v6018_v35 = vpop.f32.mrf.mxu0  ;;  %6257 = vmatmul.mubr.bf16.gmra.mxu0 %v11210_v45  ;;  %6853 = vadd.xlane.f32.xlu1 %v6852_v63  ;;  %v6856_v47 = vadd.f32 %v6855_v36, %v14197_v23  ;;  %v7356_v45 = vadd.f32 %v7355_v46, %v7137_v50  ;;  %v14223_v36 = vadd.f32 %v6465_v27, %v6013_v5  ;;  %v11214_v46 = vld [vmem:[%s11762_s12 + $0xd88] ss:$44 sps:$4 sm:$0xff]   ;;  %v11217_v50 = vld [vmem:[%s11762_s12 + $0xd90] ss:$44 sps:$4 sm:$0xff]  }
 0x421   : > { %v14210_v53 = vadd.f32 %v6467_v59, %v6015_v14  ;;  %v6471_v42 = vpop.f32.mrf.mxu1  ;;  %10535 = vmatmul.mubr.msk.bf16.gmra.mxu1 %vm3905_vm0, %v11213_v32  ;;  %v7359_v29 = vsel %vm6750_vm1, %v7140_v56, 0.0  ;;  %6266 = vmatprep.mubr.bf16.mxu0 %v11216_v30  ;;  %v6019_v31 = vadd.f32 %v6018_v35, %v17289_v9  ;;  %v17290_v14 = vld [vmem:[#allocation27_spill] sm:$0xff]  ;;  %v11220_v9 = vld [vmem:[%s11762_s12 + $0xde4] ss:$44 sps:$4 sm:$0xff]   ;;  %v17294_v23 = vld [vmem:[#allocation29_spill] sm:$0xff] }
 0x422   : > { %v6020_v34 = vpop.f32.mrf.mxu0  ;;  %6857 = vadd.xlane.f32.xlu0 %v6856_v47  ;;  %6719 = vmatprep.mubr.bf16.mxu1 %v17038_v21  ;;  %17291 = vst [vmem:[#allocation24_spill] sm:$0xff] %v14223_v36  ;;  %v7360_v1 = vadd.f32 %v7359_v29, %v7139_v52 }
 0x423   : > { %17288 = vst [vmem:[#allocation25_spill] sm:$0xff] %v14210_v53  ;;  %v6021_v59 = vadd.f32 %v6020_v34, %v17290_v14  ;;  %v6473_v63 = vpop.f32.mrf.mxu1  ;;  %v6859_v32 = vsel %vm6750_vm1, %v14210_v53, 0.0  ;;  %v7142_v30 = vmul.f32 %v14210_v53, %v14210_v53  ;;  %v14230_v60 = vadd.f32 %v6471_v42, %v6019_v31 }
 0x424   : > { %v6022_v56 = vpop.f32.mrf.mxu0  ;;  %7357 = vadd.xlane.f32.xlu1 %v7356_v45  ;;  %v6860_v14 = vadd.f32 %v6859_v32, %v14223_v36  ;;  %v17295_v45 = vld [vmem:[#allocation28_spill] sm:$0xff]  ;;  %v7141_v31 = vmul.f32 %v14223_v36, %v14223_v36 }
 0x425   : > { %v14226_v35 = vadd.f32 %v6473_v63, %v6021_v59  ;;  %v6475_v47 = vpop.f32.mrf.mxu1  ;;  %17293 = vst [vmem:[#allocation27_spill] sm:$0xff] %v14230_v60  ;;  %v7363_v5 = vsel %vm6750_vm1, %v7142_v30, 0.0  ;;  %v6023_v52 = vadd.f32 %v6022_v56, %v17295_v45  ;;  %v17297_v30 = vld [vmem:[#allocation30_spill] sm:$0xff] }
 0x426   : > { %v6024_v34 = vpop.f32.mrf.mxu0  ;;  %7361 = vadd.xlane.f32.xlu0 %v7360_v1 }
 0x427   : > { %17292 = vst [vmem:[#allocation26_spill] sm:$0xff] %v14226_v35  ;;  %v6025_v24 = vadd.f32 %v6024_v34, %v17294_v23  ;;  %v6477_v53 = vpop.f32.mrf.mxu1  ;;  %v6863_v27 = vsel %vm6750_vm1, %v14226_v35, 0.0  ;;  %v7144_v29 = vmul.f32 %v14226_v35, %v14226_v35  ;;  %v7143_v34 = vmul.f32 %v14230_v60, %v14230_v60 }
 0x428   : > { %v6028_v59 = vpop.f32.mrf.mxu0  ;;  %6267 = vmatmul.mubr.bf16.gmra.mxu0 %v11214_v46  ;;  %6861 = vadd.xlane.f32.xlu1 %v6860_v14  ;;  %v6864_v42 = vadd.f32 %v6863_v27, %v14230_v60  ;;  %v7364_v46 = vadd.f32 %v7363_v5, %v7141_v31  ;;  %v14256_v27 = vadd.f32 %v6475_v47, %v6023_v52  ;;  %v11218_v5 = vld [vmem:[%s11762_s12 + $0xde0] ss:$44 sps:$4 sm:$0xff]   ;;  %v11221_v31 = vld [vmem:[%s11762_s12 + $0xde8] ss:$44 sps:$4 sm:$0xff]   ;;  %v17302_v60 = vld [vmem:[#allocation33_spill] sm:$0xff] }
 0x429   : > { %v14243_v23 = vadd.f32 %v6477_v53, %v6025_v24  ;;  %v6481_v63 = vpop.f32.mrf.mxu1  ;;  %10536 = vmatmul.mubr.msk.bf16.gmra.mxu1 %vm3905_vm0, %v11217_v50  ;;  %v7367_v32 = vsel %vm6750_vm1, %v7144_v29, 0.0  ;;  %6276 = vmatprep.mubr.bf16.mxu0 %v11220_v9  ;;  %v6029_v1 = vadd.f32 %v6028_v59, %v17297_v30  ;;  %v17298_v24 = vld [vmem:[#allocation31_spill] sm:$0xff] }
 0x42a   : > { %v6030_v56 = vpop.f32.mrf.mxu0  ;;  %6865 = vadd.xlane.f32.xlu0 %v6864_v42  ;;  %6729 = vmatprep.mubr.bf16.mxu1 %v17038_v21  ;;  %17299 = vst [vmem:[#allocation28_spill] sm:$0xff] %v14256_v27  ;;  %v7368_v45 = vadd.f32 %v7367_v32, %v7143_v34  ;;  %v11224_v30 = vld [vmem:[%s11762_s12 + $0xe3c] ss:$44 sps:$4 sm:$0xff]  }
 0x42b   : > { %17296 = vst [vmem:[#allocation29_spill] sm:$0xff] %v14243_v23  ;;  %v6031_v53 = vadd.f32 %v6030_v56, %v17298_v24  ;;  %v6483_v14 = vpop.f32.mrf.mxu1  ;;  %v6867_v50 = vsel %vm6750_vm1, %v14243_v23, 0.0  ;;  %v7146_v9 = vmul.f32 %v14243_v23, %v14243_v23  ;;  %v14263_v35 = vadd.f32 %v6481_v63, %v6029_v1 }
 0x42c   : > { %v6032_v29 = vpop.f32.mrf.mxu0  ;;  %7365 = vadd.xlane.f32.xlu1 %v7364_v46  ;;  %v6868_v24 = vadd.f32 %v6867_v50, %v14256_v27  ;;  %v17303_v46 = vld [vmem:[#allocation32_spill] sm:$0xff]  ;;  %v7145_v1 = vmul.f32 %v14256_v27, %v14256_v27 }
 0x42d   : > { %v14259_v59 = vadd.f32 %v6483_v14, %v6031_v53  ;;  %v6485_v42 = vpop.f32.mrf.mxu1  ;;  %17301 = vst [vmem:[#allocation31_spill] sm:$0xff] %v14263_v35  ;;  %v7371_v52 = vsel %vm6750_vm1, %v7146_v9, 0.0  ;;  %v6033_v34 = vadd.f32 %v6032_v29, %v17303_v46  ;;  %v11225_v46 = vld [vmem:[%s11762_s12 + $0xe40] ss:$44 sps:$4 sm:$0xff]  }
 0x42e   : > { %v6034_v56 = vpop.f32.mrf.mxu0  ;;  %7369 = vadd.xlane.f32.xlu0 %v7368_v45  ;;  %v7372_v45 = vadd.f32 %v7371_v52, %v7145_v1 }
 0x42f   : > { %17300 = vst [vmem:[#allocation30_spill] sm:$0xff] %v14259_v59  ;;  %v6035_v36 = vadd.f32 %v6034_v56, %v17302_v60  ;;  %v6487_v23 = vpop.f32.mrf.mxu1  ;;  %v6871_v47 = vsel %vm6750_vm1, %v14259_v59, 0.0  ;;  %v7148_v32 = vmul.f32 %v14259_v59, %v14259_v59  ;;  %v14289_v56 = vadd.f32 %v6485_v42, %v6033_v34 }
 0x430   : > { %v6038_v53 = vpop.f32.mrf.mxu0  ;;  %6277 = vmatmul.mubr.bf16.gmra.mxu0 %v11218_v5  ;;  %6869 = vadd.xlane.f32.xlu1 %v6868_v24  ;;  %v6872_v63 = vadd.f32 %v6871_v47, %v14263_v35  ;;  %v7147_v5 = vmul.f32 %v14263_v35, %v14263_v35  ;;  %v11222_v47 = vld [vmem:[%s11762_s12 + $0xe38] ss:$44 sps:$4 sm:$0xff]   ;;  %s10031_s12 = sshll.u32 %s17980_s9, 3 }
 0x431   : > { %v14276_v60 = vadd.f32 %v6487_v23, %v6035_v36  ;;  %v6491_v14 = vpop.f32.mrf.mxu1  ;;  %10537 = vmatmul.mubr.msk.bf16.gmra.mxu1 %vm3905_vm0, %v11221_v31  ;;  %v7375_v50 = vsel %vm6750_vm1, %v7148_v32, 0.0  ;;  %6286 = vmatprep.mubr.bf16.mxu0 %v11224_v30  ;;  %v6039_v9 = vadd.f32 %v6038_v53, %v13325_v55  ;;  %17305 = vst [vmem:[#allocation32_spill] sm:$0xff] %v14289_v56  ;;  %s14510_s19 = scalar_lea.vmem %s16654_s2, %s10031_s12  ;;  %s14545_s22 = scalar_lea.vmem %s16655_s3, %s10031_s12 }
 0x432   : > { %v6040_v29 = vpop.f32.mrf.mxu0  ;;  %6873 = vadd.xlane.f32.xlu0 %v6872_v63  ;;  %6739 = vmatprep.mubr.bf16.mxu1 %v17038_v21  ;;  %v7376_v24 = vadd.f32 %v7375_v50, %v7147_v5  ;;  %v8179_v57 = vld [vmem:[%s14510_s19] sm:$0xff] }
 0x433   : > { %17304 = vst [vmem:[#allocation33_spill] sm:$0xff] %v14276_v60  ;;  %v6041_v36 = vadd.f32 %v6040_v29, %v13329_v62  ;;  %v6493_v23 = vpop.f32.mrf.mxu1  ;;  %v6875_v31 = vsel %vm6750_vm1, %v14276_v60, 0.0  ;;  %v7150_v30 = vmul.f32 %v14276_v60, %v14276_v60  ;;  %v14295_v21 = vadd.f32 %v6491_v14, %v6039_v9  ;;  %v17308_v29 = vld [vmem:[#allocation34_spill] sm:$0xff] }
 0x434   : > { %v6042_v55 = vpop.f32.mrf.mxu0  ;;  %7373 = vadd.xlane.f32.xlu1 %v7372_v45  ;;  %v6876_v53 = vadd.f32 %v6875_v31, %v14289_v56  ;;  %v7149_v9 = vmul.f32 %v14289_v56, %v14289_v56 }
 0x435   : > { %v14292_v52 = vadd.f32 %v6493_v23, %v6041_v36  ;;  %v6495_v32 = vpop.f32.mrf.mxu1  ;;  %17307 = vst [vmem:[#allocation152_spill] sm:$0xff] %v14295_v21  ;;  %v7379_v34 = vsel %vm6750_vm1, %v7150_v30, 0.0  ;;  %v6043_v45 = vadd.f32 %v6042_v55, %v17308_v29 }
 0x436   : > { %v6044_v62 = vpop.f32.mrf.mxu0  ;;  %7377 = vadd.xlane.f32.xlu0 %v7376_v24  ;;  %v7380_v55 = vadd.f32 %v7379_v34, %v7149_v9  ;;  %v7151_v24 = vmul.f32 %v14295_v21, %v14295_v21 }
 0x437   : > { %17306 = vst [vmem:[#allocation151_spill] sm:$0xff] %v14292_v52  ;;  %v6045_v63 = vadd.f32 %v6044_v62, %v13337_v11  ;;  %v6497_v1 = vpop.f32.mrf.mxu1  ;;  %v6879_v42 = vsel %vm6750_vm1, %v14292_v52, 0.0  ;;  %v7152_v50 = vmul.f32 %v14292_v52, %v14292_v52 }
 0x438   : > { %v6048_v5 = vpop.f32.mrf.mxu0  ;;  %6287 = vmatmul.mubr.bf16.gmra.mxu0 %v11222_v47  ;;  %6877 = vadd.xlane.f32.xlu1 %v6876_v53  ;;  %v6880_v14 = vadd.f32 %v6879_v42, %v14295_v21 }
 0x439   : > { %v14308_v11 = vadd.f32 %v6497_v1, %v6045_v63  ;;  %v6501_v36 = vpop.f32.mrf.mxu1  ;;  %10538 = vmatmul.mubr.msk.bf16.gmra.mxu1 %vm3905_vm0, %v11225_v46  ;;  %v7383_v23 = vsel %vm6750_vm1, %v7152_v50, 0.0  ;;  %v6049_v31 = vadd.f32 %v6048_v5, %v13341_v7  ;;  %v14320_v46 = vadd.f32 %v6495_v32, %v6043_v45 }
 0x43a   : > { %v6050_v30 = vpop.f32.mrf.mxu0  ;;  %6881 = vadd.xlane.f32.xlu0 %v6880_v14  ;;  %v7384_v7 = vadd.f32 %v7383_v23, %v7151_v24  ;;  %v17313_v23 = vld [vmem:[#allocation35_spill] sm:$0xff] }
 0x43b   : > { %17309 = vst [vmem:[#allocation34_spill] sm:$0xff] %v14308_v11  ;;  %v6051_v47 = vadd.f32 %v6050_v30, %v13345_v12  ;;  %v6503_v62 = vpop.f32.mrf.mxu1  ;;  %v6883_v53 = vsel %vm6750_vm1, %v14308_v11, 0.0  ;;  %v7154_v63 = vmul.f32 %v14308_v11, %v14308_v11  ;;  %17310 = vst [vmem:[#allocation153_spill] sm:$0xff] %v14320_v46  ;;  %v14324_v50 = vadd.f32 %v6501_v36, %v6049_v31 }
 0x43c   : > { %v6052_v1 = vpop.f32.mrf.mxu0  ;;  %7381 = vadd.xlane.f32.xlu1 %v7380_v55  ;;  %v6884_v12 = vadd.f32 %v6883_v53, %v14320_v46  ;;  %v7153_v31 = vmul.f32 %v14320_v46, %v14320_v46 }
 0x43d   : > { %v14322_v42 = vadd.f32 %v6503_v62, %v6051_v47  ;;  %v6505_v34 = vpop.f32.mrf.mxu1  ;;  %17312 = vst [vmem:[#allocation155_spill] sm:$0xff] %v14324_v50  ;;  %v7387_v32 = vsel %vm6750_vm1, %v7154_v63, 0.0  ;;  %v6053_v30 = vadd.f32 %v6052_v1, %v17313_v23  ;;  %v7155_v1 = vmul.f32 %v14324_v50, %v14324_v50 }
 0x43e   : > { %v6054_v29 = vpop.f32.mrf.mxu0  ;;  %7385 = vadd.xlane.f32.xlu0 %v7384_v7  ;;  %v7388_v63 = vadd.f32 %v7387_v32, %v7153_v31  ;;  %v17315_v7 = vld [vmem:[#allocation36_spill] sm:$0xff] }
 0x43f   : > { %17311 = vst [vmem:[#allocation154_spill] sm:$0xff] %v14322_v42  ;;  %v6055_v5 = vadd.f32 %v6054_v29, %v13353_v0  ;;  %v6507_v14 = vpop.f32.mrf.mxu1  ;;  %v6887_v9 = vsel %vm6750_vm1, %v14322_v42, 0.0  ;;  %v7156_v45 = vmul.f32 %v14322_v42, %v14322_v42 }
 0x440   : > { %v6058_v55 = vpop.f32.mrf.mxu0  ;;  %6885 = vadd.xlane.f32.xlu1 %v6884_v12  ;;  %v6888_v36 = vadd.f32 %v6887_v9, %v14324_v50 }
 0x441   : > { %v14337_v24 = vadd.f32 %v6507_v14, %v6055_v5  ;;  %v6511_v0 = vpop.f32.mrf.mxu1  ;;  %v7391_v47 = vsel %vm6750_vm1, %v7156_v45, 0.0  ;;  %v6059_v62 = vadd.f32 %v6058_v55, %v13358_v25  ;;  %v14348_v14 = vadd.f32 %v6505_v34, %v6053_v30 }
 0x442   : > { %v6060_v53 = vpop.f32.mrf.mxu0  ;;  %6889 = vadd.xlane.f32.xlu0 %v6888_v36  ;;  %v7392_v25 = vadd.f32 %v7391_v47, %v7155_v1 }
 0x443   : > { %17314 = vst [vmem:[#allocation35_spill] sm:$0xff] %v14337_v24  ;;  %v6061_v29 = vadd.f32 %v6060_v53, %v17315_v7  ;;  %v6513_v12 = vpop.f32.mrf.mxu1  ;;  %v6754_v9 = vpop.xlane.xlu0 %6753  ;;  %v6891_v23 = vsel %vm6750_vm1, %v14337_v24, 0.0  ;;  %v7158_v5 = vmul.f32 %v14337_v24, %v14337_v24  ;;  %17316 = vst [vmem:[#allocation36_spill] sm:$0xff] %v14348_v14  ;;  %v14352_v36 = vadd.f32 %v6511_v0, %v6059_v62  ;;  %v17319_v7 = vld [vmem:[#allocation38_spill] sm:$0xff] }
 0x444   : > { %v6062_v45 = vpop.f32.mrf.mxu0  ;;  %7389 = vadd.xlane.f32.xlu1 %v7388_v63  ;;  %v6892_v53 = vadd.f32 %v6891_v23, %v14348_v14  ;;  %v17320_v63 = vld [vmem:[#allocation37_spill] sm:$0xff] }
 0x445   : > { %v14350_v55 = vadd.f32 %v6513_v12, %v6061_v29  ;;  %v6515_v32 = vpop.f32.mrf.mxu1  ;;  %17318 = vst [vmem:[#allocation157_spill] sm:$0xff] %v14352_v36  ;;  %v7395_v30 = vsel %vm6750_vm1, %v7158_v5, 0.0  ;;  %v6063_v1 = vadd.f32 %v6062_v45, %v17320_v63  ;;  %v7157_v29 = vmul.f32 %v14348_v14, %v14348_v14 }
 0x446   : > { %v6064_v31 = vpop.f32.mrf.mxu0  ;;  %7393 = vadd.xlane.f32.xlu0 %v7392_v25  ;;  %v7159_v45 = vmul.f32 %v14352_v36, %v14352_v36  ;;  %v14376_v14 = vmul.f32 0.0051020407, %v6754_v9 }
 0x447   : > { %17317 = vst [vmem:[#allocation156_spill] sm:$0xff] %v14350_v55  ;;  %v6065_v42 = vadd.f32 %v6064_v31, %v17319_v7  ;;  %v6517_v50 = vpop.f32.mrf.mxu1  ;;  %v7258_v52 = vpop.xlane.xlu0 %7257  ;;  %v6895_v34 = vsel %vm6750_vm1, %v14350_v55, 0.0  ;;  %v7160_v47 = vmul.f32 %v14350_v55, %v14350_v55  ;;  %v17322_v7 = vld [vmem:[#allocation39_spill] sm:$0xff]  ;;  %v7396_v55 = vadd.f32 %v7395_v30, %v7157_v29 }
 0x448   : > { %v6068_v0 = vpop.f32.mrf.mxu0  ;;  %6893 = vadd.xlane.f32.xlu1 %v6892_v53  ;;  %v6896_v62 = vadd.f32 %v6895_v34, %v14352_v36  ;;  %v17323_v53 = vld [vmem:[#allocation40_spill] sm:$0xff] }
 0x449   : > { %v14365_v12 = vadd.f32 %v6517_v50, %v6065_v42  ;;  %v6521_v23 = vpop.f32.mrf.mxu1  ;;  %v7262_v25 = vpop.xlane.xlu1 %7261  ;;  %v7399_v31 = vsel %vm6750_vm1, %v7160_v47, 0.0  ;;  %v6069_v5 = vadd.f32 %v6068_v0, %v17322_v7  ;;  %v14378_v47 = vadd.f32 %v6515_v32, %v6063_v1 }
 0x44a   : > { %v6070_v24 = vpop.f32.mrf.mxu0  ;;  %6897 = vadd.xlane.f32.xlu0 %v6896_v62  ;;  %v7400_v30 = vadd.f32 %v7399_v31, %v7159_v45 }
 0x44b   : > { %17321 = vst [vmem:[#allocation38_spill] sm:$0xff] %v14365_v12  ;;  %v6071_v63 = vadd.f32 %v6070_v24, %v17323_v53  ;;  %v6523_v34 = vpop.f32.mrf.mxu1  ;;  %v6758_v21 = vpop.xlane.xlu0 %6757  ;;  %v6899_v42 = vsel %vm6750_vm1, %v14365_v12, 0.0  ;;  %v7162_v50 = vmul.f32 %v14365_v12, %v14365_v12  ;;  %17324 = vst [vmem:[#allocation37_spill] sm:$0xff] %v14378_v47  ;;  %v7675_v24 = vmul.f32 0.0051020407, %v7258_v52  ;;  %v17327_v12 = vld [vmem:[#allocation42_spill] sm:$0xff] }
 0x44c   : > { %v6072_v0 = vpop.f32.mrf.mxu0  ;;  %7397 = vadd.xlane.f32.xlu1 %v7396_v55  ;;  %v14384_v53 = vadd.f32 %v6521_v23, %v6069_v5  ;;  %v14386_v36 = vmul.f32 0.0051020407, %v6758_v21  ;;  %v6900_v9 = vadd.f32 %v6899_v42, %v14378_v47  ;;  %v7759_v21 = vmul.f32 %v14376_v14, %v14376_v14  ;;  %v17328_v23 = vld [vmem:[#allocation41_spill] sm:$0xff] }
 0x44d   : > { %v14380_v62 = vadd.f32 %v6523_v34, %v6071_v63  ;;  %v6525_v29 = vpop.f32.mrf.mxu1  ;;  %v14382_v7 = vpop.xlane.xlu1 %6761  ;;  %v7403_v31 = vsel %vm6750_vm1, %v7162_v50, 0.0  ;;  %v6073_v5 = vadd.f32 %v6072_v0, %v17328_v23 }
 0x44e   : > { %17326 = vst [vmem:[#allocation40_spill] sm:$0xff] %v14384_v53  ;;  %v6074_v11 = vpop.f32.mrf.mxu0  ;;  %7401 = vadd.xlane.f32.xlu0 %v7400_v30  ;;  %v7843_v50 = vsub.f32 %v7675_v24, %v7759_v21  ;;  %v17330_v30 = vld [vmem:[#allocation43_spill] sm:$0xff]  ;;  %v7760_v0 = vmul.f32 %v14386_v36, %v14386_v36 }
 0x44f   : > { %17325 = vst [vmem:[#allocation39_spill] sm:$0xff] %v14380_v62  ;;  %v6075_v32 = vadd.f32 %v6074_v11, %v17327_v12  ;;  %v6527_v1 = vpop.f32.mrf.mxu1  ;;  %v14390_v46 = vpop.xlane.xlu0 %7265  ;;  %v6903_v55 = vsel %vm6750_vm1, %v14380_v62, 0.0  ;;  %v7164_v52 = vmul.f32 %v14380_v62, %v14380_v62  ;;  %v7161_v11 = vmul.f32 %v14378_v47, %v14378_v47 }
 0x450   : > { %v6078_v45 = vpop.f32.mrf.mxu0  ;;  %6901 = vadd.xlane.f32.xlu1 %v6900_v9  ;;  %v6904_v42 = vadd.f32 %v6903_v55, %v14384_v53  ;;  %v17331_v9 = vld [vmem:[#allocation44_spill] sm:$0xff]  ;;  %v14418_v55 = vadd.f32 %v6525_v29, %v6073_v5  ;;  %v17335_v5 = vld [vmem:[#allocation46_spill] sm:$0xff] }
 0x451   : > { %v14402_v12 = vadd.f32 %v6527_v1, %v6075_v32  ;;  %v6531_v63 = vpop.f32.mrf.mxu1  ;;  %v14404_v34 = vpop.xlane.xlu1 %6765  ;;  %v6079_v62 = vadd.f32 %v6078_v45, %v17330_v30  ;;  %v7404_v35 = vadd.f32 %v7403_v31, %v7161_v11  ;;  %v7407_v60 = vsel %vm6750_vm1, %v7164_v52, 0.0 }
 0x452   : > { %v6080_v59 = vpop.f32.mrf.mxu0  ;;  %6905 = vadd.xlane.f32.xlu0 %v6904_v42  ;;  %v7163_v1 = vmul.f32 %v14384_v53, %v14384_v53  ;;  %17332 = vst [vmem:[#allocation41_spill] sm:$0xff] %v14418_v55  ;;  %v7676_v52 = vmul.f32 0.0051020407, %v7262_v25  ;;  %v7927_v30 = vmax.f32 %v7843_v50, 0.0 }
 0x453   : > { %17329 = vst [vmem:[#allocation42_spill] sm:$0xff] %v14402_v12  ;;  %v6081_v23 = vadd.f32 %v6080_v59, %v17331_v9  ;;  %v6533_v47 = vpop.f32.mrf.mxu1  ;;  %v14412_v32 = vpop.xlane.xlu0 %6769  ;;  %v6907_v24 = vsel %vm6750_vm1, %v14402_v12, 0.0  ;;  %v7166_v42 = vmul.f32 %v14402_v12, %v14402_v12  ;;  %v14426_v9 = vadd.f32 %v6531_v63, %v6079_v62 }
 0x454   : > { %v6082_v31 = vpop.f32.mrf.mxu0  ;;  %7405 = vadd.xlane.f32.xlu1 %v7404_v35  ;;  %v7408_v59 = vadd.f32 %v7407_v60, %v7163_v1  ;;  %v6908_v56 = vadd.f32 %v6907_v24, %v14418_v55  ;;  %v7844_v29 = vsub.f32 %v7676_v52, %v7760_v0  ;;  %v7165_v63 = vmul.f32 %v14418_v55, %v14418_v55 }
 0x455   : > { %v14420_v21 = vadd.f32 %v6533_v47, %v6081_v23  ;;  %v6535_v45 = vpop.f32.mrf.mxu1  ;;  %v14422_v11 = vpop.xlane.xlu1 %7269  ;;  %17334 = vst [vmem:[#allocation44_spill] sm:$0xff] %v14426_v9  ;;  %v7411_v60 = vsel %vm6750_vm1, %v7166_v42, 0.0  ;;  %v17336_v23 = vld [vmem:[#allocation45_spill] sm:$0xff]  ;;  %v8011_v42 = vadd.f32 1e-05, %v7927_v30  ;;  %v7167_v30 = vmul.f32 %v14426_v9, %v14426_v9 }
 0x456   : > { %v6084_v53 = vpop.f32.mrf.mxu0  ;;  %7409 = vadd.xlane.f32.xlu0 %v7408_v59  ;;  %v6083_v1 = vadd.f32 %v6082_v31, %v17336_v23  ;;  %v7412_v59 = vadd.f32 %v7411_v60, %v7165_v63 }
 0x457   : > { %17333 = vst [vmem:[#allocation43_spill] sm:$0xff] %v14420_v21  ;;  %v6085_v27 = vadd.f32 %v6084_v53, %v17335_v5  ;;  %v6537_v35 = vpop.f32.mrf.mxu1  ;;  %v14430_v25 = vpop.xlane.xlu0 %7273  ;;  %v6911_v47 = vsel %vm6750_vm1, %v14420_v21, 0.0  ;;  %v7168_v31 = vmul.f32 %v14420_v21, %v14420_v21  ;;  %v7928_v5 = vmax.f32 %v7844_v29, 0.0 }
 0x458   : > { %v14436_v50 = vpop.f32.mrf.mxu0  ;;  %6909 = vadd.xlane.f32.xlu1 %v6908_v56  ;;  %v6912_v62 = vadd.f32 %v6911_v47, %v14426_v9  ;;  %11226 = vrsqrt.f32 %v8011_v42 }
 0x459   : > { %v14441_v53 = vadd.f32 %v6537_v35, %v6085_v27  ;;  %v14443_v0 = vpop.xlane.xlu1 %6773  ;;  %v14445_v24 = vpop.f32.mrf.mxu1  ;;  %v14457_v35 = vadd.f32 %v6535_v45, %v6083_v1  ;;  %v7415_v29 = vsel %vm6750_vm1, %v7168_v31, 0.0  ;;  %v8012_v21 = vadd.f32 1e-05, %v7928_v5 }
 0x45a   : > { %v14447_v52 = vpop.f32.mrf.mxu0  ;;  %6913 = vadd.xlane.f32.xlu0 %v6912_v62  ;;  %v7416_v45 = vadd.f32 %v7415_v29, %v7167_v30 }
 0x45b   : > { %17337 = vst [vmem:[#allocation46_spill] sm:$0xff] %v14441_v53  ;;  %v14451_v56 = vpop.xlane.xlu0 %6777  ;;  %v14453_v47 = vpop.f32.mrf.mxu1  ;;  %v6915_v27 = vsel %vm6750_vm1, %v14441_v53, 0.0  ;;  %17338 = vst [vmem:[#allocation45_spill] sm:$0xff] %v14457_v35  ;;  %v7169_v31 = vmul.f32 %v14457_v35, %v14457_v35  ;;  %11228 = vrsqrt.f32 %v8012_v21 }
 0x45c   : > { %v14459_v23 = vpop.f32.mrf.mxu0  ;;  %7413 = vadd.xlane.f32.xlu1 %v7412_v59  ;;  %v6916_v63 = vadd.f32 %v6915_v27, %v14457_v35  ;;  %v7170_v59 = vmul.f32 %v14441_v53, %v14441_v53 }
 0x45d   : > { %v14461_v12 = vpop.xlane.xlu1 %7277  ;;  %v14463_v60 = vpop.f32.mrf.mxu1 }
 0x45e   : > { %v14468_v62 = vpop.f32.mrf.mxu0  ;;  %7417 = vadd.xlane.f32.xlu0 %v7416_v45  ;;  %v7419_v5 = vsel %vm6750_vm1, %v7170_v59, 0.0 }
 0x45f   : > { %v14471_v1 = vpop.xlane.xlu0 %7281  ;;  %v14473_v55 = vpop.f32.mrf.mxu1  ;;  %v7420_v30 = vadd.f32 %v7419_v5, %v7169_v31 }
 0x460   : > { %17339 = vst [vmem:[#allocation158_spill] sm:$0xff] %v14471_v1  ;;  %v14477_v19 = vpop.f32.mrf.mxu0  ;;  %6917 = vadd.xlane.f32.xlu1 %v6916_v63 }
 0x461   : > { %v14481_v9 = vpop.xlane.xlu1 %6781  ;;  %v14483_v42 = vpop.f32.mrf.mxu1 }
 0x462   : > { %v14486_v27 = vpop.f32.mrf.mxu0 }
 0x463   : > { %v14488_v29 = vpop.xlane.xlu0 %6785  ;;  %v14490_v53 = vpop.f32.mrf.mxu1 }
 0x464   : > { %17340 = vst [vmem:[#allocation159_spill] sm:$0xff] %v14488_v29  ;;  %v14492_v37 = vpop.f32.mrf.mxu0  ;;  %7421 = vadd.xlane.f32.xlu1 %v7420_v30 }
 0x465   : > { %v14494_v63 = vpop.xlane.xlu1 %7285  ;;  %v14496_v45 = vpop.f32.mrf.mxu1 }
 0x466   : > { %v14499_v35 = vpop.f32.mrf.mxu0  ;;  %v11227_v18 = vpop.eup %11226 }
 0x467   : > { %v14501_v2 = vpop.xlane.xlu0 %7289  ;;  %v14503_v59 = vpop.f32.mrf.mxu1  ;;  %v8263_v41 = vmul.f32 %v11227_v18, %v8179_v57 }
 0x468   : > { %17341 = vst [vmem:[#allocation160_spill] sm:$0xff] %v14501_v2  ;;  %v14505_v31 = vpop.f32.mrf.mxu0  ;;  %v11229_v4 = vpop.eup %11228  ;;  %v8180_v2 = vld [vmem:[%s14510_s19 + $0x8] sm:$0xff] }
 0x469   : > { %v14512_v21 = vpop.xlane.xlu1 %6789  ;;  %v14514_v5 = vpop.f32.mrf.mxu1  ;;  %v8431_v18 = vmul.f32 %v8263_v41, %v14376_v14 }
 0x46a   : > { %17342 = vst [vmem:[#allocation161_spill] sm:$0xff] %v14512_v21  ;;  %v14516_v30 = vpop.f32.mrf.mxu0 }
 0x46b   : > { %v14518_v38 = vpop.xlane.xlu0 %6793  ;;  %v14520_v48 = vpop.f32.mrf.mxu1 }
 0x46c   : > { %17343 = vst [vmem:[#allocation162_spill] sm:$0xff] %v14518_v38  ;;  %v14522_v44 = vpop.f32.mrf.mxu0 }
 0x46d   : > { %17344 = vst [vmem:[#allocation163_spill] sm:$0xff] %v14522_v44  ;;  %v14525_v28 = vpop.xlane.xlu1 %7293  ;;  %v14527_v61 = vpop.f32.mrf.mxu1 }
 0x46e   : > { %17345 = vst [vmem:[#allocation164_spill] sm:$0xff] %v14525_v28  ;;  %17346 = vst [vmem:[#allocation165_spill] sm:$0xff] %v14527_v61  ;;  %v14529_v26 = vpop.f32.mrf.mxu0 }
 0x46f   : > { %17347 = vst [vmem:[#allocation166_spill] sm:$0xff] %v14529_v26  ;;  %v14531_v51 = vpop.xlane.xlu0 %7297  ;;  %v14533_v15 = vpop.f32.mrf.mxu1 }
 0x470   : > { %17348 = vst [vmem:[#allocation167_spill] sm:$0xff] %v14531_v51  ;;  %17349 = vst [vmem:[#allocation168_spill] sm:$0xff] %v14533_v15  ;;  %v14536_v38 = vpop.f32.mrf.mxu0  ;;  %v14549_v51 = vmul.f32 %v11229_v4, %v8180_v2 }
 0x471   : > { %v14538_v29 = vpop.xlane.xlu1 %6797  ;;  %v14540_v3 = vpop.f32.mrf.mxu1 }
 0x472   : > { %17350 = vst [vmem:[#allocation169_spill] sm:$0xff] %v14538_v29  ;;  %v14547_v33 = vpop.f32.mrf.mxu0  ;;  %v8347_v29 = vld [vmem:[%s14545_s22] sm:$0xff] }
 0x473   : > { %v14551_v16 = vpop.xlane.xlu0 %6801  ;;  %v14553_v57 = vpop.f32.mrf.mxu1  ;;  %v8515_v21 = vsub.f32 %v8347_v29, %v8431_v18 }
 0x474   : > { %17351 = vst [vmem:[#allocation170_spill] sm:$0xff] %v14551_v16  ;;  %v6122_v49 = vpop.f32.mrf.mxu0  ;;  %8601 = vperm.xlu0 %10552, %v8263_v41  }
 0x475   : > { %v6123_v61 = vadd.f32 %v6122_v49, %v13469_v20  ;;  %v14558_v44 = vpop.xlane.xlu1 %7301  ;;  %8606 = vperm.xlu1 %10553, %v14549_v51   ;;  %v6575_v15 = vpop.f32.mrf.mxu1 }
 0x476   : > { %17352 = vst [vmem:[#allocation171_spill] sm:$0xff] %v14558_v44  ;;  %v6124_v28 = vpop.f32.mrf.mxu0 }
 0x477   : > { %v6125_v4 = vadd.f32 %v6124_v28, %v13472_v17  ;;  %v14562_v2 = vadd.f32 %v6575_v15, %v6123_v61  ;;  %v14564_v16 = vpop.xlane.xlu0 %7305  ;;  %v6577_v26 = vpop.f32.mrf.mxu1  ;;  %v17362_v28 = vld [vmem:[#allocation61_spill] sm:$0xff] }
 0x478   : > { %17354 = vst [vmem:[#allocation173_spill] sm:$0xff] %v14564_v16  ;;  %v14566_v14 = vpop.f32.mrf.mxu0 }
 0x479   : > { %17353 = vst [vmem:[#allocation172_spill] sm:$0xff] %v14562_v2  ;;  %17355 = vst [vmem:[#allocation174_spill] sm:$0xff] %v14566_v14  ;;  %v14568_v1 = vadd.f32 %v6577_v26, %v6125_v4  ;;  %v14570_v20 = vpop.xlane.xlu1 %6805  ;;  %9189 = vperm.xlu1 %10553, %v8515_v21   ;;  %v14572_v49 = vpop.f32.mrf.mxu1  ;;  %v17364_v26 = vld [vmem:[#allocation62_spill] sm:$0xff] }
 0x47a   : > { %17357 = vst [vmem:[#allocation176_spill] sm:$0xff] %v14570_v20  ;;  %17358 = vst [vmem:[#allocation177_spill] sm:$0xff] %v14572_v49  ;;  %v14574_v44 = vpop.f32.mrf.mxu0 }
 0x47b   : > { %17356 = vst [vmem:[#allocation175_spill] sm:$0xff] %v14568_v1  ;;  %17359 = vst [vmem:[#allocation178_spill] sm:$0xff] %v14574_v44  ;;  %v14576_v41 = vpop.xlane.xlu0 %6809  ;;  %v14578_v17 = vpop.f32.mrf.mxu1  ;;  %v17394_v44 = vld [vmem:[#allocation50_spill] sm:$0xff] }
 0x47c   : > { %17360 = vst [vmem:[#allocation179_spill] sm:$0xff] %v14576_v41  ;;  %17361 = vst [vmem:[#allocation180_spill] sm:$0xff] %v14578_v17  ;;  %v6132_v15 = vpop.f32.mrf.mxu0 }
 0x47d   : > { %v6133_v61 = vadd.f32 %v6132_v15, %v17362_v28  ;;  %v14581_v16 = vpop.xlane.xlu1 %7309  ;;  %v6585_v29 = vpop.f32.mrf.mxu1 }
 0x47e   : > { %17363 = vst [vmem:[#allocation61_spill] sm:$0xff] %v14581_v16  ;;  %v6134_v18 = vpop.f32.mrf.mxu0 }
 0x47f   : > { %v6135_v4 = vadd.f32 %v6134_v18, %v17364_v26  ;;  %v14584_v2 = vadd.f32 %v6585_v29, %v6133_v61  ;;  %v14586_v21 = vpop.xlane.xlu0 %7313  ;;  %v6587_v20 = vpop.f32.mrf.mxu1  ;;  %v17374_v61 = vld [vmem:[#allocation65_spill] sm:$0xff] }
 0x480   : > { %17366 = vst [vmem:[#allocation181_spill] sm:$0xff] %v14586_v21  ;;  %v14588_v1 = vpop.f32.mrf.mxu0 }
 0x481   : > { %17365 = vst [vmem:[#allocation62_spill] sm:$0xff] %v14584_v2  ;;  %17367 = vst [vmem:[#allocation182_spill] sm:$0xff] %v14588_v1  ;;  %v14590_v49 = vadd.f32 %v6587_v20, %v6135_v4  ;;  %v14592_v41 = vpop.xlane.xlu1 %6813  ;;  %v14594_v14 = vpop.f32.mrf.mxu1  ;;  %v17376_v1 = vld [vmem:[#allocation66_spill] sm:$0xff] }
 0x482   : > { %17369 = vst [vmem:[#allocation184_spill] sm:$0xff] %v14592_v41  ;;  %17370 = vst [vmem:[#allocation185_spill] sm:$0xff] %v14594_v14  ;;  %v14596_v15 = vpop.f32.mrf.mxu0  ;;  %v14611_v14 = vmul.f32 0.0051020407, %v14382_v7 }
 0x483   : > { %17368 = vst [vmem:[#allocation183_spill] sm:$0xff] %v14590_v49  ;;  %17371 = vst [vmem:[#allocation186_spill] sm:$0xff] %v14596_v15  ;;  %v14598_v28 = vpop.xlane.xlu0 %6817  ;;  %v14600_v16 = vpop.f32.mrf.mxu1 }
 0x484   : > { %17372 = vst [vmem:[#allocation187_spill] sm:$0xff] %v14598_v28  ;;  %17373 = vst [vmem:[#allocation188_spill] sm:$0xff] %v14600_v16  ;;  %v6142_v18 = vpop.f32.mrf.mxu0  ;;  %v17380_v16 = vld [vmem:[#allocation48_spill] sm:$0xff]  ;;  %v7761_v7 = vmul.f32 %v14611_v14, %v14611_v14 }
 0x485   : > { %v6143_v29 = vadd.f32 %v6142_v18, %v17374_v61  ;;  %v14603_v26 = vpop.xlane.xlu1 %7317  ;;  %v6595_v21 = vpop.f32.mrf.mxu1  ;;  %v6091_v15 = vadd.f32 %v14447_v52, %v17380_v16  ;;  %v17388_v52 = vld [vmem:[#allocation69_spill] sm:$0xff] }
 0x486   : > { %17375 = vst [vmem:[#allocation65_spill] sm:$0xff] %v14603_v26  ;;  %v6144_v2 = vpop.f32.mrf.mxu0 }
 0x487   : > { %v6145_v20 = vadd.f32 %v6144_v2, %v17376_v1  ;;  %v14606_v4 = vadd.f32 %v6595_v21, %v6143_v29  ;;  %v14608_v41 = vpop.xlane.xlu0 %7321  ;;  %v6597_v49 = vpop.f32.mrf.mxu1  ;;  %v7677_v29 = vmul.f32 0.0051020407, %v14390_v46  ;;  %v14633_v16 = vadd.f32 %v14453_v47, %v6091_v15 }
 0x488   : > { %17378 = vst [vmem:[#allocation189_spill] sm:$0xff] %v14608_v41  ;;  %v14613_v28 = vpop.f32.mrf.mxu0  ;;  %v6095_v47 = vadd.f32 %v14468_v62, %v17394_v44 }
 0x489   : > { %17377 = vst [vmem:[#allocation66_spill] sm:$0xff] %v14606_v4  ;;  %17379 = vst [vmem:[#allocation190_spill] sm:$0xff] %v14613_v28  ;;  %v14617_v18 = vadd.f32 %v6597_v49, %v6145_v20  ;;  %v14619_v61 = vpop.xlane.xlu1 %6821  ;;  %v14621_v26 = vpop.f32.mrf.mxu1  ;;  %v17390_v4 = vld [vmem:[#allocation47_spill] sm:$0xff]  ;;  %v7845_v17 = vsub.f32 %v7677_v29, %v7761_v7 }
 0x48a   : > { %17382 = vst [vmem:[#allocation191_spill] sm:$0xff] %v14619_v61  ;;  %17383 = vst [vmem:[#allocation192_spill] sm:$0xff] %v14621_v26  ;;  %v14623_v1 = vpop.f32.mrf.mxu0  ;;  %v17391_v26 = vld [vmem:[#allocation70_spill] sm:$0xff] }
 0x48b   : > { %17381 = vst [vmem:[#allocation48_spill] sm:$0xff] %v14617_v18  ;;  %17384 = vst [vmem:[#allocation193_spill] sm:$0xff] %v14623_v1  ;;  %v14625_v2 = vpop.xlane.xlu0 %6825  ;;  %v14627_v21 = vpop.f32.mrf.mxu1  ;;  %v6089_v18 = vadd.f32 %v14436_v50, %v17390_v4  ;;  %v6919_v50 = vsel %vm6750_vm1, %v14633_v16, 0.0 }
 0x48c   : > { %17385 = vst [vmem:[#allocation194_spill] sm:$0xff] %v14625_v2  ;;  %17386 = vst [vmem:[#allocation195_spill] sm:$0xff] %v14627_v21  ;;  %v6152_v41 = vpop.f32.mrf.mxu0 }
 0x48d   : > { %17387 = vst [vmem:[#allocation196_spill] sm:$0xff] %v14633_v16  ;;  %v6153_v49 = vadd.f32 %v6152_v41, %v17388_v52  ;;  %v14636_v20 = vpop.xlane.xlu1 %7325  ;;  %v6605_v61 = vpop.f32.mrf.mxu1  ;;  %v14660_v4 = vadd.f32 %v14445_v24, %v6089_v18 }
 0x48e   : > { %17389 = vst [vmem:[#allocation69_spill] sm:$0xff] %v14636_v20  ;;  %v6154_v2 = vpop.f32.mrf.mxu0 }
 0x48f   : > { %v6155_v28 = vadd.f32 %v6154_v2, %v17391_v26  ;;  %v14641_v21 = vadd.f32 %v6605_v61, %v6153_v49  ;;  %v14643_v1 = vpop.xlane.xlu0 %7329  ;;  %v6607_v46 = vpop.f32.mrf.mxu1  ;;  %v7172_v26 = vmul.f32 %v14633_v16, %v14633_v16  ;;  %17397 = vst [vmem:[#allocation198_spill] sm:$0xff] %v14660_v4  ;;  %v14669_v2 = vadd.f32 %v14473_v55, %v6095_v47  ;;  %v17400_v49 = vld [vmem:[#allocation49_spill] sm:$0xff]  ;;  %v17403_v55 = vld [vmem:[#allocation74_spill] sm:$0xff] }
 0x490   : > { %17393 = vst [vmem:[#allocation70_spill] sm:$0xff] %v14643_v1  ;;  %v14647_v15 = vpop.f32.mrf.mxu0  ;;  %v6920_v7 = vadd.f32 %v6919_v50, %v14660_v4  ;;  %v17401_v16 = vld [vmem:[#allocation73_spill] sm:$0xff] }
 0x491   : > { %17392 = vst [vmem:[#allocation47_spill] sm:$0xff] %v14641_v21  ;;  %v14649_v41 = vadd.f32 %v6607_v46, %v6155_v28  ;;  %v14651_v52 = vpop.xlane.xlu1 %6829  ;;  %v14653_v20 = vpop.f32.mrf.mxu1  ;;  %v7929_v28 = vmax.f32 %v7845_v17, 0.0  ;;  %17399 = vst [vmem:[#allocation200_spill] sm:$0xff] %v14669_v2  ;;  %v6093_v46 = vadd.f32 %v14459_v23, %v17400_v49  ;;  %v7171_v17 = vmul.f32 %v14660_v4, %v14660_v4 }
 0x492   : > { %17396 = vst [vmem:[#allocation197_spill] sm:$0xff] %v14651_v52  ;;  %v14662_v61 = vpop.f32.mrf.mxu0  ;;  %v7423_v52 = vsel %vm6750_vm1, %v7172_v26, 0.0 }
 0x493   : > { %17395 = vst [vmem:[#allocation50_spill] sm:$0xff] %v14649_v41  ;;  %v14664_v44 = vpop.xlane.xlu0 %6833  ;;  %v14666_v62 = vpop.f32.mrf.mxu1  ;;  %6921 = vadd.xlane.f32.xlu0 %v6920_v7  ;;  %v8013_v23 = vadd.f32 1e-05, %v7929_v28  ;;  %v7424_v49 = vadd.f32 %v7423_v52, %v7171_v17  ;;  %v14690_v26 = vadd.f32 %v14463_v60, %v6093_v46 }
 0x494   : > { %17398 = vst [vmem:[#allocation199_spill] sm:$0xff] %v14664_v44  ;;  %v6162_v29 = vpop.f32.mrf.mxu0 }
 0x495   : > { %v6163_v1 = vadd.f32 %v6162_v29, %v17401_v16  ;;  %v14675_v24 = vpop.xlane.xlu1 %7333  ;;  %v6615_v18 = vpop.f32.mrf.mxu1  ;;  %v6923_v29 = vsel %vm6750_vm1, %v14669_v2, 0.0  ;;  %17406 = vst [vmem:[#allocation201_spill] sm:$0xff] %v14690_v26  ;;  %11230 = vrsqrt.f32 %v8013_v23 }
 0x496   : > { %17402 = vst [vmem:[#allocation49_spill] sm:$0xff] %v14675_v24  ;;  %v6164_v44 = vpop.f32.mrf.mxu0  ;;  %v6924_v28 = vadd.f32 %v6923_v29, %v14690_v26 }
 0x497   : > { %v6165_v47 = vadd.f32 %v6164_v44, %v17403_v55  ;;  %v14681_v21 = vadd.f32 %v6615_v18, %v6163_v1  ;;  %v14683_v50 = vpop.xlane.xlu0 %7337  ;;  %v6617_v41 = vpop.f32.mrf.mxu1  ;;  %7425 = vadd.xlane.f32.xlu0 %v7424_v49  ;;  %v17410_v55 = vld [vmem:[#allocation77_spill] sm:$0xff] }
 0x498   : > { %17405 = vst [vmem:[#allocation74_spill] sm:$0xff] %v14683_v50  ;;  %v14685_v16 = vpop.f32.mrf.mxu0  ;;  %v17412_v50 = vld [vmem:[#allocation78_spill] sm:$0xff] }
 0x499   : > { %17404 = vst [vmem:[#allocation73_spill] sm:$0xff] %v14681_v21  ;;  %v14692_v7 = vadd.f32 %v6617_v41, %v6165_v47  ;;  %v14694_v4 = vpop.xlane.xlu1 %6837  ;;  %v14696_v44 = vpop.f32.mrf.mxu1 }
 0x49a   : > { %17408 = vst [vmem:[#allocation203_spill] sm:$0xff] %v14694_v4  ;;  %v14698_v1 = vpop.f32.mrf.mxu0 }
 0x49b   : > { %17407 = vst [vmem:[#allocation202_spill] sm:$0xff] %v14692_v7  ;;  %v14700_v18 = vpop.xlane.xlu0 %6841  ;;  %v14702_v52 = vpop.f32.mrf.mxu1 }
 0x49c   : > { %17409 = vst [vmem:[#allocation204_spill] sm:$0xff] %v14700_v18  ;;  %v6172_v17 = vpop.f32.mrf.mxu0 }
 0x49d   : > { %v6173_v60 = vadd.f32 %v6172_v17, %v17410_v55  ;;  %v14706_v46 = vpop.xlane.xlu1 %7341  ;;  %6925 = vadd.xlane.f32.xlu1 %v6924_v28  ;;  %v6625_v41 = vpop.f32.mrf.mxu1 }
 0x49e   : > { %17411 = vst [vmem:[#allocation77_spill] sm:$0xff] %v14706_v46  ;;  %v6174_v47 = vpop.f32.mrf.mxu0 }
 0x49f   : > { %v6175_v4 = vadd.f32 %v6174_v47, %v17412_v50  ;;  %v14709_v49 = vadd.f32 %v6625_v41, %v6173_v60  ;;  %v14711_v21 = vpop.xlane.xlu0 %7345  ;;  %v6627_v18 = vpop.f32.mrf.mxu1  ;;  %v17422_v60 = vld [vmem:[#allocation81_spill] sm:$0xff] }
 0x4a0   : > { %17414 = vst [vmem:[#allocation205_spill] sm:$0xff] %v14711_v21  ;;  %v14713_v7 = vpop.f32.mrf.mxu0 }
 0x4a1   : > { %17413 = vst [vmem:[#allocation78_spill] sm:$0xff] %v14709_v49  ;;  %17415 = vst [vmem:[#allocation206_spill] sm:$0xff] %v14713_v7  ;;  %v14715_v24 = vadd.f32 %v6627_v18, %v6175_v4  ;;  %v14717_v23 = vpop.xlane.xlu1 %6845  ;;  %v14719_v29 = vpop.f32.mrf.mxu1  ;;  %v17424_v18 = vld [vmem:[#allocation82_spill] sm:$0xff] }
 0x4a2   : > { %17417 = vst [vmem:[#allocation208_spill] sm:$0xff] %v14717_v23  ;;  %17418 = vst [vmem:[#allocation209_spill] sm:$0xff] %v14719_v29  ;;  %v14721_v17 = vpop.f32.mrf.mxu0 }
 0x4a3   : > { %17416 = vst [vmem:[#allocation207_spill] sm:$0xff] %v14715_v24  ;;  %17419 = vst [vmem:[#allocation210_spill] sm:$0xff] %v14721_v17  ;;  %v14723_v28 = vpop.xlane.xlu0 %6849  ;;  %v14725_v55 = vpop.f32.mrf.mxu1 }
 0x4a4   : > { %17420 = vst [vmem:[#allocation211_spill] sm:$0xff] %v14723_v28  ;;  %17421 = vst [vmem:[#allocation212_spill] sm:$0xff] %v14725_v55  ;;  %v6182_v50 = vpop.f32.mrf.mxu0  ;;  %v11231_v28 = vpop.eup %11230 }
 0x4a5   : > { %v6183_v41 = vadd.f32 %v6182_v50, %v17422_v60  ;;  %v14728_v47 = vpop.xlane.xlu1 %7349  ;;  %v6635_v21 = vpop.f32.mrf.mxu1  ;;  %v8181_v60 = vld [vmem:[%s14510_s19 + $0x10] sm:$0xff] }
 0x4a6   : > { %17423 = vst [vmem:[#allocation81_spill] sm:$0xff] %v14728_v47  ;;  %v6184_v4 = vpop.f32.mrf.mxu0  ;;  %v8432_v47 = vmul.f32 %v14549_v51, %v14386_v36  ;;  %v17436_v51 = vld [vmem:[#allocation86_spill] sm:$0xff] }
 0x4a7   : > { %v6185_v49 = vadd.f32 %v6184_v4, %v17424_v18  ;;  %v14731_v23 = vadd.f32 %v6635_v21, %v6183_v41  ;;  %v14733_v24 = vpop.xlane.xlu0 %7353  ;;  %v6637_v46 = vpop.f32.mrf.mxu1  ;;  %v8348_v4 = vld [vmem:[%s14545_s22 + $0x8] sm:$0xff] }
 0x4a8   : > { %17426 = vst [vmem:[#allocation213_spill] sm:$0xff] %v14733_v24  ;;  %v14735_v29 = vpop.f32.mrf.mxu0  ;;  %v14753_v24 = vmul.f32 %v11231_v28, %v8181_v60 }
 0x4a9   : > { %17425 = vst [vmem:[#allocation82_spill] sm:$0xff] %v14731_v23  ;;  %17427 = vst [vmem:[#allocation214_spill] sm:$0xff] %v14735_v29  ;;  %v14737_v7 = vadd.f32 %v6637_v46, %v6185_v49  ;;  %v14739_v55 = vpop.xlane.xlu1 %6853  ;;  %v14741_v50 = vpop.f32.mrf.mxu1  ;;  %v17434_v46 = vld [vmem:[#allocation85_spill] sm:$0xff] }
 0x4aa   : > { %17429 = vst [vmem:[#allocation216_spill] sm:$0xff] %v14739_v55  ;;  %17430 = vst [vmem:[#allocation217_spill] sm:$0xff] %v14741_v50  ;;  %v14746_v17 = vpop.f32.mrf.mxu0 }
 0x4ab   : > { %17428 = vst [vmem:[#allocation215_spill] sm:$0xff] %v14737_v7  ;;  %17431 = vst [vmem:[#allocation218_spill] sm:$0xff] %v14746_v17  ;;  %v14748_v21 = vpop.xlane.xlu0 %6857  ;;  %v14750_v41 = vpop.f32.mrf.mxu1  ;;  %v8516_v7 = vsub.f32 %v8348_v4, %v8432_v47 }
 0x4ac   : > { %17432 = vst [vmem:[#allocation219_spill] sm:$0xff] %v14748_v21  ;;  %17433 = vst [vmem:[#allocation220_spill] sm:$0xff] %v14750_v41  ;;  %v6192_v18 = vpop.f32.mrf.mxu0 }
 0x4ad   : > { %v6193_v49 = vadd.f32 %v6192_v18, %v17434_v46  ;;  %v14756_v23 = vpop.xlane.xlu1 %7357  ;;  %v6645_v55 = vpop.f32.mrf.mxu1  ;;  %9194 = vperm.xlu0 %10552, %v8516_v7  }
 0x4ae   : > { %17435 = vst [vmem:[#allocation85_spill] sm:$0xff] %v14756_v23  ;;  %v6194_v50 = vpop.f32.mrf.mxu0  ;;  %8611 = vperm.xlu1 %10553, %v14753_v24  }
 0x4af   : > { %v6195_v36 = vadd.f32 %v6194_v50, %v17436_v51  ;;  %v14760_v29 = vadd.f32 %v6645_v55, %v6193_v49  ;;  %v14762_v21 = vpop.xlane.xlu0 %7361  ;;  %v6647_v41 = vpop.f32.mrf.mxu1  ;;  %v17444_v50 = vld [vmem:[#allocation89_spill] sm:$0xff] }
 0x4b0   : > { %17438 = vst [vmem:[#allocation221_spill] sm:$0xff] %v14762_v21  ;;  %v14764_v17 = vpop.f32.mrf.mxu0 }
 0x4b1   : > { %17437 = vst [vmem:[#allocation86_spill] sm:$0xff] %v14760_v29  ;;  %17439 = vst [vmem:[#allocation222_spill] sm:$0xff] %v14764_v17  ;;  %v14766_v28 = vadd.f32 %v6647_v41, %v6195_v36  ;;  %v14768_v60 = vpop.xlane.xlu1 %6861  ;;  %v14770_v18 = vpop.f32.mrf.mxu1  ;;  %v17446_v29 = vld [vmem:[#allocation90_spill] sm:$0xff] }
 0x4b2   : > { %17441 = vst [vmem:[#allocation224_spill] sm:$0xff] %v14768_v60  ;;  %17442 = vst [vmem:[#allocation225_spill] sm:$0xff] %v14770_v18  ;;  %v14772_v47 = vpop.f32.mrf.mxu0 }
 0x4b3   : > { %17440 = vst [vmem:[#allocation223_spill] sm:$0xff] %v14766_v28  ;;  %v14774_v4 = vpop.xlane.xlu0 %6865  ;;  %v14776_v46 = vpop.f32.mrf.mxu1 }
 0x4b4   : > { %17443 = vst [vmem:[#allocation226_spill] sm:$0xff] %v14774_v4  ;;  %v6202_v55 = vpop.f32.mrf.mxu0 }
 0x4b5   : > { %v6203_v49 = vadd.f32 %v6202_v55, %v17444_v50  ;;  %v14779_v51 = vpop.xlane.xlu1 %7365  ;;  %v6655_v7 = vpop.f32.mrf.mxu1 }
 0x4b6   : > { %17445 = vst [vmem:[#allocation89_spill] sm:$0xff] %v14779_v51  ;;  %v6204_v21 = vpop.f32.mrf.mxu0 }
 0x4b7   : > { %v6205_v41 = vadd.f32 %v6204_v21, %v17446_v29  ;;  %v14782_v36 = vadd.f32 %v6655_v7, %v6203_v49  ;;  %v14784_v60 = vpop.xlane.xlu0 %7369  ;;  %v6657_v28 = vpop.f32.mrf.mxu1  ;;  %v14801_v21 = vmul.f32 0.0051020407, %v14404_v34 }
 0x4b8   : > { %17448 = vst [vmem:[#allocation227_spill] sm:$0xff] %v14784_v60  ;;  %v14786_v23 = vpop.f32.mrf.mxu0  ;;  %v7678_v60 = vmul.f32 0.0051020407, %v14422_v11 }
 0x4b9   : > { %17447 = vst [vmem:[#allocation90_spill] sm:$0xff] %v14782_v36  ;;  %17449 = vst [vmem:[#allocation228_spill] sm:$0xff] %v14786_v23  ;;  %v14788_v18 = vadd.f32 %v6657_v28, %v6205_v41  ;;  %v14790_v4 = vpop.xlane.xlu1 %6869  ;;  %v14792_v17 = vpop.f32.mrf.mxu1  ;;  %v7762_v34 = vmul.f32 %v14801_v21, %v14801_v21 }
 0x4ba   : > { %17451 = vst [vmem:[#allocation230_spill] sm:$0xff] %v14790_v4  ;;  %17452 = vst [vmem:[#allocation231_spill] sm:$0xff] %v14792_v17  ;;  %v14794_v55 = vpop.f32.mrf.mxu0 }
 0x4bb   : > { %17450 = vst [vmem:[#allocation229_spill] sm:$0xff] %v14788_v18  ;;  %v14796_v50 = vpop.xlane.xlu0 %6873  ;;  %v14798_v51 = vpop.f32.mrf.mxu1 }
 0x4bc   : > { %17453 = vst [vmem:[#allocation232_spill] sm:$0xff] %v14796_v50  ;;  %v6212_v29 = vpop.f32.mrf.mxu0 }
 0x4bd   : > { %v6213_v49 = vadd.f32 %v6212_v29, %v13622_v8  ;;  %v14804_v7 = vpop.xlane.xlu1 %7373  ;;  %v6665_v28 = vpop.f32.mrf.mxu1 }
 0x4be   : > { %17454 = vst [vmem:[#allocation233_spill] sm:$0xff] %v14804_v7  ;;  %v6214_v41 = vpop.f32.mrf.mxu0  ;;  %v17461_v7 = vld [vmem:[#allocation52_spill] sm:$0xff] }
 0x4bf   : > { %v6215_v4 = vadd.f32 %v6214_v41, %v13625_v40  ;;  %v14808_v36 = vadd.f32 %v6665_v28, %v6213_v49  ;;  %v14810_v18 = vpop.xlane.xlu0 %7377  ;;  %v6667_v50 = vpop.f32.mrf.mxu1  ;;  %v6101_v11 = vadd.f32 %v14486_v27, %v17461_v7  ;;  %v7846_v49 = vsub.f32 %v7678_v60, %v7762_v34  ;;  %v17468_v7 = vld [vmem:[#allocation95_spill] sm:$0xff] }
 0x4c0   : > { %17456 = vst [vmem:[#allocation235_spill] sm:$0xff] %v14810_v18  ;;  %v14812_v17 = vpop.f32.mrf.mxu0 }
 0x4c1   : > { %17455 = vst [vmem:[#allocation234_spill] sm:$0xff] %v14808_v36  ;;  %17457 = vst [vmem:[#allocation236_spill] sm:$0xff] %v14812_v17  ;;  %v14816_v23 = vadd.f32 %v6667_v50, %v6215_v4  ;;  %v14818_v8 = vpop.xlane.xlu1 %6877  ;;  %v14820_v29 = vpop.f32.mrf.mxu1  ;;  %v14834_v50 = vadd.f32 %v14490_v53, %v6101_v11  ;;  %v7174_v11 = vmul.f32 %v14669_v2, %v14669_v2 }
 0x4c2   : > { %17459 = vst [vmem:[#allocation238_spill] sm:$0xff] %v14818_v8  ;;  %17460 = vst [vmem:[#allocation239_spill] sm:$0xff] %v14820_v29  ;;  %v14824_v40 = vpop.f32.mrf.mxu0  ;;  %v17467_v29 = vld [vmem:[#allocation51_spill] sm:$0xff] }
 0x4c3   : > { %17458 = vst [vmem:[#allocation237_spill] sm:$0xff] %v14816_v23  ;;  %17462 = vst [vmem:[#allocation52_spill] sm:$0xff] %v14824_v40  ;;  %v14826_v28 = vpop.xlane.xlu0 %6881  ;;  %v14828_v41 = vpop.f32.mrf.mxu1  ;;  %v7930_v23 = vmax.f32 %v7846_v49, 0.0  ;;  %v6099_v27 = vadd.f32 %v14477_v19, %v17467_v29  ;;  %v6927_v19 = vsel %vm6750_vm1, %v14834_v50, 0.0 }
 0x4c4   : > { %17463 = vst [vmem:[#allocation240_spill] sm:$0xff] %v14826_v28  ;;  %17464 = vst [vmem:[#allocation241_spill] sm:$0xff] %v14828_v41  ;;  %v6222_v18 = vpop.f32.mrf.mxu0 }
 0x4c5   : > { %v6223_v36 = vadd.f32 %v6222_v18, %v13639_v6  ;;  %v14831_v17 = vpop.xlane.xlu1 %7381  ;;  %v6675_v4 = vpop.f32.mrf.mxu1  ;;  %17466 = vst [vmem:[#allocation243_spill] sm:$0xff] %v14834_v50  ;;  %v14860_v29 = vadd.f32 %v14483_v42, %v6099_v27  ;;  %v7173_v42 = vmul.f32 %v14690_v26, %v14690_v26  ;;  %v17479_v27 = vld [vmem:[#allocation99_spill] sm:$0xff] }
 0x4c6   : > { %17465 = vst [vmem:[#allocation242_spill] sm:$0xff] %v14831_v17  ;;  %v6224_v8 = vpop.f32.mrf.mxu0 }
 0x4c7   : > { %v6225_v60 = vadd.f32 %v6224_v8, %v17468_v7  ;;  %v14839_v34 = vadd.f32 %v6675_v4, %v6223_v36  ;;  %v14841_v28 = vpop.xlane.xlu0 %7385  ;;  %v6677_v41 = vpop.f32.mrf.mxu1  ;;  %v7176_v36 = vmul.f32 %v14834_v50, %v14834_v50  ;;  %v8014_v8 = vadd.f32 1e-05, %v7930_v23  ;;  %17475 = vst [vmem:[#allocation248_spill] sm:$0xff] %v14860_v29 }
 0x4c8   : > { %17470 = vst [vmem:[#allocation95_spill] sm:$0xff] %v14841_v28  ;;  %v14843_v40 = vpop.f32.mrf.mxu0  ;;  %v6928_v2 = vadd.f32 %v6927_v19, %v14860_v29 }
 0x4c9   : > { %17469 = vst [vmem:[#allocation51_spill] sm:$0xff] %v14839_v34  ;;  %17471 = vst [vmem:[#allocation244_spill] sm:$0xff] %v14843_v40  ;;  %v14845_v6 = vadd.f32 %v6677_v41, %v6225_v60  ;;  %v14847_v18 = vpop.xlane.xlu1 %6885  ;;  %v14849_v53 = vpop.f32.mrf.mxu1  ;;  %v17477_v60 = vld [vmem:[#allocation98_spill] sm:$0xff]  ;;  %v7431_v23 = vsel %vm6750_vm1, %v7176_v36, 0.0  ;;  %11232 = vrsqrt.f32 %v8014_v8 }
 0x4ca   : > { %17473 = vst [vmem:[#allocation246_spill] sm:$0xff] %v14847_v18  ;;  %17474 = vst [vmem:[#allocation247_spill] sm:$0xff] %v14849_v53  ;;  %v14853_v49 = vpop.f32.mrf.mxu0 }
 0x4cb   : > { %17472 = vst [vmem:[#allocation245_spill] sm:$0xff] %v14845_v6  ;;  %v14862_v41 = vpop.xlane.xlu0 %6889  ;;  %v14864_v4 = vpop.f32.mrf.mxu1  ;;  %v7427_v6 = vsel %vm6750_vm1, %v7174_v11, 0.0 }
 0x4cc   : > { %17476 = vst [vmem:[#allocation249_spill] sm:$0xff] %v14862_v41  ;;  %v6232_v7 = vpop.f32.mrf.mxu0  ;;  %6929 = vadd.xlane.f32.xlu0 %v6928_v2  ;;  %v7428_v11 = vadd.f32 %v7427_v6, %v7173_v42 }
 0x4cd   : > { %v6233_v28 = vadd.f32 %v6232_v7, %v17477_v60  ;;  %v14868_v18 = vpop.xlane.xlu1 %7389  ;;  %v6685_v34 = vpop.f32.mrf.mxu1  ;;  %v7175_v60 = vmul.f32 %v14860_v29, %v14860_v29 }
 0x4ce   : > { %17478 = vst [vmem:[#allocation98_spill] sm:$0xff] %v14868_v18  ;;  %v6234_v17 = vpop.f32.mrf.mxu0 }
 0x4cf   : > { %v6235_v50 = vadd.f32 %v6234_v17, %v17479_v27  ;;  %v14875_v41 = vadd.f32 %v6685_v34, %v6233_v28  ;;  %v14877_v7 = vpop.xlane.xlu0 %7393  ;;  %v6687_v19 = vpop.f32.mrf.mxu1  ;;  %v7432_v36 = vadd.f32 %v7431_v23, %v7175_v60  ;;  %v17485_v27 = vld [vmem:[#allocation102_spill] sm:$0xff]  ;;  %v17487_v23 = vld [vmem:[#allocation103_spill] sm:$0xff] }
 0x4d0   : > { %17481 = vst [vmem:[#allocation250_spill] sm:$0xff] %v14877_v7  ;;  %v14881_v18 = vpop.f32.mrf.mxu0 }
 0x4d1   : > { %17480 = vst [vmem:[#allocation99_spill] sm:$0xff] %v14875_v41  ;;  %v14883_v53 = vadd.f32 %v6687_v19, %v6235_v50  ;;  %v14885_v40 = vpop.xlane.xlu1 %6893  ;;  %v14887_v8 = vpop.f32.mrf.mxu1  ;;  %7433 = vadd.xlane.f32.xlu0 %v7432_v36 }
 0x4d2   : > { %17483 = vst [vmem:[#allocation252_spill] sm:$0xff] %v14885_v40  ;;  %v14889_v2 = vpop.f32.mrf.mxu0  ;;  %7429 = vadd.xlane.f32.xlu1 %v7428_v11 }
 0x4d3   : > { %17482 = vst [vmem:[#allocation251_spill] sm:$0xff] %v14883_v53  ;;  %v14891_v17 = vpop.xlane.xlu0 %6897  ;;  %v14893_v28 = vpop.f32.mrf.mxu1 }
 0x4d4   : > { %17484 = vst [vmem:[#allocation253_spill] sm:$0xff] %v14891_v17  ;;  %v6242_v34 = vpop.f32.mrf.mxu0 }
 0x4d5   : > { %v6243_v29 = vadd.f32 %v6242_v34, %v17485_v27  ;;  %v14896_v26 = vpop.xlane.xlu1 %7397  ;;  %v6695_v50 = vpop.f32.mrf.mxu1 }
 0x4d6   : > { %17486 = vst [vmem:[#allocation102_spill] sm:$0xff] %v14896_v26  ;;  %v6244_v6 = vpop.f32.mrf.mxu0  ;;  %v11233_v26 = vpop.eup %11232 }
 0x4d7   : > { %v6245_v42 = vadd.f32 %v6244_v6, %v17487_v23  ;;  %v14899_v19 = vadd.f32 %v6695_v50, %v6243_v29  ;;  %v14901_v60 = vpop.xlane.xlu0 %7401  ;;  %v6697_v11 = vpop.f32.mrf.mxu1  ;;  %v8182_v50 = vld [vmem:[%s14510_s19 + $0x18] sm:$0xff]  ;;  %v17497_v6 = vld [vmem:[#allocation106_spill] sm:$0xff] }
 0x4d8   : > { %17489 = vst [vmem:[#allocation254_spill] sm:$0xff] %v14901_v60  ;;  %v14903_v36 = vpop.f32.mrf.mxu0 }
 0x4d9   : > { %17488 = vst [vmem:[#allocation103_spill] sm:$0xff] %v14899_v19  ;;  %17490 = vst [vmem:[#allocation255_spill] sm:$0xff] %v14903_v36  ;;  %v14905_v17 = vadd.f32 %v6697_v11, %v6245_v42  ;;  %v14907_v7 = vpop.xlane.xlu1 %6901  ;;  %v14909_v40 = vpop.f32.mrf.mxu1  ;;  %v17499_v19 = vld [vmem:[#allocation107_spill] sm:$0xff] }
 0x4da   : > { %17492 = vst [vmem:[#allocation257_spill] sm:$0xff] %v14907_v7  ;;  %17493 = vst [vmem:[#allocation258_spill] sm:$0xff] %v14909_v40  ;;  %v14911_v34 = vpop.f32.mrf.mxu0  ;;  %v8266_v40 = vmul.f32 %v11233_v26, %v8182_v50 }
 0x4db   : > { %17491 = vst [vmem:[#allocation256_spill] sm:$0xff] %v14905_v17  ;;  %17494 = vst [vmem:[#allocation259_spill] sm:$0xff] %v14911_v34  ;;  %v14913_v27 = vpop.f32.mrf.mxu1  ;;  %v14915_v41 = vpop.xlane.xlu0 %6905 }
 0x4dc   : > { %17495 = vst [vmem:[#allocation260_spill] sm:$0xff] %v14913_v27  ;;  %17496 = vst [vmem:[#allocation261_spill] sm:$0xff] %v14915_v41  ;;  %v6252_v29 = vpop.f32.mrf.mxu0  ;;  %v8434_v26 = vmul.f32 %v8266_v40, %v14801_v21 }
 0x4dd   : > { %v6253_v23 = vadd.f32 %v6252_v29, %v17497_v6  ;;  %v14919_v60 = vpop.xlane.xlu1 %7405  ;;  %v6705_v42 = vpop.f32.mrf.mxu1  ;;  %v8433_v29 = vmul.f32 %v14753_v24, %v14611_v14  ;;  %v17508_v14 = vld [vmem:[#allocation110_spill] sm:$0xff] }
 0x4de   : > { %17498 = vst [vmem:[#allocation106_spill] sm:$0xff] %v14919_v60  ;;  %v6254_v11 = vpop.f32.mrf.mxu0 }
 0x4df   : > { %v6255_v7 = vadd.f32 %v6254_v11, %v17499_v19  ;;  %v14922_v17 = vadd.f32 %v6705_v42, %v6253_v23  ;;  %v6707_v53 = vpop.f32.mrf.mxu1  ;;  %v14934_v6 = vpop.xlane.xlu0 %7409  ;;  %v8349_v19 = vld [vmem:[%s14545_s22 + $0x10] sm:$0xff] }
 0x4e0   : > { %v14924_v36 = vpop.f32.mrf.mxu0  ;;  %17505 = vst [vmem:[#allocation266_spill] sm:$0xff] %v14934_v6 }
 0x4e1   : > { %17500 = vst [vmem:[#allocation107_spill] sm:$0xff] %v14922_v17  ;;  %17501 = vst [vmem:[#allocation262_spill] sm:$0xff] %v14924_v36  ;;  %v14926_v27 = vadd.f32 %v6707_v53, %v6255_v7  ;;  %v14928_v41 = vpop.xlane.xlu1 %6909  ;;  %v14930_v34 = vpop.f32.mrf.mxu1  ;;  %v8350_v53 = vld [vmem:[%s14545_s22 + $0x18] sm:$0xff] }
 0x4e2   : > { %17503 = vst [vmem:[#allocation264_spill] sm:$0xff] %v14928_v41  ;;  %17504 = vst [vmem:[#allocation265_spill] sm:$0xff] %v14930_v34  ;;  %v14936_v60 = vpop.f32.mrf.mxu0  ;;  %v8517_v41 = vsub.f32 %v8349_v19, %v8433_v29 }
 0x4e3   : > { %17502 = vst [vmem:[#allocation263_spill] sm:$0xff] %v14926_v27  ;;  %8616 = vperm.xlu1 %10553, %v8266_v40   ;;  %v14939_v23 = vpop.f32.mrf.mxu1  ;;  %v8518_v27 = vsub.f32 %v8350_v53, %v8434_v26  ;;  %v14949_v36 = vpop.xlane.xlu0 %6913  ;;  %v17513_v26 = vld [vmem:[#allocation113_spill] sm:$0xff] }
 0x4e4   : > { %17506 = vst [vmem:[#allocation267_spill] sm:$0xff] %v14939_v23  ;;  %v6262_v50 = vpop.f32.mrf.mxu0  ;;  %17510 = vst [vmem:[#allocation269_spill] sm:$0xff] %v14949_v36 }
 0x4e5   : > { %v6263_v7 = vadd.f32 %v6262_v50, %v13707_v13  ;;  %v14944_v42 = vpop.xlane.xlu1 %7413  ;;  %v6715_v11 = vpop.f32.mrf.mxu1 }
 0x4e6   : > { %17507 = vst [vmem:[#allocation268_spill] sm:$0xff] %v14944_v42  ;;  %v6264_v17 = vpop.f32.mrf.mxu0 }
 0x4e7   : > { %v6265_v24 = vadd.f32 %v6264_v17, %v17508_v14  ;;  %v14947_v6 = vadd.f32 %v6715_v11, %v6263_v7  ;;  %9199 = vperm.xlu1 %10553, %v8517_v41   ;;  %v6717_v34 = vpop.f32.mrf.mxu1  ;;  %9204 = vperm.xlu0 %10552, %v8518_v27   ;;  %v14966_v7 = vpop.xlane.xlu0 %7417 }
 0x4e8   : > { %v14951_v23 = vpop.f32.mrf.mxu0  ;;  %17515 = vst [vmem:[#allocation272_spill] sm:$0xff] %v14966_v7 }
 0x4e9   : > { %17509 = vst [vmem:[#allocation110_spill] sm:$0xff] %v14947_v6  ;;  %v14953_v21 = vadd.f32 %v6717_v34, %v6265_v24  ;;  %v14955_v13 = vpop.xlane.xlu1 %6917  ;;  %v14957_v40 = vpop.f32.mrf.mxu1  ;;  %v17516_v34 = vld [vmem:[#allocation114_spill] sm:$0xff] }
 0x4ea   : > { %17512 = vst [vmem:[#allocation271_spill] sm:$0xff] %v14955_v13  ;;  %v14959_v29 = vpop.f32.mrf.mxu0 }
 0x4eb   : > { %17511 = vst [vmem:[#allocation270_spill] sm:$0xff] %v14953_v21  ;;  %v14961_v19 = vpop.f32.mrf.mxu1 }
 0x4ec   : > { %v6272_v17 = vpop.f32.mrf.mxu0 }
 0x4ed   : > { %v6273_v41 = vadd.f32 %v6272_v17, %v17513_v26  ;;  %v14964_v50 = vpop.xlane.xlu1 %7421  ;;  %v6725_v53 = vpop.f32.mrf.mxu1 }
 0x4ee   : > { %17514 = vst [vmem:[#allocation113_spill] sm:$0xff] %v14964_v50  ;;  %v6274_v27 = vpop.f32.mrf.mxu0 }
 0x4ef   : > { %v6275_v11 = vadd.f32 %v6274_v27, %v17516_v34  ;;  %v14969_v14 = vadd.f32 %v6725_v53, %v6273_v41  ;;  %v6727_v24 = vpop.f32.mrf.mxu1  ;;  %v8602_v17 = vpop.permute.xlu0 %8601  ;;  %v17523_v53 = vld [vmem:[#allocation117_spill] sm:$0xff] }
 0x4f0   : > { %v14971_v36 = vpop.f32.mrf.mxu0  ;;  %v9019_v7 = vmul.f32 %v8602_v17, %v13773_v39  ;;  %v9020_v41 = vmul.f32 %v8602_v17, %v13768_v54  ;;  %v17524_v39 = vld [vmem:[#allocation118_spill] sm:$0xff]  ;;  %v14997_v17 = vmul.f32 0.0051020407, %v14412_v32 }
 0x4f1   : > { %17517 = vst [vmem:[#allocation114_spill] sm:$0xff] %v14969_v14  ;;  %17518 = vst [vmem:[#allocation273_spill] sm:$0xff] %v14971_v36  ;;  %v14973_v13 = vadd.f32 %v6727_v24, %v6275_v11  ;;  %v14975_v6 = vpop.permute.xlu1 %8606  ;;  %v14977_v21 = vpop.f32.mrf.mxu1  ;;  %v7596_v14 = vmul.f32 0.0051020407, %v14443_v0  ;;  %v7679_v0 = vmul.f32 0.0051020407, %v14430_v25 }
 0x4f2   : > { %17520 = vst [vmem:[#allocation275_spill] sm:$0xff] %v14977_v21  ;;  %v14979_v26 = vpop.f32.mrf.mxu0  ;;  %v17526_v32 = vld [vmem:[#allocation54_spill] sm:$0xff] }
 0x4f3   : > { %17519 = vst [vmem:[#allocation274_spill] sm:$0xff] %v14973_v13  ;;  %17521 = vst [vmem:[#allocation276_spill] sm:$0xff] %v14979_v26  ;;  %v14982_v50 = vpop.f32.mrf.mxu1  ;;  %v17525_v26 = vld [vmem:[#allocation56_spill] sm:$0xff] }
 0x4f4   : > { %17522 = vst [vmem:[#allocation277_spill] sm:$0xff] %v14982_v50  ;;  %v6282_v27 = vpop.f32.mrf.mxu0 }
 0x4f5   : > { %v6283_v34 = vadd.f32 %v6282_v27, %v17523_v53  ;;  %v9190_v11 = vpop.permute.xlu1 %9189  ;;  %v6735_v24 = vpop.f32.mrf.mxu1  ;;  %v7680_v27 = vmul.f32 0.0051020407, %v14461_v12 }
 0x4f6   : > { %v9607_v13 = vadd.f32 %v9190_v11, %v9019_v7  ;;  %v6284_v21 = vpop.f32.mrf.mxu0  ;;  %v9608_v36 = vadd.f32 %v9190_v11, %v9020_v41  ;;  %v7764_v7 = vmul.f32 %v7596_v14, %v7596_v14  ;;  %v6111_v41 = vadd.f32 %v14516_v30, %v17525_v26  ;;  %v17530_v30 = vld [vmem:[#allocation53_spill] sm:$0xff] }
 0x4f7   : > { %v6285_v50 = vadd.f32 %v6284_v21, %v17524_v39  ;;  %v14994_v42 = vadd.f32 %v6735_v24, %v6283_v34  ;;  %v6737_v54 = vpop.f32.mrf.mxu1  ;;  %v7763_v21 = vmul.f32 %v14997_v17, %v14997_v17  ;;  %v6105_v24 = vadd.f32 %v14499_v35, %v17526_v32 }
 0x4f8   : > { %9775 = vst [vmem:[%s14990_s26] sm:$0xff] %v9607_v13  ;;  %9776 = vst.msk [vmem:[%s14990_s26 + $0x8] sm:$0xff] %vm6750_vm1, %v9608_v36  ;;  %v7848_v34 = vsub.f32 %v7680_v27, %v7764_v7  ;;  %v15013_v12 = vadd.f32 %v14520_v48, %v6111_v41  ;;  %v17528_v13 = vld [vmem:[#allocation55_spill] sm:$0xff]  ;;  %v6103_v26 = vadd.f32 %v14492_v37, %v17530_v30 }
 0x4f9   : > { %v15003_v53 = vadd.f32 %v6737_v54, %v6285_v50  ;;  %v7847_v11 = vsub.f32 %v7679_v0, %v7763_v21  ;;  %v6109_v50 = vadd.f32 %v14505_v31, %v17528_v13  ;;  %v15018_v39 = vadd.f32 %v14503_v59, %v6105_v24 }
 0x4fa   : > { %17527 = vst [vmem:[#allocation117_spill] sm:$0xff] %v15013_v12  ;;  %v7932_v36 = vmax.f32 %v7848_v34, 0.0  ;;  %v7180_v54 = vmul.f32 %v15013_v12, %v15013_v12  ;;  %v6935_v35 = vsel %vm6750_vm1, %v15013_v12, 0.0  ;;  %v15033_v37 = vadd.f32 %v14496_v45, %v6103_v26  ;;  %v8183_v45 = vld [vmem:[%s14510_s19 + $0x20] sm:$0xff] }
 0x4fb   : > { %v7931_v25 = vmax.f32 %v7847_v11, 0.0  ;;  %17529 = vst [vmem:[#allocation118_spill] sm:$0xff] %v15018_v39  ;;  %v15027_v48 = vadd.f32 %v14514_v5, %v6109_v50  ;;  %v6931_v59 = vsel %vm6750_vm1, %v15018_v39, 0.0  ;;  %v8184_v11 = vld [vmem:[%s14510_s19 + $0x28] sm:$0xff] }
 0x4fc   : > { %v8016_v27 = vadd.f32 1e-05, %v7932_v36  ;;  %v7439_v7 = vsel %vm6750_vm1, %v7180_v54, 0.0  ;;  %v6932_v5 = vadd.f32 %v6931_v59, %v15033_v37  ;;  %v8352_v50 = vld [vmem:[%s14545_s22 + $0x28] sm:$0xff]  ;;  %v9021_v54 = vmul.f32 %v14975_v6, %v13780_v10 }
 0x4fd   : > { %17531 = vst [vmem:[#allocation56_spill] sm:$0xff] %v15027_v48  ;;  %v8015_v0 = vadd.f32 1e-05, %v7931_v25  ;;  %v6936_v31 = vadd.f32 %v6935_v35, %v15027_v48  ;;  %v7179_v41 = vmul.f32 %v15027_v48, %v15027_v48  ;;  %v9022_v35 = vmul.f32 %v14975_v6, %v13783_v22  ;;  %v17588_v48 = vld [vmem:[#allocation139_spill] sm:$0xff] }
 0x4fe   : > { %11234 = vrsqrt.f32 %v8016_v27  ;;  %v7682_v59 = vmul.f32 0.0051020407, %v14494_v63  ;;  %v7178_v10 = vmul.f32 %v15018_v39, %v15018_v39 }
 0x4ff   : > { %11236 = vrsqrt.f32 %v8015_v0  ;;  %v7440_v21 = vadd.f32 %v7439_v7, %v7179_v41  ;;  %v17532_v41 = vld [vmem:[#allocation58_spill] sm:$0xff] }
 0x506   : > { %6937 = vadd.xlane.f32.xlu0 %v6936_v31 }
 0x50a   : > { %7441 = vadd.xlane.f32.xlu0 %v7440_v21 }
 0x50b   : > { %6933 = vadd.xlane.f32.xlu1 %v6932_v5  ;;  %v11235_v34 = vpop.eup %11234  ;;  %v6121_v5 = vadd.f32 %v14547_v33, %v17532_v41 }
 0x50c   : > { %v11237_v32 = vpop.eup %11236  ;;  %v8268_v24 = vmul.f32 %v11235_v34, %v8184_v11  ;;  %v17534_v34 = vld [vmem:[#allocation57_spill] sm:$0xff] }
 0x50d   : > { %v8267_v36 = vmul.f32 %v11237_v32, %v8183_v45  ;;  %v15060_v22 = vadd.f32 %v14553_v57, %v6121_v5  ;;  %v6119_v11 = vadd.f32 %v14536_v38, %v17534_v34  ;;  %v7435_v32 = vsel %vm6750_vm1, %v7178_v10, 0.0  ;;  %v8354_v5 = vld [vmem:[%s14545_s22 + $0x38] sm:$0xff] }
 0x50e   : > { %v8436_v13 = vmul.f32 %v8268_v24, %v7596_v14  ;;  %v7598_v14 = vmul.f32 0.0051020407, %v14481_v9  ;;  %v7177_v9 = vmul.f32 %v15033_v37, %v15033_v37 }
 0x50f   : > { %17533 = vst [vmem:[#allocation54_spill] sm:$0xff] %v15060_v22  ;;  %v7184_v33 = vmul.f32 %v15060_v22, %v15060_v22  ;;  %v6943_v63 = vsel %vm6750_vm1, %v15060_v22, 0.0  ;;  %v15072_v57 = vadd.f32 %v14540_v3, %v6119_v11  ;;  %v8351_v3 = vld [vmem:[%s14545_s22 + $0x20] sm:$0xff] }
 0x510   : > { %v8520_v25 = vsub.f32 %v8352_v50, %v8436_v13  ;;  %v7766_v7 = vmul.f32 %v7598_v14, %v7598_v14  ;;  %v7436_v13 = vadd.f32 %v7435_v32, %v7177_v9  ;;  %v17539_v9 = vld [vmem:[#allocation123_spill] sm:$0xff] }
 0x511   : > { %17535 = vst [vmem:[#allocation55_spill] sm:$0xff] %v15072_v57  ;;  %v6944_v38 = vadd.f32 %v6943_v63, %v15072_v57  ;;  %v7447_v50 = vsel %vm6750_vm1, %v7184_v33, 0.0 }
 0x512   : > { %v7850_v21 = vsub.f32 %v7682_v59, %v7766_v7 }
 0x514   : > { %v7934_v6 = vmax.f32 %v7850_v21, 0.0 }
 0x516   : > { %v8018_v45 = vadd.f32 1e-05, %v7934_v6 }
 0x518   : > { %11238 = vrsqrt.f32 %v8018_v45 }
 0x51c   : > { %8621 = vperm.xlu1 %10553, %v8267_v36   ;;  %v15042_v30 = vpop.xlane.xlu0 %6921 }
 0x520   : > { %9214 = vperm.xlu0 %10552, %v8520_v25   ;;  %v15044_v26 = vpop.xlane.xlu0 %7425  ;;  %v7183_v25 = vmul.f32 %v15072_v57, %v15072_v57 }
 0x528   : > { %v9195_v27 = vpop.permute.xlu0 %9194 }
 0x529   : > { %v9609_v0 = vadd.f32 %v9195_v27, %v9021_v54  ;;  %v9610_v31 = vadd.f32 %v9195_v27, %v9022_v35  ;;  %v7448_v54 = vadd.f32 %v7447_v50, %v7183_v25  ;;  %v11239_v35 = vpop.eup %11238  ;;  %v8186_v27 = vld [vmem:[%s14510_s19 + $0x38] sm:$0xff] }
 0x52a   : > { %v15083_v59 = vmul.f32 %v11239_v35, %v8186_v27 }
 0x52b   : > { %9777 = vst [vmem:[%s14990_s26 + $0x10] sm:$0xff] %v9609_v0  ;;  %9778 = vst.msk [vmem:[%s14990_s26 + $0x18] sm:$0xff] %vm6750_vm1, %v9610_v31  ;;  %v8435_v0 = vmul.f32 %v8267_v36, %v14997_v17  ;;  %v15081_v31 = vpop.xlane.xlu1 %6925 }
 0x52c   : > { %v8438_v41 = vmul.f32 %v15083_v59, %v7598_v14  ;;  %v17538_v14 = vld [vmem:[#allocation124_spill] sm:$0xff] }
 0x52d   : > { %v8519_v7 = vsub.f32 %v8351_v3, %v8435_v0  ;;  %v17541_v0 = vld [vmem:[#allocation161_spill] sm:$0xff] }
 0x52e   : > { %v8522_v10 = vsub.f32 %v8354_v5, %v8438_v41  ;;  %v7600_v3 = vmul.f32 0.0051020407, %v17541_v0  ;;  %v17543_v41 = vld [vmem:[#allocation166_spill] sm:$0xff] }
 0x52f   : > { %v8612_v21 = vpop.permute.xlu1 %8611 }
 0x530   : > { %v9023_v32 = vmul.f32 %v8612_v21, %v17538_v14  ;;  %v9024_v33 = vmul.f32 %v8612_v21, %v17539_v9  ;;  %v17544_v21 = vld [vmem:[#allocation60_spill] sm:$0xff]  ;;  %v7768_v14 = vmul.f32 %v7600_v3, %v7600_v3 }
 0x53f   : > { %6945 = vadd.xlane.f32.xlu0 %v6944_v38 }
 0x540   : > { %7437 = vadd.xlane.f32.xlu1 %v7436_v13 }
 0x543   : > { %7449 = vadd.xlane.f32.xlu0 %v7448_v54  ;;  %v7597_v54 = vmul.f32 0.0051020407, %v14451_v56 }
 0x545   : > { %v7765_v35 = vmul.f32 %v7597_v54, %v7597_v54 }
 0x551   : > { %8626 = vperm.xlu1 %10553, %v8268_v24  }
 0x555   : > { %9209 = vperm.xlu1 %10553, %v8519_v7   ;;  %v15087_v6 = vpop.xlane.xlu0 %6929  ;;  %v17542_v7 = vld [vmem:[#allocation127_spill] sm:$0xff] }
 0x556   : > { %17536 = vst [vmem:[#allocation53_spill] sm:$0xff] %v15087_v6  ;;  %v6115_v5 = vadd.f32 %v17543_v41, %v17542_v7 }
 0x559   : > { %9224 = vperm.xlu0 %10552, %v8522_v10   ;;  %v17545_v10 = vld [vmem:[#allocation178_spill] sm:$0xff] }
 0x55a   : > { %v15091_v24 = vpop.xlane.xlu0 %7433 }
 0x55b   : > { %v15089_v34 = vpop.xlane.xlu1 %7429  ;;  %17537 = vst [vmem:[#allocation58_spill] sm:$0xff] %v15091_v24  ;;  %v17612_v24 = vld [vmem:[#allocation72_spill] sm:$0xff] }
 0x55f   : > { %v8617_v17 = vpop.permute.xlu1 %8616 }
 0x560   : > { %v9025_v36 = vmul.f32 %v8617_v17, %v13827_v43  ;;  %v9026_v11 = vmul.f32 %v8617_v17, %v13813_v58  ;;  %v17540_v43 = vld [vmem:[#allocation158_spill] sm:$0xff]  ;;  %v6131_v17 = vadd.f32 %v17545_v10, %v17544_v21  ;;  %v17557_v21 = vld [vmem:[#allocation177_spill] sm:$0xff] }
 0x561   : > { %v7681_v58 = vmul.f32 0.0051020407, %v17540_v43  ;;  %v17554_v43 = vld [vmem:[#allocation174_spill] sm:$0xff] }
 0x562   : > { %v9205_v45 = vpop.permute.xlu0 %9204 }
 0x563   : > { %v9200_v63 = vpop.permute.xlu1 %9199  ;;  %v9613_v50 = vadd.f32 %v9205_v45, %v9025_v36  ;;  %v9614_v25 = vadd.f32 %v9205_v45, %v9026_v11  ;;  %v7849_v27 = vsub.f32 %v7681_v58, %v7765_v35  ;;  %v17546_v36 = vld [vmem:[#allocation164_spill] sm:$0xff] }
 0x564   : > { %v9611_v13 = vadd.f32 %v9200_v63, %v9023_v32  ;;  %v9612_v38 = vadd.f32 %v9200_v63, %v9024_v33  ;;  %v7684_v56 = vmul.f32 0.0051020407, %v17546_v36  ;;  %v17547_v32 = vld [vmem:[#allocation168_spill] sm:$0xff]  ;;  %v17549_v33 = vld [vmem:[#allocation126_spill] sm:$0xff]  ;;  %v17550_v63 = vld [vmem:[#allocation163_spill] sm:$0xff] }
 0x565   : > { %9781 = vst [vmem:[%s14990_s26 + $0x30] sm:$0xff] %v9613_v50  ;;  %9782 = vst.msk [vmem:[%s14990_s26 + $0x38] sm:$0xff] %vm6750_vm1, %v9614_v25  ;;  %v7933_v11 = vmax.f32 %v7849_v27, 0.0  ;;  %v15112_v9 = vadd.f32 %v17547_v32, %v6115_v5  ;;  %v6113_v45 = vadd.f32 %v17550_v63, %v17549_v33  ;;  %v17553_v25 = vld [vmem:[#allocation59_spill] sm:$0xff]  ;;  %v17555_v27 = vld [vmem:[#allocation165_spill] sm:$0xff] }
 0x566   : > { %9779 = vst [vmem:[%s14990_s26 + $0x20] sm:$0xff] %v9611_v13  ;;  %9780 = vst.msk [vmem:[%s14990_s26 + $0x28] sm:$0xff] %vm6750_vm1, %v9612_v38  ;;  %v17551_v13 = vld [vmem:[#allocation180_spill] sm:$0xff]  ;;  %v7852_v50 = vsub.f32 %v7684_v56, %v7768_v14  ;;  %v6129_v58 = vadd.f32 %v17554_v43, %v17553_v25  ;;  %v8188_v63 = vld [vmem:[%s14510_s19 + $0x48] sm:$0xff] }
 0x567   : > { %17548 = vst [vmem:[#allocation57_spill] sm:$0xff] %v15112_v9  ;;  %v15117_v38 = vadd.f32 %v17551_v13, %v6131_v17  ;;  %v8017_v35 = vadd.f32 1e-05, %v7933_v11  ;;  %v6939_v0 = vsel %vm6750_vm1, %v15112_v9, 0.0  ;;  %v15124_v7 = vadd.f32 %v17555_v27, %v6113_v45  ;;  %v8185_v14 = vld [vmem:[%s14510_s19 + $0x30] sm:$0xff] }
 0x568   : > { %v7936_v5 = vmax.f32 %v7852_v50, 0.0  ;;  %v15129_v10 = vadd.f32 %v17557_v21, %v6129_v58  ;;  %v7182_v13 = vmul.f32 %v15112_v9, %v15112_v9 }
 0x569   : > { %17552 = vst [vmem:[#allocation124_spill] sm:$0xff] %v15117_v38  ;;  %17556 = vst [vmem:[#allocation123_spill] sm:$0xff] %v15124_v7  ;;  %v6951_v41 = vsel %vm6750_vm1, %v15117_v38, 0.0  ;;  %v6940_v17 = vadd.f32 %v6939_v0, %v15124_v7  ;;  %11240 = vrsqrt.f32 %v8017_v35  ;;  %v7188_v50 = vmul.f32 %v15117_v38, %v15117_v38  ;;  %v17569_v38 = vld [vmem:[#allocation186_spill] sm:$0xff] }
 0x56a   : > { %17558 = vst [vmem:[#allocation158_spill] sm:$0xff] %v15129_v10  ;;  %v6952_v36 = vadd.f32 %v6951_v41, %v15129_v10  ;;  %v8020_v56 = vadd.f32 1e-05, %v7936_v5  ;;  %v7443_v25 = vsel %vm6750_vm1, %v7182_v13, 0.0  ;;  %v7181_v43 = vmul.f32 %v15124_v7, %v15124_v7  ;;  %v8353_v5 = vld [vmem:[%s14545_s22 + $0x30] sm:$0xff]  ;;  %v17561_v13 = vld [vmem:[#allocation131_spill] sm:$0xff] }
 0x56b   : > { %v7455_v58 = vsel %vm6750_vm1, %v7188_v50, 0.0  ;;  %v7187_v35 = vmul.f32 %v15129_v10, %v15129_v10 }
 0x56c   : > { %11242 = vrsqrt.f32 %v8020_v56  ;;  %v7444_v0 = vadd.f32 %v7443_v25, %v7181_v43  ;;  %v17563_v25 = vld [vmem:[#allocation129_spill] sm:$0xff] }
 0x56d   : > { %v7456_v27 = vadd.f32 %v7455_v58, %v7187_v35  ;;  %v17564_v58 = vld [vmem:[#allocation128_spill] sm:$0xff] }
 0x576   : > { %v11241_v11 = vpop.eup %11240 }
 0x577   : > { %v8269_v32 = vmul.f32 %v11241_v11, %v8185_v14 }
 0x578   : > { %6953 = vadd.xlane.f32.xlu0 %v6952_v36  ;;  %v8356_v36 = vld [vmem:[%s14545_s22 + $0x48] sm:$0xff] }
 0x579   : > { %6941 = vadd.xlane.f32.xlu1 %v6940_v17  ;;  %v11243_v33 = vpop.eup %11242  ;;  %v8437_v41 = vmul.f32 %v8269_v32, %v7597_v54 }
 0x57a   : > { %v8272_v45 = vmul.f32 %v11243_v33, %v8188_v63 }
 0x57b   : > { %v8521_v56 = vsub.f32 %v8353_v5, %v8437_v41 }
 0x57c   : > { %v8440_v17 = vmul.f32 %v8272_v45, %v7600_v3  ;;  %v17562_v3 = vld [vmem:[#allocation130_spill] sm:$0xff] }
 0x57e   : > { %v8524_v11 = vsub.f32 %v8356_v36, %v8440_v17  ;;  %v17565_v36 = vld [vmem:[#allocation159_spill] sm:$0xff] }
 0x58a   : > { %8631 = vperm.xlu1 %10553, %v8269_v32  }
 0x58e   : > { %8646 = vperm.xlu0 %10552, %v8272_v45  }
 0x58f   : > { %v15150_v14 = vpop.xlane.xlu0 %6937 }
 0x590   : > { %17559 = vst [vmem:[#allocation161_spill] sm:$0xff] %v15150_v14 }
 0x593   : > { %v15154_v54 = vpop.xlane.xlu0 %7441 }
 0x594   : > { %v15146_v21 = vpop.xlane.xlu1 %6933  ;;  %17560 = vst [vmem:[#allocation127_spill] sm:$0xff] %v15154_v54  ;;  %v17590_v54 = vld [vmem:[#allocation167_spill] sm:$0xff] }
 0x598   : > { %v8622_v33 = vpop.permute.xlu1 %8621 }
 0x599   : > { %v9027_v43 = vmul.f32 %v8622_v33, %v17563_v25  ;;  %v9028_v35 = vmul.f32 %v8622_v33, %v17564_v58  ;;  %v17568_v25 = vld [vmem:[#allocation64_spill] sm:$0xff] }
 0x59a   : > { %v6141_v33 = vadd.f32 %v17569_v38, %v17568_v25  ;;  %v17575_v38 = vld [vmem:[#allocation185_spill] sm:$0xff] }
 0x59b   : > { %v9215_v50 = vpop.permute.xlu0 %9214 }
 0x5ad   : > { %7457 = vadd.xlane.f32.xlu0 %v7456_v27 }
 0x5ae   : > { %7445 = vadd.xlane.f32.xlu1 %v7444_v0 }
 0x5bf   : > { %8636 = vperm.xlu1 %10553, %v15083_v59  }
 0x5c3   : > { %9219 = vperm.xlu1 %10553, %v8521_v56   ;;  %9234 = vperm.xlu0 %10552, %v8524_v11   ;;  %v7599_v56 = vmul.f32 0.0051020407, %v17565_v36  ;;  %v17566_v11 = vld [vmem:[#allocation160_spill] sm:$0xff] }
 0x5c9   : > { %v15152_v63 = vpop.xlane.xlu1 %7437 }
 0x5cd   : > { %v8627_v32 = vpop.permute.xlu1 %8626 }
 0x5ce   : > { %v9029_v59 = vmul.f32 %v8627_v32, %v17561_v13  ;;  %v9030_v45 = vmul.f32 %v8627_v32, %v17562_v3  ;;  %v7683_v32 = vmul.f32 0.0051020407, %v17566_v11  ;;  %v17567_v13 = vld [vmem:[#allocation169_spill] sm:$0xff] }
 0x5cf   : > { %v7602_v3 = vmul.f32 0.0051020407, %v17567_v13 }
 0x5d0   : > { %v9617_v0 = vadd.f32 %v9215_v50, %v9029_v59  ;;  %v9618_v27 = vadd.f32 %v9215_v50, %v9030_v45  ;;  %v7767_v59 = vmul.f32 %v7599_v56, %v7599_v56  ;;  %v17570_v45 = vld [vmem:[#allocation171_spill] sm:$0xff] }
 0x5d1   : > { %v9210_v41 = vpop.permute.xlu1 %9209  ;;  %v7686_v50 = vmul.f32 0.0051020407, %v17570_v45 }
 0x5d2   : > { %9785 = vst [vmem:[%s14990_s26 + $0x50] sm:$0xff] %v9617_v0  ;;  %9786 = vst.msk [vmem:[%s14990_s26 + $0x58] sm:$0xff] %vm6750_vm1, %v9618_v27  ;;  %v9615_v5 = vadd.f32 %v9210_v41, %v9027_v43  ;;  %v9616_v17 = vadd.f32 %v9210_v41, %v9028_v35  ;;  %v7851_v58 = vsub.f32 %v7683_v32, %v7767_v59  ;;  %v17571_v27 = vld [vmem:[#allocation188_spill] sm:$0xff]  ;;  %v17573_v41 = vld [vmem:[#allocation63_spill] sm:$0xff] }
 0x5d3   : > { %v7770_v0 = vmul.f32 %v7602_v3, %v7602_v3  ;;  %v15173_v43 = vadd.f32 %v17571_v27, %v6141_v33  ;;  %v17577_v59 = vld [vmem:[#allocation175_spill] sm:$0xff] }
 0x5d4   : > { %9783 = vst [vmem:[%s14990_s26 + $0x40] sm:$0xff] %v9615_v5  ;;  %9784 = vst.msk [vmem:[%s14990_s26 + $0x48] sm:$0xff] %vm6750_vm1, %v9616_v17  ;;  %v17574_v5 = vld [vmem:[#allocation182_spill] sm:$0xff]  ;;  %v7935_v36 = vmax.f32 %v7851_v58, 0.0  ;;  %v6947_v33 = vsel %vm6750_vm1, %v17577_v59, 0.0 }
 0x5d5   : > { %17572 = vst [vmem:[#allocation166_spill] sm:$0xff] %v15173_v43  ;;  %v7854_v35 = vsub.f32 %v7686_v50, %v7770_v0  ;;  %v6139_v17 = vadd.f32 %v17574_v5, %v17573_v41  ;;  %v6959_v11 = vsel %vm6750_vm1, %v15173_v43, 0.0  ;;  %v17578_v0 = vld [vmem:[#allocation172_spill] sm:$0xff]  ;;  %v8187_v41 = vld [vmem:[%s14510_s19 + $0x40] sm:$0xff] }
 0x5d6   : > { %v8019_v45 = vadd.f32 1e-05, %v7935_v36  ;;  %v6948_v27 = vadd.f32 %v6947_v33, %v17578_v0  ;;  %v7192_v36 = vmul.f32 %v15173_v43, %v15173_v43  ;;  %v7185_v33 = vmul.f32 %v17578_v0, %v17578_v0 }
 0x5d7   : > { %v7938_v13 = vmax.f32 %v7854_v35, 0.0  ;;  %v15180_v25 = vadd.f32 %v17575_v38, %v6139_v17  ;;  %v8190_v35 = vld [vmem:[%s14510_s19 + $0x58] sm:$0xff] }
 0x5d8   : > { %11244 = vrsqrt.f32 %v8019_v45 }
 0x5d9   : > { %17576 = vst [vmem:[#allocation60_spill] sm:$0xff] %v15180_v25  ;;  %v6960_v32 = vadd.f32 %v6959_v11, %v15180_v25  ;;  %v8022_v50 = vadd.f32 1e-05, %v7938_v13  ;;  %v7186_v11 = vmul.f32 %v17577_v59, %v17577_v59  ;;  %v7463_v13 = vsel %vm6750_vm1, %v7192_v36, 0.0 }
 0x5da   : > { %v7191_v38 = vmul.f32 %v15180_v25, %v15180_v25 }
 0x5db   : > { %11246 = vrsqrt.f32 %v8022_v50 }
 0x5dc   : > { %v7464_v45 = vadd.f32 %v7463_v13, %v7191_v38 }
 0x5e2   : > { %6961 = vadd.xlane.f32.xlu0 %v6960_v32  ;;  %v7451_v32 = vsel %vm6750_vm1, %v7186_v11, 0.0 }
 0x5e3   : > { %v7452_v50 = vadd.f32 %v7451_v32, %v7185_v33  ;;  %v17584_v33 = vld [vmem:[#allocation134_spill] sm:$0xff] }
 0x5e5   : > { %v11245_v58 = vpop.eup %11244 }
 0x5e6   : > { %v8271_v10 = vmul.f32 %v11245_v58, %v8187_v41  ;;  %v8355_v41 = vld [vmem:[%s14545_s22 + $0x40] sm:$0xff] }
 0x5e7   : > { %6949 = vadd.xlane.f32.xlu1 %v6948_v27  ;;  %v15198_v27 = vpop.xlane.xlu0 %6945 }
 0x5e8   : > { %v11247_v5 = vpop.eup %11246  ;;  %17579 = vst [vmem:[#allocation178_spill] sm:$0xff] %v15198_v27  ;;  %v8439_v58 = vmul.f32 %v8271_v10, %v7599_v56 }
 0x5e9   : > { %v8274_v17 = vmul.f32 %v11247_v5, %v8190_v35  ;;  %v8358_v35 = vld [vmem:[%s14545_s22 + $0x58] sm:$0xff] }
 0x5ea   : > { %v8523_v43 = vsub.f32 %v8355_v41, %v8439_v58  ;;  %v17585_v58 = vld [vmem:[#allocation162_spill] sm:$0xff] }
 0x5eb   : > { %v8442_v5 = vmul.f32 %v8274_v17, %v7602_v3  ;;  %v15202_v36 = vpop.xlane.xlu0 %7449  ;;  %v17583_v3 = vld [vmem:[#allocation135_spill] sm:$0xff]  ;;  %v7601_v41 = vmul.f32 0.0051020407, %v17585_v58 }
 0x5ec   : > { %17580 = vst [vmem:[#allocation164_spill] sm:$0xff] %v15202_v36  ;;  %v17589_v36 = vld [vmem:[#allocation138_spill] sm:$0xff] }
 0x5ed   : > { %v8526_v13 = vsub.f32 %v8358_v35, %v8442_v5  ;;  %v17587_v35 = vld [vmem:[#allocation132_spill] sm:$0xff]  ;;  %v7769_v14 = vmul.f32 %v7601_v41, %v7601_v41 }
 0x5ef   : > { %v9225_v11 = vpop.permute.xlu0 %9224 }
 0x5f8   : > { %8641 = vperm.xlu1 %10553, %v8271_v10   ;;  %8656 = vperm.xlu0 %10552, %v8274_v17  }
 0x601   : > { %v15206_v25 = vpop.xlane.xlu0 %6953 }
 0x602   : > { %v15204_v22 = vpop.xlane.xlu1 %6941  ;;  %17581 = vst [vmem:[#allocation168_spill] sm:$0xff] %v15206_v25 }
 0x606   : > { %v8632_v38 = vpop.permute.xlu1 %8631 }
 0x609   : > { %v8647_v32 = vpop.permute.xlu0 %8646 }
 0x60a   : > { %v9037_v25 = vmul.f32 %v8647_v32, %v17588_v48  ;;  %v9038_v27 = vmul.f32 %v8647_v32, %v17589_v36  ;;  %v17594_v36 = vld [vmem:[#allocation61_spill] sm:$0xff] }
 0x60b   : > { %v7688_v32 = vmul.f32 0.0051020407, %v17594_v36 }
 0x617   : > { %7465 = vadd.xlane.f32.xlu0 %v7464_v45 }
 0x61c   : > { %7453 = vadd.xlane.f32.xlu1 %v7452_v50 }
 0x62d   : > { %9229 = vperm.xlu1 %10553, %v8523_v43   ;;  %9244 = vperm.xlu0 %10552, %v8526_v13   ;;  %v17586_v43 = vld [vmem:[#allocation133_spill] sm:$0xff]  ;;  %v9032_v13 = vmul.f32 %v8632_v38, %v17587_v35 }
 0x62e   : > { %v9031_v5 = vmul.f32 %v8632_v38, %v17586_v43 }
 0x636   : > { %v15210_v56 = vpop.xlane.xlu0 %7457 }
 0x637   : > { %v15208_v45 = vpop.xlane.xlu1 %7445  ;;  %17582 = vst [vmem:[#allocation126_spill] sm:$0xff] %v15210_v56 }
 0x63b   : > { %v8637_v10 = vpop.permute.xlu1 %8636 }
 0x63c   : > { %v9033_v17 = vmul.f32 %v8637_v10, %v17583_v3  ;;  %v9034_v50 = vmul.f32 %v8637_v10, %v17584_v33  ;;  %v7685_v3 = vmul.f32 0.0051020407, %v17590_v54  ;;  %v17591_v10 = vld [vmem:[#allocation176_spill] sm:$0xff] }
 0x63d   : > { %v7604_v33 = vmul.f32 0.0051020407, %v17591_v10 }
 0x63e   : > { %v9621_v57 = vadd.f32 %v9225_v11, %v9033_v17  ;;  %v9622_v12 = vadd.f32 %v9225_v11, %v9034_v50  ;;  %v9235_v58 = vpop.permute.xlu0 %9234  ;;  %v17592_v11 = vld [vmem:[#allocation68_spill] sm:$0xff]  ;;  %v17593_v50 = vld [vmem:[#allocation193_spill] sm:$0xff] }
 0x63f   : > { %v9220_v56 = vpop.permute.xlu1 %9219  ;;  %v6151_v43 = vadd.f32 %v17593_v50, %v17592_v11  ;;  %v9625_v48 = vadd.f32 %v9235_v58, %v9037_v25  ;;  %v9626_v35 = vadd.f32 %v9235_v58, %v9038_v27  ;;  %v7772_v54 = vmul.f32 %v7604_v33, %v7604_v33 }
 0x640   : > { %9789 = vst [vmem:[%s14990_s26 + $0x70] sm:$0xff] %v9621_v57  ;;  %9790 = vst.msk [vmem:[%s14990_s26 + $0x78] sm:$0xff] %vm6750_vm1, %v9622_v12  ;;  %v9619_v38 = vadd.f32 %v9220_v56, %v9031_v5  ;;  %v9620_v17 = vadd.f32 %v9220_v56, %v9032_v13  ;;  %v7853_v57 = vsub.f32 %v7685_v3, %v7769_v14  ;;  %v17595_v12 = vld [vmem:[#allocation195_spill] sm:$0xff]  ;;  %v17598_v13 = vld [vmem:[#allocation190_spill] sm:$0xff] }
 0x641   : > { %9793 = vst [vmem:[%s14990_s26 + $0x90] sm:$0xff] %v9625_v48  ;;  %9794 = vst.msk [vmem:[%s14990_s26 + $0x98] sm:$0xff] %vm6750_vm1, %v9626_v35  ;;  %v15234_v10 = vadd.f32 %v17595_v12, %v6151_v43  ;;  %v7856_v56 = vsub.f32 %v7688_v32, %v7772_v54  ;;  %v17597_v5 = vld [vmem:[#allocation67_spill] sm:$0xff]  ;;  %v17602_v35 = vld [vmem:[#allocation62_spill] sm:$0xff] }
 0x642   : > { %9787 = vst [vmem:[%s14990_s26 + $0x60] sm:$0xff] %v9619_v38  ;;  %9788 = vst.msk [vmem:[%s14990_s26 + $0x68] sm:$0xff] %vm6750_vm1, %v9620_v17  ;;  %v6149_v25 = vadd.f32 %v17598_v13, %v17597_v5  ;;  %v7937_v27 = vmax.f32 %v7853_v57, 0.0  ;;  %v17599_v17 = vld [vmem:[#allocation192_spill] sm:$0xff]  ;;  %v17601_v3 = vld [vmem:[#allocation183_spill] sm:$0xff] }
 0x643   : > { %17596 = vst [vmem:[#allocation163_spill] sm:$0xff] %v15234_v10  ;;  %v6967_v58 = vsel %vm6750_vm1, %v15234_v10, 0.0  ;;  %v7940_v38 = vmax.f32 %v7856_v56, 0.0  ;;  %v6955_v43 = vsel %vm6750_vm1, %v17601_v3, 0.0  ;;  %v8189_v57 = vld [vmem:[%s14510_s19 + $0x50] sm:$0xff]  ;;  %v8192_v12 = vld [vmem:[%s14510_s19 + $0x68] sm:$0xff]  ;;  %v7196_v13 = vmul.f32 %v15234_v10, %v15234_v10 }
 0x644   : > { %v15241_v11 = vadd.f32 %v17599_v17, %v6149_v25  ;;  %v8021_v50 = vadd.f32 1e-05, %v7937_v27  ;;  %v6956_v36 = vadd.f32 %v6955_v43, %v17602_v35  ;;  %v7190_v25 = vmul.f32 %v17601_v3, %v17601_v3 }
 0x645   : > { %v8024_v48 = vadd.f32 1e-05, %v7940_v38  ;;  %v7471_v27 = vsel %vm6750_vm1, %v7196_v13, 0.0 }
 0x646   : > { %17600 = vst [vmem:[#allocation180_spill] sm:$0xff] %v15241_v11  ;;  %v6968_v14 = vadd.f32 %v6967_v58, %v15241_v11  ;;  %11248 = vrsqrt.f32 %v8021_v50  ;;  %v7195_v58 = vmul.f32 %v15241_v11, %v15241_v11  ;;  %v7459_v17 = vsel %vm6750_vm1, %v7190_v25, 0.0 }
 0x647   : > { %11250 = vrsqrt.f32 %v8024_v48  ;;  %v7189_v50 = vmul.f32 %v17602_v35, %v17602_v35  ;;  %v8357_v48 = vld [vmem:[%s14545_s22 + $0x50] sm:$0xff] }
 0x648   : > { %v7472_v38 = vadd.f32 %v7471_v27, %v7195_v58 }
 0x64c   : > { %6969 = vadd.xlane.f32.xlu0 %v6968_v14  ;;  %v7460_v14 = vadd.f32 %v7459_v17, %v7189_v50  ;;  %v17608_v50 = vld [vmem:[#allocation143_spill] sm:$0xff] }
 0x651   : > { %6957 = vadd.xlane.f32.xlu1 %v6956_v36 }
 0x653   : > { %v11249_v32 = vpop.eup %11248 }
 0x654   : > { %v11251_v54 = vpop.eup %11250  ;;  %v8273_v56 = vmul.f32 %v11249_v32, %v8189_v57  ;;  %v8360_v32 = vld [vmem:[%s14545_s22 + $0x68] sm:$0xff] }
 0x655   : > { %v8276_v5 = vmul.f32 %v11251_v54, %v8192_v12 }
 0x656   : > { %v8441_v43 = vmul.f32 %v8273_v56, %v7601_v41  ;;  %v17606_v41 = vld [vmem:[#allocation137_spill] sm:$0xff] }
 0x657   : > { %v8444_v36 = vmul.f32 %v8276_v5, %v7604_v33 }
 0x658   : > { %v8525_v57 = vsub.f32 %v8357_v48, %v8441_v43  ;;  %v17609_v43 = vld [vmem:[#allocation142_spill] sm:$0xff] }
 0x659   : > { %v8528_v54 = vsub.f32 %v8360_v32, %v8444_v36  ;;  %v17610_v32 = vld [vmem:[#allocation173_spill] sm:$0xff] }
 0x662   : > { %8651 = vperm.xlu1 %10553, %v8273_v56   ;;  %8666 = vperm.xlu0 %10552, %v8276_v5   ;;  %v17607_v56 = vld [vmem:[#allocation136_spill] sm:$0xff] }
 0x66b   : > { %v15263_v13 = vpop.xlane.xlu0 %6961 }
 0x66c   : > { %17603 = vst [vmem:[#allocation59_spill] sm:$0xff] %v15263_v13 }
 0x670   : > { %v15261_v12 = vpop.xlane.xlu1 %6949 }
 0x673   : > { %v8657_v25 = vpop.permute.xlu0 %8656 }
 0x674   : > { %v8642_v27 = vpop.permute.xlu1 %8641  ;;  %v9042_v48 = vmul.f32 %v8657_v25, %v17609_v43 }
 0x675   : > { %v9035_v33 = vmul.f32 %v8642_v27, %v17606_v41  ;;  %v9036_v5 = vmul.f32 %v8642_v27, %v17607_v56  ;;  %v6161_v41 = vadd.f32 %v14662_v61, %v17612_v24  ;;  %v17613_v56 = vld [vmem:[#allocation65_spill] sm:$0xff] }
 0x676   : > { %v7690_v35 = vmul.f32 0.0051020407, %v17613_v56 }
 0x677   : > { %v15286_v43 = vadd.f32 %v14666_v62, %v6161_v41 }
 0x679   : > { %17614 = vst [vmem:[#allocation165_spill] sm:$0xff] %v15286_v43 }
 0x681   : > { %7473 = vadd.xlane.f32.xlu0 %v7472_v38  ;;  %v17605_v38 = vld [vmem:[#allocation170_spill] sm:$0xff] }
 0x682   : > { %v7603_v17 = vmul.f32 0.0051020407, %v17605_v38 }
 0x684   : > { %v7771_v27 = vmul.f32 %v7603_v17, %v7603_v17 }
 0x686   : > { %7461 = vadd.xlane.f32.xlu1 %v7460_v14  ;;  %v9041_v14 = vmul.f32 %v8657_v25, %v17608_v50 }
 0x697   : > { %9239 = vperm.xlu1 %10553, %v8525_v57   ;;  %9254 = vperm.xlu0 %10552, %v8528_v54   ;;  %v7687_v57 = vmul.f32 0.0051020407, %v17610_v32  ;;  %v17611_v54 = vld [vmem:[#allocation184_spill] sm:$0xff] }
 0x698   : > { %v7606_v11 = vmul.f32 0.0051020407, %v17611_v54 }
 0x699   : > { %v7855_v25 = vsub.f32 %v7687_v57, %v7771_v27  ;;  %v8191_v57 = vld [vmem:[%s14510_s19 + $0x60] sm:$0xff]  ;;  %v7200_v27 = vmul.f32 %v15286_v43, %v15286_v43 }
 0x69a   : > { %v7774_v50 = vmul.f32 %v7606_v11, %v7606_v11 }
 0x69b   : > { %v7939_v24 = vmax.f32 %v7855_v25, 0.0  ;;  %v7479_v25 = vsel %vm6750_vm1, %v7200_v27, 0.0 }
 0x6a0   : > { %v15267_v10 = vpop.xlane.xlu0 %7465 }
 0x6a1   : > { %17604 = vst [vmem:[#allocation174_spill] sm:$0xff] %v15267_v10 }
 0x6a5   : > { %v15265_v58 = vpop.xlane.xlu1 %7453 }
 0x6a8   : > { %v9245_v10 = vpop.permute.xlu0 %9244 }
 0x6a9   : > { %v9230_v36 = vpop.permute.xlu1 %9229  ;;  %v9629_v6 = vadd.f32 %v9245_v10, %v9041_v14  ;;  %v9630_v3 = vadd.f32 %v9245_v10, %v9042_v48  ;;  %v6975_v10 = vsel %vm6750_vm1, %v15286_v43, 0.0  ;;  %v17617_v48 = vld [vmem:[#allocation48_spill] sm:$0xff] }
 0x6aa   : > { %v9623_v13 = vadd.f32 %v9230_v36, %v9035_v33  ;;  %v9624_v38 = vadd.f32 %v9230_v36, %v9036_v5  ;;  %v7858_v33 = vsub.f32 %v7690_v35, %v7774_v50  ;;  %v17615_v5 = vld [vmem:[#allocation71_spill] sm:$0xff]  ;;  %v6963_v62 = vsel %vm6750_vm1, %v17617_v48, 0.0  ;;  %v17618_v36 = vld [vmem:[#allocation66_spill] sm:$0xff]  ;;  %v17628_v43 = vld [vmem:[#allocation76_spill] sm:$0xff] }
 0x6ab   : > { %9797 = vst [vmem:[%s14990_s26 + $0xb0] sm:$0xff] %v9629_v6  ;;  %9798 = vst.msk [vmem:[%s14990_s26 + $0xb8] sm:$0xff] %vm6750_vm1, %v9630_v3  ;;  %v6159_v61 = vadd.f32 %v14647_v15, %v17615_v5  ;;  %v8023_v3 = vadd.f32 1e-05, %v7939_v24  ;;  %v6964_v32 = vadd.f32 %v6963_v62, %v17618_v36  ;;  %v7194_v56 = vmul.f32 %v17617_v48, %v17617_v48 }
 0x6ac   : > { %9791 = vst [vmem:[%s14990_s26 + $0x80] sm:$0xff] %v9623_v13  ;;  %9792 = vst.msk [vmem:[%s14990_s26 + $0x88] sm:$0xff] %vm6750_vm1, %v9624_v38  ;;  %v7942_v13 = vmax.f32 %v7858_v33, 0.0  ;;  %v8194_v38 = vld [vmem:[%s14510_s19 + $0x78] sm:$0xff] }
 0x6ad   : > { %v15293_v6 = vadd.f32 %v14653_v20, %v6159_v61  ;;  %11252 = vrsqrt.f32 %v8023_v3  ;;  %v7467_v5 = vsel %vm6750_vm1, %v7194_v56, 0.0  ;;  %v7193_v61 = vmul.f32 %v17618_v36, %v17618_v36  ;;  %v17621_v56 = vld [vmem:[#allocation179_spill] sm:$0xff] }
 0x6ae   : > { %v8026_v35 = vadd.f32 1e-05, %v7942_v13  ;;  %v8359_v13 = vld [vmem:[%s14545_s22 + $0x60] sm:$0xff] }
 0x6af   : > { %17616 = vst [vmem:[#allocation177_spill] sm:$0xff] %v15293_v6  ;;  %v6976_v14 = vadd.f32 %v6975_v10, %v15293_v6  ;;  %v7199_v50 = vmul.f32 %v15293_v6, %v15293_v6  ;;  %v7468_v24 = vadd.f32 %v7467_v5, %v7193_v61  ;;  %v17625_v5 = vld [vmem:[#allocation146_spill] sm:$0xff] }
 0x6b0   : > { %11254 = vrsqrt.f32 %v8026_v35 }
 0x6b1   : > { %v7480_v33 = vadd.f32 %v7479_v25, %v7199_v50  ;;  %v7605_v25 = vmul.f32 0.0051020407, %v17621_v56  ;;  %v17624_v50 = vld [vmem:[#allocation147_spill] sm:$0xff] }
 0x6b6   : > { %6977 = vadd.xlane.f32.xlu0 %v6976_v14  ;;  %v8362_v14 = vld [vmem:[%s14545_s22 + $0x78] sm:$0xff] }
 0x6ba   : > { %v11253_v15 = vpop.eup %11252 }
 0x6bb   : > { %6965 = vadd.xlane.f32.xlu1 %v6964_v32  ;;  %v8275_v20 = vmul.f32 %v11253_v15, %v8191_v57 }
 0x6bd   : > { %v11255_v54 = vpop.eup %11254  ;;  %v8443_v10 = vmul.f32 %v8275_v20, %v7603_v17  ;;  %v17622_v17 = vld [vmem:[#allocation141_spill] sm:$0xff] }
 0x6be   : > { %v8278_v41 = vmul.f32 %v11255_v54, %v8194_v38 }
 0x6bf   : > { %v8527_v62 = vsub.f32 %v8359_v13, %v8443_v10  ;;  %v17626_v10 = vld [vmem:[#allocation181_spill] sm:$0xff] }
 0x6c0   : > { %v8446_v3 = vmul.f32 %v8278_v41, %v7606_v11  ;;  %v7689_v13 = vmul.f32 0.0051020407, %v17626_v10  ;;  %v17633_v10 = vld [vmem:[#allocation50_spill] sm:$0xff] }
 0x6c2   : > { %v8530_v35 = vsub.f32 %v8362_v14, %v8446_v3  ;;  %v17627_v3 = vld [vmem:[#allocation191_spill] sm:$0xff] }
 0x6c3   : > { %v7608_v14 = vmul.f32 0.0051020407, %v17627_v3 }
 0x6cc   : > { %8661 = vperm.xlu1 %10553, %v8275_v20   ;;  %8676 = vperm.xlu0 %10552, %v8278_v41   ;;  %v17623_v20 = vld [vmem:[#allocation140_spill] sm:$0xff] }
 0x6d5   : > { %v15315_v15 = vpop.xlane.xlu0 %6969 }
 0x6d6   : > { %17619 = vst [vmem:[#allocation131_spill] sm:$0xff] %v15315_v15 }
 0x6da   : > { %v15313_v32 = vpop.xlane.xlu1 %6957 }
 0x6dd   : > { %v8667_v54 = vpop.permute.xlu0 %8666 }
 0x6de   : > { %v8652_v57 = vpop.permute.xlu1 %8651  ;;  %v9046_v61 = vmul.f32 %v8667_v54, %v17625_v5 }
 0x6df   : > { %v9039_v11 = vmul.f32 %v8652_v57, %v17622_v17  ;;  %v9040_v41 = vmul.f32 %v8652_v57, %v17623_v20  ;;  %v6171_v17 = vadd.f32 %v14698_v1, %v17628_v43  ;;  %v7773_v57 = vmul.f32 %v7605_v25, %v7605_v25  ;;  %v17629_v20 = vld [vmem:[#allocation69_spill] sm:$0xff] }
 0x6e0   : > { %v7692_v15 = vmul.f32 0.0051020407, %v17629_v20  ;;  %v7198_v20 = vmul.f32 %v17633_v10, %v17633_v10 }
 0x6e1   : > { %v15338_v5 = vadd.f32 %v14702_v52, %v6171_v17  ;;  %v6971_v52 = vsel %vm6750_vm1, %v17633_v10, 0.0 }
 0x6e3   : > { %17630 = vst [vmem:[#allocation129_spill] sm:$0xff] %v15338_v5 }
 0x6eb   : > { %7481 = vadd.xlane.f32.xlu0 %v7480_v33  ;;  %v9045_v33 = vmul.f32 %v8667_v54, %v17624_v50  ;;  %v7857_v54 = vsub.f32 %v7689_v13, %v7773_v57  ;;  %v7776_v50 = vmul.f32 %v7608_v14, %v7608_v14  ;;  %v17634_v13 = vld [vmem:[#allocation47_spill] sm:$0xff]  ;;  %v7204_v57 = vmul.f32 %v15338_v5, %v15338_v5 }
 0x6ec   : > { %v6972_v3 = vadd.f32 %v6971_v52, %v17634_v13 }
 0x6ed   : > { %v7941_v43 = vmax.f32 %v7857_v54, 0.0  ;;  %v7487_v54 = vsel %vm6750_vm1, %v7204_v57, 0.0 }
 0x6f0   : > { %7469 = vadd.xlane.f32.xlu1 %v7468_v24 }
 0x701   : > { %9249 = vperm.xlu1 %10553, %v8527_v62   ;;  %9264 = vperm.xlu0 %10552, %v8530_v35  }
 0x70a   : > { %v15319_v27 = vpop.xlane.xlu0 %7473 }
 0x70b   : > { %17620 = vst [vmem:[#allocation130_spill] sm:$0xff] %v15319_v27 }
 0x70f   : > { %v15317_v38 = vpop.xlane.xlu1 %7461 }
 0x712   : > { %v9255_v62 = vpop.permute.xlu0 %9254 }
 0x713   : > { %v9240_v24 = vpop.permute.xlu1 %9239  ;;  %v9633_v6 = vadd.f32 %v9255_v62, %v9045_v33  ;;  %v9634_v27 = vadd.f32 %v9255_v62, %v9046_v61  ;;  %v6983_v33 = vsel %vm6750_vm1, %v15338_v5, 0.0  ;;  %v8193_v62 = vld [vmem:[%s14510_s19 + $0x70] sm:$0xff] }
 0x714   : > { %v9627_v35 = vadd.f32 %v9240_v24, %v9039_v11  ;;  %v9628_v56 = vadd.f32 %v9240_v24, %v9040_v41  ;;  %v7860_v11 = vsub.f32 %v7692_v15, %v7776_v50  ;;  %v17631_v41 = vld [vmem:[#allocation75_spill] sm:$0xff]  ;;  %v17644_v5 = vld [vmem:[#allocation80_spill] sm:$0xff] }
 0x715   : > { %9801 = vst [vmem:[%s14990_s26 + $0xd0] sm:$0xff] %v9633_v6  ;;  %9802 = vst.msk [vmem:[%s14990_s26 + $0xd8] sm:$0xff] %vm6750_vm1, %v9634_v27  ;;  %v6169_v1 = vadd.f32 %v14685_v16, %v17631_v41  ;;  %v8025_v27 = vadd.f32 1e-05, %v7941_v43  ;;  %v7475_v41 = vsel %vm6750_vm1, %v7198_v20, 0.0  ;;  %v17637_v20 = vld [vmem:[#allocation187_spill] sm:$0xff] }
 0x716   : > { %9795 = vst [vmem:[%s14990_s26 + $0xa0] sm:$0xff] %v9627_v35  ;;  %9796 = vst.msk [vmem:[%s14990_s26 + $0xa8] sm:$0xff] %vm6750_vm1, %v9628_v56  ;;  %v7944_v61 = vmax.f32 %v7860_v11, 0.0  ;;  %v8196_v56 = vld [vmem:[%s14510_s19 + $0x88] sm:$0xff] }
 0x717   : > { %v15345_v6 = vadd.f32 %v14696_v44, %v6169_v1  ;;  %11256 = vrsqrt.f32 %v8025_v27  ;;  %v7197_v1 = vmul.f32 %v17634_v13, %v17634_v13 }
 0x718   : > { %v8028_v15 = vadd.f32 1e-05, %v7944_v61  ;;  %v8361_v61 = vld [vmem:[%s14545_s22 + $0x70] sm:$0xff] }
 0x719   : > { %17632 = vst [vmem:[#allocation128_spill] sm:$0xff] %v15345_v6  ;;  %v6984_v24 = vadd.f32 %v6983_v33, %v15345_v6  ;;  %v7203_v50 = vmul.f32 %v15345_v6, %v15345_v6  ;;  %v7476_v43 = vadd.f32 %v7475_v41, %v7197_v1  ;;  %v17641_v41 = vld [vmem:[#allocation125_spill] sm:$0xff]  ;;  %v17645_v6 = vld [vmem:[#allocation210_spill] sm:$0xff] }
 0x71a   : > { %11258 = vrsqrt.f32 %v8028_v15 }
 0x71b   : > { %v7488_v11 = vadd.f32 %v7487_v54, %v7203_v50  ;;  %v7607_v54 = vmul.f32 0.0051020407, %v17637_v20  ;;  %v17640_v50 = vld [vmem:[#allocation2_spill] sm:$0xff] }
 0x720   : > { %6985 = vadd.xlane.f32.xlu0 %v6984_v24  ;;  %v8364_v24 = vld [vmem:[%s14545_s22 + $0x88] sm:$0xff] }
 0x724   : > { %v11257_v16 = vpop.eup %11256 }
 0x725   : > { %6973 = vadd.xlane.f32.xlu1 %v6972_v3  ;;  %v8277_v44 = vmul.f32 %v11257_v16, %v8193_v62 }
 0x727   : > { %v11259_v35 = vpop.eup %11258  ;;  %v8445_v33 = vmul.f32 %v8277_v44, %v7605_v25  ;;  %v17638_v25 = vld [vmem:[#allocation145_spill] sm:$0xff] }
 0x728   : > { %v8280_v17 = vmul.f32 %v11259_v35, %v8196_v56 }
 0x729   : > { %v8529_v52 = vsub.f32 %v8361_v61, %v8445_v33  ;;  %v17642_v33 = vld [vmem:[#allocation189_spill] sm:$0xff] }
 0x72a   : > { %v8448_v27 = vmul.f32 %v8280_v17, %v7608_v14  ;;  %v7691_v61 = vmul.f32 0.0051020407, %v17642_v33 }
 0x72c   : > { %v8532_v15 = vsub.f32 %v8364_v24, %v8448_v27  ;;  %v17643_v27 = vld [vmem:[#allocation197_spill] sm:$0xff] }
 0x72d   : > { %v7610_v24 = vmul.f32 0.0051020407, %v17643_v27  ;;  %v17651_v27 = vld [vmem:[#allocation209_spill] sm:$0xff] }
 0x736   : > { %8671 = vperm.xlu1 %10553, %v8277_v44   ;;  %8686 = vperm.xlu0 %10552, %v8280_v17   ;;  %v17639_v44 = vld [vmem:[#allocation144_spill] sm:$0xff] }
 0x73f   : > { %v15367_v16 = vpop.xlane.xlu0 %6977 }
 0x740   : > { %17635 = vst [vmem:[#allocation159_spill] sm:$0xff] %v15367_v16 }
 0x744   : > { %v15365_v3 = vpop.xlane.xlu1 %6965 }
 0x747   : > { %v8677_v35 = vpop.permute.xlu0 %8676 }
 0x748   : > { %v8662_v62 = vpop.permute.xlu1 %8661  ;;  %v9050_v1 = vmul.f32 %v8677_v35, %v17641_v41  ;;  %v17647_v41 = vld [vmem:[#allocation212_spill] sm:$0xff] }
 0x749   : > { %v9043_v14 = vmul.f32 %v8662_v62, %v17638_v25  ;;  %v9044_v17 = vmul.f32 %v8662_v62, %v17639_v44  ;;  %v6181_v25 = vadd.f32 %v17645_v6, %v17644_v5  ;;  %v7775_v62 = vmul.f32 %v7607_v54, %v7607_v54  ;;  %v17646_v44 = vld [vmem:[#allocation49_spill] sm:$0xff] }
 0x74a   : > { %v7694_v10 = vmul.f32 0.0051020407, %v17646_v44  ;;  %v8195_v44 = vld [vmem:[%s14510_s19 + $0x80] sm:$0xff] }
 0x74b   : > { %v15390_v33 = vadd.f32 %v17647_v41, %v6181_v25 }
 0x74d   : > { %17648 = vst [vmem:[#allocation169_spill] sm:$0xff] %v15390_v33 }
 0x755   : > { %7489 = vadd.xlane.f32.xlu0 %v7488_v11  ;;  %v9049_v11 = vmul.f32 %v8677_v35, %v17640_v50  ;;  %v7859_v35 = vsub.f32 %v7691_v61, %v7775_v62  ;;  %v7778_v50 = vmul.f32 %v7610_v24, %v7610_v24 }
 0x757   : > { %v7943_v6 = vmax.f32 %v7859_v35, 0.0 }
 0x75a   : > { %7477 = vadd.xlane.f32.xlu1 %v7476_v43 }
 0x76b   : > { %9259 = vperm.xlu1 %10553, %v8529_v52   ;;  %9274 = vperm.xlu0 %10552, %v8532_v15  }
 0x774   : > { %v15371_v57 = vpop.xlane.xlu0 %7481 }
 0x775   : > { %17636 = vst [vmem:[#allocation160_spill] sm:$0xff] %v15371_v57 }
 0x779   : > { %v15369_v56 = vpop.xlane.xlu1 %7469 }
 0x77c   : > { %v9265_v52 = vpop.permute.xlu0 %9264 }
 0x77d   : > { %v9250_v43 = vpop.permute.xlu1 %9249  ;;  %v9637_v57 = vadd.f32 %v9265_v52, %v9049_v11  ;;  %v9638_v16 = vadd.f32 %v9265_v52, %v9050_v1  ;;  %v6991_v11 = vsel %vm6750_vm1, %v15390_v33, 0.0  ;;  %v17653_v52 = vld [vmem:[#allocation202_spill] sm:$0xff] }
 0x77e   : > { %v9631_v15 = vadd.f32 %v9250_v43, %v9043_v14  ;;  %v9632_v20 = vadd.f32 %v9250_v43, %v9044_v17  ;;  %v7862_v14 = vsub.f32 %v7694_v10, %v7778_v50  ;;  %v17649_v17 = vld [vmem:[#allocation79_spill] sm:$0xff]  ;;  %v17650_v43 = vld [vmem:[#allocation206_spill] sm:$0xff]  ;;  %v8198_v50 = vld [vmem:[%s14510_s19 + $0x98] sm:$0xff] }
 0x77f   : > { %9805 = vst [vmem:[%s14990_s26 + $0xf0] sm:$0xff] %v9637_v57  ;;  %9806 = vst.msk [vmem:[%s14990_s26 + $0xf8] sm:$0xff] %vm6750_vm1, %v9638_v16  ;;  %v6179_v5 = vadd.f32 %v17650_v43, %v17649_v17  ;;  %v8027_v16 = vadd.f32 1e-05, %v7943_v6  ;;  %v7208_v17 = vmul.f32 %v15390_v33, %v15390_v33  ;;  %v7202_v43 = vmul.f32 %v17653_v52, %v17653_v52 }
 0x780   : > { %9799 = vst [vmem:[%s14990_s26 + $0xc0] sm:$0xff] %v9631_v15  ;;  %9800 = vst.msk [vmem:[%s14990_s26 + $0xc8] sm:$0xff] %vm6750_vm1, %v9632_v20  ;;  %v7946_v1 = vmax.f32 %v7862_v14, 0.0  ;;  %v6979_v15 = vsel %vm6750_vm1, %v17653_v52, 0.0  ;;  %v17654_v20 = vld [vmem:[#allocation73_spill] sm:$0xff]  ;;  %v17665_v52 = vld [vmem:[#allocation218_spill] sm:$0xff] }
 0x781   : > { %v15397_v57 = vadd.f32 %v17651_v27, %v6179_v5  ;;  %v6980_v25 = vadd.f32 %v6979_v15, %v17654_v20  ;;  %11260 = vrsqrt.f32 %v8027_v16  ;;  %v7495_v5 = vsel %vm6750_vm1, %v7208_v17, 0.0  ;;  %v8363_v15 = vld [vmem:[%s14545_s22 + $0x80] sm:$0xff] }
 0x782   : > { %v8030_v10 = vadd.f32 1e-05, %v7946_v1  ;;  %v7483_v1 = vsel %vm6750_vm1, %v7202_v43, 0.0  ;;  %v7201_v27 = vmul.f32 %v17654_v20, %v17654_v20 }
 0x783   : > { %17652 = vst [vmem:[#allocation64_spill] sm:$0xff] %v15397_v57  ;;  %v6992_v61 = vadd.f32 %v6991_v11, %v15397_v57  ;;  %v7207_v6 = vmul.f32 %v15397_v57, %v15397_v57 }
 0x784   : > { %11262 = vrsqrt.f32 %v8030_v10  ;;  %v7484_v16 = vadd.f32 %v7483_v1, %v7201_v27  ;;  %v17660_v27 = vld [vmem:[#allocation4_spill] sm:$0xff] }
 0x785   : > { %v7496_v11 = vadd.f32 %v7495_v5, %v7207_v6 }
 0x78a   : > { %6993 = vadd.xlane.f32.xlu0 %v6992_v61 }
 0x78e   : > { %v11261_v62 = vpop.eup %11260 }
 0x78f   : > { %6981 = vadd.xlane.f32.xlu1 %v6980_v25  ;;  %v8279_v41 = vmul.f32 %v11261_v62, %v8195_v44  ;;  %v8366_v25 = vld [vmem:[%s14545_s22 + $0x98] sm:$0xff] }
 0x791   : > { %v11263_v35 = vpop.eup %11262  ;;  %v8447_v61 = vmul.f32 %v8279_v41, %v7607_v54  ;;  %v17658_v54 = vld [vmem:[#allocation149_spill] sm:$0xff] }
 0x792   : > { %v8282_v14 = vmul.f32 %v11263_v35, %v8198_v50 }
 0x793   : > { %v8531_v62 = vsub.f32 %v8363_v15, %v8447_v61  ;;  %v17661_v61 = vld [vmem:[#allocation5_spill] sm:$0xff] }
 0x794   : > { %v8450_v10 = vmul.f32 %v8282_v14, %v7610_v24 }
 0x796   : > { %v8534_v44 = vsub.f32 %v8366_v25, %v8450_v10  ;;  %v17662_v25 = vld [vmem:[#allocation70_spill] sm:$0xff] }
 0x7a0   : > { %8681 = vperm.xlu1 %10553, %v8279_v41   ;;  %8696 = vperm.xlu0 %10552, %v8282_v14   ;;  %v17659_v41 = vld [vmem:[#allocation148_spill] sm:$0xff] }
 0x7a9   : > { %v15419_v50 = vpop.xlane.xlu0 %6985 }
 0x7aa   : > { %17655 = vst [vmem:[#allocation186_spill] sm:$0xff] %v15419_v50  ;;  %v17664_v50 = vld [vmem:[#allocation84_spill] sm:$0xff] }
 0x7ae   : > { %v15417_v35 = vpop.xlane.xlu1 %6973 }
 0x7b1   : > { %v8687_v43 = vpop.permute.xlu0 %8686 }
 0x7b2   : > { %v8672_v17 = vpop.permute.xlu1 %8671  ;;  %v9054_v15 = vmul.f32 %v8687_v43, %v17661_v61  ;;  %v17667_v61 = vld [vmem:[#allocation220_spill] sm:$0xff] }
 0x7b3   : > { %v9047_v24 = vmul.f32 %v8672_v17, %v17658_v54  ;;  %v9048_v14 = vmul.f32 %v8672_v17, %v17659_v41  ;;  %v6191_v54 = vadd.f32 %v17665_v52, %v17664_v50  ;;  %v17666_v41 = vld [vmem:[#allocation77_spill] sm:$0xff] }
 0x7b4   : > { %v7696_v48 = vmul.f32 0.0051020407, %v17666_v41  ;;  %v8197_v41 = vld [vmem:[%s14510_s19 + $0x90] sm:$0xff] }
 0x7bf   : > { %7497 = vadd.xlane.f32.xlu0 %v7496_v11  ;;  %v17657_v11 = vld [vmem:[#allocation194_spill] sm:$0xff] }
 0x7c0   : > { %v7609_v1 = vmul.f32 0.0051020407, %v17657_v11 }
 0x7c2   : > { %v7777_v17 = vmul.f32 %v7609_v1, %v7609_v1 }
 0x7c4   : > { %7485 = vadd.xlane.f32.xlu1 %v7484_v16  ;;  %v9053_v16 = vmul.f32 %v8687_v43, %v17660_v27 }
 0x7d5   : > { %9269 = vperm.xlu1 %10553, %v8531_v62   ;;  %9284 = vperm.xlu0 %10552, %v8534_v44   ;;  %v7693_v62 = vmul.f32 0.0051020407, %v17662_v25  ;;  %v17663_v44 = vld [vmem:[#allocation203_spill] sm:$0xff]  ;;  %v15442_v25 = vadd.f32 %v17667_v61, %v6191_v54 }
 0x7d6   : > { %v7612_v33 = vmul.f32 0.0051020407, %v17663_v44 }
 0x7d7   : > { %v7861_v43 = vsub.f32 %v7693_v62, %v7777_v17  ;;  %17668 = vst [vmem:[#allocation188_spill] sm:$0xff] %v15442_v25  ;;  %v6999_v50 = vsel %vm6750_vm1, %v15442_v25, 0.0  ;;  %v17673_v62 = vld [vmem:[#allocation207_spill] sm:$0xff] }
 0x7d8   : > { %v7780_v27 = vmul.f32 %v7612_v33, %v7612_v33  ;;  %v6987_v44 = vsel %vm6750_vm1, %v17673_v62, 0.0 }
 0x7de   : > { %v15423_v6 = vpop.xlane.xlu0 %7489 }
 0x7df   : > { %17656 = vst [vmem:[#allocation171_spill] sm:$0xff] %v15423_v6 }
 0x7e3   : > { %v15421_v5 = vpop.xlane.xlu1 %7477 }
 0x7e6   : > { %v9275_v57 = vpop.permute.xlu0 %9274 }
 0x7e7   : > { %v9260_v10 = vpop.permute.xlu1 %9259  ;;  %v9641_v20 = vadd.f32 %v9275_v57, %v9053_v16  ;;  %v9642_v13 = vadd.f32 %v9275_v57, %v9054_v15  ;;  %v7945_v57 = vmax.f32 %v7861_v43, 0.0  ;;  %v17671_v16 = vld [vmem:[#allocation217_spill] sm:$0xff] }
 0x7e8   : > { %v9635_v6 = vadd.f32 %v9260_v10, %v9047_v24  ;;  %v9636_v11 = vadd.f32 %v9260_v10, %v9048_v14  ;;  %v7864_v24 = vsub.f32 %v7696_v48, %v7780_v27  ;;  %v17669_v14 = vld [vmem:[#allocation83_spill] sm:$0xff]  ;;  %v17670_v10 = vld [vmem:[#allocation214_spill] sm:$0xff] }
 0x7e9   : > { %9809 = vst [vmem:[%s14990_s26 + $0x110] sm:$0xff] %v9641_v20  ;;  %9810 = vst.msk [vmem:[%s14990_s26 + $0x118] sm:$0xff] %vm6750_vm1, %v9642_v13  ;;  %v6189_v52 = vadd.f32 %v17670_v10, %v17669_v14  ;;  %v8029_v13 = vadd.f32 1e-05, %v7945_v57  ;;  %v8200_v27 = vld [vmem:[%s14510_s19 + $0xa8] sm:$0xff]  ;;  %v7212_v14 = vmul.f32 %v15442_v25, %v15442_v25  ;;  %v7206_v10 = vmul.f32 %v17673_v62, %v17673_v62 }
 0x7ea   : > { %9803 = vst [vmem:[%s14990_s26 + $0xe0] sm:$0xff] %v9635_v6  ;;  %9804 = vst.msk [vmem:[%s14990_s26 + $0xe8] sm:$0xff] %vm6750_vm1, %v9636_v11  ;;  %v7948_v6 = vmax.f32 %v7864_v24, 0.0  ;;  %v17674_v11 = vld [vmem:[#allocation78_spill] sm:$0xff] }
 0x7eb   : > { %v15449_v20 = vadd.f32 %v17671_v16, %v6189_v52  ;;  %v6988_v54 = vadd.f32 %v6987_v44, %v17674_v11  ;;  %11264 = vrsqrt.f32 %v8029_v13  ;;  %v7503_v52 = vsel %vm6750_vm1, %v7212_v14, 0.0  ;;  %v8365_v44 = vld [vmem:[%s14545_s22 + $0x90] sm:$0xff] }
 0x7ec   : > { %v8032_v48 = vadd.f32 1e-05, %v7948_v6  ;;  %v7491_v6 = vsel %vm6750_vm1, %v7206_v10, 0.0  ;;  %v7205_v16 = vmul.f32 %v17674_v11, %v17674_v11 }
 0x7ed   : > { %17672 = vst [vmem:[#allocation63_spill] sm:$0xff] %v15449_v20  ;;  %v7000_v15 = vadd.f32 %v6999_v50, %v15449_v20  ;;  %v7211_v57 = vmul.f32 %v15449_v20, %v15449_v20 }
 0x7ee   : > { %11266 = vrsqrt.f32 %v8032_v48  ;;  %v7492_v13 = vadd.f32 %v7491_v6, %v7205_v16  ;;  %v17680_v16 = vld [vmem:[#allocation8_spill] sm:$0xff] }
 0x7ef   : > { %v7504_v50 = vadd.f32 %v7503_v52, %v7211_v57 }
 0x7f4   : > { %7001 = vadd.xlane.f32.xlu0 %v7000_v15 }
 0x7f8   : > { %v11265_v17 = vpop.eup %11264 }
 0x7f9   : > { %6989 = vadd.xlane.f32.xlu1 %v6988_v54  ;;  %v8281_v61 = vmul.f32 %v11265_v17, %v8197_v41  ;;  %v8368_v54 = vld [vmem:[%s14545_s22 + $0xa8] sm:$0xff] }
 0x7fb   : > { %v11267_v43 = vpop.eup %11266  ;;  %v8449_v15 = vmul.f32 %v8281_v61, %v7609_v1  ;;  %v17678_v1 = vld [vmem:[#allocation150_spill] sm:$0xff] }
 0x7fc   : > { %v8284_v24 = vmul.f32 %v11267_v43, %v8200_v27 }
 0x7fd   : > { %v8533_v17 = vsub.f32 %v8365_v44, %v8449_v15  ;;  %v17681_v15 = vld [vmem:[#allocation9_spill] sm:$0xff] }
 0x7fe   : > { %v8452_v48 = vmul.f32 %v8284_v24, %v7612_v33 }
 0x800   : > { %v8536_v41 = vsub.f32 %v8368_v54, %v8452_v48  ;;  %v17682_v54 = vld [vmem:[#allocation74_spill] sm:$0xff] }
 0x80a   : > { %8691 = vperm.xlu1 %10553, %v8281_v61   ;;  %8706 = vperm.xlu0 %10552, %v8284_v24   ;;  %v17679_v61 = vld [vmem:[#allocation3_spill] sm:$0xff] }
 0x813   : > { %v15471_v27 = vpop.xlane.xlu0 %6993 }
 0x814   : > { %17675 = vst [vmem:[#allocation182_spill] sm:$0xff] %v15471_v27  ;;  %v17684_v27 = vld [vmem:[#allocation88_spill] sm:$0xff] }
 0x818   : > { %v15469_v43 = vpop.xlane.xlu1 %6981 }
 0x81b   : > { %v8697_v10 = vpop.permute.xlu0 %8696 }
 0x81c   : > { %v8682_v14 = vpop.permute.xlu1 %8681  ;;  %v9058_v44 = vmul.f32 %v8697_v10, %v17681_v15 }
 0x81d   : > { %v9051_v33 = vmul.f32 %v8682_v14, %v17678_v1  ;;  %v9052_v24 = vmul.f32 %v8682_v14, %v17679_v61  ;;  %v6201_v1 = vadd.f32 %v14772_v47, %v17684_v27  ;;  %v17685_v61 = vld [vmem:[#allocation81_spill] sm:$0xff] }
 0x81e   : > { %v7698_v36 = vmul.f32 0.0051020407, %v17685_v61  ;;  %v8202_v61 = vld [vmem:[%s14510_s19 + $0xb8] sm:$0xff] }
 0x81f   : > { %v15494_v15 = vadd.f32 %v14776_v46, %v6201_v1  ;;  %v8199_v1 = vld [vmem:[%s14510_s19 + $0xa0] sm:$0xff] }
 0x821   : > { %17686 = vst [vmem:[#allocation135_spill] sm:$0xff] %v15494_v15  ;;  %v7007_v27 = vsel %vm6750_vm1, %v15494_v15, 0.0 }
 0x829   : > { %7505 = vadd.xlane.f32.xlu0 %v7504_v50  ;;  %v17677_v50 = vld [vmem:[#allocation199_spill] sm:$0xff] }
 0x82a   : > { %v7611_v6 = vmul.f32 0.0051020407, %v17677_v50 }
 0x82c   : > { %v7779_v14 = vmul.f32 %v7611_v6, %v7611_v6 }
 0x82e   : > { %7493 = vadd.xlane.f32.xlu1 %v7492_v13  ;;  %v9057_v13 = vmul.f32 %v8697_v10, %v17680_v16 }
 0x83f   : > { %9279 = vperm.xlu1 %10553, %v8533_v17   ;;  %9294 = vperm.xlu0 %10552, %v8536_v41   ;;  %v7695_v17 = vmul.f32 0.0051020407, %v17682_v54  ;;  %v17683_v41 = vld [vmem:[#allocation208_spill] sm:$0xff]  ;;  %v17691_v54 = vld [vmem:[#allocation215_spill] sm:$0xff] }
 0x840   : > { %v7614_v25 = vmul.f32 0.0051020407, %v17683_v41  ;;  %v6995_v46 = vsel %vm6750_vm1, %v17691_v54, 0.0 }
 0x841   : > { %v7863_v10 = vsub.f32 %v7695_v17, %v7779_v14  ;;  %v17692_v17 = vld [vmem:[#allocation82_spill] sm:$0xff] }
 0x842   : > { %v7782_v16 = vmul.f32 %v7614_v25, %v7614_v25  ;;  %v6996_v41 = vadd.f32 %v6995_v46, %v17692_v17 }
 0x848   : > { %v15475_v57 = vpop.xlane.xlu0 %7497 }
 0x849   : > { %17676 = vst [vmem:[#allocation185_spill] sm:$0xff] %v15475_v57 }
 0x84d   : > { %v15473_v52 = vpop.xlane.xlu1 %7485 }
 0x850   : > { %v9285_v20 = vpop.permute.xlu0 %9284 }
 0x851   : > { %v9270_v48 = vpop.permute.xlu1 %9269  ;;  %v9645_v62 = vadd.f32 %v9285_v20, %v9057_v13  ;;  %v9646_v11 = vadd.f32 %v9285_v20, %v9058_v44  ;;  %v7947_v20 = vmax.f32 %v7863_v10, 0.0  ;;  %v17689_v13 = vld [vmem:[#allocation225_spill] sm:$0xff] }
 0x852   : > { %v9639_v57 = vadd.f32 %v9270_v48, %v9051_v33  ;;  %v9640_v50 = vadd.f32 %v9270_v48, %v9052_v24  ;;  %v7866_v33 = vsub.f32 %v7698_v36, %v7782_v16  ;;  %v17687_v24 = vld [vmem:[#allocation87_spill] sm:$0xff]  ;;  %v17688_v48 = vld [vmem:[#allocation222_spill] sm:$0xff] }
 0x853   : > { %9813 = vst [vmem:[%s14990_s26 + $0x130] sm:$0xff] %v9645_v62  ;;  %9814 = vst.msk [vmem:[%s14990_s26 + $0x138] sm:$0xff] %vm6750_vm1, %v9646_v11  ;;  %v6199_v47 = vadd.f32 %v17688_v48, %v17687_v24  ;;  %v8031_v11 = vadd.f32 1e-05, %v7947_v20  ;;  %v7210_v24 = vmul.f32 %v17691_v54, %v17691_v54 }
 0x854   : > { %9807 = vst [vmem:[%s14990_s26 + $0x100] sm:$0xff] %v9639_v57  ;;  %9808 = vst.msk [vmem:[%s14990_s26 + $0x108] sm:$0xff] %vm6750_vm1, %v9640_v50  ;;  %v7950_v57 = vmax.f32 %v7866_v33, 0.0  ;;  %v7216_v33 = vmul.f32 %v15494_v15, %v15494_v15 }
 0x855   : > { %v15501_v62 = vadd.f32 %v17689_v13, %v6199_v47  ;;  %11268 = vrsqrt.f32 %v8031_v11 }
 0x856   : > { %v8034_v36 = vadd.f32 1e-05, %v7950_v57  ;;  %v7511_v48 = vsel %vm6750_vm1, %v7216_v33, 0.0  ;;  %v7209_v57 = vmul.f32 %v17692_v17, %v17692_v17 }
 0x857   : > { %17690 = vst [vmem:[#allocation134_spill] sm:$0xff] %v15501_v62  ;;  %v7008_v44 = vadd.f32 %v7007_v27, %v15501_v62  ;;  %v7215_v47 = vmul.f32 %v15501_v62, %v15501_v62  ;;  %v7499_v27 = vsel %vm6750_vm1, %v7210_v24, 0.0 }
 0x858   : > { %11270 = vrsqrt.f32 %v8034_v36  ;;  %v7500_v13 = vadd.f32 %v7499_v27, %v7209_v57  ;;  %v8370_v36 = vld [vmem:[%s14545_s22 + $0xb8] sm:$0xff]  ;;  %v17698_v27 = vld [vmem:[#allocation12_spill] sm:$0xff] }
 0x859   : > { %v7512_v20 = vadd.f32 %v7511_v48, %v7215_v47  ;;  %v17695_v47 = vld [vmem:[#allocation204_spill] sm:$0xff] }
 0x85e   : > { %7009 = vadd.xlane.f32.xlu0 %v7008_v44  ;;  %v8367_v44 = vld [vmem:[%s14545_s22 + $0xa0] sm:$0xff] }
 0x862   : > { %v11269_v50 = vpop.eup %11268 }
 0x863   : > { %6997 = vadd.xlane.f32.xlu1 %v6996_v41  ;;  %v8283_v10 = vmul.f32 %v11269_v50, %v8199_v1 }
 0x865   : > { %v11271_v14 = vpop.eup %11270  ;;  %v8451_v11 = vmul.f32 %v8283_v10, %v7611_v6  ;;  %v17696_v6 = vld [vmem:[#allocation7_spill] sm:$0xff] }
 0x866   : > { %v8286_v16 = vmul.f32 %v11271_v14, %v8202_v61 }
 0x867   : > { %v8535_v41 = vsub.f32 %v8367_v44, %v8451_v11 }
 0x868   : > { %v8454_v46 = vmul.f32 %v8286_v16, %v7614_v25 }
 0x86a   : > { %v8538_v50 = vsub.f32 %v8370_v36, %v8454_v46  ;;  %v17700_v46 = vld [vmem:[#allocation205_spill] sm:$0xff] }
 0x86b   : > { %v7697_v36 = vmul.f32 0.0051020407, %v17700_v46  ;;  %v17709_v46 = vld [vmem:[#allocation223_spill] sm:$0xff] }
 0x874   : > { %8701 = vperm.xlu1 %10553, %v8283_v10   ;;  %8716 = vperm.xlu0 %10552, %v8286_v16   ;;  %v17697_v10 = vld [vmem:[#allocation6_spill] sm:$0xff] }
 0x87d   : > { %v15523_v14 = vpop.xlane.xlu0 %7001 }
 0x87e   : > { %17693 = vst [vmem:[#allocation162_spill] sm:$0xff] %v15523_v14 }
 0x882   : > { %v15521_v1 = vpop.xlane.xlu1 %6989 }
 0x885   : > { %v8707_v33 = vpop.permute.xlu0 %8706 }
 0x886   : > { %v8692_v61 = vpop.permute.xlu1 %8691  ;;  %v9061_v57 = vmul.f32 %v8707_v33, %v17698_v27 }
 0x887   : > { %v9055_v25 = vmul.f32 %v8692_v61, %v17696_v6  ;;  %v9056_v16 = vmul.f32 %v8692_v61, %v17697_v10  ;;  %v17703_v10 = vld [vmem:[#allocation85_spill] sm:$0xff] }
 0x888   : > { %v7700_v17 = vmul.f32 0.0051020407, %v17703_v10  ;;  %v8204_v10 = vld [vmem:[%s14510_s19 + $0xc8] sm:$0xff] }
 0x893   : > { %7513 = vadd.xlane.f32.xlu0 %v7512_v20  ;;  %v7613_v20 = vmul.f32 0.0051020407, %v17695_v47 }
 0x895   : > { %v7781_v61 = vmul.f32 %v7613_v20, %v7613_v20 }
 0x898   : > { %7501 = vadd.xlane.f32.xlu1 %v7500_v13  ;;  %v17699_v13 = vld [vmem:[#allocation13_spill] sm:$0xff] }
 0x899   : > { %v9062_v11 = vmul.f32 %v8707_v33, %v17699_v13  ;;  %v7865_v33 = vsub.f32 %v7697_v36, %v7781_v61  ;;  %v17710_v36 = vld [vmem:[#allocation86_spill] sm:$0xff] }
 0x8a9   : > { %9289 = vperm.xlu1 %10553, %v8535_v41   ;;  %9304 = vperm.xlu0 %10552, %v8538_v50   ;;  %v17701_v41 = vld [vmem:[#allocation216_spill] sm:$0xff] }
 0x8aa   : > { %v7616_v50 = vmul.f32 0.0051020407, %v17701_v41 }
 0x8ac   : > { %v7784_v27 = vmul.f32 %v7616_v50, %v7616_v50 }
 0x8b2   : > { %v15527_v48 = vpop.xlane.xlu0 %7505 }
 0x8b3   : > { %17694 = vst [vmem:[#allocation133_spill] sm:$0xff] %v15527_v48  ;;  %v17702_v48 = vld [vmem:[#allocation92_spill] sm:$0xff] }
 0x8b4   : > { %v6211_v6 = vadd.f32 %v14794_v55, %v17702_v48 }
 0x8b6   : > { %v15546_v13 = vadd.f32 %v14798_v51, %v6211_v6  ;;  %v7003_v51 = vsel %vm6750_vm1, %v17709_v46, 0.0  ;;  %v8201_v6 = vld [vmem:[%s14510_s19 + $0xb0] sm:$0xff] }
 0x8b7   : > { %v15525_v24 = vpop.xlane.xlu1 %7493  ;;  %v7004_v41 = vadd.f32 %v7003_v51, %v17710_v36 }
 0x8b8   : > { %17704 = vst [vmem:[#allocation132_spill] sm:$0xff] %v15546_v13 }
 0x8ba   : > { %v9295_v15 = vpop.permute.xlu0 %9294 }
 0x8bb   : > { %v9280_v44 = vpop.permute.xlu1 %9279  ;;  %v9649_v14 = vadd.f32 %v9295_v15, %v9061_v57  ;;  %v9650_v54 = vadd.f32 %v9295_v15, %v9062_v11  ;;  %v7949_v15 = vmax.f32 %v7865_v33, 0.0  ;;  %v17707_v57 = vld [vmem:[#allocation231_spill] sm:$0xff] }
 0x8bc   : > { %v9643_v62 = vadd.f32 %v9280_v44, %v9055_v25  ;;  %v9644_v47 = vadd.f32 %v9280_v44, %v9056_v16  ;;  %v7868_v25 = vsub.f32 %v7700_v17, %v7784_v27  ;;  %v17705_v16 = vld [vmem:[#allocation91_spill] sm:$0xff]  ;;  %v17706_v44 = vld [vmem:[#allocation228_spill] sm:$0xff] }
 0x8bd   : > { %9817 = vst [vmem:[%s14990_s26 + $0x150] sm:$0xff] %v9649_v14  ;;  %9818 = vst.msk [vmem:[%s14990_s26 + $0x158] sm:$0xff] %vm6750_vm1, %v9650_v54  ;;  %v6209_v55 = vadd.f32 %v17706_v44, %v17705_v16  ;;  %v8033_v54 = vadd.f32 1e-05, %v7949_v15  ;;  %v7214_v16 = vmul.f32 %v17709_v46, %v17709_v46 }
 0x8be   : > { %9811 = vst [vmem:[%s14990_s26 + $0x120] sm:$0xff] %v9643_v62  ;;  %9812 = vst.msk [vmem:[%s14990_s26 + $0x128] sm:$0xff] %vm6750_vm1, %v9644_v47  ;;  %v7015_v62 = vsel %vm6750_vm1, %v15546_v13, 0.0  ;;  %v7952_v48 = vmax.f32 %v7868_v25, 0.0  ;;  %v7220_v25 = vmul.f32 %v15546_v13, %v15546_v13 }
 0x8bf   : > { %v15553_v14 = vadd.f32 %v17707_v57, %v6209_v55  ;;  %11272 = vrsqrt.f32 %v8033_v54 }
 0x8c0   : > { %v8036_v17 = vadd.f32 1e-05, %v7952_v48  ;;  %v7519_v44 = vsel %vm6750_vm1, %v7220_v25, 0.0  ;;  %v7213_v48 = vmul.f32 %v17710_v36, %v17710_v36 }
 0x8c1   : > { %17708 = vst [vmem:[#allocation139_spill] sm:$0xff] %v15553_v14  ;;  %v7016_v11 = vadd.f32 %v7015_v62, %v15553_v14  ;;  %v7219_v55 = vmul.f32 %v15553_v14, %v15553_v14  ;;  %v7507_v62 = vsel %vm6750_vm1, %v7214_v16, 0.0 }
 0x8c2   : > { %11274 = vrsqrt.f32 %v8036_v17  ;;  %v7508_v57 = vadd.f32 %v7507_v62, %v7213_v48  ;;  %v8372_v17 = vld [vmem:[%s14545_s22 + $0xc8] sm:$0xff]  ;;  %v17716_v62 = vld [vmem:[#allocation16_spill] sm:$0xff] }
 0x8c3   : > { %v7520_v15 = vadd.f32 %v7519_v44, %v7219_v55  ;;  %v17713_v55 = vld [vmem:[#allocation211_spill] sm:$0xff] }
 0x8c8   : > { %7017 = vadd.xlane.f32.xlu0 %v7016_v11  ;;  %v8369_v11 = vld [vmem:[%s14545_s22 + $0xb0] sm:$0xff] }
 0x8cc   : > { %v11273_v47 = vpop.eup %11272 }
 0x8cd   : > { %7005 = vadd.xlane.f32.xlu1 %v7004_v41  ;;  %v8285_v33 = vmul.f32 %v11273_v47, %v8201_v6 }
 0x8cf   : > { %v11275_v61 = vpop.eup %11274  ;;  %v8453_v54 = vmul.f32 %v8285_v33, %v7613_v20  ;;  %v17714_v20 = vld [vmem:[#allocation11_spill] sm:$0xff] }
 0x8d0   : > { %v8288_v27 = vmul.f32 %v11275_v61, %v8204_v10 }
 0x8d1   : > { %v8537_v41 = vsub.f32 %v8369_v11, %v8453_v54 }
 0x8d2   : > { %v8456_v51 = vmul.f32 %v8288_v27, %v7616_v50 }
 0x8d4   : > { %v8540_v47 = vsub.f32 %v8372_v17, %v8456_v51  ;;  %v17718_v51 = vld [vmem:[#allocation213_spill] sm:$0xff] }
 0x8d5   : > { %v7699_v17 = vmul.f32 0.0051020407, %v17718_v51 }
 0x8de   : > { %8711 = vperm.xlu1 %10553, %v8285_v33   ;;  %8726 = vperm.xlu0 %10552, %v8288_v27   ;;  %v17715_v33 = vld [vmem:[#allocation10_spill] sm:$0xff] }
 0x8e7   : > { %v15575_v61 = vpop.xlane.xlu0 %7009 }
 0x8e8   : > { %17711 = vst [vmem:[#allocation138_spill] sm:$0xff] %v15575_v61  ;;  %v17721_v61 = vld [vmem:[#allocation52_spill] sm:$0xff] }
 0x8ec   : > { %v15573_v6 = vpop.xlane.xlu1 %6997 }
 0x8ef   : > { %v8717_v25 = vpop.permute.xlu0 %8716 }
 0x8f0   : > { %v8702_v10 = vpop.permute.xlu1 %8701  ;;  %v9065_v48 = vmul.f32 %v8717_v25, %v17716_v62 }
 0x8f1   : > { %v9059_v50 = vmul.f32 %v8702_v10, %v17714_v20  ;;  %v9060_v27 = vmul.f32 %v8702_v10, %v17715_v33  ;;  %v17722_v33 = vld [vmem:[#allocation89_spill] sm:$0xff] }
 0x8f2   : > { %v7702_v59 = vmul.f32 0.0051020407, %v17722_v33  ;;  %v8203_v33 = vld [vmem:[%s14510_s19 + $0xc0] sm:$0xff] }
 0x8fd   : > { %7521 = vadd.xlane.f32.xlu0 %v7520_v15  ;;  %v7615_v15 = vmul.f32 0.0051020407, %v17713_v55 }
 0x8ff   : > { %v7783_v10 = vmul.f32 %v7615_v15, %v7615_v15 }
 0x902   : > { %7509 = vadd.xlane.f32.xlu1 %v7508_v57  ;;  %v17717_v57 = vld [vmem:[#allocation17_spill] sm:$0xff] }
 0x903   : > { %v9066_v54 = vmul.f32 %v8717_v25, %v17717_v57  ;;  %v7867_v25 = vsub.f32 %v7699_v17, %v7783_v10  ;;  %v17723_v57 = vld [vmem:[#allocation241_spill] sm:$0xff] }
 0x904   : > { %v17729_v17 = vld [vmem:[#allocation229_spill] sm:$0xff] }
 0x913   : > { %9299 = vperm.xlu1 %10553, %v8537_v41   ;;  %9314 = vperm.xlu0 %10552, %v8540_v47   ;;  %v17719_v41 = vld [vmem:[#allocation224_spill] sm:$0xff] }
 0x914   : > { %v7618_v47 = vmul.f32 0.0051020407, %v17719_v41  ;;  %v7011_v41 = vsel %vm6750_vm1, %v17729_v17, 0.0 }
 0x916   : > { %v7786_v62 = vmul.f32 %v7618_v47, %v7618_v47 }
 0x91c   : > { %v15579_v44 = vpop.xlane.xlu0 %7513 }
 0x91d   : > { %17712 = vst [vmem:[#allocation167_spill] sm:$0xff] %v15579_v44  ;;  %v17720_v44 = vld [vmem:[#allocation94_spill] sm:$0xff] }
 0x91e   : > { %v6221_v20 = vadd.f32 %v17721_v61, %v17720_v44 }
 0x920   : > { %v15598_v51 = vadd.f32 %v17723_v57, %v6221_v20 }
 0x921   : > { %v15577_v16 = vpop.xlane.xlu1 %7501 }
 0x922   : > { %17724 = vst [vmem:[#allocation176_spill] sm:$0xff] %v15598_v51 }
 0x924   : > { %v9305_v13 = vpop.permute.xlu0 %9304 }
 0x925   : > { %v9290_v11 = vpop.permute.xlu1 %9289  ;;  %v9653_v46 = vadd.f32 %v9305_v13, %v9065_v48  ;;  %v9654_v36 = vadd.f32 %v9305_v13, %v9066_v54  ;;  %v7951_v13 = vmax.f32 %v7867_v25, 0.0  ;;  %v17727_v48 = vld [vmem:[#allocation239_spill] sm:$0xff] }
 0x926   : > { %v9647_v14 = vadd.f32 %v9290_v11, %v9059_v50  ;;  %v9648_v55 = vadd.f32 %v9290_v11, %v9060_v27  ;;  %v7870_v50 = vsub.f32 %v7702_v59, %v7786_v62  ;;  %v17725_v27 = vld [vmem:[#allocation93_spill] sm:$0xff]  ;;  %v17726_v11 = vld [vmem:[#allocation236_spill] sm:$0xff] }
 0x927   : > { %9821 = vst [vmem:[%s14990_s26 + $0x170] sm:$0xff] %v9653_v46  ;;  %9822 = vst.msk [vmem:[%s14990_s26 + $0x178] sm:$0xff] %vm6750_vm1, %v9654_v36  ;;  %v6219_v61 = vadd.f32 %v17726_v11, %v17725_v27  ;;  %v8035_v36 = vadd.f32 1e-05, %v7951_v13  ;;  %v8206_v62 = vld [vmem:[%s14510_s19 + $0xd8] sm:$0xff]  ;;  %v7224_v27 = vmul.f32 %v15598_v51, %v15598_v51  ;;  %v7218_v11 = vmul.f32 %v17729_v17, %v17729_v17 }
 0x928   : > { %9815 = vst [vmem:[%s14990_s26 + $0x140] sm:$0xff] %v9647_v14  ;;  %9816 = vst.msk [vmem:[%s14990_s26 + $0x148] sm:$0xff] %vm6750_vm1, %v9648_v55  ;;  %v7023_v14 = vsel %vm6750_vm1, %v15598_v51, 0.0  ;;  %v7954_v44 = vmax.f32 %v7870_v50, 0.0  ;;  %v17730_v55 = vld [vmem:[#allocation90_spill] sm:$0xff] }
 0x929   : > { %v15605_v46 = vadd.f32 %v17727_v48, %v6219_v61  ;;  %v7012_v20 = vadd.f32 %v7011_v41, %v17730_v55  ;;  %11276 = vrsqrt.f32 %v8035_v36  ;;  %v7527_v61 = vsel %vm6750_vm1, %v7224_v27, 0.0  ;;  %v8371_v41 = vld [vmem:[%s14545_s22 + $0xc0] sm:$0xff] }
 0x92a   : > { %v8038_v59 = vadd.f32 1e-05, %v7954_v44  ;;  %v7515_v44 = vsel %vm6750_vm1, %v7218_v11, 0.0  ;;  %v7217_v48 = vmul.f32 %v17730_v55, %v17730_v55 }
 0x92b   : > { %17728 = vst [vmem:[#allocation68_spill] sm:$0xff] %v15605_v46  ;;  %v7024_v54 = vadd.f32 %v7023_v14, %v15605_v46  ;;  %v7223_v13 = vmul.f32 %v15605_v46, %v15605_v46 }
 0x92c   : > { %11278 = vrsqrt.f32 %v8038_v59  ;;  %v7516_v36 = vadd.f32 %v7515_v44, %v7217_v48  ;;  %v17736_v48 = vld [vmem:[#allocation20_spill] sm:$0xff] }
 0x92d   : > { %v7528_v14 = vadd.f32 %v7527_v61, %v7223_v13 }
 0x932   : > { %7025 = vadd.xlane.f32.xlu0 %v7024_v54 }
 0x936   : > { %v11277_v10 = vpop.eup %11276 }
 0x937   : > { %7013 = vadd.xlane.f32.xlu1 %v7012_v20  ;;  %v8287_v57 = vmul.f32 %v11277_v10, %v8203_v33  ;;  %v8374_v20 = vld [vmem:[%s14545_s22 + $0xd8] sm:$0xff] }
 0x939   : > { %v11279_v25 = vpop.eup %11278  ;;  %v8455_v54 = vmul.f32 %v8287_v57, %v7615_v15  ;;  %v17734_v15 = vld [vmem:[#allocation15_spill] sm:$0xff] }
 0x93a   : > { %v8290_v50 = vmul.f32 %v11279_v25, %v8206_v62 }
 0x93b   : > { %v8539_v10 = vsub.f32 %v8371_v41, %v8455_v54  ;;  %v17737_v54 = vld [vmem:[#allocation21_spill] sm:$0xff] }
 0x93c   : > { %v8458_v59 = vmul.f32 %v8290_v50, %v7618_v47 }
 0x93e   : > { %v8542_v33 = vsub.f32 %v8374_v20, %v8458_v59  ;;  %v17738_v20 = vld [vmem:[#allocation221_spill] sm:$0xff] }
 0x948   : > { %8721 = vperm.xlu1 %10553, %v8287_v57   ;;  %8736 = vperm.xlu0 %10552, %v8290_v50   ;;  %v17735_v57 = vld [vmem:[#allocation14_spill] sm:$0xff] }
 0x951   : > { %v15627_v62 = vpop.xlane.xlu0 %7017 }
 0x952   : > { %17731 = vst [vmem:[#allocation193_spill] sm:$0xff] %v15627_v62  ;;  %v17740_v62 = vld [vmem:[#allocation97_spill] sm:$0xff] }
 0x956   : > { %v15625_v25 = vpop.xlane.xlu1 %7005 }
 0x959   : > { %v8727_v11 = vpop.permute.xlu0 %8726 }
 0x95a   : > { %v8712_v27 = vpop.permute.xlu1 %8711  ;;  %v9070_v41 = vmul.f32 %v8727_v11, %v17737_v54 }
 0x95b   : > { %v9063_v47 = vmul.f32 %v8712_v27, %v17734_v15  ;;  %v9064_v50 = vmul.f32 %v8712_v27, %v17735_v57  ;;  %v6231_v15 = vadd.f32 %v14853_v49, %v17740_v62  ;;  %v17741_v57 = vld [vmem:[#allocation233_spill] sm:$0xff] }
 0x95c   : > { %v7704_v0 = vmul.f32 0.0051020407, %v17741_v57  ;;  %v8208_v57 = vld [vmem:[%s14510_s19 + $0xe8] sm:$0xff] }
 0x95d   : > { %v15650_v54 = vadd.f32 %v14864_v4, %v6231_v15  ;;  %v8205_v15 = vld [vmem:[%s14510_s19 + $0xd0] sm:$0xff] }
 0x95f   : > { %17742 = vst [vmem:[#allocation195_spill] sm:$0xff] %v15650_v54  ;;  %v7031_v62 = vsel %vm6750_vm1, %v15650_v54, 0.0 }
 0x967   : > { %7529 = vadd.xlane.f32.xlu0 %v7528_v14  ;;  %v17733_v14 = vld [vmem:[#allocation219_spill] sm:$0xff] }
 0x968   : > { %v7617_v44 = vmul.f32 0.0051020407, %v17733_v14 }
 0x96a   : > { %v7785_v27 = vmul.f32 %v7617_v44, %v7617_v44 }
 0x96c   : > { %7517 = vadd.xlane.f32.xlu1 %v7516_v36  ;;  %v9069_v36 = vmul.f32 %v8727_v11, %v17736_v48 }
 0x97d   : > { %9309 = vperm.xlu1 %10553, %v8539_v10   ;;  %9324 = vperm.xlu0 %10552, %v8542_v33   ;;  %v7701_v10 = vmul.f32 0.0051020407, %v17738_v20  ;;  %v17739_v33 = vld [vmem:[#allocation230_spill] sm:$0xff]  ;;  %v17747_v20 = vld [vmem:[#allocation237_spill] sm:$0xff] }
 0x97e   : > { %v7620_v51 = vmul.f32 0.0051020407, %v17739_v33  ;;  %v7019_v4 = vsel %vm6750_vm1, %v17747_v20, 0.0 }
 0x97f   : > { %v7869_v11 = vsub.f32 %v7701_v10, %v7785_v27  ;;  %v17748_v10 = vld [vmem:[#allocation234_spill] sm:$0xff] }
 0x980   : > { %v7788_v48 = vmul.f32 %v7620_v51, %v7620_v51  ;;  %v7020_v33 = vadd.f32 %v7019_v4, %v17748_v10 }
 0x986   : > { %v15631_v13 = vpop.xlane.xlu0 %7521 }
 0x987   : > { %17732 = vst [vmem:[#allocation61_spill] sm:$0xff] %v15631_v13 }
 0x98b   : > { %v15629_v61 = vpop.xlane.xlu1 %7509 }
 0x98e   : > { %v9315_v46 = vpop.permute.xlu0 %9314 }
 0x98f   : > { %v9300_v59 = vpop.permute.xlu1 %9299  ;;  %v9657_v17 = vadd.f32 %v9315_v46, %v9069_v36  ;;  %v9658_v55 = vadd.f32 %v9315_v46, %v9070_v41  ;;  %v7953_v46 = vmax.f32 %v7869_v11, 0.0  ;;  %v17745_v36 = vld [vmem:[#allocation247_spill] sm:$0xff] }
 0x990   : > { %v9651_v13 = vadd.f32 %v9300_v59, %v9063_v47  ;;  %v9652_v14 = vadd.f32 %v9300_v59, %v9064_v50  ;;  %v7872_v47 = vsub.f32 %v7704_v0, %v7788_v48  ;;  %v17743_v50 = vld [vmem:[#allocation96_spill] sm:$0xff] }
 0x991   : > { %9825 = vst [vmem:[%s14990_s26 + $0x190] sm:$0xff] %v9657_v17  ;;  %9826 = vst.msk [vmem:[%s14990_s26 + $0x198] sm:$0xff] %vm6750_vm1, %v9658_v55  ;;  %v17744_v59 = vld [vmem:[#allocation244_spill] sm:$0xff]  ;;  %v8037_v55 = vadd.f32 1e-05, %v7953_v46 }
 0x992   : > { %9819 = vst [vmem:[%s14990_s26 + $0x160] sm:$0xff] %v9651_v13  ;;  %9820 = vst.msk [vmem:[%s14990_s26 + $0x168] sm:$0xff] %vm6750_vm1, %v9652_v14  ;;  %v6229_v49 = vadd.f32 %v17744_v59, %v17743_v50  ;;  %v7956_v13 = vmax.f32 %v7872_v47, 0.0  ;;  %v7228_v47 = vmul.f32 %v15650_v54, %v15650_v54  ;;  %v7222_v50 = vmul.f32 %v17747_v20, %v17747_v20 }
 0x993   : > { %11280 = vrsqrt.f32 %v8037_v55 }
 0x994   : > { %v15657_v17 = vadd.f32 %v17745_v36, %v6229_v49  ;;  %v8040_v0 = vadd.f32 1e-05, %v7956_v13  ;;  %v7535_v59 = vsel %vm6750_vm1, %v7228_v47, 0.0  ;;  %v7221_v13 = vmul.f32 %v17748_v10, %v17748_v10 }
 0x996   : > { %17746 = vst [vmem:[#allocation67_spill] sm:$0xff] %v15657_v17  ;;  %v7032_v41 = vadd.f32 %v7031_v62, %v15657_v17  ;;  %11282 = vrsqrt.f32 %v8040_v0  ;;  %v7227_v49 = vmul.f32 %v15657_v17, %v15657_v17  ;;  %v7523_v62 = vsel %vm6750_vm1, %v7222_v50, 0.0  ;;  %v8376_v0 = vld [vmem:[%s14545_s22 + $0xe8] sm:$0xff] }
 0x997   : > { %v7524_v36 = vadd.f32 %v7523_v62, %v7221_v13  ;;  %v17754_v62 = vld [vmem:[#allocation24_spill] sm:$0xff] }
 0x998   : > { %v7536_v46 = vadd.f32 %v7535_v59, %v7227_v49  ;;  %v17751_v49 = vld [vmem:[#allocation226_spill] sm:$0xff] }
 0x99c   : > { %7033 = vadd.xlane.f32.xlu0 %v7032_v41  ;;  %v8373_v41 = vld [vmem:[%s14545_s22 + $0xd0] sm:$0xff] }
 0x9a0   : > { %v11281_v14 = vpop.eup %11280 }
 0x9a1   : > { %7021 = vadd.xlane.f32.xlu1 %v7020_v33  ;;  %v8289_v11 = vmul.f32 %v11281_v14, %v8205_v15 }
 0x9a3   : > { %v11283_v27 = vpop.eup %11282  ;;  %v8457_v55 = vmul.f32 %v8289_v11, %v7617_v44  ;;  %v17752_v44 = vld [vmem:[#allocation19_spill] sm:$0xff] }
 0x9a4   : > { %v8292_v48 = vmul.f32 %v11283_v27, %v8208_v57 }
 0x9a5   : > { %v8541_v33 = vsub.f32 %v8373_v41, %v8457_v55 }
 0x9a6   : > { %v8460_v4 = vmul.f32 %v8292_v48, %v7620_v51 }
 0x9a8   : > { %v8544_v14 = vsub.f32 %v8376_v0, %v8460_v4  ;;  %v17756_v4 = vld [vmem:[#allocation227_spill] sm:$0xff] }
 0x9a9   : > { %v7703_v0 = vmul.f32 0.0051020407, %v17756_v4 }
 0x9b2   : > { %8731 = vperm.xlu1 %10553, %v8289_v11   ;;  %8746 = vperm.xlu0 %10552, %v8292_v48   ;;  %v17753_v11 = vld [vmem:[#allocation18_spill] sm:$0xff] }
 0x9bb   : > { %v15679_v27 = vpop.xlane.xlu0 %7025 }
 0x9bc   : > { %17749 = vst [vmem:[#allocation190_spill] sm:$0xff] %v15679_v27 }
 0x9c0   : > { %v15677_v15 = vpop.xlane.xlu1 %7013 }
 0x9c3   : > { %v8737_v47 = vpop.permute.xlu0 %8736 }
 0x9c4   : > { %v8722_v57 = vpop.permute.xlu1 %8721  ;;  %v9073_v13 = vmul.f32 %v8737_v47, %v17754_v62 }
 0x9c5   : > { %v9067_v51 = vmul.f32 %v8722_v57, %v17752_v44  ;;  %v9068_v48 = vmul.f32 %v8722_v57, %v17753_v11  ;;  %v17759_v11 = vld [vmem:[#allocation242_spill] sm:$0xff] }
 0x9c6   : > { %v7706_v10 = vmul.f32 0.0051020407, %v17759_v11 }
 0x9d1   : > { %7537 = vadd.xlane.f32.xlu0 %v7536_v46  ;;  %v7619_v46 = vmul.f32 0.0051020407, %v17751_v49 }
 0x9d3   : > { %v7787_v57 = vmul.f32 %v7619_v46, %v7619_v46 }
 0x9d6   : > { %7525 = vadd.xlane.f32.xlu1 %v7524_v36  ;;  %v17755_v36 = vld [vmem:[#allocation25_spill] sm:$0xff] }
 0x9d7   : > { %v9074_v55 = vmul.f32 %v8737_v47, %v17755_v36  ;;  %v7871_v47 = vsub.f32 %v7703_v0, %v7787_v57  ;;  %v8207_v0 = vld [vmem:[%s14510_s19 + $0xe0] sm:$0xff] }
 0x9e7   : > { %9319 = vperm.xlu1 %10553, %v8541_v33   ;;  %9334 = vperm.xlu0 %10552, %v8544_v14   ;;  %v17757_v33 = vld [vmem:[#allocation238_spill] sm:$0xff] }
 0x9e8   : > { %v7622_v14 = vmul.f32 0.0051020407, %v17757_v33 }
 0x9ea   : > { %v7790_v62 = vmul.f32 %v7622_v14, %v7622_v14 }
 0x9f0   : > { %v15683_v59 = vpop.xlane.xlu0 %7529 }
 0x9f1   : > { %17750 = vst [vmem:[#allocation192_spill] sm:$0xff] %v15683_v59  ;;  %v17758_v59 = vld [vmem:[#allocation101_spill] sm:$0xff] }
 0x9f2   : > { %v6241_v44 = vadd.f32 %v14889_v2, %v17758_v59 }
 0x9f4   : > { %v15702_v36 = vadd.f32 %v14893_v28, %v6241_v44 }
 0x9f5   : > { %v15681_v50 = vpop.xlane.xlu1 %7517 }
 0x9f6   : > { %17760 = vst [vmem:[#allocation170_spill] sm:$0xff] %v15702_v36  ;;  %v7232_v57 = vmul.f32 %v15702_v36, %v15702_v36 }
 0x9f8   : > { %v9325_v54 = vpop.permute.xlu0 %9324 }
 0x9f9   : > { %v9310_v41 = vpop.permute.xlu1 %9309  ;;  %v9661_v27 = vadd.f32 %v9325_v54, %v9073_v13  ;;  %v9662_v20 = vadd.f32 %v9325_v54, %v9074_v55  ;;  %v7955_v54 = vmax.f32 %v7871_v47, 0.0  ;;  %v17763_v55 = vld [vmem:[#allocation245_spill] sm:$0xff]  ;;  %v7543_v47 = vsel %vm6750_vm1, %v7232_v57, 0.0 }
 0x9fa   : > { %v9655_v17 = vadd.f32 %v9310_v41, %v9067_v51  ;;  %v9656_v49 = vadd.f32 %v9310_v41, %v9068_v48  ;;  %v7874_v51 = vsub.f32 %v7706_v10, %v7790_v62  ;;  %v17761_v48 = vld [vmem:[#allocation100_spill] sm:$0xff]  ;;  %v7027_v28 = vsel %vm6750_vm1, %v17763_v55, 0.0  ;;  %v17764_v41 = vld [vmem:[#allocation51_spill] sm:$0xff] }
 0x9fb   : > { %9829 = vst [vmem:[%s14990_s26 + $0x1b0] sm:$0xff] %v9661_v27  ;;  %9830 = vst.msk [vmem:[%s14990_s26 + $0x1b8] sm:$0xff] %vm6750_vm1, %v9662_v20  ;;  %v6239_v2 = vadd.f32 %v14881_v18, %v17761_v48  ;;  %v8039_v20 = vadd.f32 1e-05, %v7955_v54  ;;  %v7028_v4 = vadd.f32 %v7027_v28, %v17764_v41  ;;  %v7226_v11 = vmul.f32 %v17763_v55, %v17763_v55 }
 0x9fc   : > { %9823 = vst [vmem:[%s14990_s26 + $0x180] sm:$0xff] %v9655_v17  ;;  %9824 = vst.msk [vmem:[%s14990_s26 + $0x188] sm:$0xff] %vm6750_vm1, %v9656_v49  ;;  %v7039_v17 = vsel %vm6750_vm1, %v15702_v36, 0.0  ;;  %v7958_v59 = vmax.f32 %v7874_v51, 0.0  ;;  %v8210_v49 = vld [vmem:[%s14510_s19 + $0xf8] sm:$0xff] }
 0x9fd   : > { %v15709_v27 = vadd.f32 %v14887_v8, %v6239_v2  ;;  %11284 = vrsqrt.f32 %v8039_v20  ;;  %v7531_v48 = vsel %vm6750_vm1, %v7226_v11, 0.0  ;;  %v7225_v2 = vmul.f32 %v17764_v41, %v17764_v41  ;;  %v17767_v11 = vld [vmem:[#allocation232_spill] sm:$0xff]  ;;  %v17774_v36 = vld [vmem:[#allocation105_spill] sm:$0xff] }
 0x9fe   : > { %v8042_v10 = vadd.f32 1e-05, %v7958_v59  ;;  %v8375_v59 = vld [vmem:[%s14545_s22 + $0xe0] sm:$0xff] }
 0x9ff   : > { %17762 = vst [vmem:[#allocation137_spill] sm:$0xff] %v15709_v27  ;;  %v7040_v13 = vadd.f32 %v7039_v17, %v15709_v27  ;;  %v7231_v62 = vmul.f32 %v15709_v27, %v15709_v27  ;;  %v7532_v54 = vadd.f32 %v7531_v48, %v7225_v2  ;;  %v17771_v48 = vld [vmem:[#allocation29_spill] sm:$0xff]  ;;  %v17775_v27 = vld [vmem:[#allocation259_spill] sm:$0xff] }
 0xa00   : > { %11286 = vrsqrt.f32 %v8042_v10 }
 0xa01   : > { %v7544_v51 = vadd.f32 %v7543_v47, %v7231_v62  ;;  %v7621_v47 = vmul.f32 0.0051020407, %v17767_v11  ;;  %v17770_v62 = vld [vmem:[#allocation28_spill] sm:$0xff] }
 0xa06   : > { %7041 = vadd.xlane.f32.xlu0 %v7040_v13  ;;  %v8378_v13 = vld [vmem:[%s14545_s22 + $0xf8] sm:$0xff] }
 0xa0a   : > { %v11285_v18 = vpop.eup %11284 }
 0xa0b   : > { %7029 = vadd.xlane.f32.xlu1 %v7028_v4  ;;  %v8291_v8 = vmul.f32 %v11285_v18, %v8207_v0 }
 0xa0d   : > { %v11287_v33 = vpop.eup %11286  ;;  %v8459_v17 = vmul.f32 %v8291_v8, %v7619_v46  ;;  %v17768_v46 = vld [vmem:[#allocation23_spill] sm:$0xff] }
 0xa0e   : > { %v8294_v44 = vmul.f32 %v11287_v33, %v8210_v49 }
 0xa0f   : > { %v8543_v28 = vsub.f32 %v8375_v59, %v8459_v17  ;;  %v17772_v17 = vld [vmem:[#allocation235_spill] sm:$0xff] }
 0xa10   : > { %v8462_v20 = vmul.f32 %v8294_v44, %v7622_v14  ;;  %v7705_v59 = vmul.f32 0.0051020407, %v17772_v17 }
 0xa12   : > { %v8546_v10 = vsub.f32 %v8378_v13, %v8462_v20  ;;  %v17773_v20 = vld [vmem:[#allocation246_spill] sm:$0xff] }
 0xa13   : > { %v7624_v13 = vmul.f32 0.0051020407, %v17773_v20  ;;  %v17781_v20 = vld [vmem:[#allocation258_spill] sm:$0xff] }
 0xa1c   : > { %8741 = vperm.xlu1 %10553, %v8291_v8   ;;  %8756 = vperm.xlu0 %10552, %v8294_v44   ;;  %v17769_v8 = vld [vmem:[#allocation22_spill] sm:$0xff] }
 0xa25   : > { %v15731_v18 = vpop.xlane.xlu0 %7033 }
 0xa26   : > { %17765 = vst [vmem:[#allocation136_spill] sm:$0xff] %v15731_v18 }
 0xa2a   : > { %v15729_v4 = vpop.xlane.xlu1 %7021 }
 0xa2d   : > { %v8747_v33 = vpop.permute.xlu0 %8746 }
 0xa2e   : > { %v8732_v0 = vpop.permute.xlu1 %8731  ;;  %v9078_v2 = vmul.f32 %v8747_v33, %v17771_v48  ;;  %v17777_v48 = vld [vmem:[#allocation260_spill] sm:$0xff] }
 0xa2f   : > { %v9071_v14 = vmul.f32 %v8732_v0, %v17768_v46  ;;  %v9072_v44 = vmul.f32 %v8732_v0, %v17769_v8  ;;  %v6251_v46 = vadd.f32 %v17775_v27, %v17774_v36  ;;  %v7789_v0 = vmul.f32 %v7621_v47, %v7621_v47  ;;  %v17776_v8 = vld [vmem:[#allocation98_spill] sm:$0xff] }
 0xa30   : > { %v7708_v55 = vmul.f32 0.0051020407, %v17776_v8  ;;  %v8209_v8 = vld [vmem:[%s14510_s19 + $0xf0] sm:$0xff] }
 0xa31   : > { %v15754_v17 = vadd.f32 %v17777_v48, %v6251_v46 }
 0xa33   : > { %17778 = vst [vmem:[#allocation142_spill] sm:$0xff] %v15754_v17 }
 0xa3b   : > { %7545 = vadd.xlane.f32.xlu0 %v7544_v51  ;;  %v9077_v51 = vmul.f32 %v8747_v33, %v17770_v62  ;;  %v7873_v33 = vsub.f32 %v7705_v59, %v7789_v0  ;;  %v7792_v62 = vmul.f32 %v7624_v13, %v7624_v13 }
 0xa3d   : > { %v7957_v27 = vmax.f32 %v7873_v33, 0.0 }
 0xa40   : > { %7533 = vadd.xlane.f32.xlu1 %v7532_v54 }
 0xa51   : > { %9329 = vperm.xlu1 %10553, %v8543_v28   ;;  %9344 = vperm.xlu0 %10552, %v8546_v10  }
 0xa5a   : > { %v15735_v57 = vpop.xlane.xlu0 %7537 }
 0xa5b   : > { %17766 = vst [vmem:[#allocation143_spill] sm:$0xff] %v15735_v57 }
 0xa5f   : > { %v15733_v49 = vpop.xlane.xlu1 %7525 }
 0xa62   : > { %v9335_v28 = vpop.permute.xlu0 %9334 }
 0xa63   : > { %v9320_v54 = vpop.permute.xlu1 %9319  ;;  %v9665_v57 = vadd.f32 %v9335_v28, %v9077_v51  ;;  %v9666_v18 = vadd.f32 %v9335_v28, %v9078_v2  ;;  %v7047_v51 = vsel %vm6750_vm1, %v15754_v17, 0.0  ;;  %v17783_v28 = vld [vmem:[#allocation251_spill] sm:$0xff] }
 0xa64   : > { %v9659_v10 = vadd.f32 %v9320_v54, %v9071_v14  ;;  %v9660_v11 = vadd.f32 %v9320_v54, %v9072_v44  ;;  %v7876_v14 = vsub.f32 %v7708_v55, %v7792_v62  ;;  %v17779_v44 = vld [vmem:[#allocation104_spill] sm:$0xff]  ;;  %v17780_v54 = vld [vmem:[#allocation255_spill] sm:$0xff] }
 0xa65   : > { %9833 = vst [vmem:[%s14990_s26 + $0x1d0] sm:$0xff] %v9665_v57  ;;  %9834 = vst.msk [vmem:[%s14990_s26 + $0x1d8] sm:$0xff] %vm6750_vm1, %v9666_v18  ;;  %v6249_v36 = vadd.f32 %v17780_v54, %v17779_v44  ;;  %v8041_v18 = vadd.f32 1e-05, %v7957_v27  ;;  %v8212_v62 = vld [vmem:[%s14510_s19 + $0x108] sm:$0xff]  ;;  %v7236_v44 = vmul.f32 %v15754_v17, %v15754_v17  ;;  %v7230_v54 = vmul.f32 %v17783_v28, %v17783_v28 }
 0xa66   : > { %9827 = vst [vmem:[%s14990_s26 + $0x1a0] sm:$0xff] %v9659_v10  ;;  %9828 = vst.msk [vmem:[%s14990_s26 + $0x1a8] sm:$0xff] %vm6750_vm1, %v9660_v11  ;;  %v7960_v2 = vmax.f32 %v7876_v14, 0.0  ;;  %v7035_v10 = vsel %vm6750_vm1, %v17783_v28, 0.0  ;;  %v17784_v11 = vld [vmem:[#allocation99_spill] sm:$0xff] }
 0xa67   : > { %v15761_v57 = vadd.f32 %v17781_v20, %v6249_v36  ;;  %v7036_v46 = vadd.f32 %v7035_v10, %v17784_v11  ;;  %11288 = vrsqrt.f32 %v8041_v18  ;;  %v7551_v36 = vsel %vm6750_vm1, %v7236_v44, 0.0  ;;  %v8377_v10 = vld [vmem:[%s14545_s22 + $0xf0] sm:$0xff] }
 0xa68   : > { %v8044_v55 = vadd.f32 1e-05, %v7960_v2  ;;  %v7539_v2 = vsel %vm6750_vm1, %v7230_v54, 0.0  ;;  %v7229_v20 = vmul.f32 %v17784_v11, %v17784_v11 }
 0xa69   : > { %17782 = vst [vmem:[#allocation173_spill] sm:$0xff] %v15761_v57  ;;  %v7048_v59 = vadd.f32 %v7047_v51, %v15761_v57  ;;  %v7235_v27 = vmul.f32 %v15761_v57, %v15761_v57 }
 0xa6a   : > { %11290 = vrsqrt.f32 %v8044_v55  ;;  %v7540_v18 = vadd.f32 %v7539_v2, %v7229_v20  ;;  %v17790_v20 = vld [vmem:[#allocation32_spill] sm:$0xff] }
 0xa6b   : > { %v7552_v51 = vadd.f32 %v7551_v36, %v7235_v27 }
 0xa70   : > { %7049 = vadd.xlane.f32.xlu0 %v7048_v59 }
 0xa74   : > { %v11289_v0 = vpop.eup %11288 }
 0xa75   : > { %7037 = vadd.xlane.f32.xlu1 %v7036_v46  ;;  %v8293_v48 = vmul.f32 %v11289_v0, %v8209_v8  ;;  %v8380_v46 = vld [vmem:[%s14545_s22 + $0x108] sm:$0xff] }
 0xa77   : > { %v11291_v33 = vpop.eup %11290  ;;  %v8461_v59 = vmul.f32 %v8293_v48, %v7621_v47  ;;  %v17788_v47 = vld [vmem:[#allocation27_spill] sm:$0xff] }
 0xa78   : > { %v8296_v14 = vmul.f32 %v11291_v33, %v8212_v62 }
 0xa79   : > { %v8545_v0 = vsub.f32 %v8377_v10, %v8461_v59  ;;  %v17791_v59 = vld [vmem:[#allocation33_spill] sm:$0xff] }
 0xa7a   : > { %v8464_v55 = vmul.f32 %v8296_v14, %v7624_v13 }
 0xa7c   : > { %v8548_v8 = vsub.f32 %v8380_v46, %v8464_v55  ;;  %v17792_v46 = vld [vmem:[#allocation95_spill] sm:$0xff] }
 0xa86   : > { %8751 = vperm.xlu1 %10553, %v8293_v48   ;;  %8766 = vperm.xlu0 %10552, %v8296_v14   ;;  %v17789_v48 = vld [vmem:[#allocation26_spill] sm:$0xff] }
 0xa8f   : > { %v15783_v62 = vpop.xlane.xlu0 %7041 }
 0xa90   : > { %17785 = vst [vmem:[#allocation184_spill] sm:$0xff] %v15783_v62  ;;  %v17794_v62 = vld [vmem:[#allocation109_spill] sm:$0xff] }
 0xa94   : > { %v15781_v33 = vpop.xlane.xlu1 %7029 }
 0xa97   : > { %v8757_v54 = vpop.permute.xlu0 %8756 }
 0xa98   : > { %v8742_v44 = vpop.permute.xlu1 %8741  ;;  %v9082_v10 = vmul.f32 %v8757_v54, %v17791_v59  ;;  %v17796_v59 = vld [vmem:[#allocation267_spill] sm:$0xff] }
 0xa99   : > { %v9075_v13 = vmul.f32 %v8742_v44, %v17788_v47  ;;  %v9076_v14 = vmul.f32 %v8742_v44, %v17789_v48  ;;  %v6261_v47 = vadd.f32 %v14936_v60, %v17794_v62  ;;  %v17795_v48 = vld [vmem:[#allocation102_spill] sm:$0xff] }
 0xa9a   : > { %v7710_v41 = vmul.f32 0.0051020407, %v17795_v48  ;;  %v8211_v48 = vld [vmem:[%s14510_s19 + $0x100] sm:$0xff] }
 0xaa5   : > { %7553 = vadd.xlane.f32.xlu0 %v7552_v51  ;;  %v17787_v51 = vld [vmem:[#allocation240_spill] sm:$0xff] }
 0xaa6   : > { %v7623_v2 = vmul.f32 0.0051020407, %v17787_v51 }
 0xaa8   : > { %v7791_v44 = vmul.f32 %v7623_v2, %v7623_v2 }
 0xaaa   : > { %7541 = vadd.xlane.f32.xlu1 %v7540_v18  ;;  %v9081_v18 = vmul.f32 %v8757_v54, %v17790_v20 }
 0xabb   : > { %9339 = vperm.xlu1 %10553, %v8545_v0   ;;  %9354 = vperm.xlu0 %10552, %v8548_v8   ;;  %v7707_v0 = vmul.f32 0.0051020407, %v17792_v46  ;;  %v17793_v8 = vld [vmem:[#allocation252_spill] sm:$0xff]  ;;  %v15806_v46 = vadd.f32 %v17796_v59, %v6261_v47 }
 0xabc   : > { %v7626_v17 = vmul.f32 0.0051020407, %v17793_v8 }
 0xabd   : > { %v7875_v54 = vsub.f32 %v7707_v0, %v7791_v44  ;;  %17797 = vst [vmem:[#allocation65_spill] sm:$0xff] %v15806_v46  ;;  %v7055_v62 = vsel %vm6750_vm1, %v15806_v46, 0.0  ;;  %v17802_v0 = vld [vmem:[#allocation256_spill] sm:$0xff] }
 0xabe   : > { %v7794_v20 = vmul.f32 %v7626_v17, %v7626_v17  ;;  %v7043_v8 = vsel %vm6750_vm1, %v17802_v0, 0.0 }
 0xac4   : > { %v15787_v27 = vpop.xlane.xlu0 %7545 }
 0xac5   : > { %17786 = vst [vmem:[#allocation72_spill] sm:$0xff] %v15787_v27 }
 0xac9   : > { %v15785_v36 = vpop.xlane.xlu1 %7533 }
 0xacc   : > { %v9345_v57 = vpop.permute.xlu0 %9344 }
 0xacd   : > { %v9330_v55 = vpop.permute.xlu1 %9329  ;;  %v9669_v28 = vadd.f32 %v9345_v57, %v9081_v18  ;;  %v9670_v11 = vadd.f32 %v9345_v57, %v9082_v10  ;;  %v7959_v57 = vmax.f32 %v7875_v54, 0.0  ;;  %v17800_v18 = vld [vmem:[#allocation265_spill] sm:$0xff] }
 0xace   : > { %v9663_v27 = vadd.f32 %v9330_v55, %v9075_v13  ;;  %v9664_v51 = vadd.f32 %v9330_v55, %v9076_v14  ;;  %v7878_v13 = vsub.f32 %v7710_v41, %v7794_v20  ;;  %v17798_v14 = vld [vmem:[#allocation108_spill] sm:$0xff]  ;;  %v17799_v55 = vld [vmem:[#allocation262_spill] sm:$0xff]  ;;  %v8214_v20 = vld [vmem:[%s14510_s19 + $0x118] sm:$0xff] }
 0xacf   : > { %9837 = vst [vmem:[%s14990_s26 + $0x1f0] sm:$0xff] %v9669_v28  ;;  %9838 = vst.msk [vmem:[%s14990_s26 + $0x1f8] sm:$0xff] %vm6750_vm1, %v9670_v11  ;;  %v6259_v60 = vadd.f32 %v17799_v55, %v17798_v14  ;;  %v8043_v11 = vadd.f32 1e-05, %v7959_v57  ;;  %v7240_v14 = vmul.f32 %v15806_v46, %v15806_v46  ;;  %v7234_v55 = vmul.f32 %v17802_v0, %v17802_v0 }
 0xad0   : > { %9831 = vst [vmem:[%s14990_s26 + $0x1c0] sm:$0xff] %v9663_v27  ;;  %9832 = vst.msk [vmem:[%s14990_s26 + $0x1c8] sm:$0xff] %vm6750_vm1, %v9664_v51  ;;  %v7962_v27 = vmax.f32 %v7878_v13, 0.0  ;;  %v17803_v51 = vld [vmem:[#allocation103_spill] sm:$0xff] }
 0xad1   : > { %v15813_v28 = vadd.f32 %v17800_v18, %v6259_v60  ;;  %v7044_v47 = vadd.f32 %v7043_v8, %v17803_v51  ;;  %11292 = vrsqrt.f32 %v8043_v11  ;;  %v7559_v60 = vsel %vm6750_vm1, %v7240_v14, 0.0  ;;  %v8379_v8 = vld [vmem:[%s14545_s22 + $0x100] sm:$0xff] }
 0xad2   : > { %v8046_v41 = vadd.f32 1e-05, %v7962_v27  ;;  %v7547_v27 = vsel %vm6750_vm1, %v7234_v55, 0.0  ;;  %v7233_v18 = vmul.f32 %v17803_v51, %v17803_v51 }
 0xad3   : > { %17801 = vst [vmem:[#allocation71_spill] sm:$0xff] %v15813_v28  ;;  %v7056_v10 = vadd.f32 %v7055_v62, %v15813_v28  ;;  %v7239_v57 = vmul.f32 %v15813_v28, %v15813_v28 }
 0xad4   : > { %11294 = vrsqrt.f32 %v8046_v41  ;;  %v7548_v11 = vadd.f32 %v7547_v27, %v7233_v18  ;;  %v17809_v18 = vld [vmem:[#allocation153_spill] sm:$0xff] }
 0xad5   : > { %v7560_v62 = vadd.f32 %v7559_v60, %v7239_v57 }
 0xada   : > { %7057 = vadd.xlane.f32.xlu0 %v7056_v10 }
 0xade   : > { %v11293_v44 = vpop.eup %11292 }
 0xadf   : > { %7045 = vadd.xlane.f32.xlu1 %v7044_v47  ;;  %v8295_v59 = vmul.f32 %v11293_v44, %v8211_v48  ;;  %v8382_v47 = vld [vmem:[%s14545_s22 + $0x118] sm:$0xff] }
 0xae1   : > { %v11295_v54 = vpop.eup %11294  ;;  %v8463_v10 = vmul.f32 %v8295_v59, %v7623_v2  ;;  %v17807_v2 = vld [vmem:[#allocation31_spill] sm:$0xff] }
 0xae2   : > { %v8298_v13 = vmul.f32 %v11295_v54, %v8214_v20 }
 0xae3   : > { %v8547_v44 = vsub.f32 %v8379_v8, %v8463_v10  ;;  %v17810_v10 = vld [vmem:[#allocation34_spill] sm:$0xff] }
 0xae4   : > { %v8466_v41 = vmul.f32 %v8298_v13, %v7626_v17 }
 0xae6   : > { %v8550_v48 = vsub.f32 %v8382_v47, %v8466_v41  ;;  %v17811_v47 = vld [vmem:[#allocation250_spill] sm:$0xff] }
 0xaf0   : > { %8761 = vperm.xlu1 %10553, %v8295_v59   ;;  %8776 = vperm.xlu0 %10552, %v8298_v13   ;;  %v17808_v59 = vld [vmem:[#allocation30_spill] sm:$0xff] }
 0xaf9   : > { %v15835_v20 = vpop.xlane.xlu0 %7049 }
 0xafa   : > { %17804 = vst [vmem:[#allocation179_spill] sm:$0xff] %v15835_v20  ;;  %v17813_v20 = vld [vmem:[#allocation112_spill] sm:$0xff] }
 0xafe   : > { %v15833_v54 = vpop.xlane.xlu1 %7037 }
 0xb01   : > { %v8767_v55 = vpop.permute.xlu0 %8766 }
 0xb02   : > { %v8752_v14 = vpop.permute.xlu1 %8751  ;;  %v9086_v8 = vmul.f32 %v8767_v55, %v17810_v10 }
 0xb03   : > { %v9079_v17 = vmul.f32 %v8752_v14, %v17807_v2  ;;  %v9080_v13 = vmul.f32 %v8752_v14, %v17808_v59  ;;  %v6271_v2 = vadd.f32 %v14959_v29, %v17813_v20  ;;  %v17814_v59 = vld [vmem:[#allocation106_spill] sm:$0xff] }
 0xb04   : > { %v7712_v9 = vmul.f32 0.0051020407, %v17814_v59 }
 0xb05   : > { %v15858_v10 = vadd.f32 %v14961_v19, %v6271_v2 }
 0xb07   : > { %17815 = vst [vmem:[#allocation140_spill] sm:$0xff] %v15858_v10  ;;  %v7063_v20 = vsel %vm6750_vm1, %v15858_v10, 0.0 }
 0xb0f   : > { %7561 = vadd.xlane.f32.xlu0 %v7560_v62  ;;  %v17806_v62 = vld [vmem:[#allocation249_spill] sm:$0xff] }
 0xb10   : > { %v7625_v27 = vmul.f32 0.0051020407, %v17806_v62 }
 0xb12   : > { %v7793_v14 = vmul.f32 %v7625_v27, %v7625_v27 }
 0xb14   : > { %7549 = vadd.xlane.f32.xlu1 %v7548_v11  ;;  %v9085_v11 = vmul.f32 %v8767_v55, %v17809_v18 }
 0xb25   : > { %9349 = vperm.xlu1 %10553, %v8547_v44   ;;  %9364 = vperm.xlu0 %10552, %v8550_v48   ;;  %v7709_v44 = vmul.f32 0.0051020407, %v17811_v47  ;;  %v17812_v48 = vld [vmem:[#allocation257_spill] sm:$0xff] }
 0xb26   : > { %v7628_v46 = vmul.f32 0.0051020407, %v17812_v48 }
 0xb27   : > { %v7877_v55 = vsub.f32 %v7709_v44, %v7793_v14  ;;  %v8213_v44 = vld [vmem:[%s14510_s19 + $0x110] sm:$0xff]  ;;  %v7244_v14 = vmul.f32 %v15858_v10, %v15858_v10 }
 0xb28   : > { %v7796_v18 = vmul.f32 %v7628_v46, %v7628_v46  ;;  %v17829_v10 = vld [vmem:[#allocation116_spill] sm:$0xff] }
 0xb2e   : > { %v15839_v57 = vpop.xlane.xlu0 %7553 }
 0xb2f   : > { %17805 = vst [vmem:[#allocation141_spill] sm:$0xff] %v15839_v57 }
 0xb33   : > { %v15837_v60 = vpop.xlane.xlu1 %7541 }
 0xb36   : > { %v9355_v28 = vpop.permute.xlu0 %9354 }
 0xb37   : > { %v9340_v41 = vpop.permute.xlu1 %9339  ;;  %v9673_v0 = vadd.f32 %v9355_v28, %v9085_v11  ;;  %v9674_v51 = vadd.f32 %v9355_v28, %v9086_v8  ;;  %v7961_v28 = vmax.f32 %v7877_v55, 0.0  ;;  %v17818_v8 = vld [vmem:[#allocation263_spill] sm:$0xff]  ;;  %v7567_v55 = vsel %vm6750_vm1, %v7244_v14, 0.0 }
 0xb38   : > { %v9667_v57 = vadd.f32 %v9340_v41, %v9079_v17  ;;  %v9668_v62 = vadd.f32 %v9340_v41, %v9080_v13  ;;  %v7880_v17 = vsub.f32 %v7712_v9, %v7796_v18  ;;  %v17816_v13 = vld [vmem:[#allocation111_spill] sm:$0xff]  ;;  %v7051_v19 = vsel %vm6750_vm1, %v17818_v8, 0.0 }
 0xb39   : > { %9841 = vst [vmem:[%s14990_s26 + $0x210] sm:$0xff] %v9673_v0  ;;  %9842 = vst.msk [vmem:[%s14990_s26 + $0x218] sm:$0xff] %vm6750_vm1, %v9674_v51  ;;  %v6269_v29 = vadd.f32 %v14951_v23, %v17816_v13  ;;  %v8045_v51 = vadd.f32 1e-05, %v7961_v28  ;;  %v17819_v41 = vld [vmem:[#allocation107_spill] sm:$0xff]  ;;  %v7238_v59 = vmul.f32 %v17818_v8, %v17818_v8 }
 0xb3a   : > { %9835 = vst [vmem:[%s14990_s26 + $0x1e0] sm:$0xff] %v9667_v57  ;;  %9836 = vst.msk [vmem:[%s14990_s26 + $0x1e8] sm:$0xff] %vm6750_vm1, %v9668_v62  ;;  %v7964_v57 = vmax.f32 %v7880_v17, 0.0  ;;  %v7052_v47 = vadd.f32 %v7051_v19, %v17819_v41  ;;  %v8216_v62 = vld [vmem:[%s14510_s19 + $0x128] sm:$0xff] }
 0xb3b   : > { %v15865_v0 = vadd.f32 %v14957_v40, %v6269_v29  ;;  %11296 = vrsqrt.f32 %v8045_v51  ;;  %v7555_v13 = vsel %vm6750_vm1, %v7238_v59, 0.0  ;;  %v7237_v29 = vmul.f32 %v17819_v41, %v17819_v41  ;;  %v17822_v59 = vld [vmem:[#allocation253_spill] sm:$0xff] }
 0xb3c   : > { %v8048_v9 = vadd.f32 1e-05, %v7964_v57  ;;  %v8381_v57 = vld [vmem:[%s14545_s22 + $0x110] sm:$0xff] }
 0xb3d   : > { %17817 = vst [vmem:[#allocation147_spill] sm:$0xff] %v15865_v0  ;;  %v7064_v11 = vadd.f32 %v7063_v20, %v15865_v0  ;;  %v7243_v18 = vmul.f32 %v15865_v0, %v15865_v0  ;;  %v7556_v28 = vadd.f32 %v7555_v13, %v7237_v29  ;;  %v17826_v13 = vld [vmem:[#allocation35_spill] sm:$0xff]  ;;  %v17830_v0 = vld [vmem:[#allocation276_spill] sm:$0xff] }
 0xb3e   : > { %11298 = vrsqrt.f32 %v8048_v9 }
 0xb3f   : > { %v7568_v17 = vadd.f32 %v7567_v55, %v7243_v18  ;;  %v7627_v55 = vmul.f32 0.0051020407, %v17822_v59  ;;  %v17825_v18 = vld [vmem:[#allocation36_spill] sm:$0xff] }
 0xb44   : > { %7065 = vadd.xlane.f32.xlu0 %v7064_v11  ;;  %v8384_v11 = vld [vmem:[%s14545_s22 + $0x128] sm:$0xff] }
 0xb48   : > { %v11297_v23 = vpop.eup %11296 }
 0xb49   : > { %7053 = vadd.xlane.f32.xlu1 %v7052_v47  ;;  %v8297_v40 = vmul.f32 %v11297_v23, %v8213_v44 }
 0xb4b   : > { %v11299_v48 = vpop.eup %11298  ;;  %v8465_v20 = vmul.f32 %v8297_v40, %v7625_v27  ;;  %v17823_v27 = vld [vmem:[#allocation152_spill] sm:$0xff] }
 0xb4c   : > { %v8300_v2 = vmul.f32 %v11299_v48, %v8216_v62 }
 0xb4d   : > { %v8549_v19 = vsub.f32 %v8381_v57, %v8465_v20  ;;  %v17827_v20 = vld [vmem:[#allocation254_spill] sm:$0xff] }
 0xb4e   : > { %v8468_v51 = vmul.f32 %v8300_v2, %v7628_v46  ;;  %v7711_v57 = vmul.f32 0.0051020407, %v17827_v20 }
 0xb50   : > { %v8552_v9 = vsub.f32 %v8384_v11, %v8468_v51  ;;  %v17828_v51 = vld [vmem:[#allocation264_spill] sm:$0xff] }
 0xb51   : > { %v7630_v11 = vmul.f32 0.0051020407, %v17828_v51  ;;  %v17836_v51 = vld [vmem:[#allocation275_spill] sm:$0xff] }
 0xb5a   : > { %8771 = vperm.xlu1 %10553, %v8297_v40   ;;  %8786 = vperm.xlu0 %10552, %v8300_v2   ;;  %v17824_v40 = vld [vmem:[#allocation151_spill] sm:$0xff] }
 0xb63   : > { %v15887_v23 = vpop.xlane.xlu0 %7057 }
 0xb64   : > { %17820 = vst [vmem:[#allocation146_spill] sm:$0xff] %v15887_v23 }
 0xb68   : > { %v15885_v47 = vpop.xlane.xlu1 %7045 }
 0xb6b   : > { %v8777_v48 = vpop.permute.xlu0 %8776 }
 0xb6c   : > { %v8762_v44 = vpop.permute.xlu1 %8761  ;;  %v9090_v29 = vmul.f32 %v8777_v48, %v17826_v13  ;;  %v17832_v13 = vld [vmem:[#allocation277_spill] sm:$0xff] }
 0xb6d   : > { %v9083_v46 = vmul.f32 %v8762_v44, %v17823_v27  ;;  %v9084_v2 = vmul.f32 %v8762_v44, %v17824_v40  ;;  %v6281_v27 = vadd.f32 %v17830_v0, %v17829_v10  ;;  %v7795_v44 = vmul.f32 %v7627_v55, %v7627_v55  ;;  %v17831_v40 = vld [vmem:[#allocation268_spill] sm:$0xff] }
 0xb6e   : > { %v7714_v8 = vmul.f32 0.0051020407, %v17831_v40  ;;  %v8215_v40 = vld [vmem:[%s14510_s19 + $0x120] sm:$0xff] }
 0xb6f   : > { %v15910_v20 = vadd.f32 %v17832_v13, %v6281_v27 }
 0xb71   : > { %17833 = vst [vmem:[#allocation191_spill] sm:$0xff] %v15910_v20 }
 0xb79   : > { %7569 = vadd.xlane.f32.xlu0 %v7568_v17  ;;  %v9089_v17 = vmul.f32 %v8777_v48, %v17825_v18  ;;  %v7879_v48 = vsub.f32 %v7711_v57, %v7795_v44  ;;  %v7798_v18 = vmul.f32 %v7630_v11, %v7630_v11 }
 0xb7b   : > { %v7963_v0 = vmax.f32 %v7879_v48, 0.0 }
 0xb7e   : > { %7557 = vadd.xlane.f32.xlu1 %v7556_v28 }
 0xb8f   : > { %9359 = vperm.xlu1 %10553, %v8549_v19   ;;  %9374 = vperm.xlu0 %10552, %v8552_v9  }
 0xb98   : > { %v15891_v14 = vpop.xlane.xlu0 %7561 }
 0xb99   : > { %17821 = vst [vmem:[#allocation181_spill] sm:$0xff] %v15891_v14 }
 0xb9d   : > { %v15889_v62 = vpop.xlane.xlu1 %7549 }
 0xba0   : > { %v9365_v19 = vpop.permute.xlu0 %9364 }
 0xba1   : > { %v9350_v28 = vpop.permute.xlu1 %9349  ;;  %v9677_v14 = vadd.f32 %v9365_v19, %v9089_v17  ;;  %v9678_v23 = vadd.f32 %v9365_v19, %v9090_v29  ;;  %v7071_v17 = vsel %vm6750_vm1, %v15910_v20, 0.0  ;;  %v17838_v19 = vld [vmem:[#allocation270_spill] sm:$0xff] }
 0xba2   : > { %v9671_v9 = vadd.f32 %v9350_v28, %v9083_v46  ;;  %v9672_v59 = vadd.f32 %v9350_v28, %v9084_v2  ;;  %v7882_v46 = vsub.f32 %v7714_v8, %v7798_v18  ;;  %v17834_v2 = vld [vmem:[#allocation115_spill] sm:$0xff]  ;;  %v17835_v28 = vld [vmem:[#allocation273_spill] sm:$0xff] }
 0xba3   : > { %9845 = vst [vmem:[%s14990_s26 + $0x230] sm:$0xff] %v9677_v14  ;;  %9846 = vst.msk [vmem:[%s14990_s26 + $0x238] sm:$0xff] %vm6750_vm1, %v9678_v23  ;;  %v6279_v10 = vadd.f32 %v17835_v28, %v17834_v2  ;;  %v8047_v23 = vadd.f32 1e-05, %v7963_v0  ;;  %v8218_v18 = vld [vmem:[%s14510_s19 + $0x138] sm:$0xff]  ;;  %v7248_v2 = vmul.f32 %v15910_v20, %v15910_v20  ;;  %v7242_v28 = vmul.f32 %v17838_v19, %v17838_v19  ;;  %v17847_v20 = vld [vmem:[#allocation266_spill] sm:$0xff] }
 0xba4   : > { %9839 = vst [vmem:[%s14990_s26 + $0x200] sm:$0xff] %v9671_v9  ;;  %9840 = vst.msk [vmem:[%s14990_s26 + $0x208] sm:$0xff] %vm6750_vm1, %v9672_v59  ;;  %v7966_v29 = vmax.f32 %v7882_v46, 0.0  ;;  %v7059_v9 = vsel %vm6750_vm1, %v17838_v19, 0.0  ;;  %v17839_v59 = vld [vmem:[#allocation110_spill] sm:$0xff] }
 0xba5   : > { %v15917_v14 = vadd.f32 %v17836_v51, %v6279_v10  ;;  %v7060_v27 = vadd.f32 %v7059_v9, %v17839_v59  ;;  %11300 = vrsqrt.f32 %v8047_v23  ;;  %v7575_v10 = vsel %vm6750_vm1, %v7248_v2, 0.0  ;;  %v8383_v9 = vld [vmem:[%s14545_s22 + $0x120] sm:$0xff] }
 0xba6   : > { %v8050_v8 = vadd.f32 1e-05, %v7966_v29  ;;  %v7563_v29 = vsel %vm6750_vm1, %v7242_v28, 0.0  ;;  %v7241_v51 = vmul.f32 %v17839_v59, %v17839_v59 }
 0xba7   : > { %17837 = vst [vmem:[#allocation76_spill] sm:$0xff] %v15917_v14  ;;  %v7072_v57 = vadd.f32 %v7071_v17, %v15917_v14  ;;  %v7247_v0 = vmul.f32 %v15917_v14, %v15917_v14  ;;  %v7713_v14 = vmul.f32 0.0051020407, %v17847_v20 }
 0xba8   : > { %11302 = vrsqrt.f32 %v8050_v8  ;;  %v7564_v23 = vadd.f32 %v7563_v29, %v7241_v51  ;;  %v17842_v29 = vld [vmem:[#allocation261_spill] sm:$0xff] }
 0xba9   : > { %v7576_v17 = vadd.f32 %v7575_v10, %v7247_v0  ;;  %v6288_v10 = vpop.f32.mrf.mxu0 }
 0xbae   : > { %7073 = vadd.xlane.f32.xlu0 %v7072_v57 }
 0xbb2   : > { %v11301_v44 = vpop.eup %11300 }
 0xbb3   : > { %7061 = vadd.xlane.f32.xlu1 %v7060_v27  ;;  %v8299_v13 = vmul.f32 %v11301_v44, %v8215_v40  ;;  %v8386_v27 = vld [vmem:[%s14545_s22 + $0x138] sm:$0xff] }
 0xbb5   : > { %v11303_v48 = vpop.eup %11302  ;;  %v8467_v57 = vmul.f32 %v8299_v13, %v7627_v55  ;;  %v15946_v55 = vmul.f32 0.0051020407, %v17842_v29 }
 0xbb6   : > { %v8302_v46 = vmul.f32 %v11303_v48, %v8218_v18 }
 0xbb7   : > { %v8551_v44 = vsub.f32 %v8383_v9, %v8467_v57  ;;  %v17845_v9 = vld [vmem:[#allocation37_spill] sm:$0xff] }
 0xbb8   : > { %v8470_v8 = vmul.f32 %v8302_v46, %v7630_v11  ;;  %v6290_v11 = vpop.f32.mrf.mxu0 }
 0xbba   : > { %v8554_v40 = vsub.f32 %v8386_v27, %v8470_v8  ;;  %v17846_v27 = vld [vmem:[#allocation38_spill] sm:$0xff] }
 0xbc4   : > { %8781 = vperm.xlu1 %10553, %v8299_v13   ;;  %8796 = vperm.xlu0 %10552, %v8302_v46   ;;  %v6741_v13 = vpop.f32.mrf.mxu1  ;;  %v17843_v46 = vld [vmem:[#allocation155_spill] sm:$0xff] }
 0xbcd   : > { %v15939_v18 = vpop.xlane.xlu0 %7065 }
 0xbce   : > { %17840 = vst [vmem:[#allocation69_spill] sm:$0xff] %v15939_v18 }
 0xbd2   : > { %v15937_v48 = vpop.xlane.xlu1 %7053 }
 0xbd5   : > { %v8787_v28 = vpop.permute.xlu0 %8786 }
 0xbd6   : > { %v8772_v2 = vpop.permute.xlu1 %8771  ;;  %v9093_v8 = vmul.f32 %v8787_v28, %v17845_v9  ;;  %v17850_v9 = vld [vmem:[#allocation113_spill] sm:$0xff] }
 0xbd7   : > { %v9087_v51 = vmul.f32 %v8772_v2, %v17843_v46  ;;  %v17849_v46 = vld [vmem:[#allocation120_spill] sm:$0xff]  ;;  %v7716_v39 = vmul.f32 0.0051020407, %v17850_v9  ;;  %v8220_v9 = vld [vmem:[%s14510_s19 + $0x148] sm:$0xff] }
 0xbd8   : > { %v6291_v41 = vadd.f32 %v6290_v11, %v17849_v46 }
 0xbe3   : > { %7577 = vadd.xlane.f32.xlu0 %v7576_v17 }
 0xbe8   : > { %7565 = vadd.xlane.f32.xlu1 %v7564_v23  ;;  %v17844_v23 = vld [vmem:[#allocation154_spill] sm:$0xff] }
 0xbe9   : > { %v9088_v57 = vmul.f32 %v8772_v2, %v17844_v23  ;;  %v7797_v23 = vmul.f32 %v15946_v55, %v15946_v55 }
 0xbeb   : > { %v7881_v20 = vsub.f32 %v7713_v14, %v7797_v23 }
 0xbf9   : > { %9369 = vperm.xlu1 %10553, %v8551_v44   ;;  %9384 = vperm.xlu0 %10552, %v8554_v40   ;;  %v9094_v44 = vmul.f32 %v8787_v28, %v17846_v27  ;;  %v6743_v28 = vpop.f32.mrf.mxu1 }
 0xc02   : > { %v15943_v17 = vpop.xlane.xlu0 %7569 }
 0xc03   : > { %17841 = vst [vmem:[#allocation75_spill] sm:$0xff] %v15943_v17  ;;  %v17848_v17 = vld [vmem:[#allocation271_spill] sm:$0xff] }
 0xc04   : > { %v15954_v29 = vmul.f32 0.0051020407, %v17848_v17 }
 0xc06   : > { %v7800_v17 = vmul.f32 %v15954_v29, %v15954_v29 }
 0xc07   : > { %v15941_v0 = vpop.xlane.xlu1 %7557 }
 0xc08   : > { %v7884_v11 = vsub.f32 %v7716_v39, %v7800_v17  ;;  %v17853_v39 = vld [vmem:[#allocation114_spill] sm:$0xff]  ;;  %v7718_v17 = vmul.f32 0.0051020407, %v15089_v34 }
 0xc0a   : > { %v9375_v18 = vpop.permute.xlu0 %9374  ;;  %v7968_v27 = vmax.f32 %v7884_v11, 0.0 }
 0xc0b   : > { %v9360_v40 = vpop.permute.xlu1 %9359  ;;  %v9681_v7 = vadd.f32 %v9375_v18, %v9093_v8  ;;  %v9682_v2 = vadd.f32 %v9375_v18, %v9094_v44  ;;  %v17851_v18 = vld [vmem:[#allocation119_spill] sm:$0xff]  ;;  %v7965_v8 = vmax.f32 %v7881_v20, 0.0  ;;  %v17852_v44 = vld [vmem:[#allocation274_spill] sm:$0xff]  ;;  %v7634_v20 = vmul.f32 0.0051020407, %v15081_v31 }
 0xc0c   : > { %v9675_v19 = vadd.f32 %v9360_v40, %v9087_v51  ;;  %v9676_v59 = vadd.f32 %v9360_v40, %v9088_v57  ;;  %v15968_v51 = vadd.f32 %v6743_v28, %v6291_v41  ;;  %v6289_v57 = vadd.f32 %v6288_v10, %v17851_v18 }
 0xc0d   : > { %9849 = vst [vmem:[%s14990_s26 + $0x250] sm:$0xff] %v9681_v7  ;;  %9850 = vst.msk [vmem:[%s14990_s26 + $0x258] sm:$0xff] %vm6750_vm1, %v9682_v2  ;;  %v8049_v7 = vadd.f32 1e-05, %v7965_v8  ;;  %v7067_v40 = vsel %vm6750_vm1, %v17852_v44, 0.0  ;;  %v8217_v2 = vld [vmem:[%s14510_s19 + $0x130] sm:$0xff]  ;;  %v7802_v11 = vmul.f32 %v7634_v20, %v7634_v20  ;;  %v7246_v8 = vmul.f32 %v17852_v44, %v17852_v44 }
 0xc0e   : > { %9843 = vst [vmem:[%s14990_s26 + $0x220] sm:$0xff] %v9675_v19  ;;  %9844 = vst.msk [vmem:[%s14990_s26 + $0x228] sm:$0xff] %vm6750_vm1, %v9676_v59  ;;  %v7079_v19 = vsel %vm6750_vm1, %v15968_v51, 0.0  ;;  %v15973_v59 = vadd.f32 %v6741_v13, %v6289_v57  ;;  %v8052_v41 = vadd.f32 1e-05, %v7968_v27  ;;  %v7068_v46 = vadd.f32 %v7067_v40, %v17853_v39 }
 0xc0f   : > { %11304 = vrsqrt.f32 %v8049_v7  ;;  %v7252_v18 = vmul.f32 %v15968_v51, %v15968_v51  ;;  %v7886_v57 = vsub.f32 %v7718_v17, %v7802_v11  ;;  %v7720_v31 = vmul.f32 0.0051020407, %v15152_v63 }
 0xc10   : > { %v7080_v14 = vadd.f32 %v7079_v19, %v15973_v59  ;;  %11306 = vrsqrt.f32 %v8052_v41  ;;  %v15988_v19 = vmul.f32 0.0051020407, %v15146_v21  ;;  %v7251_v7 = vmul.f32 %v15973_v59, %v15973_v59 }
 0xc11   : > { %v7583_v27 = vsel %vm6750_vm1, %v7252_v18, 0.0  ;;  %v7571_v41 = vsel %vm6750_vm1, %v7246_v8, 0.0 }
 0xc12   : > { %v7804_v34 = vmul.f32 %v15988_v19, %v15988_v19  ;;  %v7584_v40 = vadd.f32 %v7583_v27, %v7251_v7 }
 0xc14   : > { %v7888_v21 = vsub.f32 %v7720_v31, %v7804_v34 }
 0xc16   : > { %v7972_v63 = vmax.f32 %v7888_v21, 0.0 }
 0xc18   : > { %7081 = vadd.xlane.f32.xlu0 %v7080_v14  ;;  %v7970_v14 = vmax.f32 %v7886_v57, 0.0  ;;  %v8056_v18 = vadd.f32 1e-05, %v7972_v63  ;;  %v16006_v57 = vmul.f32 0.0051020407, %v15261_v12  ;;  %v8388_v12 = vld [vmem:[%s14545_s22 + $0x148] sm:$0xff] }
 0xc1c   : > { %v11305_v10 = vpop.eup %11304 }
 0xc1d   : > { %7069 = vadd.xlane.f32.xlu1 %v7068_v46  ;;  %v11307_v23 = vpop.eup %11306  ;;  %v8301_v28 = vmul.f32 %v11305_v10, %v8217_v2  ;;  %v7245_v46 = vmul.f32 %v17853_v39, %v17853_v39  ;;  %v8054_v10 = vadd.f32 1e-05, %v7970_v14  ;;  %v16000_v2 = vmul.f32 0.0051020407, %v15204_v22  ;;  %v8385_v14 = vld [vmem:[%s14545_s22 + $0x130] sm:$0xff] }
 0xc1e   : > { %v8304_v13 = vmul.f32 %v11307_v23, %v8220_v9  ;;  %v7722_v9 = vmul.f32 0.0051020407, %v15208_v45  ;;  %v7724_v22 = vmul.f32 0.0051020407, %v15265_v58  ;;  %v7808_v45 = vmul.f32 %v16006_v57, %v16006_v57 }
 0xc1f   : > { %v7572_v23 = vadd.f32 %v7571_v41, %v7245_v46  ;;  %11308 = vrsqrt.f32 %v8054_v10  ;;  %v7806_v17 = vmul.f32 %v16000_v2, %v16000_v2  ;;  %v8469_v27 = vmul.f32 %v8301_v28, %v15946_v55  ;;  %v8222_v46 = vld [vmem:[%s14510_s19 + $0x158] sm:$0xff] }
 0xc20   : > { %11310 = vrsqrt.f32 %v8056_v18  ;;  %v7892_v31 = vsub.f32 %v7724_v22, %v7808_v45  ;;  %v8472_v34 = vmul.f32 %v8304_v13, %v15954_v29  ;;  %v16015_v41 = vmul.f32 0.0051020407, %v15313_v32 }
 0xc21   : > { %v7890_v11 = vsub.f32 %v7722_v9, %v7806_v17  ;;  %v8553_v10 = vsub.f32 %v8385_v14, %v8469_v27  ;;  %v7726_v58 = vmul.f32 0.0051020407, %v15317_v38  ;;  %v8390_v17 = vld [vmem:[%s14545_s22 + $0x158] sm:$0xff]  ;;  %v16027_v18 = vmul.f32 0.0051020407, %v15365_v3 }
 0xc22   : > { %v7976_v21 = vmax.f32 %v7892_v31, 0.0  ;;  %v7728_v22 = vmul.f32 0.0051020407, %v15369_v56 }
 0xc23   : > { %v7974_v8 = vmax.f32 %v7890_v11, 0.0  ;;  %v8224_v11 = vld [vmem:[%s14510_s19 + $0x168] sm:$0xff] }
 0xc25   : > { %v8058_v7 = vadd.f32 1e-05, %v7974_v8 }
 0xc27   : > { %11312 = vrsqrt.f32 %v8058_v7 }
 0xc2e   : > { %8791 = vperm.xlu1 %10553, %v8301_v28   ;;  %8806 = vperm.xlu0 %10552, %v8304_v13   ;;  %v7810_v28 = vmul.f32 %v16015_v41, %v16015_v41  ;;  %v8060_v13 = vadd.f32 1e-05, %v7976_v21 }
 0xc30   : > { %v7894_v29 = vsub.f32 %v7726_v58, %v7810_v28  ;;  %11314 = vrsqrt.f32 %v8060_v13 }
 0xc32   : > { %v7978_v38 = vmax.f32 %v7894_v29, 0.0  ;;  %v17854_v29 = vld [vmem:[#allocation269_spill] sm:$0xff] }
 0xc33   : > { %v16046_v13 = vmul.f32 0.0051020407, %v17854_v29 }
 0xc34   : > { %v8062_v14 = vadd.f32 1e-05, %v7978_v38 }
 0xc36   : > { %11316 = vrsqrt.f32 %v8062_v14 }
 0xc37   : > { %v16029_v8 = vpop.xlane.xlu0 %7073 }
 0xc3c   : > { %v16022_v32 = vpop.xlane.xlu1 %7061 }
 0xc3f   : > { %v8797_v31 = vpop.permute.xlu0 %8796 }
 0xc40   : > { %v8782_v7 = vpop.permute.xlu1 %8781 }
 0xc4d   : > { %7585 = vadd.xlane.f32.xlu0 %v7584_v40  ;;  %v11309_v40 = vpop.eup %11308 }
 0xc4e   : > { %v8306_v55 = vmul.f32 %v11309_v40, %v8222_v46  ;;  %v11311_v63 = vpop.eup %11310  ;;  %v8392_v46 = vld [vmem:[%s14545_s22 + $0x168] sm:$0xff] }
 0xc4f   : > { %v8308_v27 = vmul.f32 %v11311_v63, %v8224_v11  ;;  %v11313_v3 = vpop.eup %11312  ;;  %v17856_v63 = vld [vmem:[#allocation156_spill] sm:$0xff]  ;;  %v17857_v11 = vld [vmem:[#allocation41_spill] sm:$0xff] }
 0xc50   : > { %v8474_v9 = vmul.f32 %v8306_v55, %v7634_v20  ;;  %v7812_v20 = vmul.f32 %v16027_v18, %v16027_v18  ;;  %v9097_v38 = vmul.f32 %v8797_v31, %v17857_v11  ;;  %v16064_v11 = vmul.f32 0.0051020407, %v15469_v43 }
 0xc51   : > { %v8476_v40 = vmul.f32 %v8308_v27, %v15988_v19  ;;  %v17855_v19 = vld [vmem:[#allocation157_spill] sm:$0xff] }
 0xc52   : > { %7573 = vadd.xlane.f32.xlu1 %v7572_v23  ;;  %v8556_v23 = vsub.f32 %v8388_v12, %v8472_v34  ;;  %v8558_v45 = vsub.f32 %v8390_v17, %v8474_v9  ;;  %v7896_v34 = vsub.f32 %v7728_v22, %v7812_v20  ;;  %v8226_v12 = vld [vmem:[%s14510_s19 + $0x178] sm:$0xff]  ;;  %v9091_v9 = vmul.f32 %v8782_v7, %v17855_v19  ;;  %v17858_v22 = vld [vmem:[#allocation42_spill] sm:$0xff] }
 0xc53   : > { %v8310_v21 = vmul.f32 %v11313_v3, %v8226_v12  ;;  %v8560_v28 = vsub.f32 %v8392_v46, %v8476_v40  ;;  %v8394_v19 = vld [vmem:[%s14545_s22 + $0x178] sm:$0xff] }
 0xc63   : > { %9379 = vperm.xlu1 %10553, %v8553_v10   ;;  %9394 = vperm.xlu0 %10552, %v8556_v23   ;;  %v16038_v10 = vmul.f32 0.0051020407, %v15417_v35  ;;  %v7980_v23 = vmax.f32 %v7896_v34, 0.0  ;;  %v9092_v35 = vmul.f32 %v8782_v7, %v17856_v63  ;;  %v8478_v7 = vmul.f32 %v8310_v21, %v16000_v2  ;;  %v11315_v63 = vpop.eup %11314 }
 0xc64   : > { %v11317_v43 = vpop.eup %11316 }
 0xc65   : > { %v7814_v17 = vmul.f32 %v16038_v10, %v16038_v10  ;;  %v8064_v40 = vadd.f32 1e-05, %v7980_v23  ;;  %v8562_v23 = vsub.f32 %v8394_v19, %v8478_v7  ;;  %v7734_v7 = vmul.f32 0.0051020407, %v15525_v24  ;;  %v8398_v19 = vld [vmem:[%s14545_s22 + $0x198] sm:$0xff] }
 0xc66   : > { %v16088_v24 = vmul.f32 0.0051020407, %v15573_v6  ;;  %v16095_v6 = vmul.f32 0.0051020407, %v15625_v25 }
 0xc67   : > { %8816 = vperm.xlu0 %10552, %v8306_v55   ;;  %v7730_v55 = vmul.f32 0.0051020407, %v15421_v5  ;;  %11318 = vrsqrt.f32 %v8064_v40 }
 0xc69   : > { %v7898_v12 = vsub.f32 %v7730_v55, %v7814_v17  ;;  %v7816_v17 = vmul.f32 %v16064_v11, %v16064_v11 }
 0xc6b   : > { %9404 = vperm.xlu0 %10552, %v8558_v45   ;;  %v9098_v45 = vmul.f32 %v8797_v31, %v17858_v22  ;;  %v7799_v31 = vmul.f32 %v16046_v13, %v16046_v13  ;;  %v7982_v55 = vmax.f32 %v7898_v12, 0.0 }
 0xc6c   : > { %v16042_v58 = vpop.xlane.xlu0 %7577 }
 0xc6d   : > { %v8066_v22 = vadd.f32 1e-05, %v7982_v55 }
 0xc6f   : > { %8826 = vperm.xlu0 %10552, %v8308_v27   ;;  %v17859_v27 = vld [vmem:[#allocation272_spill] sm:$0xff]  ;;  %11320 = vrsqrt.f32 %v8066_v22  ;;  %v8234_v22 = vld [vmem:[%s14510_s19 + $0x1b8] sm:$0xff] }
 0xc70   : > { %v7715_v20 = vmul.f32 0.0051020407, %v17859_v27  ;;  %v8230_v27 = vld [vmem:[%s14510_s19 + $0x198] sm:$0xff] }
 0xc71   : > { %v16040_v56 = vpop.xlane.xlu1 %7565 }
 0xc72   : > { %v7883_v2 = vsub.f32 %v7715_v20, %v7799_v31  ;;  %v8232_v31 = vld [vmem:[%s14510_s19 + $0x1a8] sm:$0xff] }
 0xc73   : > { %9414 = vperm.xlu0 %10552, %v8560_v28   ;;  %v8228_v28 = vld [vmem:[%s14510_s19 + $0x188] sm:$0xff] }
 0xc74   : > { %v9385_v14 = vpop.permute.xlu0 %9384 }
 0xc75   : > { %v9370_v5 = vpop.permute.xlu1 %9369  ;;  %v9685_v46 = vadd.f32 %v9385_v14, %v9097_v38  ;;  %v9686_v29 = vadd.f32 %v9385_v14, %v9098_v45  ;;  %v7967_v38 = vmax.f32 %v7883_v2, 0.0  ;;  %v8396_v14 = vld [vmem:[%s14545_s22 + $0x188] sm:$0xff] }
 0xc76   : > { %v9679_v3 = vadd.f32 %v9370_v5, %v9091_v9  ;;  %v9680_v34 = vadd.f32 %v9370_v5, %v9092_v35  ;;  %v7732_v9 = vmul.f32 0.0051020407, %v15473_v52  ;;  %v8312_v35 = vmul.f32 %v11315_v63, %v8228_v28  ;;  %v11319_v63 = vpop.eup %11318 }
 0xc77   : > { %9853 = vst [vmem:[%s14990_s26 + $0x270] sm:$0xff] %v9685_v46  ;;  %9854 = vst.msk [vmem:[%s14990_s26 + $0x278] sm:$0xff] %vm6750_vm1, %v9686_v29  ;;  %8836 = vperm.xlu0 %10552, %v8310_v21   ;;  %v16076_v21 = vmul.f32 0.0051020407, %v15521_v1  ;;  %v8051_v20 = vadd.f32 1e-05, %v7967_v38  ;;  %v8314_v52 = vmul.f32 %v11317_v43, %v8230_v27  ;;  %v8316_v55 = vmul.f32 %v11319_v63, %v8232_v31 }
 0xc78   : > { %9847 = vst [vmem:[%s14990_s26 + $0x240] sm:$0xff] %v9679_v3  ;;  %9848 = vst.msk [vmem:[%s14990_s26 + $0x248] sm:$0xff] %vm6750_vm1, %v9680_v34  ;;  %v7900_v45 = vsub.f32 %v7732_v9, %v7816_v17  ;;  %v8480_v5 = vmul.f32 %v8312_v35, %v16006_v57  ;;  %v7075_v3 = vsel %vm6750_vm1, %v15003_v53, 0.0  ;;  %v8400_v43 = vld [vmem:[%s14545_s22 + $0x1a8] sm:$0xff] }
 0xc79   : > { %v7818_v57 = vmul.f32 %v16076_v21, %v16076_v21  ;;  %v7076_v1 = vadd.f32 %v7075_v3, %v14994_v42  ;;  %11322 = vrsqrt.f32 %v8051_v20  ;;  %v8482_v12 = vmul.f32 %v8314_v52, %v16015_v41  ;;  %v8219_v20 = vld [vmem:[%s14510_s19 + $0x140] sm:$0xff] }
 0xc7a   : > { %v7984_v34 = vmax.f32 %v7900_v45, 0.0  ;;  %v8564_v40 = vsub.f32 %v8396_v14, %v8480_v5  ;;  %v7820_v41 = vmul.f32 %v16088_v24, %v16088_v24  ;;  %v8484_v17 = vmul.f32 %v8316_v55, %v16027_v18 }
 0xc7b   : > { %9424 = vperm.xlu0 %10552, %v8562_v23   ;;  %v7902_v29 = vsub.f32 %v7734_v7, %v7818_v57  ;;  %v8566_v28 = vsub.f32 %v8398_v19, %v8482_v12  ;;  %v7736_v23 = vmul.f32 0.0051020407, %v15577_v16  ;;  %v7738_v16 = vmul.f32 0.0051020407, %v15629_v61  ;;  %v8402_v61 = vld [vmem:[%s14545_s22 + $0x1b8] sm:$0xff] }
 0xc7c   : > { %v8068_v46 = vadd.f32 1e-05, %v7984_v34  ;;  %v11321_v38 = vpop.eup %11320  ;;  %v8568_v27 = vsub.f32 %v8400_v43, %v8484_v17  ;;  %v7822_v18 = vmul.f32 %v16095_v6, %v16095_v6  ;;  %v16110_v57 = vmul.f32 0.0051020407, %v15677_v15  ;;  %v8406_v43 = vld [vmem:[%s14545_s22 + $0x1d8] sm:$0xff] }
 0xc7d   : > { %v7986_v2 = vmax.f32 %v7902_v29, 0.0  ;;  %v8318_v14 = vmul.f32 %v11321_v38, %v8234_v22  ;;  %v7740_v12 = vmul.f32 0.0051020407, %v15681_v50  ;;  %v16117_v15 = vmul.f32 0.0051020407, %v15729_v4  ;;  %v8240_v22 = vld [vmem:[%s14510_s19 + $0x1e8] sm:$0xff] }
 0xc7e   : > { %11324 = vrsqrt.f32 %v8068_v46  ;;  %v7742_v50 = vmul.f32 0.0051020407, %v15733_v49 }
 0xc7f   : > { %8846 = vperm.xlu0 %10552, %v8312_v35   ;;  %v8070_v9 = vadd.f32 1e-05, %v7986_v2  ;;  %v7904_v35 = vsub.f32 %v7736_v23, %v7820_v41  ;;  %v8486_v34 = vmul.f32 %v8318_v14, %v16038_v10  ;;  %v7824_v10 = vmul.f32 %v16110_v57, %v16110_v57  ;;  %v8404_v2 = vld [vmem:[%s14545_s22 + $0x1c8] sm:$0xff]  ;;  %v8238_v23 = vld [vmem:[%s14510_s19 + $0x1d8] sm:$0xff] }
 0xc81   : > { %11326 = vrsqrt.f32 %v8070_v9  ;;  %v7988_v5 = vmax.f32 %v7904_v35, 0.0  ;;  %v8570_v46 = vsub.f32 %v8402_v61, %v8486_v34  ;;  %v7908_v63 = vsub.f32 %v7740_v12, %v7824_v10 }
 0xc82   : > { %v7826_v35 = vmul.f32 %v16117_v15, %v16117_v15  ;;  %v16137_v34 = vmul.f32 0.0051020407, %v15833_v54 }
 0xc83   : > { %9434 = vperm.xlu0 %10552, %v8564_v40   ;;  %v8072_v3 = vadd.f32 1e-05, %v7988_v5  ;;  %v8236_v40 = vld [vmem:[%s14510_s19 + $0x1c8] sm:$0xff] }
 0xc85   : > { %11328 = vrsqrt.f32 %v8072_v3  ;;  %v8242_v3 = vld [vmem:[%s14510_s19 + $0x1f8] sm:$0xff] }
 0xc86   : > { %v11323_v45 = vpop.eup %11322 }
 0xc87   : > { %7077 = vadd.xlane.f32.xlu1 %v7076_v1  ;;  %8856 = vperm.xlu0 %10552, %v8314_v52   ;;  %v7906_v52 = vsub.f32 %v7738_v16, %v7822_v18  ;;  %v16103_v25 = vmul.f32 %v11323_v45, %v8219_v20  ;;  %v16128_v16 = vmul.f32 0.0051020407, %v15781_v33  ;;  %v7744_v45 = vmul.f32 0.0051020407, %v15785_v36  ;;  %v8408_v33 = vld [vmem:[%s14545_s22 + $0x1e8] sm:$0xff] }
 0xc89   : > { %v7990_v1 = vmax.f32 %v7906_v52, 0.0 }
 0xc8b   : > { %9444 = vperm.xlu0 %10552, %v8566_v28   ;;  %v11325_v7 = vpop.eup %11324  ;;  %v8074_v19 = vadd.f32 1e-05, %v7990_v1 }
 0xc8c   : > { %v8320_v29 = vmul.f32 %v11325_v7, %v8236_v40  ;;  %v7250_v7 = vmul.f32 %v15003_v53, %v15003_v53  ;;  %v7746_v40 = vmul.f32 0.0051020407, %v15837_v60  ;;  %v16151_v60 = vmul.f32 0.0051020407, %v15885_v47 }
 0xc8d   : > { %11330 = vrsqrt.f32 %v8074_v19 }
 0xc8e   : > { %v8488_v31 = vmul.f32 %v8320_v29, %v16064_v11  ;;  %v11327_v28 = vpop.eup %11326  ;;  %v7910_v11 = vsub.f32 %v7742_v50, %v7826_v35  ;;  %v7579_v10 = vsel %vm6750_vm1, %v7250_v7, 0.0 }
 0xc8f   : > { %8866 = vperm.xlu0 %10552, %v8316_v55   ;;  %v7992_v55 = vmax.f32 %v7908_v63, 0.0  ;;  %v8322_v9 = vmul.f32 %v11327_v28, %v8238_v23  ;;  %v7249_v63 = vmul.f32 %v14994_v42, %v14994_v42  ;;  %v7748_v23 = vmul.f32 0.0051020407, %v15889_v62 }
 0xc90   : > { %v8572_v41 = vsub.f32 %v8404_v2, %v8488_v31  ;;  %v7994_v49 = vmax.f32 %v7910_v11, 0.0  ;;  %v8244_v31 = vld [vmem:[%s14510_s19 + $0x208] sm:$0xff]  ;;  %v8246_v11 = vld [vmem:[%s14510_s19 + $0x218] sm:$0xff] }
 0xc91   : > { %v8076_v17 = vadd.f32 1e-05, %v7992_v55  ;;  %v8490_v38 = vmul.f32 %v8322_v9, %v16076_v21  ;;  %v7580_v2 = vadd.f32 %v7579_v10, %v7249_v63  ;;  %v7832_v55 = vmul.f32 %v16151_v60, %v16151_v60 }
 0xc92   : > { %v11329_v4 = vpop.eup %11328  ;;  %v8078_v21 = vadd.f32 1e-05, %v7994_v49 }
 0xc93   : > { %9454 = vperm.xlu0 %10552, %v8568_v27   ;;  %11332 = vrsqrt.f32 %v8076_v17  ;;  %v8574_v5 = vsub.f32 %v8406_v43, %v8490_v38  ;;  %v8324_v27 = vmul.f32 %v11329_v4, %v8240_v22  ;;  %v7916_v35 = vsub.f32 %v7748_v23, %v7832_v55  ;;  %v8412_v17 = vld [vmem:[%s14545_s22 + $0x208] sm:$0xff] }
 0xc94   : > { %11334 = vrsqrt.f32 %v8078_v21  ;;  %v16160_v38 = vmul.f32 0.0051020407, %v15937_v48  ;;  %v7750_v43 = vmul.f32 0.0051020407, %v15941_v0 }
 0xc95   : > { %v8492_v52 = vmul.f32 %v8324_v27, %v16088_v24  ;;  %v7830_v24 = vmul.f32 %v16137_v34, %v16137_v34  ;;  %v8000_v4 = vmax.f32 %v7916_v35, 0.0 }
 0xc96   : > { %v7834_v49 = vmul.f32 %v16160_v38, %v16160_v38 }
 0xc97   : > { %8876 = vperm.xlu0 %10552, %v8318_v14   ;;  %v7828_v14 = vmul.f32 %v16128_v16, %v16128_v16  ;;  %v8576_v1 = vsub.f32 %v8408_v33, %v8492_v52  ;;  %v7914_v54 = vsub.f32 %v7746_v40, %v7830_v24  ;;  %v8416_v40 = vld [vmem:[%s14545_s22 + $0x228] sm:$0xff] }
 0xc98   : > { %8801 = vperm.xlu1 %10553, %v16103_v25   ;;  %v7918_v48 = vsub.f32 %v7750_v43, %v7834_v49 }
 0xc99   : > { %v7912_v18 = vsub.f32 %v7744_v45, %v7828_v14  ;;  %v8471_v45 = vmul.f32 %v16103_v25, %v16046_v13  ;;  %v8387_v14 = vld [vmem:[%s14545_s22 + $0x140] sm:$0xff] }
 0xc9a   : > { %v11331_v20 = vpop.eup %11330 }
 0xc9b   : > { %9464 = vperm.xlu0 %10552, %v8570_v46   ;;  %v8326_v36 = vmul.f32 %v11331_v20, %v8242_v3  ;;  %v7996_v61 = vmax.f32 %v7912_v18, 0.0  ;;  %v8248_v20 = vld [vmem:[%s14510_s19 + $0x228] sm:$0xff]  ;;  %v16172_v18 = vmul.f32 0.0051020407, %v16022_v32  ;;  %v8555_v52 = vsub.f32 %v8387_v14, %v8471_v45  ;;  %v6745_v45 = vpop.f32.mrf.mxu1 }
 0xc9c   : > { %v8002_v3 = vmax.f32 %v7918_v48, 0.0 }
 0xc9d   : > { %v8494_v12 = vmul.f32 %v8326_v36, %v16095_v6  ;;  %v8080_v46 = vadd.f32 1e-05, %v7996_v61  ;;  %v7998_v6 = vmax.f32 %v7914_v54, 0.0  ;;  %v7836_v13 = vmul.f32 %v16172_v18, %v16172_v18 }
 0xc9e   : > { %v8086_v25 = vadd.f32 1e-05, %v8002_v3  ;;  %v7717_v3 = vmul.f32 0.0051020407, %v15044_v26  ;;  %v17864_v26 = vld [vmem:[#allocation122_spill] sm:$0xff] }
 0xc9f   : > { %8886 = vperm.xlu0 %10552, %v8320_v29   ;;  %v8410_v29 = vld [vmem:[%s14545_s22 + $0x1f8] sm:$0xff]  ;;  %11336 = vrsqrt.f32 %v8080_v46 }
 0xca0   : > { %v11333_v19 = vpop.eup %11332  ;;  %v8578_v28 = vsub.f32 %v8410_v29, %v8494_v12 }
 0xca1   : > { %v8328_v50 = vmul.f32 %v11333_v19, %v8244_v31  ;;  %v7082_v61 = vpop.xlane.xlu0 %7081 }
 0xca2   : > { %v16180_v29 = vmul.f32 0.0051020407, %v7082_v61 }
 0xca3   : > { %9474 = vperm.xlu0 %10552, %v8572_v41   ;;  %v11335_v41 = vpop.eup %11334  ;;  %v8496_v47 = vmul.f32 %v8328_v50, %v16110_v57 }
 0xca4   : > { %v8330_v62 = vmul.f32 %v11335_v41, %v8246_v11  ;;  %v7841_v23 = vmul.f32 %v16180_v29, %v16180_v29 }
 0xca5   : > { %v8580_v22 = vsub.f32 %v8412_v17, %v8496_v47  ;;  %v6292_v47 = vpop.f32.mrf.mxu0 }
 0xca6   : > { %v8498_v57 = vmul.f32 %v8330_v62, %v16117_v15  ;;  %v7752_v15 = vmul.f32 0.0051020407, %v16040_v56  ;;  %v7070_v24 = vpop.xlane.xlu1 %7069 }
 0xca7   : > { %8896 = vperm.xlu0 %10552, %v8322_v9   ;;  %v8082_v9 = vadd.f32 1e-05, %v7998_v6  ;;  %v16183_v31 = vmul.f32 0.0051020407, %v7070_v24  ;;  %v8252_v6 = vld [vmem:[%s14510_s19 + $0x248] sm:$0xff] }
 0xca9   : > { %11338 = vrsqrt.f32 %v8082_v9  ;;  %v8807_v54 = vpop.permute.xlu0 %8806 }
 0xcaa   : > { %v8792_v19 = vpop.permute.xlu1 %8791 }
 0xcab   : > { %9484 = vperm.xlu0 %10552, %v8574_v5   ;;  %v8084_v5 = vadd.f32 1e-05, %v8000_v4  ;;  %v17860_v4 = vld [vmem:[#allocation40_spill] sm:$0xff] }
 0xcac   : > { %v11337_v21 = vpop.eup %11336  ;;  %v9095_v43 = vmul.f32 %v8792_v19, %v17860_v4 }
 0xcad   : > { %11340 = vrsqrt.f32 %v8084_v5  ;;  %v8332_v33 = vmul.f32 %v11337_v21, %v8248_v20  ;;  %v17862_v5 = vld [vmem:[#allocation45_spill] sm:$0xff] }
 0xcae   : > { %11342 = vrsqrt.f32 %v8086_v25  ;;  %v9101_v48 = vmul.f32 %v8807_v54, %v17862_v5 }
 0xcaf   : > { %8906 = vperm.xlu0 %10552, %v8324_v27   ;;  %v8414_v27 = vld [vmem:[%s14545_s22 + $0x218] sm:$0xff]  ;;  %v8500_v32 = vmul.f32 %v8332_v33, %v16128_v16 }
 0xcb0   : > { %v8582_v0 = vsub.f32 %v8414_v27, %v8498_v57  ;;  %v17863_v27 = vld [vmem:[#allocation46_spill] sm:$0xff] }
 0xcb1   : > { %v8584_v12 = vsub.f32 %v8416_v40, %v8500_v32  ;;  %v9102_v14 = vmul.f32 %v8807_v54, %v17863_v27  ;;  %v8254_v32 = vld [vmem:[%s14510_s19 + $0x258] sm:$0xff]  ;;  %v17868_v27 = vld [vmem:[#allocation118_spill] sm:$0xff] }
 0xcb3   : > { %9494 = vperm.xlu0 %10552, %v8576_v1   ;;  %v8250_v1 = vld [vmem:[%s14510_s19 + $0x238] sm:$0xff] }
 0xcb6   : > { %v11339_v7 = vpop.eup %11338 }
 0xcb7   : > { %8916 = vperm.xlu0 %10552, %v8326_v36   ;;  %v7920_v36 = vsub.f32 %v7752_v15, %v7836_v13  ;;  %v8334_v46 = vmul.f32 %v11339_v7, %v8250_v1 }
 0xcb9   : > { %v8004_v56 = vmax.f32 %v7920_v36, 0.0  ;;  %v8502_v16 = vmul.f32 %v8334_v46, %v16137_v34  ;;  %v7838_v34 = vmul.f32 %v16183_v31, %v16183_v31  ;;  %v8420_v36 = vld [vmem:[%s14545_s22 + $0x248] sm:$0xff] }
 0xcba   : > { %v11341_v63 = vpop.eup %11340 }
 0xcbb   : > { %9504 = vperm.xlu0 %10552, %v8578_v28   ;;  %v8088_v10 = vadd.f32 1e-05, %v8004_v56  ;;  %v8336_v35 = vmul.f32 %v11341_v63, %v8252_v6  ;;  %v17866_v63 = vld [vmem:[#allocation200_spill] sm:$0xff] }
 0xcbc   : > { %7581 = vadd.xlane.f32.xlu1 %v7580_v2  ;;  %v8418_v2 = vld [vmem:[%s14545_s22 + $0x238] sm:$0xff] }
 0xcbd   : > { %11344 = vrsqrt.f32 %v8088_v10  ;;  %v8586_v41 = vsub.f32 %v8418_v2, %v8502_v16 }
 0xcbf   : > { %8926 = vperm.xlu0 %10552, %v8328_v50  }
 0xcc3   : > { %9514 = vperm.xlu0 %10552, %v8580_v22   ;;  %v17861_v22 = vld [vmem:[#allocation39_spill] sm:$0xff] }
 0xcc4   : > { %v9096_v49 = vmul.f32 %v8792_v19, %v17861_v22  ;;  %v17865_v19 = vld [vmem:[#allocation201_spill] sm:$0xff] }
 0xcc7   : > { %8936 = vperm.xlu0 %10552, %v8330_v62   ;;  %v16192_v62 = vmul.f32 0.0051020407, %v15042_v30  ;;  %v6294_v30 = vpop.f32.mrf.mxu0 }
 0xcc8   : > { %v6295_v1 = vadd.f32 %v6294_v30, %v17864_v26 }
 0xccb   : > { %9524 = vperm.xlu0 %10552, %v8582_v0   ;;  %v8504_v0 = vmul.f32 %v8336_v35, %v16151_v60  ;;  %v7801_v60 = vmul.f32 %v16192_v62, %v16192_v62 }
 0xccd   : > { %9389 = vperm.xlu1 %10553, %v8555_v52   ;;  %v11343_v52 = vpop.eup %11342  ;;  %v8588_v24 = vsub.f32 %v8420_v36, %v8504_v0  ;;  %v8424_v0 = vld [vmem:[%s14545_s22 + $0x268] sm:$0xff] }
 0xcce   : > { %v8338_v56 = vmul.f32 %v11343_v52, %v8254_v32  ;;  %v11345_v6 = vpop.eup %11344  ;;  %v8258_v52 = vld [vmem:[%s14510_s19 + $0x278] sm:$0xff] }
 0xccf   : > { %8946 = vperm.xlu0 %10552, %v8332_v33   ;;  %v17870_v32 = vld [vmem:[#allocation57_spill] sm:$0xff] }
 0xcd0   : > { %v8506_v2 = vmul.f32 %v8338_v56, %v16160_v38 }
 0xcd3   : > { %9534 = vperm.xlu0 %10552, %v8584_v12   ;;  %v6747_v12 = vpop.f32.mrf.mxu1 }
 0xcd4   : > { %v16211_v10 = vadd.f32 %v6747_v12, %v6295_v1  ;;  %v8221_v12 = vld [vmem:[%s14510_s19 + $0x150] sm:$0xff] }
 0xcd6   : > { %v7586_v28 = vpop.xlane.xlu0 %7585  ;;  %v7083_v38 = vsel %vm6750_vm1, %v16211_v10, 0.0 }
 0xcd7   : > { %v7757_v50 = vmul.f32 0.0051020407, %v7586_v28  ;;  %8956 = vperm.xlu0 %10552, %v8334_v46   ;;  %v7885_v46 = vsub.f32 %v7717_v3, %v7801_v60 }
 0xcd9   : > { %v7925_v55 = vsub.f32 %v7757_v50, %v7841_v23  ;;  %v17867_v23 = vld [vmem:[#allocation121_spill] sm:$0xff] }
 0xcda   : > { %v6293_v50 = vadd.f32 %v6292_v47, %v17867_v23  ;;  %v17873_v23 = vld [vmem:[#allocation62_spill] sm:$0xff] }
 0xcdb   : > { %v7574_v9 = vpop.xlane.xlu1 %7573  ;;  %v8009_v17 = vmax.f32 %v7925_v55, 0.0  ;;  %9544 = vperm.xlu0 %10552, %v8586_v41   ;;  %v7969_v55 = vmax.f32 %v7885_v46, 0.0  ;;  %v17871_v46 = vld [vmem:[#allocation172_spill] sm:$0xff] }
 0xcdc   : > { %v7754_v11 = vmul.f32 0.0051020407, %v7574_v9  ;;  %v8422_v9 = vld [vmem:[%s14545_s22 + $0x258] sm:$0xff] }
 0xcdd   : > { %v8093_v21 = vadd.f32 1e-05, %v8009_v17  ;;  %v8590_v17 = vsub.f32 %v8422_v9, %v8506_v2  ;;  %v8053_v47 = vadd.f32 1e-05, %v7969_v55  ;;  %v17874_v55 = vld [vmem:[#allocation183_spill] sm:$0xff] }
 0xcde   : > { %v7922_v57 = vsub.f32 %v7754_v11, %v7838_v34  ;;  %v9395_v33 = vpop.permute.xlu0 %9394 }
 0xcdf   : > { %v9380_v20 = vpop.permute.xlu1 %9379  ;;  %11346 = vrsqrt.f32 %v8093_v21  ;;  %v9689_v7 = vadd.f32 %v9395_v33, %v9101_v48  ;;  %v9690_v61 = vadd.f32 %v9395_v33, %v9102_v14  ;;  %8966 = vperm.xlu0 %10552, %v8336_v35   ;;  %v8256_v35 = vld [vmem:[%s14510_s19 + $0x268] sm:$0xff] }
 0xce0   : > { %v8006_v15 = vmax.f32 %v7922_v57, 0.0  ;;  %v9683_v13 = vadd.f32 %v9380_v20, %v9095_v43  ;;  %v9684_v25 = vadd.f32 %v9380_v20, %v9096_v49  ;;  %v8340_v4 = vmul.f32 %v11345_v6, %v8256_v35  ;;  %v8261_v49 = vld [vmem:[%s14510_s19 + $0x290] sm:$0xff] }
 0xce1   : > { %9857 = vst [vmem:[%s14990_s26 + $0x290] sm:$0xff] %v9689_v7  ;;  %9858 = vst.msk [vmem:[%s14990_s26 + $0x298] sm:$0xff] %vm6750_vm1, %v9690_v61  ;;  %v16224_v43 = vadd.f32 %v6745_v45, %v6293_v50 }
 0xce2   : > { %v8090_v40 = vadd.f32 1e-05, %v8006_v15  ;;  %9851 = vst [vmem:[%s14990_s26 + $0x260] sm:$0xff] %v9683_v13  ;;  %9852 = vst.msk [vmem:[%s14990_s26 + $0x268] sm:$0xff] %vm6750_vm1, %v9684_v25  ;;  %v8817_v54 = vpop.permute.xlu0 %8816  ;;  %v8508_v21 = vmul.f32 %v8340_v4, %v16172_v18  ;;  %v17869_v25 = vld [vmem:[#allocation123_spill] sm:$0xff] }
 0xce3   : > { %9554 = vperm.xlu0 %10552, %v8588_v24   ;;  %v9105_v16 = vmul.f32 %v8817_v54, %v17865_v19  ;;  %v9106_v28 = vmul.f32 %v8817_v54, %v17866_v63  ;;  %v7084_v5 = vadd.f32 %v7083_v38, %v16224_v43  ;;  %v17872_v19 = vld [vmem:[#allocation175_spill] sm:$0xff]  ;;  %v17876_v38 = vld [vmem:[#allocation48_spill] sm:$0xff] }
 0xce4   : > { %11348 = vrsqrt.f32 %v8090_v40  ;;  %v8592_v18 = vsub.f32 %v8424_v0, %v8508_v21  ;;  %v8426_v40 = vld [vmem:[%s14545_s22 + $0x278] sm:$0xff]  ;;  %v17879_v0 = vld [vmem:[#allocation47_spill] sm:$0xff] }
 0xce5   : > { %11350 = vrsqrt.f32 %v8053_v47 }
 0xce6   : > { %v9405_v41 = vpop.permute.xlu0 %9404 }
 0xce7   : > { %v9693_v34 = vadd.f32 %v9405_v41, %v9105_v16  ;;  %v9694_v11 = vadd.f32 %v9405_v41, %v9106_v28  ;;  %8976 = vperm.xlu0 %10552, %v8338_v56  }
 0xce9   : > { %9861 = vst [vmem:[%s14990_s26 + $0x2b0] sm:$0xff] %v9693_v34  ;;  %9862 = vst.msk [vmem:[%s14990_s26 + $0x2b8] sm:$0xff] %vm6750_vm1, %v9694_v11 }
 0xcea   : > { %v8827_v22 = vpop.permute.xlu0 %8826 }
 0xceb   : > { %9564 = vperm.xlu0 %10552, %v8590_v17   ;;  %v9109_v48 = vmul.f32 %v8827_v22, %v15033_v37  ;;  %v9110_v14 = vmul.f32 %v8827_v22, %v17868_v27  ;;  %v17875_v17 = vld [vmem:[#allocation66_spill] sm:$0xff] }
 0xcec   : > { %v11347_v57 = vpop.eup %11346  ;;  %v17878_v27 = vld [vmem:[#allocation58_spill] sm:$0xff] }
 0xced   : > { %v16231_v20 = vmul.f32 %v11347_v57, %v8261_v49 }
 0xcee   : > { %v9415_v45 = vpop.permute.xlu0 %9414 }
 0xcef   : > { %v9697_v3 = vadd.f32 %v9415_v45, %v9109_v48  ;;  %v9698_v15 = vadd.f32 %v9415_v45, %v9110_v14  ;;  %8986 = vperm.xlu0 %10552, %v8340_v4   ;;  %v16237_v37 = vmul.f32 %v16231_v20, %v16180_v29  ;;  %v7719_v14 = vmul.f32 0.0051020407, %v17878_v27 }
 0xcf1   : > { %v11349_v30 = vpop.eup %11348  ;;  %7085 = vadd.xlane.f32.xlu1 %v7084_v5  ;;  %9865 = vst [vmem:[%s14990_s26 + $0x2d0] sm:$0xff] %v9697_v3  ;;  %9866 = vst.msk [vmem:[%s14990_s26 + $0x2d8] sm:$0xff] %vm6750_vm1, %v9698_v15  ;;  %v17877_v5 = vld [vmem:[#allocation53_spill] sm:$0xff] }
 0xcf2   : > { %v8342_v33 = vmul.f32 %v11349_v30, %v8258_v52  ;;  %v8837_v13 = vpop.permute.xlu0 %8836  ;;  %v11351_v56 = vpop.eup %11350  ;;  %v16266_v48 = vmul.f32 0.0051020407, %v17877_v5  ;;  %v17880_v30 = vld [vmem:[#allocation50_spill] sm:$0xff]  ;;  %v17889_v5 = vld [vmem:[#allocation168_spill] sm:$0xff] }
 0xcf3   : > { %9574 = vperm.xlu0 %10552, %v8592_v18   ;;  %v9113_v36 = vmul.f32 %v8837_v13, %v17869_v25  ;;  %v9114_v7 = vmul.f32 %v8837_v13, %v17870_v32  ;;  %v16252_v63 = vmul.f32 %v11351_v56, %v8221_v12  ;;  %v17881_v25 = vld [vmem:[#allocation161_spill] sm:$0xff]  ;;  %v16304_v27 = vmul.f32 0.0051020407, %v17889_v5 }
 0xcf4   : > { %v8510_v61 = vmul.f32 %v8342_v33, %v16183_v31  ;;  %v7803_v45 = vmul.f32 %v16266_v48, %v16266_v48 }
 0xcf6   : > { %v9425_v60 = vpop.permute.xlu0 %9424  ;;  %v8594_v1 = vsub.f32 %v8426_v40, %v8510_v61  ;;  %v7887_v15 = vsub.f32 %v7719_v14, %v7803_v45  ;;  %v7254_v61 = vmul.f32 %v16211_v10, %v16211_v10  ;;  %v17890_v45 = vld [vmem:[#allocation126_spill] sm:$0xff] }
 0xcf7   : > { %v9701_v26 = vadd.f32 %v9425_v60, %v9113_v36  ;;  %v9702_v29 = vadd.f32 %v9425_v60, %v9114_v7  ;;  %8996 = vperm.xlu0 %10552, %v8342_v33   ;;  %v16277_v36 = vmul.f32 0.0051020407, %v17881_v25  ;;  %v17882_v60 = vld [vmem:[#allocation127_spill] sm:$0xff] }
 0xcf8   : > { %v7971_v32 = vmax.f32 %v7887_v15, 0.0  ;;  %v7721_v40 = vmul.f32 0.0051020407, %v17882_v60  ;;  %v17892_v15 = vld [vmem:[#allocation215_spill] sm:$0xff] }
 0xcf9   : > { %9869 = vst [vmem:[%s14990_s26 + $0x2f0] sm:$0xff] %v9701_v26  ;;  %9870 = vst.msk [vmem:[%s14990_s26 + $0x2f8] sm:$0xff] %vm6750_vm1, %v9702_v29  ;;  %v7805_v26 = vmul.f32 %v16277_v36, %v16277_v36  ;;  %v17883_v29 = vld [vmem:[#allocation73_spill] sm:$0xff] }
 0xcfa   : > { %v8847_v24 = vpop.permute.xlu0 %8846  ;;  %v8055_v12 = vadd.f32 1e-05, %v7971_v32 }
 0xcfb   : > { %9584 = vperm.xlu0 %10552, %v8594_v1   ;;  %v9117_v54 = vmul.f32 %v8847_v24, %v17871_v46  ;;  %v9118_v31 = vmul.f32 %v8847_v24, %v17872_v19  ;;  %v17884_v24 = vld [vmem:[#allocation202_spill] sm:$0xff] }
 0xcfc   : > { %11352 = vrsqrt.f32 %v8055_v12 }
 0xcfe   : > { %v9435_v16 = vpop.permute.xlu0 %9434 }
 0xcff   : > { %v9705_v28 = vadd.f32 %v9435_v16, %v9117_v54  ;;  %v9706_v2 = vadd.f32 %v9435_v16, %v9118_v31  ;;  %v7889_v54 = vsub.f32 %v7721_v40, %v7805_v26  ;;  %v7587_v16 = vsel %vm6750_vm1, %v7254_v61, 0.0  ;;  %v8223_v40 = vld [vmem:[%s14510_s19 + $0x160] sm:$0xff]  ;;  %v17893_v26 = vld [vmem:[#allocation59_spill] sm:$0xff] }
 0xd01   : > { %9873 = vst [vmem:[%s14990_s26 + $0x310] sm:$0xff] %v9705_v28  ;;  %9874 = vst.msk [vmem:[%s14990_s26 + $0x318] sm:$0xff] %vm6750_vm1, %v9706_v2  ;;  %v7253_v28 = vmul.f32 %v16224_v43, %v16224_v43  ;;  %v17885_v2 = vld [vmem:[#allocation178_spill] sm:$0xff] }
 0xd02   : > { %8811 = vperm.xlu1 %10553, %v16252_v63   ;;  %v8857_v6 = vpop.permute.xlu0 %8856 }
 0xd03   : > { %v9121_v50 = vmul.f32 %v8857_v6, %v17873_v23  ;;  %v9122_v41 = vmul.f32 %v8857_v6, %v17874_v55  ;;  %v16293_v6 = vmul.f32 0.0051020407, %v17885_v2  ;;  %v7973_v55 = vmax.f32 %v7889_v54, 0.0 }
 0xd06   : > { %v9445_v9 = vpop.permute.xlu0 %9444 }
 0xd07   : > { %v9709_v35 = vadd.f32 %v9445_v9, %v9121_v50  ;;  %v9710_v34 = vadd.f32 %v9445_v9, %v9122_v41  ;;  %v7588_v50 = vadd.f32 %v7587_v16, %v7253_v28  ;;  %v17886_v41 = vld [vmem:[#allocation164_spill] sm:$0xff]  ;;  %v17896_v16 = vld [vmem:[#allocation223_spill] sm:$0xff] }
 0xd08   : > { %v7723_v9 = vmul.f32 0.0051020407, %v17886_v41  ;;  %v17897_v41 = vld [vmem:[#allocation131_spill] sm:$0xff] }
 0xd09   : > { %9877 = vst [vmem:[%s14990_s26 + $0x330] sm:$0xff] %v9709_v35  ;;  %9878 = vst.msk [vmem:[%s14990_s26 + $0x338] sm:$0xff] %vm6750_vm1, %v9710_v34  ;;  %v7807_v35 = vmul.f32 %v16293_v6, %v16293_v6  ;;  %v17887_v34 = vld [vmem:[#allocation78_spill] sm:$0xff]  ;;  %v11353_v25 = vpop.eup %11352 }
 0xd0a   : > { %v8867_v11 = vpop.permute.xlu0 %8866 }
 0xd0b   : > { %v9125_v4 = vmul.f32 %v8867_v11, %v17875_v17  ;;  %v9126_v47 = vmul.f32 %v8867_v11, %v17876_v38  ;;  %v17888_v17 = vld [vmem:[#allocation207_spill] sm:$0xff] }
 0xd0e   : > { %v9455_v22 = vpop.permute.xlu0 %9454 }
 0xd0f   : > { %v9713_v49 = vadd.f32 %v9455_v22, %v9125_v4  ;;  %v9714_v57 = vadd.f32 %v9455_v22, %v9126_v47  ;;  %v8057_v47 = vadd.f32 1e-05, %v7973_v55  ;;  %v7891_v22 = vsub.f32 %v7723_v9, %v7807_v35 }
 0xd10   : > { %v16331_v9 = vmul.f32 0.0051020407, %v17897_v41 }
 0xd11   : > { %9881 = vst [vmem:[%s14990_s26 + $0x350] sm:$0xff] %v9713_v49  ;;  %9882 = vst.msk [vmem:[%s14990_s26 + $0x358] sm:$0xff] %vm6750_vm1, %v9714_v57  ;;  %11354 = vrsqrt.f32 %v8057_v47 }
 0xd12   : > { %v8877_v21 = vpop.permute.xlu0 %8876 }
 0xd13   : > { %v9129_v52 = vmul.f32 %v8877_v21, %v17879_v0  ;;  %v9130_v3 = vmul.f32 %v8877_v21, %v17880_v30  ;;  %v7975_v21 = vmax.f32 %v7891_v22, 0.0  ;;  %v7725_v0 = vmul.f32 0.0051020407, %v17890_v45  ;;  %v17891_v30 = vld [vmem:[#allocation82_spill] sm:$0xff]  ;;  %v7078_v22 = vpop.xlane.xlu1 %7077 }
 0xd14   : > { %v17899_v45 = vld [vmem:[#allocation90_spill] sm:$0xff] }
 0xd15   : > { %v8059_v32 = vadd.f32 1e-05, %v7975_v21 }
 0xd16   : > { %v9465_v18 = vpop.permute.xlu0 %9464 }
 0xd17   : > { %v9717_v33 = vadd.f32 %v9465_v18, %v9129_v52  ;;  %v9718_v13 = vadd.f32 %v9465_v18, %v9130_v3  ;;  %v7809_v52 = vmul.f32 %v16304_v27, %v16304_v27  ;;  %11356 = vrsqrt.f32 %v8059_v32 }
 0xd19   : > { %9885 = vst [vmem:[%s14990_s26 + $0x370] sm:$0xff] %v9717_v33  ;;  %9886 = vst.msk [vmem:[%s14990_s26 + $0x378] sm:$0xff] %vm6750_vm1, %v9718_v13  ;;  %v8473_v13 = vmul.f32 %v16252_v63, %v16192_v62 }
 0xd1a   : > { %v8887_v7 = vpop.permute.xlu0 %8886 }
 0xd1b   : > { %v9133_v1 = vmul.f32 %v8887_v7, %v17883_v29  ;;  %v9134_v56 = vmul.f32 %v8887_v7, %v17884_v24  ;;  %v7893_v7 = vsub.f32 %v7725_v0, %v7809_v52  ;;  %v16318_v29 = vmul.f32 0.0051020407, %v17893_v26  ;;  %v17894_v24 = vld [vmem:[#allocation174_spill] sm:$0xff]  ;;  %v17900_v52 = vld [vmem:[#allocation229_spill] sm:$0xff] }
 0xd1c   : > { %v8227_v26 = vld [vmem:[%s14510_s19 + $0x180] sm:$0xff] }
 0xd1d   : > { %v7977_v62 = vmax.f32 %v7893_v7, 0.0  ;;  %v7811_v54 = vmul.f32 %v16318_v29, %v16318_v29  ;;  %v17901_v7 = vld [vmem:[#allocation159_spill] sm:$0xff] }
 0xd1e   : > { %v9475_v46 = vpop.permute.xlu0 %9474 }
 0xd1f   : > { %v9721_v19 = vadd.f32 %v9475_v46, %v9133_v1  ;;  %v9722_v31 = vadd.f32 %v9475_v46, %v9134_v56  ;;  %v8389_v1 = vld [vmem:[%s14545_s22 + $0x150] sm:$0xff]  ;;  %v7727_v56 = vmul.f32 0.0051020407, %v17894_v24  ;;  %v8307_v46 = vmul.f32 %v11353_v25, %v8223_v40 }
 0xd20   : > { %v8557_v63 = vsub.f32 %v8389_v1, %v8473_v13  ;;  %v8061_v55 = vadd.f32 1e-05, %v7977_v62  ;;  %v8393_v40 = vld [vmem:[%s14545_s22 + $0x170] sm:$0xff] }
 0xd21   : > { %9889 = vst [vmem:[%s14990_s26 + $0x390] sm:$0xff] %v9721_v19  ;;  %9890 = vst.msk [vmem:[%s14990_s26 + $0x398] sm:$0xff] %vm6750_vm1, %v9722_v31  ;;  %v17895_v19 = vld [vmem:[#allocation86_spill] sm:$0xff]  ;;  %v7895_v2 = vsub.f32 %v7727_v56, %v7811_v54  ;;  %v17902_v24 = vld [vmem:[#allocation160_spill] sm:$0xff] }
 0xd22   : > { %v8897_v23 = vpop.permute.xlu0 %8896  ;;  %11358 = vrsqrt.f32 %v8061_v55  ;;  %v7731_v56 = vmul.f32 0.0051020407, %v17902_v24  ;;  %v17905_v55 = vld [vmem:[#allocation44_spill] sm:$0xff] }
 0xd23   : > { %v9137_v11 = vmul.f32 %v8897_v23, %v17887_v34  ;;  %v9138_v4 = vmul.f32 %v8897_v23, %v17888_v17  ;;  %v8391_v17 = vld [vmem:[%s14545_s22 + $0x160] sm:$0xff] }
 0xd26   : > { %7589 = vadd.xlane.f32.xlu1 %v7588_v50  ;;  %v9485_v38 = vpop.permute.xlu0 %9484  ;;  %v8475_v50 = vmul.f32 %v8307_v46, %v16266_v48  ;;  %v7813_v48 = vmul.f32 %v16331_v9, %v16331_v9 }
 0xd27   : > { %v9725_v49 = vadd.f32 %v9485_v38, %v9137_v11  ;;  %v9726_v57 = vadd.f32 %v9485_v38, %v9138_v4  ;;  %v11355_v11 = vpop.eup %11354  ;;  %v8225_v4 = vld [vmem:[%s14510_s19 + $0x170] sm:$0xff]  ;;  %v17898_v38 = vld [vmem:[#allocation130_spill] sm:$0xff] }
 0xd28   : > { %v7729_v47 = vmul.f32 0.0051020407, %v17898_v38  ;;  %v8559_v5 = vsub.f32 %v8391_v17, %v8475_v50  ;;  %v11357_v32 = vpop.eup %11356 }
 0xd29   : > { %9893 = vst [vmem:[%s14990_s26 + $0x3b0] sm:$0xff] %v9725_v49  ;;  %9894 = vst.msk [vmem:[%s14990_s26 + $0x3b8] sm:$0xff] %vm6750_vm1, %v9726_v57  ;;  %v7979_v49 = vmax.f32 %v7895_v2, 0.0  ;;  %v17904_v2 = vld [vmem:[#allocation237_spill] sm:$0xff] }
 0xd2a   : > { %v8907_v14 = vpop.permute.xlu0 %8906  ;;  %v7897_v21 = vsub.f32 %v7729_v47, %v7813_v48 }
 0xd2b   : > { %v9141_v3 = vmul.f32 %v8907_v14, %v17891_v30  ;;  %v9142_v18 = vmul.f32 %v8907_v14, %v17892_v15  ;;  %v8309_v14 = vmul.f32 %v11355_v11, %v8225_v4 }
 0xd2c   : > { %v7981_v1 = vmax.f32 %v7897_v21, 0.0  ;;  %v8229_v21 = vld [vmem:[%s14510_s19 + $0x190] sm:$0xff] }
 0xd2d   : > { %v8477_v25 = vmul.f32 %v8309_v14, %v16277_v36  ;;  %v8311_v36 = vmul.f32 %v11357_v32, %v8227_v26 }
 0xd2e   : > { %v9495_v33 = vpop.permute.xlu0 %9494 }
 0xd2f   : > { %v9729_v61 = vadd.f32 %v9495_v33, %v9141_v3  ;;  %v9730_v60 = vadd.f32 %v9495_v33, %v9142_v18  ;;  %v8063_v3 = vadd.f32 1e-05, %v7979_v49  ;;  %v8802_v18 = vpop.permute.xlu1 %8801  ;;  %v8561_v62 = vsub.f32 %v8393_v40, %v8477_v25  ;;  %v11359_v49 = vpop.eup %11358  ;;  %v17909_v25 = vld [vmem:[#allocation51_spill] sm:$0xff] }
 0xd30   : > { %v9099_v41 = vmul.f32 %v8802_v18, %v17905_v55  ;;  %v17913_v55 = vld [vmem:[#allocation99_spill] sm:$0xff] }
 0xd31   : > { %9897 = vst [vmem:[%s14990_s26 + $0x3d0] sm:$0xff] %v9729_v61  ;;  %9898 = vst.msk [vmem:[%s14990_s26 + $0x3d8] sm:$0xff] %vm6750_vm1, %v9730_v60  ;;  %v16345_v61 = vmul.f32 0.0051020407, %v17901_v7  ;;  %v16347_v60 = vmul.f32 0.0051020407, %v7078_v22  ;;  %11360 = vrsqrt.f32 %v8063_v3  ;;  %v8479_v22 = vmul.f32 %v8311_v36, %v16293_v6 }
 0xd32   : > { %v8917_v12 = vpop.permute.xlu0 %8916  ;;  %v17908_v3 = vld [vmem:[#allocation171_spill] sm:$0xff]  ;;  %v17910_v7 = vld [vmem:[#allocation245_spill] sm:$0xff] }
 0xd33   : > { %v9145_v31 = vmul.f32 %v8917_v12, %v17895_v19  ;;  %v9146_v28 = vmul.f32 %v8917_v12, %v17896_v16  ;;  %v7840_v54 = vmul.f32 %v16347_v60, %v16347_v60  ;;  %v17903_v16 = vld [vmem:[#allocation234_spill] sm:$0xff] }
 0xd36   : > { %v9505_v23 = vpop.permute.xlu0 %9504 }
 0xd37   : > { %9399 = vperm.xlu1 %10553, %v8557_v63   ;;  %v9733_v35 = vadd.f32 %v9505_v23, %v9145_v31  ;;  %v9734_v34 = vadd.f32 %v9505_v23, %v9146_v28  ;;  %v7815_v63 = vmul.f32 %v16345_v61, %v16345_v61  ;;  %v8065_v31 = vadd.f32 1e-05, %v7981_v1 }
 0xd39   : > { %9901 = vst [vmem:[%s14990_s26 + $0x3f0] sm:$0xff] %v9733_v35  ;;  %9902 = vst.msk [vmem:[%s14990_s26 + $0x3f8] sm:$0xff] %vm6750_vm1, %v9734_v34  ;;  %v7899_v50 = vsub.f32 %v7731_v56, %v7815_v63  ;;  %v17906_v35 = vld [vmem:[#allocation43_spill] sm:$0xff]  ;;  %11362 = vrsqrt.f32 %v8065_v31  ;;  %v8397_v63 = vld [vmem:[%s14545_s22 + $0x190] sm:$0xff] }
 0xd3a   : > { %v8927_v57 = vpop.permute.xlu0 %8926  ;;  %v9100_v34 = vmul.f32 %v8802_v18, %v17906_v35  ;;  %v17914_v35 = vld [vmem:[#allocation251_spill] sm:$0xff] }
 0xd3b   : > { %8821 = vperm.xlu1 %10553, %v8307_v46   ;;  %v9149_v0 = vmul.f32 %v8927_v57, %v17899_v45  ;;  %v9150_v30 = vmul.f32 %v8927_v57, %v17900_v52  ;;  %v17907_v45 = vld [vmem:[#allocation186_spill] sm:$0xff]  ;;  %v7983_v52 = vmax.f32 %v7899_v50, 0.0 }
 0xd3d   : > { %v8067_v26 = vadd.f32 1e-05, %v7983_v52 }
 0xd3e   : > { %v9515_v15 = vpop.permute.xlu0 %9514  ;;  %v11361_v24 = vpop.eup %11360 }
 0xd3f   : > { %9409 = vperm.xlu1 %10553, %v8559_v5   ;;  %v9737_v33 = vadd.f32 %v9515_v15, %v9149_v0  ;;  %v9738_v13 = vadd.f32 %v9515_v15, %v9150_v30  ;;  %v16367_v0 = vmul.f32 0.0051020407, %v17907_v45  ;;  %v7733_v15 = vmul.f32 0.0051020407, %v17908_v3  ;;  %v17916_v3 = vld [vmem:[#allocation133_spill] sm:$0xff] }
 0xd41   : > { %9905 = vst [vmem:[%s14990_s26 + $0x410] sm:$0xff] %v9737_v33  ;;  %9906 = vst.msk [vmem:[%s14990_s26 + $0x418] sm:$0xff] %vm6750_vm1, %v9738_v13  ;;  %v8313_v33 = vmul.f32 %v11359_v49, %v8229_v21  ;;  %v7817_v13 = vmul.f32 %v16367_v0, %v16367_v0  ;;  %v17915_v21 = vld [vmem:[#allocation162_spill] sm:$0xff] }
 0xd42   : > { %v8937_v12 = vpop.permute.xlu0 %8936  ;;  %v16399_v45 = vmul.f32 0.0051020407, %v17915_v21  ;;  %v8237_v21 = vld [vmem:[%s14510_s19 + $0x1d0] sm:$0xff] }
 0xd43   : > { %8831 = vperm.xlu1 %10553, %v8309_v14   ;;  %v9153_v28 = vmul.f32 %v8937_v12, %v17903_v16  ;;  %v9154_v23 = vmul.f32 %v8937_v12, %v17904_v2  ;;  %v8395_v14 = vld [vmem:[%s14545_s22 + $0x180] sm:$0xff]  ;;  %v7901_v56 = vsub.f32 %v7733_v15, %v7817_v13  ;;  %v17912_v2 = vld [vmem:[#allocation185_spill] sm:$0xff]  ;;  %v7737_v15 = vmul.f32 0.0051020407, %v17916_v3 }
 0xd44   : > { %v8563_v18 = vsub.f32 %v8395_v14, %v8479_v22 }
 0xd45   : > { %v7582_v46 = vpop.xlane.xlu1 %7581 }
 0xd46   : > { %v7756_v19 = vmul.f32 0.0051020407, %v7582_v46  ;;  %v9525_v17 = vpop.permute.xlu0 %9524 }
 0xd47   : > { %9419 = vperm.xlu1 %10553, %v8561_v62   ;;  %v9741_v4 = vadd.f32 %v9525_v17, %v9153_v28  ;;  %v9742_v38 = vadd.f32 %v9525_v17, %v9154_v23  ;;  %v8481_v62 = vmul.f32 %v8313_v33, %v16304_v27  ;;  %v7985_v28 = vmax.f32 %v7901_v56, 0.0 }
 0xd48   : > { %v7924_v11 = vsub.f32 %v7756_v19, %v7840_v54  ;;  %v17911_v54 = vld [vmem:[#allocation182_spill] sm:$0xff]  ;;  %v7735_v23 = vmul.f32 0.0051020407, %v17912_v2 }
 0xd49   : > { %v9390_v47 = vpop.permute.xlu1 %9389  ;;  %9909 = vst [vmem:[%s14990_s26 + $0x430] sm:$0xff] %v9741_v4  ;;  %9910 = vst.msk [vmem:[%s14990_s26 + $0x438] sm:$0xff] %vm6750_vm1, %v9742_v38  ;;  %v16384_v19 = vmul.f32 0.0051020407, %v17911_v54  ;;  %v8565_v50 = vsub.f32 %v8397_v63, %v8481_v62  ;;  %v11363_v4 = vpop.eup %11362  ;;  %v8069_v38 = vadd.f32 1e-05, %v7985_v28 }
 0xd4a   : > { %v8008_v57 = vmax.f32 %v7924_v11, 0.0  ;;  %v9687_v48 = vadd.f32 %v9390_v47, %v9099_v41  ;;  %v9688_v5 = vadd.f32 %v9390_v47, %v9100_v34  ;;  %v8947_v6 = vpop.permute.xlu0 %8946  ;;  %v8401_v54 = vld [vmem:[%s14545_s22 + $0x1b0] sm:$0xff] }
 0xd4b   : > { %8841 = vperm.xlu1 %10553, %v8311_v36   ;;  %v9157_v32 = vmul.f32 %v8947_v6, %v17909_v25  ;;  %v9158_v40 = vmul.f32 %v8947_v6, %v17910_v7  ;;  %v8231_v36 = vld [vmem:[%s14510_s19 + $0x1a0] sm:$0xff]  ;;  %v7819_v27 = vmul.f32 %v16384_v19, %v16384_v19  ;;  %v7821_v25 = vmul.f32 %v16399_v45, %v16399_v45 }
 0xd4c   : > { %v8092_v30 = vadd.f32 1e-05, %v8008_v57  ;;  %9855 = vst [vmem:[%s14990_s26 + $0x280] sm:$0xff] %v9687_v48  ;;  %9856 = vst.msk [vmem:[%s14990_s26 + $0x288] sm:$0xff] %vm6750_vm1, %v9688_v5  ;;  %v8315_v16 = vmul.f32 %v11361_v24, %v8231_v36  ;;  %v8260_v57 = vld [vmem:[%s14510_s19 + $0x288] sm:$0xff]  ;;  %v8233_v48 = vld [vmem:[%s14510_s19 + $0x1b0] sm:$0xff] }
 0xd4d   : > { %v7903_v47 = vsub.f32 %v7735_v23, %v7819_v27  ;;  %v8399_v5 = vld [vmem:[%s14545_s22 + $0x1a0] sm:$0xff]  ;;  %v7905_v62 = vsub.f32 %v7737_v15, %v7821_v25  ;;  %v17920_v23 = vld [vmem:[#allocation167_spill] sm:$0xff] }
 0xd4e   : > { %11364 = vrsqrt.f32 %v8092_v30  ;;  %v9535_v1 = vpop.permute.xlu0 %9534  ;;  %v8483_v17 = vmul.f32 %v8315_v16, %v16318_v29  ;;  %v8317_v29 = vmul.f32 %v11363_v4, %v8233_v48  ;;  %v17923_v48 = vld [vmem:[#allocation193_spill] sm:$0xff] }
 0xd4f   : > { %9429 = vperm.xlu1 %10553, %v8563_v18   ;;  %v9745_v12 = vadd.f32 %v9535_v1, %v9157_v32  ;;  %v9746_v46 = vadd.f32 %v9535_v1, %v9158_v40  ;;  %11366 = vrsqrt.f32 %v8067_v26  ;;  %v7987_v6 = vmax.f32 %v7903_v47, 0.0  ;;  %v17917_v32 = vld [vmem:[#allocation103_spill] sm:$0xff]  ;;  %v17918_v40 = vld [vmem:[#allocation256_spill] sm:$0xff] }
 0xd50   : > { %11368 = vrsqrt.f32 %v8069_v38  ;;  %v8567_v18 = vsub.f32 %v8399_v5, %v8483_v17  ;;  %v8485_v56 = vmul.f32 %v8317_v29, %v16331_v9  ;;  %v7989_v9 = vmax.f32 %v7905_v62, 0.0  ;;  %v17927_v62 = vld [vmem:[#allocation190_spill] sm:$0xff] }
 0xd51   : > { %9913 = vst [vmem:[%s14990_s26 + $0x450] sm:$0xff] %v9745_v12  ;;  %9914 = vst.msk [vmem:[%s14990_s26 + $0x458] sm:$0xff] %vm6750_vm1, %v9746_v46  ;;  %v8071_v46 = vadd.f32 1e-05, %v7987_v6  ;;  %v16427_v5 = vmul.f32 0.0051020407, %v17923_v48 }
 0xd52   : > { %v8957_v31 = vpop.permute.xlu0 %8956  ;;  %v8569_v27 = vsub.f32 %v8401_v54, %v8485_v56  ;;  %v8073_v38 = vadd.f32 1e-05, %v7989_v9  ;;  %v17928_v54 = vld [vmem:[#allocation192_spill] sm:$0xff] }
 0xd53   : > { %8851 = vperm.xlu1 %10553, %v8313_v33   ;;  %v9161_v41 = vmul.f32 %v8957_v31, %v17913_v55  ;;  %v9162_v34 = vmul.f32 %v8957_v31, %v17914_v35  ;;  %v8428_v33 = vld [vmem:[%s14545_s22 + $0x288] sm:$0xff]  ;;  %v17919_v31 = vld [vmem:[#allocation138_spill] sm:$0xff]  ;;  %11370 = vrsqrt.f32 %v8071_v46  ;;  %v7825_v15 = vmul.f32 %v16427_v5, %v16427_v5 }
 0xd54   : > { %11372 = vrsqrt.f32 %v8073_v38  ;;  %v8239_v46 = vld [vmem:[%s14510_s19 + $0x1e0] sm:$0xff] }
 0xd55   : > { %v8407_v38 = vld [vmem:[%s14545_s22 + $0x1e0] sm:$0xff] }
 0xd56   : > { %v9545_v11 = vpop.permute.xlu0 %9544 }
 0xd57   : > { %9439 = vperm.xlu1 %10553, %v8565_v50   ;;  %v9749_v22 = vadd.f32 %v9545_v11, %v9161_v41  ;;  %v9750_v49 = vadd.f32 %v9545_v11, %v9162_v34  ;;  %v7739_v50 = vmul.f32 0.0051020407, %v17920_v23  ;;  %v17921_v41 = vld [vmem:[#allocation107_spill] sm:$0xff] }
 0xd58   : > { %v17922_v34 = vld [vmem:[#allocation263_spill] sm:$0xff] }
 0xd59   : > { %9917 = vst [vmem:[%s14990_s26 + $0x470] sm:$0xff] %v9749_v22  ;;  %9918 = vst.msk [vmem:[%s14990_s26 + $0x478] sm:$0xff] %vm6750_vm1, %v9750_v49 }
 0xd5a   : > { %v8967_v52 = vpop.permute.xlu0 %8966 }
 0xd5b   : > { %v11365_v14 = vpop.eup %11364  ;;  %8861 = vperm.xlu1 %10553, %v8315_v16   ;;  %v9165_v7 = vmul.f32 %v8967_v52, %v17917_v32  ;;  %v9166_v26 = vmul.f32 %v8967_v52, %v17918_v40  ;;  %v16415_v16 = vmul.f32 0.0051020407, %v17919_v31  ;;  %v17924_v52 = vld [vmem:[#allocation61_spill] sm:$0xff]  ;;  %v7743_v31 = vmul.f32 0.0051020407, %v17928_v54 }
 0xd5c   : > { %v8344_v30 = vmul.f32 %v11365_v14, %v8260_v57  ;;  %v11367_v12 = vpop.eup %11366  ;;  %v8403_v14 = vld [vmem:[%s14545_s22 + $0x1c0] sm:$0xff] }
 0xd5d   : > { %v7823_v55 = vmul.f32 %v16415_v16, %v16415_v16  ;;  %v11369_v57 = vpop.eup %11368 }
 0xd5e   : > { %9006 = vperm.xlu0 %10552, %v8344_v30   ;;  %v8512_v13 = vmul.f32 %v8344_v30, %v16347_v60  ;;  %v9555_v1 = vpop.permute.xlu0 %9554  ;;  %v8235_v60 = vld [vmem:[%s14510_s19 + $0x1c0] sm:$0xff]  ;;  %v7741_v30 = vmul.f32 0.0051020407, %v17924_v52  ;;  %v8321_v3 = vmul.f32 %v11369_v57, %v8237_v21 }
 0xd5f   : > { %9449 = vperm.xlu1 %10553, %v8567_v18   ;;  %v9753_v36 = vadd.f32 %v9555_v1, %v9165_v7  ;;  %v9754_v63 = vadd.f32 %v9555_v1, %v9166_v26  ;;  %v8319_v2 = vmul.f32 %v11367_v12, %v8235_v60  ;;  %v7907_v47 = vsub.f32 %v7739_v50, %v7823_v55  ;;  %v17925_v18 = vld [vmem:[#allocation110_spill] sm:$0xff]  ;;  %v8405_v12 = vld [vmem:[%s14545_s22 + $0x1d0] sm:$0xff] }
 0xd60   : > { %v8596_v24 = vsub.f32 %v8428_v33, %v8512_v13  ;;  %v17926_v13 = vld [vmem:[#allocation270_spill] sm:$0xff]  ;;  %v7909_v32 = vsub.f32 %v7741_v30, %v7825_v15  ;;  %v11371_v56 = vpop.eup %11370  ;;  %v8409_v30 = vld [vmem:[%s14545_s22 + $0x1f0] sm:$0xff] }
 0xd61   : > { %9921 = vst [vmem:[%s14990_s26 + $0x490] sm:$0xff] %v9753_v36  ;;  %9922 = vst.msk [vmem:[%s14990_s26 + $0x498] sm:$0xff] %vm6750_vm1, %v9754_v63  ;;  %v8487_v4 = vmul.f32 %v8319_v2, %v16345_v61  ;;  %v7991_v61 = vmax.f32 %v7907_v47, 0.0  ;;  %v16443_v36 = vmul.f32 0.0051020407, %v17927_v62  ;;  %v8241_v47 = vld [vmem:[%s14510_s19 + $0x1f0] sm:$0xff] }
 0xd62   : > { %9594 = vperm.xlu0 %10552, %v8596_v24   ;;  %v8977_v28 = vpop.permute.xlu0 %8976  ;;  %v8489_v24 = vmul.f32 %v8321_v3, %v16367_v0  ;;  %v7993_v63 = vmax.f32 %v7909_v32, 0.0  ;;  %v8323_v0 = vmul.f32 %v11371_v56, %v8239_v46  ;;  %v17932_v15 = vld [vmem:[#allocation72_spill] sm:$0xff]  ;;  %v17934_v62 = vld [vmem:[#allocation141_spill] sm:$0xff] }
 0xd63   : > { %8871 = vperm.xlu1 %10553, %v8317_v29   ;;  %v9169_v35 = vmul.f32 %v8977_v28, %v17921_v41  ;;  %v9170_v11 = vmul.f32 %v8977_v28, %v17922_v34  ;;  %v8571_v6 = vsub.f32 %v8403_v14, %v8487_v4  ;;  %v8075_v40 = vadd.f32 1e-05, %v7991_v61  ;;  %v17931_v61 = vld [vmem:[#allocation184_spill] sm:$0xff] }
 0xd64   : > { %v8573_v28 = vsub.f32 %v8405_v12, %v8489_v24  ;;  %v8077_v50 = vadd.f32 1e-05, %v7993_v63  ;;  %v8491_v34 = vmul.f32 %v8323_v0, %v16384_v19  ;;  %v17933_v24 = vld [vmem:[#allocation179_spill] sm:$0xff]  ;;  %v7749_v63 = vmul.f32 0.0051020407, %v17934_v62 }
 0xd65   : > { %11374 = vrsqrt.f32 %v8075_v40  ;;  %v16478_v56 = vmul.f32 0.0051020407, %v17933_v24  ;;  %v8419_v24 = vld [vmem:[%s14545_s22 + $0x240] sm:$0xff] }
 0xd66   : > { %v9565_v17 = vpop.permute.xlu0 %9564  ;;  %11376 = vrsqrt.f32 %v8077_v50 }
 0xd67   : > { %9459 = vperm.xlu1 %10553, %v8569_v27   ;;  %v9757_v22 = vadd.f32 %v9565_v17, %v9169_v35  ;;  %v9758_v49 = vadd.f32 %v9565_v17, %v9170_v11  ;;  %v11373_v11 = vpop.eup %11372  ;;  %v17929_v17 = vld [vmem:[#allocation136_spill] sm:$0xff]  ;;  %v7833_v54 = vmul.f32 %v16478_v56, %v16478_v56 }
 0xd68   : > { %v16455_v4 = vmul.f32 0.0051020407, %v17929_v17  ;;  %v8325_v57 = vmul.f32 %v11373_v11, %v8241_v47 }
 0xd69   : > { %9925 = vst [vmem:[%s14990_s26 + $0x4b0] sm:$0xff] %v9757_v22  ;;  %9926 = vst.msk [vmem:[%s14990_s26 + $0x4b8] sm:$0xff] %vm6750_vm1, %v9758_v49  ;;  %v8575_v49 = vsub.f32 %v8407_v38, %v8491_v34 }
 0xd6a   : > { %v8987_v29 = vpop.permute.xlu0 %8986  ;;  %v7829_v19 = vmul.f32 %v16455_v4, %v16455_v4  ;;  %v8493_v21 = vmul.f32 %v8325_v57, %v16399_v45 }
 0xd6b   : > { %8881 = vperm.xlu1 %10553, %v8319_v2   ;;  %v9173_v33 = vmul.f32 %v8987_v29, %v17925_v18  ;;  %v9174_v25 = vmul.f32 %v8987_v29, %v17926_v13  ;;  %v7827_v2 = vmul.f32 %v16443_v36, %v16443_v36  ;;  %v8243_v29 = vld [vmem:[%s14510_s19 + $0x200] sm:$0xff]  ;;  %v7747_v18 = vmul.f32 0.0051020407, %v17932_v15 }
 0xd6c   : > { %v8251_v15 = vld [vmem:[%s14510_s19 + $0x240] sm:$0xff] }
 0xd6d   : > { %v7911_v55 = vsub.f32 %v7743_v31, %v7827_v2 }
 0xd6e   : > { %v9575_v7 = vpop.permute.xlu0 %9574 }
 0xd6f   : > { %9469 = vperm.xlu1 %10553, %v8571_v6   ;;  %v9761_v26 = vadd.f32 %v9575_v7, %v9173_v33  ;;  %v9762_v1 = vadd.f32 %v9575_v7, %v9174_v25  ;;  %v7995_v22 = vmax.f32 %v7911_v55, 0.0  ;;  %v16469_v6 = vmul.f32 0.0051020407, %v17931_v61  ;;  %v8417_v61 = vld [vmem:[%s14545_s22 + $0x230] sm:$0xff] }
 0xd70   : > { %v8577_v33 = vsub.f32 %v8409_v30, %v8493_v21 }
 0xd71   : > { %9929 = vst [vmem:[%s14990_s26 + $0x4d0] sm:$0xff] %v9761_v26  ;;  %9930 = vst.msk [vmem:[%s14990_s26 + $0x4d8] sm:$0xff] %vm6750_vm1, %v9762_v1  ;;  %v8079_v14 = vadd.f32 1e-05, %v7995_v22  ;;  %v7831_v25 = vmul.f32 %v16469_v6, %v16469_v6  ;;  %v8245_v26 = vld [vmem:[%s14510_s19 + $0x210] sm:$0xff]  ;;  %v8411_v1 = vld [vmem:[%s14545_s22 + $0x200] sm:$0xff] }
 0xd72   : > { %v8997_v60 = vpop.permute.xlu0 %8996  ;;  %v11375_v52 = vpop.eup %11374  ;;  %v17937_v22 = vld [vmem:[#allocation69_spill] sm:$0xff] }
 0xd73   : > { %8891 = vperm.xlu1 %10553, %v8321_v3   ;;  %v9177_v9 = vmul.f32 %v8997_v60, %v17853_v39  ;;  %v9178_v23 = vmul.f32 %v8997_v60, %v17852_v44  ;;  %v17930_v44 = vld [vmem:[#allocation143_spill] sm:$0xff]  ;;  %11378 = vrsqrt.f32 %v8079_v14  ;;  %v8327_v13 = vmul.f32 %v11375_v52, %v8243_v29  ;;  %v11377_v32 = vpop.eup %11376 }
 0xd74   : > { %v7745_v39 = vmul.f32 0.0051020407, %v17930_v44  ;;  %v7915_v7 = vsub.f32 %v7747_v18, %v7831_v25  ;;  %v8329_v12 = vmul.f32 %v11377_v32, %v8245_v26  ;;  %v8249_v44 = vld [vmem:[%s14510_s19 + $0x230] sm:$0xff]  ;;  %v16505_v18 = vmul.f32 0.0051020407, %v16029_v8 }
 0xd75   : > { %v8495_v40 = vmul.f32 %v8327_v13, %v16415_v16  ;;  %v7755_v25 = vmul.f32 0.0051020407, %v16042_v58  ;;  %v8253_v8 = vld [vmem:[%s14510_s19 + $0x250] sm:$0xff] }
 0xd76   : > { %v9585_v27 = vpop.permute.xlu0 %9584  ;;  %v7913_v48 = vsub.f32 %v7745_v39, %v7829_v19  ;;  %v7999_v46 = vmax.f32 %v7915_v7, 0.0  ;;  %v8497_v31 = vmul.f32 %v8329_v12, %v16427_v5  ;;  %v8415_v39 = vld [vmem:[%s14545_s22 + $0x220] sm:$0xff] }
 0xd77   : > { %9479 = vperm.xlu1 %10553, %v8573_v28   ;;  %v9765_v41 = vadd.f32 %v9585_v27, %v9177_v9  ;;  %v9766_v35 = vadd.f32 %v9585_v27, %v9178_v23  ;;  %v8579_v60 = vsub.f32 %v8411_v1, %v8495_v40  ;;  %v7917_v28 = vsub.f32 %v7749_v63, %v7833_v54  ;;  %v8247_v9 = vld [vmem:[%s14510_s19 + $0x220] sm:$0xff] }
 0xd78   : > { %v7997_v3 = vmax.f32 %v7913_v48, 0.0  ;;  %v8083_v16 = vadd.f32 1e-05, %v7999_v46  ;;  %v17935_v23 = vld [vmem:[#allocation146_spill] sm:$0xff]  ;;  %v17938_v48 = vld [vmem:[#allocation75_spill] sm:$0xff] }
 0xd79   : > { %9933 = vst [vmem:[%s14990_s26 + $0x4f0] sm:$0xff] %v9765_v41  ;;  %9934 = vst.msk [vmem:[%s14990_s26 + $0x4f8] sm:$0xff] %vm6750_vm1, %v9766_v35  ;;  %v16487_v50 = vmul.f32 0.0051020407, %v17935_v23  ;;  %v8001_v55 = vmax.f32 %v7917_v28, 0.0  ;;  %v17936_v41 = vld [vmem:[#allocation181_spill] sm:$0xff] }
 0xd7a   : > { %v8081_v45 = vadd.f32 1e-05, %v7997_v3  ;;  %v7751_v35 = vmul.f32 0.0051020407, %v17936_v41  ;;  %v7753_v14 = vmul.f32 0.0051020407, %v17938_v48 }
 0xd7b   : > { %8901 = vperm.xlu1 %10553, %v8323_v0   ;;  %v8413_v0 = vld [vmem:[%s14545_s22 + $0x210] sm:$0xff]  ;;  %v7835_v5 = vmul.f32 %v16487_v50, %v16487_v50  ;;  %v8085_v17 = vadd.f32 1e-05, %v8001_v55  ;;  %v8255_v41 = vld [vmem:[%s14510_s19 + $0x260] sm:$0xff] }
 0xd7c   : > { %11380 = vrsqrt.f32 %v8081_v45  ;;  %v8581_v27 = vsub.f32 %v8413_v0, %v8497_v31  ;;  %v7086_v45 = vpop.xlane.xlu1 %7085  ;;  %v17939_v0 = vld [vmem:[#allocation198_spill] sm:$0xff]  ;;  %v8421_v55 = vld [vmem:[%s14545_s22 + $0x250] sm:$0xff] }
 0xd7d   : > { %11382 = vrsqrt.f32 %v8083_v16  ;;  %v7919_v38 = vsub.f32 %v7751_v35, %v7835_v5  ;;  %v16513_v46 = vmul.f32 0.0051020407, %v7086_v45 }
 0xd7e   : > { %11384 = vrsqrt.f32 %v8085_v17 }
 0xd7f   : > { %9489 = vperm.xlu1 %10553, %v8575_v49   ;;  %v16496_v49 = vmul.f32 0.0051020407, %v17937_v22  ;;  %v8003_v19 = vmax.f32 %v7919_v38, 0.0  ;;  %v7842_v54 = vmul.f32 %v16513_v46, %v16513_v46  ;;  %v17941_v22 = vld [vmem:[#allocation248_spill] sm:$0xff] }
 0xd80   : > { %v11379_v2 = vpop.eup %11378 }
 0xd81   : > { %v8331_v34 = vmul.f32 %v11379_v2, %v8247_v9  ;;  %v7837_v52 = vmul.f32 %v16496_v49, %v16496_v49  ;;  %v17940_v9 = vld [vmem:[#allocation196_spill] sm:$0xff] }
 0xd83   : > { %8911 = vperm.xlu1 %10553, %v8325_v57   ;;  %v8499_v47 = vmul.f32 %v8331_v34, %v16443_v36  ;;  %v8087_v36 = vadd.f32 1e-05, %v8003_v19  ;;  %v7921_v29 = vsub.f32 %v7753_v14, %v7837_v52  ;;  %v17942_v19 = vld [vmem:[#allocation243_spill] sm:$0xff]  ;;  %v8423_v14 = vld [vmem:[%s14545_s22 + $0x260] sm:$0xff] }
 0xd85   : > { %v8583_v21 = vsub.f32 %v8415_v39, %v8499_v47  ;;  %11386 = vrsqrt.f32 %v8087_v36 }
 0xd87   : > { %9499 = vperm.xlu1 %10553, %v8577_v33  }
 0xd89   : > { %v11381_v11 = vpop.eup %11380 }
 0xd8a   : > { %v8333_v57 = vmul.f32 %v11381_v11, %v8249_v44  ;;  %v11383_v3 = vpop.eup %11382 }
 0xd8b   : > { %8921 = vperm.xlu1 %10553, %v8327_v13   ;;  %v8005_v13 = vmax.f32 %v7921_v29, 0.0  ;;  %v8335_v32 = vmul.f32 %v11383_v3, %v8251_v15  ;;  %v11385_v1 = vpop.eup %11384 }
 0xd8c   : > { %v8501_v30 = vmul.f32 %v8333_v57, %v16455_v4  ;;  %v7839_v4 = vmul.f32 %v16505_v18, %v16505_v18  ;;  %v8337_v63 = vmul.f32 %v11385_v1, %v8253_v8 }
 0xd8d   : > { %v8089_v7 = vadd.f32 1e-05, %v8005_v13  ;;  %v8503_v26 = vmul.f32 %v8335_v32, %v16469_v6 }
 0xd8e   : > { %v8585_v33 = vsub.f32 %v8417_v61, %v8501_v30  ;;  %v7923_v40 = vsub.f32 %v7755_v25, %v7839_v4  ;;  %v8505_v16 = vmul.f32 %v8337_v63, %v16478_v56  ;;  %v17944_v25 = vld [vmem:[#allocation117_spill] sm:$0xff]  ;;  %v8259_v4 = vld [vmem:[%s14510_s19 + $0x280] sm:$0xff] }
 0xd8f   : > { %9509 = vperm.xlu1 %10553, %v8579_v60   ;;  %11388 = vrsqrt.f32 %v8089_v7  ;;  %v8587_v62 = vsub.f32 %v8419_v24, %v8503_v26 }
 0xd90   : > { %v8007_v58 = vmax.f32 %v7923_v40, 0.0  ;;  %v8589_v17 = vsub.f32 %v8421_v55, %v8505_v16  ;;  %v8262_v40 = vld [vmem:[%s14510_s19 + $0x298] sm:$0xff] }
 0xd92   : > { %v8091_v6 = vadd.f32 1e-05, %v8007_v58  ;;  %v11387_v28 = vpop.eup %11386 }
 0xd93   : > { %8931 = vperm.xlu1 %10553, %v8329_v12   ;;  %v8812_v12 = vpop.permute.xlu1 %8811  ;;  %v8339_v56 = vmul.f32 %v11387_v28, %v8255_v41  ;;  %v17948_v41 = vld [vmem:[#allocation124_spill] sm:$0xff] }
 0xd94   : > { %v9103_v2 = vmul.f32 %v8812_v12, %v17939_v0  ;;  %v9104_v23 = vmul.f32 %v8812_v12, %v17940_v9  ;;  %11390 = vrsqrt.f32 %v8091_v6  ;;  %v17946_v6 = vld [vmem:[#allocation54_spill] sm:$0xff] }
 0xd95   : > { %v8507_v44 = vmul.f32 %v8339_v56, %v16487_v50  ;;  %v8427_v0 = vld [vmem:[%s14545_s22 + $0x280] sm:$0xff] }
 0xd97   : > { %9519 = vperm.xlu1 %10553, %v8581_v27   ;;  %v8591_v29 = vsub.f32 %v8423_v14, %v8507_v44  ;;  %v17949_v44 = vld [vmem:[#allocation60_spill] sm:$0xff] }
 0xd9b   : > { %8941 = vperm.xlu1 %10553, %v8331_v34  }
 0xd9c   : > { %v11389_v39 = vpop.eup %11388 }
 0xd9f   : > { %9529 = vperm.xlu1 %10553, %v8583_v21   ;;  %v8257_v21 = vld [vmem:[%s14510_s19 + $0x270] sm:$0xff] }
 0xda0   : > { %v8341_v61 = vmul.f32 %v11389_v39, %v8257_v21 }
 0xda1   : > { %v11391_v15 = vpop.eup %11390 }
 0xda2   : > { %v8509_v3 = vmul.f32 %v8341_v61, %v16496_v49  ;;  %v8343_v12 = vmul.f32 %v11391_v15, %v8259_v4 }
 0xda3   : > { %8951 = vperm.xlu1 %10553, %v8333_v57  }
 0xda7   : > { %9539 = vperm.xlu1 %10553, %v8585_v33   ;;  %v17943_v33 = vld [vmem:[#allocation56_spill] sm:$0xff] }
 0xdab   : > { %8961 = vperm.xlu1 %10553, %v8335_v32   ;;  %v8425_v32 = vld [vmem:[%s14545_s22 + $0x270] sm:$0xff] }
 0xdac   : > { %v8593_v8 = vsub.f32 %v8425_v32, %v8509_v3 }
 0xdaf   : > { %9549 = vperm.xlu1 %10553, %v8587_v62   ;;  %v7590_v60 = vpop.xlane.xlu1 %7589  ;;  %v8430_v62 = vld [vmem:[%s14545_s22 + $0x298] sm:$0xff] }
 0xdb0   : > { %v7758_v31 = vmul.f32 0.0051020407, %v7590_v60  ;;  %v8511_v60 = vmul.f32 %v8343_v12, %v16505_v18 }
 0xdb2   : > { %v7926_v27 = vsub.f32 %v7758_v31, %v7842_v54  ;;  %v17945_v54 = vld [vmem:[#allocation55_spill] sm:$0xff] }
 0xdb3   : > { %8971 = vperm.xlu1 %10553, %v8337_v63   ;;  %v9400_v35 = vpop.permute.xlu1 %9399 }
 0xdb4   : > { %v8010_v34 = vmax.f32 %v7926_v27, 0.0  ;;  %v9691_v5 = vadd.f32 %v9400_v35, %v9103_v2  ;;  %v9692_v11 = vadd.f32 %v9400_v35, %v9104_v23  ;;  %v8595_v27 = vsub.f32 %v8427_v0, %v8511_v60  ;;  %v17957_v60 = vld [vmem:[#allocation64_spill] sm:$0xff] }
 0xdb6   : > { %v8094_v38 = vadd.f32 1e-05, %v8010_v34  ;;  %9859 = vst [vmem:[%s14990_s26 + $0x2a0] sm:$0xff] %v9691_v5  ;;  %9860 = vst.msk [vmem:[%s14990_s26 + $0x2a8] sm:$0xff] %vm6750_vm1, %v9692_v11  ;;  %v8429_v34 = vld [vmem:[%s14545_s22 + $0x290] sm:$0xff] }
 0xdb7   : > { %9559 = vperm.xlu1 %10553, %v8589_v17   ;;  %v8822_v47 = vpop.permute.xlu1 %8821 }
 0xdb8   : > { %11392 = vrsqrt.f32 %v8094_v38  ;;  %v9107_v57 = vmul.f32 %v8822_v47, %v17941_v22  ;;  %v9108_v48 = vmul.f32 %v8822_v47, %v17942_v19  ;;  %v17950_v22 = vld [vmem:[#allocation166_spill] sm:$0xff] }
 0xdbb   : > { %8981 = vperm.xlu1 %10553, %v8339_v56   ;;  %v9410_v52 = vpop.permute.xlu1 %9409  ;;  %v8597_v56 = vsub.f32 %v8429_v34, %v16237_v37  ;;  %v17961_v34 = vld [vmem:[#allocation134_spill] sm:$0xff] }
 0xdbc   : > { %v9695_v30 = vadd.f32 %v9410_v52, %v9107_v57  ;;  %v9696_v36 = vadd.f32 %v9410_v52, %v9108_v48 }
 0xdbe   : > { %9863 = vst [vmem:[%s14990_s26 + $0x2c0] sm:$0xff] %v9695_v30  ;;  %9864 = vst.msk [vmem:[%s14990_s26 + $0x2c8] sm:$0xff] %vm6750_vm1, %v9696_v36 }
 0xdbf   : > { %9569 = vperm.xlu1 %10553, %v8591_v29   ;;  %v8832_v50 = vpop.permute.xlu1 %8831  ;;  %v17951_v29 = vld [vmem:[#allocation180_spill] sm:$0xff] }
 0xdc0   : > { %v9111_v13 = vmul.f32 %v8832_v50, %v17943_v33  ;;  %v9112_v45 = vmul.f32 %v8832_v50, %v17944_v25 }
 0xdc3   : > { %8991 = vperm.xlu1 %10553, %v8341_v61   ;;  %v9420_v7 = vpop.permute.xlu1 %9419  ;;  %v17952_v61 = vld [vmem:[#allocation163_spill] sm:$0xff] }
 0xdc4   : > { %v9699_v26 = vadd.f32 %v9420_v7, %v9111_v13  ;;  %v9700_v1 = vadd.f32 %v9420_v7, %v9112_v45  ;;  %v17953_v13 = vld [vmem:[#allocation177_spill] sm:$0xff] }
 0xdc5   : > { %v11393_v24 = vpop.eup %11392  ;;  %v17954_v45 = vld [vmem:[#allocation165_spill] sm:$0xff] }
 0xdc6   : > { %9867 = vst [vmem:[%s14990_s26 + $0x2e0] sm:$0xff] %v9699_v26  ;;  %9868 = vst.msk [vmem:[%s14990_s26 + $0x2e8] sm:$0xff] %vm6750_vm1, %v9700_v1  ;;  %v8346_v49 = vmul.f32 %v11393_v24, %v8262_v40  ;;  %v17955_v1 = vld [vmem:[#allocation128_spill] sm:$0xff] }
 0xdc7   : > { %9579 = vperm.xlu1 %10553, %v8593_v8   ;;  %v8842_v58 = vpop.permute.xlu1 %8841  ;;  %v17956_v8 = vld [vmem:[#allocation129_spill] sm:$0xff] }
 0xdc8   : > { %9016 = vperm.xlu0 %10552, %v8346_v49   ;;  %v8514_v63 = vmul.f32 %v8346_v49, %v16513_v46  ;;  %v9115_v31 = vmul.f32 %v8842_v58, %v17945_v54  ;;  %v9116_v16 = vmul.f32 %v8842_v58, %v17946_v6  ;;  %v17947_v46 = vld [vmem:[#allocation158_spill] sm:$0xff] }
 0xdca   : > { %v8598_v28 = vsub.f32 %v8430_v62, %v8514_v63 }
 0xdcb   : > { %9001 = vperm.xlu1 %10553, %v8343_v12   ;;  %v9430_v2 = vpop.permute.xlu1 %9429 }
 0xdcc   : > { %v9703_v9 = vadd.f32 %v9430_v2, %v9115_v31  ;;  %v9704_v23 = vadd.f32 %v9430_v2, %v9116_v16  ;;  %9604 = vperm.xlu0 %10552, %v8598_v28   ;;  %v17958_v31 = vld [vmem:[#allocation169_spill] sm:$0xff] }
 0xdce   : > { %9871 = vst [vmem:[%s14990_s26 + $0x300] sm:$0xff] %v9703_v9  ;;  %9872 = vst.msk [vmem:[%s14990_s26 + $0x308] sm:$0xff] %vm6750_vm1, %v9704_v23  ;;  %v17959_v9 = vld [vmem:[#allocation63_spill] sm:$0xff] }
 0xdcf   : > { %9589 = vperm.xlu1 %10553, %v8595_v27   ;;  %v8852_v18 = vpop.permute.xlu1 %8851  ;;  %v17960_v27 = vld [vmem:[#allocation188_spill] sm:$0xff] }
 0xdd0   : > { %v9119_v55 = vmul.f32 %v8852_v18, %v17947_v46  ;;  %v9120_v35 = vmul.f32 %v8852_v18, %v17948_v41 }
 0xdd3   : > { %9011 = vperm.xlu1 %10553, %v16231_v20   ;;  %v9440_v5 = vpop.permute.xlu1 %9439 }
 0xdd4   : > { %v9707_v11 = vadd.f32 %v9440_v5, %v9119_v55  ;;  %v9708_v17 = vadd.f32 %v9440_v5, %v9120_v35 }
 0xdd6   : > { %9875 = vst [vmem:[%s14990_s26 + $0x320] sm:$0xff] %v9707_v11  ;;  %9876 = vst.msk [vmem:[%s14990_s26 + $0x328] sm:$0xff] %vm6750_vm1, %v9708_v17  ;;  %v17962_v11 = vld [vmem:[#allocation135_spill] sm:$0xff] }
 0xdd7   : > { %9599 = vperm.xlu1 %10553, %v8597_v56   ;;  %v8862_v38 = vpop.permute.xlu1 %8861 }
 0xdd8   : > { %v9123_v39 = vmul.f32 %v8862_v38, %v17949_v44  ;;  %v9124_v57 = vmul.f32 %v8862_v38, %v17950_v22 }
 0xdd9   : > { %v9007_v47 = vpop.permute.xlu0 %9006 }
 0xdda   : > { %v9181_v19 = vmul.f32 %v9007_v47, %v14994_v42  ;;  %v9182_v48 = vmul.f32 %v9007_v47, %v15003_v53 }
 0xddb   : > { %v9450_v20 = vpop.permute.xlu1 %9449 }
 0xddc   : > { %v9711_v14 = vadd.f32 %v9450_v20, %v9123_v39  ;;  %v9712_v37 = vadd.f32 %v9450_v20, %v9124_v57  ;;  %v17963_v39 = vld [vmem:[#allocation139_spill] sm:$0xff]  ;;  %v17964_v57 = vld [vmem:[#allocation132_spill] sm:$0xff] }
 0xddd   : > { %v9595_v21 = vpop.permute.xlu0 %9594 }
 0xdde   : > { %9879 = vst [vmem:[%s14990_s26 + $0x340] sm:$0xff] %v9711_v14  ;;  %9880 = vst.msk [vmem:[%s14990_s26 + $0x348] sm:$0xff] %vm6750_vm1, %v9712_v37  ;;  %v9769_v52 = vadd.f32 %v9595_v21, %v9181_v19  ;;  %v9770_v30 = vadd.f32 %v9595_v21, %v9182_v48  ;;  %v17965_v21 = vld [vmem:[#allocation68_spill] sm:$0xff] }
 0xddf   : > { %v8872_v36 = vpop.permute.xlu1 %8871 }
 0xde0   : > { %9937 = vst [vmem:[%s14990_s26 + $0x510] sm:$0xff] %v9769_v52  ;;  %9938 = vst.msk [vmem:[%s14990_s26 + $0x518] sm:$0xff] %vm6750_vm1, %v9770_v30  ;;  %v9127_v42 = vmul.f32 %v8872_v36, %v17951_v29  ;;  %v9128_v53 = vmul.f32 %v8872_v36, %v17952_v61  ;;  %v17966_v30 = vld [vmem:[#allocation176_spill] sm:$0xff] }
 0xde3   : > { %v9460_v50 = vpop.permute.xlu1 %9459 }
 0xde4   : > { %v9715_v3 = vadd.f32 %v9460_v50, %v9127_v42  ;;  %v9716_v15 = vadd.f32 %v9460_v50, %v9128_v53  ;;  %v17967_v50 = vld [vmem:[#allocation67_spill] sm:$0xff] }
 0xde6   : > { %9883 = vst [vmem:[%s14990_s26 + $0x360] sm:$0xff] %v9715_v3  ;;  %9884 = vst.msk [vmem:[%s14990_s26 + $0x368] sm:$0xff] %vm6750_vm1, %v9716_v15  ;;  %v17968_v15 = vld [vmem:[#allocation195_spill] sm:$0xff] }
 0xde7   : > { %v8882_v33 = vpop.permute.xlu1 %8881 }
 0xde8   : > { %v9131_v25 = vmul.f32 %v8882_v33, %v17953_v13  ;;  %v9132_v32 = vmul.f32 %v8882_v33, %v17954_v45 }
 0xdeb   : > { %v9470_v4 = vpop.permute.xlu1 %9469 }
 0xdec   : > { %v9719_v7 = vadd.f32 %v9470_v4, %v9131_v25  ;;  %v9720_v40 = vadd.f32 %v9470_v4, %v9132_v32  ;;  %v17969_v4 = vld [vmem:[#allocation137_spill] sm:$0xff] }
 0xdee   : > { %9887 = vst [vmem:[%s14990_s26 + $0x380] sm:$0xff] %v9719_v7  ;;  %9888 = vst.msk [vmem:[%s14990_s26 + $0x388] sm:$0xff] %vm6750_vm1, %v9720_v40  ;;  %v17970_v40 = vld [vmem:[#allocation170_spill] sm:$0xff] }
 0xdef   : > { %v8892_v26 = vpop.permute.xlu1 %8891 }
 0xdf0   : > { %v9135_v24 = vmul.f32 %v8892_v26, %v17955_v1  ;;  %v9136_v12 = vmul.f32 %v8892_v26, %v17956_v8 }
 0xdf3   : > { %v9480_v49 = vpop.permute.xlu1 %9479 }
 0xdf4   : > { %v9723_v58 = vadd.f32 %v9480_v49, %v9135_v24  ;;  %v9724_v62 = vadd.f32 %v9480_v49, %v9136_v12  ;;  %v17971_v49 = vld [vmem:[#allocation173_spill] sm:$0xff] }
 0xdf6   : > { %9891 = vst [vmem:[%s14990_s26 + $0x3a0] sm:$0xff] %v9723_v58  ;;  %9892 = vst.msk [vmem:[%s14990_s26 + $0x3a8] sm:$0xff] %vm6750_vm1, %v9724_v62  ;;  %v17972_v62 = vld [vmem:[#allocation142_spill] sm:$0xff] }
 0xdf7   : > { %v8902_v63 = vpop.permute.xlu1 %8901 }
 0xdf8   : > { %v9139_v54 = vmul.f32 %v8902_v63, %v17957_v60  ;;  %v9140_v6 = vmul.f32 %v8902_v63, %v17958_v31 }
 0xdfb   : > { %v9490_v16 = vpop.permute.xlu1 %9489 }
 0xdfc   : > { %v9727_v28 = vadd.f32 %v9490_v16, %v9139_v54  ;;  %v9728_v0 = vadd.f32 %v9490_v16, %v9140_v6  ;;  %v17973_v16 = vld [vmem:[#allocation71_spill] sm:$0xff] }
 0xdfe   : > { %9895 = vst [vmem:[%s14990_s26 + $0x3c0] sm:$0xff] %v9727_v28  ;;  %9896 = vst.msk [vmem:[%s14990_s26 + $0x3c8] sm:$0xff] %vm6750_vm1, %v9728_v0  ;;  %v17974_v0 = vld [vmem:[#allocation65_spill] sm:$0xff] }
 0xdff   : > { %v8912_v2 = vpop.permute.xlu1 %8911 }
 0xe00   : > { %v9143_v23 = vmul.f32 %v8912_v2, %v17959_v9  ;;  %v9144_v18 = vmul.f32 %v8912_v2, %v17960_v27 }
 0xe03   : > { %v9500_v46 = vpop.permute.xlu1 %9499 }
 0xe04   : > { %v9731_v55 = vadd.f32 %v9500_v46, %v9143_v23  ;;  %v9732_v41 = vadd.f32 %v9500_v46, %v9144_v18  ;;  %v17975_v46 = vld [vmem:[#allocation147_spill] sm:$0xff] }
 0xe06   : > { %9899 = vst [vmem:[%s14990_s26 + $0x3e0] sm:$0xff] %v9731_v55  ;;  %9900 = vst.msk [vmem:[%s14990_s26 + $0x3e8] sm:$0xff] %vm6750_vm1, %v9732_v41  ;;  %v17976_v41 = vld [vmem:[#allocation140_spill] sm:$0xff] }
 0xe07   : > { %v8922_v35 = vpop.permute.xlu1 %8921 }
 0xe08   : > { %v9147_v5 = vmul.f32 %v8922_v35, %v17961_v34  ;;  %v9148_v17 = vmul.f32 %v8922_v35, %v17962_v11 }
 0xe0b   : > { %v9510_v56 = vpop.permute.xlu1 %9509 }
 0xe0c   : > { %v9735_v38 = vadd.f32 %v9510_v56, %v9147_v5  ;;  %v9736_v47 = vadd.f32 %v9510_v56, %v9148_v17 }
 0xe0e   : > { %9903 = vst [vmem:[%s14990_s26 + $0x400] sm:$0xff] %v9735_v38  ;;  %9904 = vst.msk [vmem:[%s14990_s26 + $0x408] sm:$0xff] %vm6750_vm1, %v9736_v47 }
 0xe0f   : > { %v8932_v44 = vpop.permute.xlu1 %8931 }
 0xe10   : > { %v9151_v22 = vmul.f32 %v8932_v44, %v17963_v39  ;;  %v9152_v20 = vmul.f32 %v8932_v44, %v17964_v57  ;;  %v17977_v57 = vld [vmem:[#allocation76_spill] sm:$0xff] }
 0xe13   : > { %v9520_v19 = vpop.permute.xlu1 %9519 }
 0xe14   : > { %v9739_v48 = vadd.f32 %v9520_v19, %v9151_v22  ;;  %v9740_v14 = vadd.f32 %v9520_v19, %v9152_v20  ;;  %v17978_v19 = vld [vmem:[#allocation191_spill] sm:$0xff] }
 0xe16   : > { %9907 = vst [vmem:[%s14990_s26 + $0x420] sm:$0xff] %v9739_v48  ;;  %9908 = vst.msk [vmem:[%s14990_s26 + $0x428] sm:$0xff] %vm6750_vm1, %v9740_v14 }
 0xe17   : > { %v8942_v37 = vpop.permute.xlu1 %8941 }
 0xe18   : > { %v9155_v52 = vmul.f32 %v8942_v37, %v17965_v21  ;;  %v9156_v36 = vmul.f32 %v8942_v37, %v17966_v30 }
 0xe1b   : > { %v9530_v29 = vpop.permute.xlu1 %9529 }
 0xe1c   : > { %v9743_v42 = vadd.f32 %v9530_v29, %v9155_v52  ;;  %v9744_v61 = vadd.f32 %v9530_v29, %v9156_v36 }
 0xe1e   : > { %9911 = vst [vmem:[%s14990_s26 + $0x440] sm:$0xff] %v9743_v42  ;;  %9912 = vst.msk [vmem:[%s14990_s26 + $0x448] sm:$0xff] %vm6750_vm1, %v9744_v61 }
 0xe1f   : > { %v8952_v53 = vpop.permute.xlu1 %8951 }
 0xe20   : > { %v9159_v3 = vmul.f32 %v8952_v53, %v17967_v50  ;;  %v9160_v33 = vmul.f32 %v8952_v53, %v17968_v15 }
 0xe23   : > { %v9540_v13 = vpop.permute.xlu1 %9539 }
 0xe24   : > { %v9747_v25 = vadd.f32 %v9540_v13, %v9159_v3  ;;  %v9748_v45 = vadd.f32 %v9540_v13, %v9160_v33 }
 0xe26   : > { %9915 = vst [vmem:[%s14990_s26 + $0x460] sm:$0xff] %v9747_v25  ;;  %9916 = vst.msk [vmem:[%s14990_s26 + $0x468] sm:$0xff] %vm6750_vm1, %v9748_v45 }
 0xe27   : > { %v8962_v32 = vpop.permute.xlu1 %8961 }
 0xe28   : > { %v9163_v7 = vmul.f32 %v8962_v32, %v17969_v4  ;;  %v9164_v26 = vmul.f32 %v8962_v32, %v17970_v40 }
 0xe2b   : > { %v9550_v1 = vpop.permute.xlu1 %9549 }
 0xe2c   : > { %v9751_v24 = vadd.f32 %v9550_v1, %v9163_v7  ;;  %v9752_v8 = vadd.f32 %v9550_v1, %v9164_v26 }
 0xe2e   : > { %9919 = vst [vmem:[%s14990_s26 + $0x480] sm:$0xff] %v9751_v24  ;;  %9920 = vst.msk [vmem:[%s14990_s26 + $0x488] sm:$0xff] %vm6750_vm1, %v9752_v8 }
 0xe2f   : > { %v8972_v12 = vpop.permute.xlu1 %8971 }
 0xe30   : > { %v9167_v58 = vmul.f32 %v8972_v12, %v17971_v49  ;;  %v9168_v63 = vmul.f32 %v8972_v12, %v17972_v62 }
 0xe33   : > { %v9560_v60 = vpop.permute.xlu1 %9559 }
 0xe34   : > { %v9755_v54 = vadd.f32 %v9560_v60, %v9167_v58  ;;  %v9756_v31 = vadd.f32 %v9560_v60, %v9168_v63 }
 0xe36   : > { %9923 = vst [vmem:[%s14990_s26 + $0x4a0] sm:$0xff] %v9755_v54  ;;  %9924 = vst.msk [vmem:[%s14990_s26 + $0x4a8] sm:$0xff] %vm6750_vm1, %v9756_v31 }
 0xe37   : > { %v8982_v6 = vpop.permute.xlu1 %8981 }
 0xe38   : > { %v9171_v28 = vmul.f32 %v8982_v6, %v17973_v16  ;;  %v9172_v2 = vmul.f32 %v8982_v6, %v17974_v0 }
 0xe3b   : > { %v9570_v9 = vpop.permute.xlu1 %9569 }
 0xe3c   : > { %v9759_v23 = vadd.f32 %v9570_v9, %v9171_v28  ;;  %v9760_v27 = vadd.f32 %v9570_v9, %v9172_v2 }
 0xe3e   : > { %9927 = vst [vmem:[%s14990_s26 + $0x4c0] sm:$0xff] %v9759_v23  ;;  %9928 = vst.msk [vmem:[%s14990_s26 + $0x4c8] sm:$0xff] %vm6750_vm1, %v9760_v27 }
 0xe3f   : > { %v8992_v18 = vpop.permute.xlu1 %8991 }
 0xe40   : > { %v9175_v55 = vmul.f32 %v8992_v18, %v17975_v46  ;;  %v9176_v35 = vmul.f32 %v8992_v18, %v17976_v41 }
 0xe43   : > { %v9017_v34 = vpop.permute.xlu0 %9016  ;;  %v9580_v5 = vpop.permute.xlu1 %9579 }
 0xe44   : > { %v9763_v11 = vadd.f32 %v9580_v5, %v9175_v55  ;;  %v9764_v17 = vadd.f32 %v9580_v5, %v9176_v35  ;;  %v9185_v56 = vmul.f32 %v9017_v34, %v16224_v43  ;;  %v9186_v38 = vmul.f32 %v9017_v34, %v16211_v10 }
 0xe46   : > { %9931 = vst [vmem:[%s14990_s26 + $0x4e0] sm:$0xff] %v9763_v11  ;;  %9932 = vst.msk [vmem:[%s14990_s26 + $0x4e8] sm:$0xff] %vm6750_vm1, %v9764_v17 }
 0xe47   : > { %v9605_v47 = vpop.permute.xlu0 %9604  ;;  %v9002_v44 = vpop.permute.xlu1 %9001 }
 0xe48   : > { %v9773_v39 = vadd.f32 %v9605_v47, %v9185_v56  ;;  %v9774_v22 = vadd.f32 %v9605_v47, %v9186_v38  ;;  %v9179_v20 = vmul.f32 %v9002_v44, %v17977_v57  ;;  %v9180_v48 = vmul.f32 %v9002_v44, %v17978_v19 }
 0xe4a   : > { %9941 = vst [vmem:[%s14990_s26 + $0x530] sm:$0xff] %v9773_v39  ;;  %9942 = vst.msk [vmem:[%s14990_s26 + $0x538] sm:$0xff] %vm6750_vm1, %v9774_v22 }
 0xe4b   : > { %v9590_v43 = vpop.permute.xlu1 %9589 }
 0xe4c   : > { %v9767_v14 = vadd.f32 %v9590_v43, %v9179_v20  ;;  %v9768_v37 = vadd.f32 %v9590_v43, %v9180_v48 }
 0xe4e   : > { %9935 = vst [vmem:[%s14990_s26 + $0x500] sm:$0xff] %v9767_v14  ;;  %9936 = vst.msk [vmem:[%s14990_s26 + $0x508] sm:$0xff] %vm6750_vm1, %v9768_v37 }
 0xe4f   : > { %v9012_v10 = vpop.permute.xlu1 %9011 }
 0xe50   : > { %v9183_v21 = vmul.f32 %v9012_v10, %v15973_v59  ;;  %v9184_v52 = vmul.f32 %v9012_v10, %v15968_v51 }
 0xe53   : > { %v9600_v30 = vpop.permute.xlu1 %9599 }
 0xe54   : > { %v9771_v36 = vadd.f32 %v9600_v30, %v9183_v21  ;;  %v9772_v29 = vadd.f32 %v9600_v30, %v9184_v52 }
 0xe56   : > { %9939 = vst [vmem:[%s14990_s26 + $0x520] sm:$0xff] %v9771_v36  ;;  %9940 = vst.msk [vmem:[%s14990_s26 + $0x528] sm:$0xff] %vm6750_vm1, %v9772_v29 }
 0xe57 PF: > { %s14_s15 = sadd.s32 1, %s11400_s15  }
 0xe58   : > { %p11_p4 = scmp.ge.s32.totalorder %s14_s15, 4  }
 0xe5a   :  { %13 = sbr.rel (!%p11_p4) target bundleno = 1 (0x1), region = 72 }

</bundles_post_ra>
